<compile_context>
chip_gen: v7x
topology: tpu7x:2x2x1
jax: 0.10.0
libtpu: 0.0.40
codegen_flags: <defaults>
</compile_context>

<pallas_src>
import functools
import math

import jax
import jax.numpy as jnp
from jax.experimental import pallas as pl
from jax.experimental.pallas import tpu as pltpu

# ---------------- synthetic model config (small, deterministic) ----------------
VOCAB = 64
VOCAB_PAD = 128            # lane-dense logits store; sliced back to VOCAB outside
HIDDEN = 32
NUM_HEADS = 4
HEAD_DIM = HIDDEN // NUM_HEADS
FFN = 64
NUM_LAYERS = 2
MAX_POS = 16
LN_EPS = 1e-12
NEG_INF = -1e9

# Operand ordering for the single fused kernel (must match wrapper + init).
ENC_PARAM_NAMES = (
    "emb_ln_g", "emb_ln_b",
    "wq", "wk", "wv", "wo", "bo", "ln1_g", "ln1_b",
    "w1", "b1", "w2", "b2", "ln2_g", "ln2_b",
)
DEC_PARAM_NAMES = (
    "emb_ln_g", "emb_ln_b",
    "self_wq", "self_wk", "self_wv", "self_wo", "self_bo", "ln1_g", "ln1_b",
    "cross_wq", "cross_wk", "cross_wv", "cross_wo", "cross_bo", "ln2_g", "ln2_b",
    "w1", "b1", "w2", "b2", "ln3_g", "ln3_b",
    "lm_w", "lm_b",
)

# Head-batched dot_general dimension numbers (leading dim = heads = batch dim).
_DN_PROJ = (((2,), (1,)), ((0,), (0,)))   # (NH,T,H)  @ (NH,H,D)  -> (NH,T,D)
_DN_QK   = (((2,), (2,)), ((0,), (0,)))   # (NH,Tq,D) @ (NH,Tk,D) -> (NH,Tq,Tk)
_DN_PV   = (((2,), (1,)), ((0,), (0,)))   # (NH,Tq,Tk)@ (NH,Tk,D) -> (NH,Tq,D)
_DN_OUT  = (((2,), (1,)), ((0,), (0,)))   # (NH,Tq,D) @ (NH,D,H)  -> (NH,Tq,H)


# ----------------------------- in-kernel helpers --------------------------------
def _layer_norm(x, g, b):
    """LayerNorm over the last axis; all math in float32."""
    mu = jnp.mean(x, axis=-1, keepdims=True)
    xc = x - mu
    var = jnp.mean(xc * xc, axis=-1, keepdims=True)
    return xc * jax.lax.rsqrt(var + LN_EPS) * g + b


def _dense(x, w_bf16, b_f32, activation=None):
    """y = act(x @ w + b): bf16 MXU matmul with f32 accumulation, f32 epilogue."""
    y = jnp.dot(x.astype(jnp.bfloat16), w_bf16,
                preferred_element_type=jnp.float32) + b_f32
    if activation == "gelu":
        y = jax.nn.gelu(y, approximate=True)
    return y


def _bcast_heads(x_f32):
    """(T, H) f32 residual -> (NUM_HEADS, T, H) bf16 replicated across heads."""
    xb = x_f32.astype(jnp.bfloat16)
    return jnp.broadcast_to(xb[None], (NUM_HEADS,) + xb.shape)


def _attention(xq_b, xkv_b, wq, wk, wv, wo, bo, mask):
    """Head-batched multi-head attention: no slicing, no concat, no transposes.

    xq_b:  (NH, Tq, H) bf16 query source (replicated per head).
    xkv_b: (NH, Tk, H) bf16 key/value source (replicated per head).
    wq/wk/wv: (NH, H, D) bf16 head-major projections (1/sqrt(D) folded into wq).
    wo: (NH, D, H) bf16 — rows of the standard (H, H) output projection grouped
        by head, so summing per-head partial products == concat(heads) @ Wo.
    bo: (1, H) f32.  mask: None or additive f32 (Tq, Tk) (broadcast over heads).
    """
    q = jax.lax.dot_general(xq_b, wq, _DN_PROJ,
                            preferred_element_type=jnp.float32).astype(jnp.bfloat16)
    k = jax.lax.dot_general(xkv_b, wk, _DN_PROJ,
                            preferred_element_type=jnp.float32).astype(jnp.bfloat16)
    v = jax.lax.dot_general(xkv_b, wv, _DN_PROJ,
                            preferred_element_type=jnp.float32).astype(jnp.bfloat16)
    s = jax.lax.dot_general(q, k, _DN_QK, preferred_element_type=jnp.float32)
    if mask is not None:
        s = s + mask
    m = jnp.max(s, axis=-1, keepdims=True)
    e = jnp.exp(s - m)
    p = e * pl.reciprocal(jnp.sum(e, axis=-1, keepdims=True), approx=True)
    o = jax.lax.dot_general(p.astype(jnp.bfloat16), v, _DN_PV,
                            preferred_element_type=jnp.float32).astype(jnp.bfloat16)
    oh = jax.lax.dot_general(o, wo, _DN_OUT, preferred_element_type=jnp.float32)
    return jnp.sum(oh, axis=0) + bo                 # sum over heads == concat @ Wo


# ------------------------------- fused kernel ------------------------------------
def model_kernel(*refs):
    """Whole model for one batch element: encoder stack -> decoder stack -> logits."""
    x_ref, y_ref = refs[0], refs[1]
    pos = 2
    e = dict(zip(ENC_PARAM_NAMES, refs[pos:pos + len(ENC_PARAM_NAMES)]))
    pos += len(ENC_PARAM_NAMES)
    d = dict(zip(DEC_PARAM_NAMES, refs[pos:pos + len(DEC_PARAM_NAMES)]))
    out_ref = refs[pos + len(DEC_PARAM_NAMES)]
    tgt_len = y_ref.shape[1]

    # ---------------- encoder stack ----------------
    x = _layer_norm(x_ref[0], e["emb_ln_g"][...], e["emb_ln_b"][...])
    for i in range(NUM_LAYERS):
        xb = _bcast_heads(x)                         # one broadcast reused for Q/K/V
        a = _attention(xb, xb, e["wq"][i], e["wk"][i], e["wv"][i],
                       e["wo"][i], e["bo"][i], None)
        x = _layer_norm(x + a, e["ln1_g"][i], e["ln1_b"][i])
        h = _dense(x, e["w1"][i], e["b1"][i], activation="gelu")
        h = _dense(h, e["w2"][i], e["b2"][i])
        x = _layer_norm(x + h, e["ln2_g"][i], e["ln2_b"][i])
    # Encoder output stays in-kernel (no HBM round trip); cross-attn K/V source
    # broadcast is hoisted out of the decoder layer loop.
    enc_b = _bcast_heads(x)

    # ---------------- decoder stack + tied LM head ----------------
    y = _layer_norm(y_ref[0], d["emb_ln_g"][...], d["emb_ln_b"][...])
    rows = jax.lax.broadcasted_iota(jnp.int32, (tgt_len, tgt_len), 0)
    cols = jax.lax.broadcasted_iota(jnp.int32, (tgt_len, tgt_len), 1)
    causal = jnp.where(rows >= cols, 0.0, NEG_INF).astype(jnp.float32)
    for i in range(NUM_LAYERS):
        # causal self-attention
        yb = _bcast_heads(y)
        a = _attention(yb, yb, d["self_wq"][i], d["self_wk"][i], d["self_wv"][i],
                       d["self_wo"][i], d["self_bo"][i], causal)
        y = _layer_norm(y + a, d["ln1_g"][i], d["ln1_b"][i])
        # cross-attention (K/V from encoder hidden states)
        c = _attention(_bcast_heads(y), enc_b,
                       d["cross_wq"][i], d["cross_wk"][i], d["cross_wv"][i],
                       d["cross_wo"][i], d["cross_bo"][i], None)
        y = _layer_norm(y + c, d["ln2_g"][i], d["ln2_b"][i])
        # feed-forward
        h = _dense(y, d["w1"][i], d["b1"][i], activation="gelu")
        h = _dense(h, d["w2"][i], d["b2"][i])
        y = _layer_norm(y + h, d["ln3_g"][i], d["ln3_b"][i])
    # Tied LM head; lane-dense (VOCAB padded to 128) store.
    logits = _dense(y, d["lm_w"][...], d["lm_b"][...])
    out_ref[0] = logits.astype(out_ref.dtype)


# ------------------------------ Pallas wrapper ------------------------------------
def _resident_spec(arr):
    """Whole array resident in VMEM; constant block index => fetched once."""
    zeros = (0,) * arr.ndim
    return pl.BlockSpec(arr.shape, lambda b: zeros)


def context_llm_pallas(x_emb, y_emb, enc_p, dec_p):
    batch, src_len, _ = x_emb.shape
    _, tgt_len, _ = y_emb.shape
    enc_ops = [enc_p[n] for n in ENC_PARAM_NAMES]
    dec_ops = [dec_p[n] for n in DEC_PARAM_NAMES]
    operands = [x_emb, y_emb] + enc_ops + dec_ops

    in_specs = ([pl.BlockSpec((1, src_len, HIDDEN), lambda b: (b, 0, 0)),
                 pl.BlockSpec((1, tgt_len, HIDDEN), lambda b: (b, 0, 0))]
                + [_resident_spec(a) for a in enc_ops + dec_ops])
    out_specs = pl.BlockSpec((1, tgt_len, VOCAB_PAD), lambda b: (b, 0, 0))

    return pl.pallas_call(
        model_kernel,
        grid=(batch,),                               # one batch element per step;
        in_specs=in_specs,                           # "parallel" -> both TCs on v7x
        out_specs=out_specs,
        out_shape=jax.ShapeDtypeStruct((batch, tgt_len, VOCAB_PAD), jnp.float32),
        compiler_params=pltpu.CompilerParams(dimension_semantics=("parallel",)),
    )(*operands)


# ------------------------------ model forward ------------------------------------
def context_llm_forward(input_ids, context_ids, params):
    enc_p, dec_p = params["enc"], params["dec"]
    _, src_len = input_ids.shape
    _, tgt_len = context_ids.shape
    # Embedding gathers stay in plain JAX; everything downstream is ONE fused
    # pallas_call (encoder + decoder + LM head).
    x = jnp.take(enc_p["tok"], input_ids, axis=0) + enc_p["pos"][:src_len][None]
    y = jnp.take(dec_p["tok"], context_ids, axis=0) + dec_p["pos"][:tgt_len][None]
    logits = context_llm_pallas(x, y, enc_p, dec_p)
    return logits[:, :, :VOCAB]


# ------------------------------- parameter init -----------------------------------
def init_params(key):
    cnt = [0]

    def nxt():
        cnt[0] += 1
        return jax.random.fold_in(key, cnt[0])

    def rand(shape):
        return 0.02 * jax.random.normal(nxt(), shape, jnp.float32)

    scale = 1.0 / math.sqrt(HEAD_DIM)        # folded into Q weights at init time

    def head_in_proj(scaled=False):
        # standard (H, H) weight -> head-major (NH, H, D); per-layer stack.
        mats = []
        for _ in range(NUM_LAYERS):
            w = rand((HIDDEN, HIDDEN))
            if scaled:
                w = w * scale
            mats.append(w.reshape(HIDDEN, NUM_HEADS, HEAD_DIM).transpose(1, 0, 2))
        return jnp.stack(mats).astype(jnp.bfloat16)          # (L, NH, H, D)

    def head_out_proj():
        # standard (H, H) output projection, rows grouped by head -> (NH, D, H).
        mats = [rand((HIDDEN, HIDDEN)).reshape(NUM_HEADS, HEAD_DIM, HIDDEN)
                for _ in range(NUM_LAYERS)]
        return jnp.stack(mats).astype(jnp.bfloat16)          # (L, NH, D, H)

    def stack_w(shape):
        return jnp.stack([rand(shape) for _ in range(NUM_LAYERS)]).astype(jnp.bfloat16)

    def zeros_b(n):
        return jnp.zeros((NUM_LAYERS, 1, n), jnp.float32)

    def ln_g():
        return jnp.ones((NUM_LAYERS, 1, HIDDEN), jnp.float32)

    def ln_b():
        return jnp.zeros((NUM_LAYERS, 1, HIDDEN), jnp.float32)

    enc = {
        "tok": rand((VOCAB, HIDDEN)),
        "pos": rand((MAX_POS, HIDDEN)),
        "emb_ln_g": jnp.ones((1, HIDDEN), jnp.float32),
        "emb_ln_b": jnp.zeros((1, HIDDEN), jnp.float32),
        "wq": head_in_proj(scaled=True), "wk": head_in_proj(), "wv": head_in_proj(),
        "wo": head_out_proj(), "bo": zeros_b(HIDDEN),
        "ln1_g": ln_g(), "ln1_b": ln_b(),
        "w1": stack_w((HIDDEN, FFN)), "b1": zeros_b(FFN),
        "w2": stack_w((FFN, HIDDEN)), "b2": zeros_b(HIDDEN),
        "ln2_g": ln_g(), "ln2_b": ln_b(),
    }

    dec_tok = rand((VOCAB, HIDDEN))
    lm_w = jnp.zeros((HIDDEN, VOCAB_PAD), jnp.float32).at[:, :VOCAB].set(dec_tok.T)
    dec = {
        "tok": dec_tok,
        "pos": rand((MAX_POS, HIDDEN)),
        "emb_ln_g": jnp.ones((1, HIDDEN), jnp.float32),
        "emb_ln_b": jnp.zeros((1, HIDDEN), jnp.float32),
        "self_wq": head_in_proj(scaled=True), "self_wk": head_in_proj(),
        "self_wv": head_in_proj(),
        "self_wo": head_out_proj(), "self_bo": zeros_b(HIDDEN),
        "ln1_g": ln_g(), "ln1_b": ln_b(),
        "cross_wq": head_in_proj(scaled=True), "cross_wk": head_in_proj(),
        "cross_wv": head_in_proj(),
        "cross_wo": head_out_proj(), "cross_bo": zeros_b(HIDDEN),
        "ln2_g": ln_g(), "ln2_b": ln_b(),
        "w1": stack_w((HIDDEN, FFN)), "b1": zeros_b(FFN),
        "w2": stack_w((FFN, HIDDEN)), "b2": zeros_b(HIDDEN),
        "ln3_g": ln_g(), "ln3_b": ln_b(),
        "lm_w": lm_w.astype(jnp.bfloat16),                 # tied to dec token emb
        "lm_b": jnp.zeros((1, VOCAB_PAD), jnp.float32),
    }
    return {"enc": enc, "dec": dec}


# ------------------------------------ main ----------------------------------------
if __name__ == "__main__":
    key = jax.random.PRNGKey(0)
    params = init_params(key)

    B, S_SRC, S_TGT = 2, 8, 8
    k1, k2 = jax.random.split(jax.random.fold_in(key, 9999))
    input_ids = jax.random.randint(k1, (B, S_SRC), 0, VOCAB, dtype=jnp.int32)
    context_ids = jax.random.randint(k2, (B, S_TGT), 0, VOCAB, dtype=jnp.int32)

    fwd = jax.jit(lambda a, b: context_llm_forward(a, b, params))
    logits = fwd(input_ids, context_ids)
    jax.block_until_ready(logits)

    assert logits.shape == (B, S_TGT, VOCAB)
    assert bool(jnp.all(jnp.isfinite(logits)))
    print("KERNEL_OK")
</pallas_src>

<mosaic_0001>
module attributes {stable_mosaic.version = 11 : i64} {
  func.func @model_kernel(%arg0: i32, %arg1: memref<1x8x32xf32, #tpu.memory_space<vmem>>, %arg2: memref<1x8x32xf32, #tpu.memory_space<vmem>>, %arg3: memref<1x32xf32, #tpu.memory_space<vmem>>, %arg4: memref<1x32xf32, #tpu.memory_space<vmem>>, %arg5: memref<2x4x32x8xbf16, #tpu.memory_space<vmem>>, %arg6: memref<2x4x32x8xbf16, #tpu.memory_space<vmem>>, %arg7: memref<2x4x32x8xbf16, #tpu.memory_space<vmem>>, %arg8: memref<2x4x8x32xbf16, #tpu.memory_space<vmem>>, %arg9: memref<2x1x32xf32, #tpu.memory_space<vmem>>, %arg10: memref<2x1x32xf32, #tpu.memory_space<vmem>>, %arg11: memref<2x1x32xf32, #tpu.memory_space<vmem>>, %arg12: memref<2x32x64xbf16, #tpu.memory_space<vmem>>, %arg13: memref<2x1x64xf32, #tpu.memory_space<vmem>>, %arg14: memref<2x64x32xbf16, #tpu.memory_space<vmem>>, %arg15: memref<2x1x32xf32, #tpu.memory_space<vmem>>, %arg16: memref<2x1x32xf32, #tpu.memory_space<vmem>>, %arg17: memref<2x1x32xf32, #tpu.memory_space<vmem>>, %arg18: memref<1x32xf32, #tpu.memory_space<vmem>>, %arg19: memref<1x32xf32, #tpu.memory_space<vmem>>, %arg20: memref<2x4x32x8xbf16, #tpu.memory_space<vmem>>, %arg21: memref<2x4x32x8xbf16, #tpu.memory_space<vmem>>, %arg22: memref<2x4x32x8xbf16, #tpu.memory_space<vmem>>, %arg23: memref<2x4x8x32xbf16, #tpu.memory_space<vmem>>, %arg24: memref<2x1x32xf32, #tpu.memory_space<vmem>>, %arg25: memref<2x1x32xf32, #tpu.memory_space<vmem>>, %arg26: memref<2x1x32xf32, #tpu.memory_space<vmem>>, %arg27: memref<2x4x32x8xbf16, #tpu.memory_space<vmem>>, %arg28: memref<2x4x32x8xbf16, #tpu.memory_space<vmem>>, %arg29: memref<2x4x32x8xbf16, #tpu.memory_space<vmem>>, %arg30: memref<2x4x8x32xbf16, #tpu.memory_space<vmem>>, %arg31: memref<2x1x32xf32, #tpu.memory_space<vmem>>, %arg32: memref<2x1x32xf32, #tpu.memory_space<vmem>>, %arg33: memref<2x1x32xf32, #tpu.memory_space<vmem>>, %arg34: memref<2x32x64xbf16, #tpu.memory_space<vmem>>, %arg35: memref<2x1x64xf32, #tpu.memory_space<vmem>>, %arg36: memref<2x64x32xbf16, #tpu.memory_space<vmem>>, %arg37: memref<2x1x32xf32, #tpu.memory_space<vmem>>, %arg38: memref<2x1x32xf32, #tpu.memory_space<vmem>>, %arg39: memref<2x1x32xf32, #tpu.memory_space<vmem>>, %arg40: memref<32x128xbf16, #tpu.memory_space<vmem>>, %arg41: memref<1x128xf32, #tpu.memory_space<vmem>>, %arg42: memref<1x8x128xf32, #tpu.memory_space<vmem>>) attributes {dimension_semantics = [#tpu.dimension_semantics<parallel>], iteration_bounds = array<i64: 2>, scalar_prefetch = 0 : i64, scratch_operands = 0 : i64, tpu.core_type = #tpu.core_type<tc>, window_params = [{transform_indices = @transform_0, window_bounds = array<i64: 1, 8, 32>}, {transform_indices = @transform_1, window_bounds = array<i64: 1, 8, 32>}, {pipeline_mode = #tpu.pipeline_mode<synchronous>, transform_indices = @transform_2, window_bounds = array<i64: 1, 32>}, {pipeline_mode = #tpu.pipeline_mode<synchronous>, transform_indices = @transform_3, window_bounds = array<i64: 1, 32>}, {pipeline_mode = #tpu.pipeline_mode<synchronous>, transform_indices = @transform_4, window_bounds = array<i64: 2, 4, 32, 8>}, {pipeline_mode = #tpu.pipeline_mode<synchronous>, transform_indices = @transform_5, window_bounds = array<i64: 2, 4, 32, 8>}, {pipeline_mode = #tpu.pipeline_mode<synchronous>, transform_indices = @transform_6, window_bounds = array<i64: 2, 4, 32, 8>}, {pipeline_mode = #tpu.pipeline_mode<synchronous>, transform_indices = @transform_7, window_bounds = array<i64: 2, 4, 8, 32>}, {pipeline_mode = #tpu.pipeline_mode<synchronous>, transform_indices = @transform_8, window_bounds = array<i64: 2, 1, 32>}, {pipeline_mode = #tpu.pipeline_mode<synchronous>, transform_indices = @transform_9, window_bounds = array<i64: 2, 1, 32>}, {pipeline_mode = #tpu.pipeline_mode<synchronous>, transform_indices = @transform_10, window_bounds = array<i64: 2, 1, 32>}, {pipeline_mode = #tpu.pipeline_mode<synchronous>, transform_indices = @transform_11, window_bounds = array<i64: 2, 32, 64>}, {pipeline_mode = #tpu.pipeline_mode<synchronous>, transform_indices = @transform_12, window_bounds = array<i64: 2, 1, 64>}, {pipeline_mode = #tpu.pipeline_mode<synchronous>, transform_indices = @transform_13, window_bounds = array<i64: 2, 64, 32>}, {pipeline_mode = #tpu.pipeline_mode<synchronous>, transform_indices = @transform_14, window_bounds = array<i64: 2, 1, 32>}, {pipeline_mode = #tpu.pipeline_mode<synchronous>, transform_indices = @transform_15, window_bounds = array<i64: 2, 1, 32>}, {pipeline_mode = #tpu.pipeline_mode<synchronous>, transform_indices = @transform_16, window_bounds = array<i64: 2, 1, 32>}, {pipeline_mode = #tpu.pipeline_mode<synchronous>, transform_indices = @transform_17, window_bounds = array<i64: 1, 32>}, {pipeline_mode = #tpu.pipeline_mode<synchronous>, transform_indices = @transform_18, window_bounds = array<i64: 1, 32>}, {pipeline_mode = #tpu.pipeline_mode<synchronous>, transform_indices = @transform_19, window_bounds = array<i64: 2, 4, 32, 8>}, {pipeline_mode = #tpu.pipeline_mode<synchronous>, transform_indices = @transform_20, window_bounds = array<i64: 2, 4, 32, 8>}, {pipeline_mode = #tpu.pipeline_mode<synchronous>, transform_indices = @transform_21, window_bounds = array<i64: 2, 4, 32, 8>}, {pipeline_mode = #tpu.pipeline_mode<synchronous>, transform_indices = @transform_22, window_bounds = array<i64: 2, 4, 8, 32>}, {pipeline_mode = #tpu.pipeline_mode<synchronous>, transform_indices = @transform_23, window_bounds = array<i64: 2, 1, 32>}, {pipeline_mode = #tpu.pipeline_mode<synchronous>, transform_indices = @transform_24, window_bounds = array<i64: 2, 1, 32>}, {pipeline_mode = #tpu.pipeline_mode<synchronous>, transform_indices = @transform_25, window_bounds = array<i64: 2, 1, 32>}, {pipeline_mode = #tpu.pipeline_mode<synchronous>, transform_indices = @transform_26, window_bounds = array<i64: 2, 4, 32, 8>}, {pipeline_mode = #tpu.pipeline_mode<synchronous>, transform_indices = @transform_27, window_bounds = array<i64: 2, 4, 32, 8>}, {pipeline_mode = #tpu.pipeline_mode<synchronous>, transform_indices = @transform_28, window_bounds = array<i64: 2, 4, 32, 8>}, {pipeline_mode = #tpu.pipeline_mode<synchronous>, transform_indices = @transform_29, window_bounds = array<i64: 2, 4, 8, 32>}, {pipeline_mode = #tpu.pipeline_mode<synchronous>, transform_indices = @transform_30, window_bounds = array<i64: 2, 1, 32>}, {pipeline_mode = #tpu.pipeline_mode<synchronous>, transform_indices = @transform_31, window_bounds = array<i64: 2, 1, 32>}, {pipeline_mode = #tpu.pipeline_mode<synchronous>, transform_indices = @transform_32, window_bounds = array<i64: 2, 1, 32>}, {pipeline_mode = #tpu.pipeline_mode<synchronous>, transform_indices = @transform_33, window_bounds = array<i64: 2, 32, 64>}, {pipeline_mode = #tpu.pipeline_mode<synchronous>, transform_indices = @transform_34, window_bounds = array<i64: 2, 1, 64>}, {pipeline_mode = #tpu.pipeline_mode<synchronous>, transform_indices = @transform_35, window_bounds = array<i64: 2, 64, 32>}, {pipeline_mode = #tpu.pipeline_mode<synchronous>, transform_indices = @transform_36, window_bounds = array<i64: 2, 1, 32>}, {pipeline_mode = #tpu.pipeline_mode<synchronous>, transform_indices = @transform_37, window_bounds = array<i64: 2, 1, 32>}, {pipeline_mode = #tpu.pipeline_mode<synchronous>, transform_indices = @transform_38, window_bounds = array<i64: 2, 1, 32>}, {pipeline_mode = #tpu.pipeline_mode<synchronous>, transform_indices = @transform_39, window_bounds = array<i64: 32, 128>}, {pipeline_mode = #tpu.pipeline_mode<synchronous>, transform_indices = @transform_40, window_bounds = array<i64: 1, 128>}, {transform_indices = @transform_41, window_bounds = array<i64: 1, 8, 128>}]} {
    %c0 = arith.constant 0 : index
    %c0_0 = arith.constant 0 : index
    %c0_1 = arith.constant 0 : index
    %0 = vector.load %arg1[%c0, %c0_0, %c0_1] : memref<1x8x32xf32, #tpu.memory_space<vmem>>, vector<1x8x32xf32>
    %1 = vector.shape_cast %0 : vector<1x8x32xf32> to vector<8x32xf32>
    %c0_2 = arith.constant 0 : index
    %c0_3 = arith.constant 0 : index
    %2 = vector.load %arg3[%c0_2, %c0_3] : memref<1x32xf32, #tpu.memory_space<vmem>>, vector<1x32xf32>
    %c0_4 = arith.constant 0 : index
    %c0_5 = arith.constant 0 : index
    %3 = vector.load %arg4[%c0_4, %c0_5] : memref<1x32xf32, #tpu.memory_space<vmem>>, vector<1x32xf32>
    %cst = arith.constant dense<0.000000e+00> : vector<8xf32>
    %4 = vector.multi_reduction <add>, %1, %cst [1] : vector<8x32xf32> to vector<8xf32>
    %5 = vector.shape_cast %4 : vector<8xf32> to vector<8x1xf32>
    %cst_6 = arith.constant 3.200000e+01 : f32
    %6 = vector.broadcast %cst_6 : f32 to vector<8x1xf32>
    %7 = arith.divf %5, %6 : vector<8x1xf32>
    %8 = vector.broadcast %7 : vector<8x1xf32> to vector<8x32xf32>
    %9 = arith.subf %1, %8 : vector<8x32xf32>
    %10 = arith.mulf %9, %9 : vector<8x32xf32>
    %cst_7 = arith.constant dense<0.000000e+00> : vector<8xf32>
    %11 = vector.multi_reduction <add>, %10, %cst_7 [1] : vector<8x32xf32> to vector<8xf32>
    %12 = vector.shape_cast %11 : vector<8xf32> to vector<8x1xf32>
    %cst_8 = arith.constant 3.200000e+01 : f32
    %13 = vector.broadcast %cst_8 : f32 to vector<8x1xf32>
    %14 = arith.divf %12, %13 : vector<8x1xf32>
    %cst_9 = arith.constant 9.99999996E-13 : f32
    %15 = vector.broadcast %cst_9 : f32 to vector<8x1xf32>
    %16 = arith.addf %14, %15 : vector<8x1xf32>
    %17 = math.rsqrt %16 : vector<8x1xf32>
    %18 = vector.broadcast %17 : vector<8x1xf32> to vector<8x32xf32>
    %19 = arith.mulf %9, %18 : vector<8x32xf32>
    %20 = vector.broadcast %2 : vector<1x32xf32> to vector<8x32xf32>
    %21 = arith.mulf %19, %20 : vector<8x32xf32>
    %22 = vector.broadcast %3 : vector<1x32xf32> to vector<8x32xf32>
    %23 = arith.addf %21, %22 : vector<8x32xf32>
    %24 = arith.truncf %23 : vector<8x32xf32> to vector<8x32xbf16>
    %25 = vector.shape_cast %24 : vector<8x32xbf16> to vector<1x8x32xbf16>
    %26 = vector.shape_cast %25 : vector<1x8x32xbf16> to vector<1x8x32xbf16>
    %27 = vector.broadcast %26 : vector<1x8x32xbf16> to vector<4x8x32xbf16>
    %c0_10 = arith.constant 0 : index
    %c0_11 = arith.constant 0 : index
    %c0_12 = arith.constant 0 : index
    %c0_13 = arith.constant 0 : index
    %28 = vector.load %arg5[%c0_10, %c0_11, %c0_12, %c0_13] : memref<2x4x32x8xbf16, #tpu.memory_space<vmem>>, vector<1x4x32x8xbf16>
    %29 = vector.shape_cast %28 : vector<1x4x32x8xbf16> to vector<4x32x8xbf16>
    %c0_14 = arith.constant 0 : index
    %c0_15 = arith.constant 0 : index
    %c0_16 = arith.constant 0 : index
    %c0_17 = arith.constant 0 : index
    %30 = vector.load %arg6[%c0_14, %c0_15, %c0_16, %c0_17] : memref<2x4x32x8xbf16, #tpu.memory_space<vmem>>, vector<1x4x32x8xbf16>
    %31 = vector.shape_cast %30 : vector<1x4x32x8xbf16> to vector<4x32x8xbf16>
    %c0_18 = arith.constant 0 : index
    %c0_19 = arith.constant 0 : index
    %c0_20 = arith.constant 0 : index
    %c0_21 = arith.constant 0 : index
    %32 = vector.load %arg7[%c0_18, %c0_19, %c0_20, %c0_21] : memref<2x4x32x8xbf16, #tpu.memory_space<vmem>>, vector<1x4x32x8xbf16>
    %33 = vector.shape_cast %32 : vector<1x4x32x8xbf16> to vector<4x32x8xbf16>
    %c0_22 = arith.constant 0 : index
    %c0_23 = arith.constant 0 : index
    %c0_24 = arith.constant 0 : index
    %c0_25 = arith.constant 0 : index
    %34 = vector.load %arg8[%c0_22, %c0_23, %c0_24, %c0_25] : memref<2x4x8x32xbf16, #tpu.memory_space<vmem>>, vector<1x4x8x32xbf16>
    %35 = vector.shape_cast %34 : vector<1x4x8x32xbf16> to vector<4x8x32xbf16>
    %c0_26 = arith.constant 0 : index
    %c0_27 = arith.constant 0 : index
    %c0_28 = arith.constant 0 : index
    %36 = vector.load %arg9[%c0_26, %c0_27, %c0_28] : memref<2x1x32xf32, #tpu.memory_space<vmem>>, vector<1x1x32xf32>
    %37 = vector.shape_cast %36 : vector<1x1x32xf32> to vector<1x32xf32>
    %cst_29 = arith.constant dense<0.000000e+00> : vector<4x8x8xf32>
    %38 = tpu.matmul %27, %29, %cst_29 {dimension_numbers = #tpu.dot_dimension_numbers<[2], [1], [1], [2], [0, 0, 0, 1, 1, 2], [0], [0]>} : vector<4x8x32xbf16>, vector<4x32x8xbf16>, vector<4x8x8xf32> -> vector<4x8x8xf32>
    %39 = arith.truncf %38 : vector<4x8x8xf32> to vector<4x8x8xbf16>
    %cst_30 = arith.constant dense<0.000000e+00> : vector<4x8x8xf32>
    %40 = tpu.matmul %27, %31, %cst_30 {dimension_numbers = #tpu.dot_dimension_numbers<[2], [1], [1], [2], [0, 0, 0, 1, 1, 2], [0], [0]>} : vector<4x8x32xbf16>, vector<4x32x8xbf16>, vector<4x8x8xf32> -> vector<4x8x8xf32>
    %41 = arith.truncf %40 : vector<4x8x8xf32> to vector<4x8x8xbf16>
    %cst_31 = arith.constant dense<0.000000e+00> : vector<4x8x8xf32>
    %42 = tpu.matmul %27, %33, %cst_31 {dimension_numbers = #tpu.dot_dimension_numbers<[2], [1], [1], [2], [0, 0, 0, 1, 1, 2], [0], [0]>} : vector<4x8x32xbf16>, vector<4x32x8xbf16>, vector<4x8x8xf32> -> vector<4x8x8xf32>
    %43 = arith.truncf %42 : vector<4x8x8xf32> to vector<4x8x8xbf16>
    %cst_32 = arith.constant dense<0.000000e+00> : vector<4x8x8xf32>
    %44 = tpu.matmul %39, %41, %cst_32 {dimension_numbers = #tpu.dot_dimension_numbers<[2], [2], [1], [1], [0, 0, 0, 1, 1, 1], [0], [0]>} : vector<4x8x8xbf16>, vector<4x8x8xbf16>, vector<4x8x8xf32> -> vector<4x8x8xf32>
    %cst_33 = arith.constant dense<0xFF800000> : vector<4x8xf32>
    %45 = vector.multi_reduction <maximumf>, %44, %cst_33 [2] : vector<4x8x8xf32> to vector<4x8xf32>
    %46 = vector.shape_cast %45 : vector<4x8xf32> to vector<4x8x1xf32>
    %47 = vector.broadcast %46 : vector<4x8x1xf32> to vector<4x8x8xf32>
    %48 = arith.subf %44, %47 : vector<4x8x8xf32>
    %49 = math.exp %48 : vector<4x8x8xf32>
    %cst_34 = arith.constant dense<0.000000e+00> : vector<4x8xf32>
    %50 = vector.multi_reduction <add>, %49, %cst_34 [2] : vector<4x8x8xf32> to vector<4x8xf32>
    %51 = vector.shape_cast %50 : vector<4x8xf32> to vector<4x8x1xf32>
    %52 = tpu.reciprocal %51 {approx = true} : vector<4x8x1xf32> -> vector<4x8x1xf32>
    %53 = vector.broadcast %52 : vector<4x8x1xf32> to vector<4x8x8xf32>
    %54 = arith.mulf %49, %53 : vector<4x8x8xf32>
    %55 = arith.truncf %54 : vector<4x8x8xf32> to vector<4x8x8xbf16>
    %cst_35 = arith.constant dense<0.000000e+00> : vector<4x8x8xf32>
    %56 = tpu.matmul %55, %43, %cst_35 {dimension_numbers = #tpu.dot_dimension_numbers<[2], [1], [1], [2], [0, 0, 0, 1, 1, 2], [0], [0]>} : vector<4x8x8xbf16>, vector<4x8x8xbf16>, vector<4x8x8xf32> -> vector<4x8x8xf32>
    %57 = arith.truncf %56 : vector<4x8x8xf32> to vector<4x8x8xbf16>
    %cst_36 = arith.constant dense<0.000000e+00> : vector<4x8x32xf32>
    %58 = tpu.matmul %57, %35, %cst_36 {dimension_numbers = #tpu.dot_dimension_numbers<[2], [1], [1], [2], [0, 0, 0, 1, 1, 2], [0], [0]>} : vector<4x8x8xbf16>, vector<4x8x32xbf16>, vector<4x8x32xf32> -> vector<4x8x32xf32>
    %cst_37 = arith.constant dense<0.000000e+00> : vector<8x32xf32>
    %59 = vector.multi_reduction <add>, %58, %cst_37 [0] : vector<4x8x32xf32> to vector<8x32xf32>
    %60 = vector.broadcast %37 : vector<1x32xf32> to vector<8x32xf32>
    %61 = arith.addf %59, %60 : vector<8x32xf32>
    %62 = arith.addf %23, %61 : vector<8x32xf32>
    %c0_38 = arith.constant 0 : index
    %c0_39 = arith.constant 0 : index
    %c0_40 = arith.constant 0 : index
    %63 = vector.load %arg10[%c0_38, %c0_39, %c0_40] : memref<2x1x32xf32, #tpu.memory_space<vmem>>, vector<1x1x32xf32>
    %64 = vector.shape_cast %63 : vector<1x1x32xf32> to vector<1x32xf32>
    %c0_41 = arith.constant 0 : index
    %c0_42 = arith.constant 0 : index
    %c0_43 = arith.constant 0 : index
    %65 = vector.load %arg11[%c0_41, %c0_42, %c0_43] : memref<2x1x32xf32, #tpu.memory_space<vmem>>, vector<1x1x32xf32>
    %66 = vector.shape_cast %65 : vector<1x1x32xf32> to vector<1x32xf32>
    %cst_44 = arith.constant dense<0.000000e+00> : vector<8xf32>
    %67 = vector.multi_reduction <add>, %62, %cst_44 [1] : vector<8x32xf32> to vector<8xf32>
    %68 = vector.shape_cast %67 : vector<8xf32> to vector<8x1xf32>
    %cst_45 = arith.constant 3.200000e+01 : f32
    %69 = vector.broadcast %cst_45 : f32 to vector<8x1xf32>
    %70 = arith.divf %68, %69 : vector<8x1xf32>
    %71 = vector.broadcast %70 : vector<8x1xf32> to vector<8x32xf32>
    %72 = arith.subf %62, %71 : vector<8x32xf32>
    %73 = arith.mulf %72, %72 : vector<8x32xf32>
    %cst_46 = arith.constant dense<0.000000e+00> : vector<8xf32>
    %74 = vector.multi_reduction <add>, %73, %cst_46 [1] : vector<8x32xf32> to vector<8xf32>
    %75 = vector.shape_cast %74 : vector<8xf32> to vector<8x1xf32>
    %cst_47 = arith.constant 3.200000e+01 : f32
    %76 = vector.broadcast %cst_47 : f32 to vector<8x1xf32>
    %77 = arith.divf %75, %76 : vector<8x1xf32>
    %cst_48 = arith.constant 9.99999996E-13 : f32
    %78 = vector.broadcast %cst_48 : f32 to vector<8x1xf32>
    %79 = arith.addf %77, %78 : vector<8x1xf32>
    %80 = math.rsqrt %79 : vector<8x1xf32>
    %81 = vector.broadcast %80 : vector<8x1xf32> to vector<8x32xf32>
    %82 = arith.mulf %72, %81 : vector<8x32xf32>
    %83 = vector.broadcast %64 : vector<1x32xf32> to vector<8x32xf32>
    %84 = arith.mulf %82, %83 : vector<8x32xf32>
    %85 = vector.broadcast %66 : vector<1x32xf32> to vector<8x32xf32>
    %86 = arith.addf %84, %85 : vector<8x32xf32>
    %c0_49 = arith.constant 0 : index
    %c0_50 = arith.constant 0 : index
    %c0_51 = arith.constant 0 : index
    %87 = vector.load %arg12[%c0_49, %c0_50, %c0_51] : memref<2x32x64xbf16, #tpu.memory_space<vmem>>, vector<1x32x64xbf16>
    %88 = vector.shape_cast %87 : vector<1x32x64xbf16> to vector<32x64xbf16>
    %c0_52 = arith.constant 0 : index
    %c0_53 = arith.constant 0 : index
    %c0_54 = arith.constant 0 : index
    %89 = vector.load %arg13[%c0_52, %c0_53, %c0_54] : memref<2x1x64xf32, #tpu.memory_space<vmem>>, vector<1x1x64xf32>
    %90 = vector.shape_cast %89 : vector<1x1x64xf32> to vector<1x64xf32>
    %91 = arith.truncf %86 : vector<8x32xf32> to vector<8x32xbf16>
    %cst_55 = arith.constant dense<0.000000e+00> : vector<8x64xf32>
    %92 = tpu.matmul %91, %88, %cst_55 {dimension_numbers = #tpu.dot_dimension_numbers<[1], [0], [0], [1], [0, 0, 1, 1], [], []>} : vector<8x32xbf16>, vector<32x64xbf16>, vector<8x64xf32> -> vector<8x64xf32>
    %93 = vector.broadcast %90 : vector<1x64xf32> to vector<8x64xf32>
    %94 = arith.addf %92, %93 : vector<8x64xf32>
    %95 = arith.mulf %94, %94 : vector<8x64xf32>
    %96 = arith.mulf %94, %95 : vector<8x64xf32>
    %cst_56 = arith.constant 4.471500e-02 : f32
    %97 = vector.broadcast %cst_56 : f32 to vector<8x64xf32>
    %98 = arith.mulf %97, %96 : vector<8x64xf32>
    %99 = arith.addf %94, %98 : vector<8x64xf32>
    %cst_57 = arith.constant 0.797884583 : f32
    %100 = vector.broadcast %cst_57 : f32 to vector<8x64xf32>
    %101 = arith.mulf %100, %99 : vector<8x64xf32>
    %102 = math.tanh %101 : vector<8x64xf32>
    %cst_58 = arith.constant 1.000000e+00 : f32
    %103 = vector.broadcast %cst_58 : f32 to vector<8x64xf32>
    %104 = arith.addf %103, %102 : vector<8x64xf32>
    %cst_59 = arith.constant 5.000000e-01 : f32
    %105 = vector.broadcast %cst_59 : f32 to vector<8x64xf32>
    %106 = arith.mulf %105, %104 : vector<8x64xf32>
    %107 = arith.mulf %94, %106 : vector<8x64xf32>
    %c0_60 = arith.constant 0 : index
    %c0_61 = arith.constant 0 : index
    %c0_62 = arith.constant 0 : index
    %108 = vector.load %arg14[%c0_60, %c0_61, %c0_62] : memref<2x64x32xbf16, #tpu.memory_space<vmem>>, vector<1x64x32xbf16>
    %109 = vector.shape_cast %108 : vector<1x64x32xbf16> to vector<64x32xbf16>
    %c0_63 = arith.constant 0 : index
    %c0_64 = arith.constant 0 : index
    %c0_65 = arith.constant 0 : index
    %110 = vector.load %arg15[%c0_63, %c0_64, %c0_65] : memref<2x1x32xf32, #tpu.memory_space<vmem>>, vector<1x1x32xf32>
    %111 = vector.shape_cast %110 : vector<1x1x32xf32> to vector<1x32xf32>
    %112 = arith.truncf %107 : vector<8x64xf32> to vector<8x64xbf16>
    %cst_66 = arith.constant dense<0.000000e+00> : vector<8x32xf32>
    %113 = tpu.matmul %112, %109, %cst_66 {dimension_numbers = #tpu.dot_dimension_numbers<[1], [0], [0], [1], [0, 0, 1, 1], [], []>} : vector<8x64xbf16>, vector<64x32xbf16>, vector<8x32xf32> -> vector<8x32xf32>
    %114 = vector.broadcast %111 : vector<1x32xf32> to vector<8x32xf32>
    %115 = arith.addf %113, %114 : vector<8x32xf32>
    %116 = arith.addf %86, %115 : vector<8x32xf32>
    %c0_67 = arith.constant 0 : index
    %c0_68 = arith.constant 0 : index
    %c0_69 = arith.constant 0 : index
    %117 = vector.load %arg16[%c0_67, %c0_68, %c0_69] : memref<2x1x32xf32, #tpu.memory_space<vmem>>, vector<1x1x32xf32>
    %118 = vector.shape_cast %117 : vector<1x1x32xf32> to vector<1x32xf32>
    %c0_70 = arith.constant 0 : index
    %c0_71 = arith.constant 0 : index
    %c0_72 = arith.constant 0 : index
    %119 = vector.load %arg17[%c0_70, %c0_71, %c0_72] : memref<2x1x32xf32, #tpu.memory_space<vmem>>, vector<1x1x32xf32>
    %120 = vector.shape_cast %119 : vector<1x1x32xf32> to vector<1x32xf32>
    %cst_73 = arith.constant dense<0.000000e+00> : vector<8xf32>
    %121 = vector.multi_reduction <add>, %116, %cst_73 [1] : vector<8x32xf32> to vector<8xf32>
    %122 = vector.shape_cast %121 : vector<8xf32> to vector<8x1xf32>
    %cst_74 = arith.constant 3.200000e+01 : f32
    %123 = vector.broadcast %cst_74 : f32 to vector<8x1xf32>
    %124 = arith.divf %122, %123 : vector<8x1xf32>
    %125 = vector.broadcast %124 : vector<8x1xf32> to vector<8x32xf32>
    %126 = arith.subf %116, %125 : vector<8x32xf32>
    %127 = arith.mulf %126, %126 : vector<8x32xf32>
    %cst_75 = arith.constant dense<0.000000e+00> : vector<8xf32>
    %128 = vector.multi_reduction <add>, %127, %cst_75 [1] : vector<8x32xf32> to vector<8xf32>
    %129 = vector.shape_cast %128 : vector<8xf32> to vector<8x1xf32>
    %cst_76 = arith.constant 3.200000e+01 : f32
    %130 = vector.broadcast %cst_76 : f32 to vector<8x1xf32>
    %131 = arith.divf %129, %130 : vector<8x1xf32>
    %cst_77 = arith.constant 9.99999996E-13 : f32
    %132 = vector.broadcast %cst_77 : f32 to vector<8x1xf32>
    %133 = arith.addf %131, %132 : vector<8x1xf32>
    %134 = math.rsqrt %133 : vector<8x1xf32>
    %135 = vector.broadcast %134 : vector<8x1xf32> to vector<8x32xf32>
    %136 = arith.mulf %126, %135 : vector<8x32xf32>
    %137 = vector.broadcast %118 : vector<1x32xf32> to vector<8x32xf32>
    %138 = arith.mulf %136, %137 : vector<8x32xf32>
    %139 = vector.broadcast %120 : vector<1x32xf32> to vector<8x32xf32>
    %140 = arith.addf %138, %139 : vector<8x32xf32>
    %141 = arith.truncf %140 : vector<8x32xf32> to vector<8x32xbf16>
    %142 = vector.shape_cast %141 : vector<8x32xbf16> to vector<1x8x32xbf16>
    %143 = vector.shape_cast %142 : vector<1x8x32xbf16> to vector<1x8x32xbf16>
    %144 = vector.broadcast %143 : vector<1x8x32xbf16> to vector<4x8x32xbf16>
    %c1 = arith.constant 1 : index
    %c0_78 = arith.constant 0 : index
    %c0_79 = arith.constant 0 : index
    %c0_80 = arith.constant 0 : index
    %145 = vector.load %arg5[%c1, %c0_78, %c0_79, %c0_80] : memref<2x4x32x8xbf16, #tpu.memory_space<vmem>>, vector<1x4x32x8xbf16>
    %146 = vector.shape_cast %145 : vector<1x4x32x8xbf16> to vector<4x32x8xbf16>
    %c1_81 = arith.constant 1 : index
    %c0_82 = arith.constant 0 : index
    %c0_83 = arith.constant 0 : index
    %c0_84 = arith.constant 0 : index
    %147 = vector.load %arg6[%c1_81, %c0_82, %c0_83, %c0_84] : memref<2x4x32x8xbf16, #tpu.memory_space<vmem>>, vector<1x4x32x8xbf16>
    %148 = vector.shape_cast %147 : vector<1x4x32x8xbf16> to vector<4x32x8xbf16>
    %c1_85 = arith.constant 1 : index
    %c0_86 = arith.constant 0 : index
    %c0_87 = arith.constant 0 : index
    %c0_88 = arith.constant 0 : index
    %149 = vector.load %arg7[%c1_85, %c0_86, %c0_87, %c0_88] : memref<2x4x32x8xbf16, #tpu.memory_space<vmem>>, vector<1x4x32x8xbf16>
    %150 = vector.shape_cast %149 : vector<1x4x32x8xbf16> to vector<4x32x8xbf16>
    %c1_89 = arith.constant 1 : index
    %c0_90 = arith.constant 0 : index
    %c0_91 = arith.constant 0 : index
    %c0_92 = arith.constant 0 : index
    %151 = vector.load %arg8[%c1_89, %c0_90, %c0_91, %c0_92] : memref<2x4x8x32xbf16, #tpu.memory_space<vmem>>, vector<1x4x8x32xbf16>
    %152 = vector.shape_cast %151 : vector<1x4x8x32xbf16> to vector<4x8x32xbf16>
    %c1_93 = arith.constant 1 : index
    %c0_94 = arith.constant 0 : index
    %c0_95 = arith.constant 0 : index
    %153 = vector.load %arg9[%c1_93, %c0_94, %c0_95] : memref<2x1x32xf32, #tpu.memory_space<vmem>>, vector<1x1x32xf32>
    %154 = vector.shape_cast %153 : vector<1x1x32xf32> to vector<1x32xf32>
    %cst_96 = arith.constant dense<0.000000e+00> : vector<4x8x8xf32>
    %155 = tpu.matmul %144, %146, %cst_96 {dimension_numbers = #tpu.dot_dimension_numbers<[2], [1], [1], [2], [0, 0, 0, 1, 1, 2], [0], [0]>} : vector<4x8x32xbf16>, vector<4x32x8xbf16>, vector<4x8x8xf32> -> vector<4x8x8xf32>
    %156 = arith.truncf %155 : vector<4x8x8xf32> to vector<4x8x8xbf16>
    %cst_97 = arith.constant dense<0.000000e+00> : vector<4x8x8xf32>
    %157 = tpu.matmul %144, %148, %cst_97 {dimension_numbers = #tpu.dot_dimension_numbers<[2], [1], [1], [2], [0, 0, 0, 1, 1, 2], [0], [0]>} : vector<4x8x32xbf16>, vector<4x32x8xbf16>, vector<4x8x8xf32> -> vector<4x8x8xf32>
    %158 = arith.truncf %157 : vector<4x8x8xf32> to vector<4x8x8xbf16>
    %cst_98 = arith.constant dense<0.000000e+00> : vector<4x8x8xf32>
    %159 = tpu.matmul %144, %150, %cst_98 {dimension_numbers = #tpu.dot_dimension_numbers<[2], [1], [1], [2], [0, 0, 0, 1, 1, 2], [0], [0]>} : vector<4x8x32xbf16>, vector<4x32x8xbf16>, vector<4x8x8xf32> -> vector<4x8x8xf32>
    %160 = arith.truncf %159 : vector<4x8x8xf32> to vector<4x8x8xbf16>
    %cst_99 = arith.constant dense<0.000000e+00> : vector<4x8x8xf32>
    %161 = tpu.matmul %156, %158, %cst_99 {dimension_numbers = #tpu.dot_dimension_numbers<[2], [2], [1], [1], [0, 0, 0, 1, 1, 1], [0], [0]>} : vector<4x8x8xbf16>, vector<4x8x8xbf16>, vector<4x8x8xf32> -> vector<4x8x8xf32>
    %cst_100 = arith.constant dense<0xFF800000> : vector<4x8xf32>
    %162 = vector.multi_reduction <maximumf>, %161, %cst_100 [2] : vector<4x8x8xf32> to vector<4x8xf32>
    %163 = vector.shape_cast %162 : vector<4x8xf32> to vector<4x8x1xf32>
    %164 = vector.broadcast %163 : vector<4x8x1xf32> to vector<4x8x8xf32>
    %165 = arith.subf %161, %164 : vector<4x8x8xf32>
    %166 = math.exp %165 : vector<4x8x8xf32>
    %cst_101 = arith.constant dense<0.000000e+00> : vector<4x8xf32>
    %167 = vector.multi_reduction <add>, %166, %cst_101 [2] : vector<4x8x8xf32> to vector<4x8xf32>
    %168 = vector.shape_cast %167 : vector<4x8xf32> to vector<4x8x1xf32>
    %169 = tpu.reciprocal %168 {approx = true} : vector<4x8x1xf32> -> vector<4x8x1xf32>
    %170 = vector.broadcast %169 : vector<4x8x1xf32> to vector<4x8x8xf32>
    %171 = arith.mulf %166, %170 : vector<4x8x8xf32>
    %172 = arith.truncf %171 : vector<4x8x8xf32> to vector<4x8x8xbf16>
    %cst_102 = arith.constant dense<0.000000e+00> : vector<4x8x8xf32>
    %173 = tpu.matmul %172, %160, %cst_102 {dimension_numbers = #tpu.dot_dimension_numbers<[2], [1], [1], [2], [0, 0, 0, 1, 1, 2], [0], [0]>} : vector<4x8x8xbf16>, vector<4x8x8xbf16>, vector<4x8x8xf32> -> vector<4x8x8xf32>
    %174 = arith.truncf %173 : vector<4x8x8xf32> to vector<4x8x8xbf16>
    %cst_103 = arith.constant dense<0.000000e+00> : vector<4x8x32xf32>
    %175 = tpu.matmul %174, %152, %cst_103 {dimension_numbers = #tpu.dot_dimension_numbers<[2], [1], [1], [2], [0, 0, 0, 1, 1, 2], [0], [0]>} : vector<4x8x8xbf16>, vector<4x8x32xbf16>, vector<4x8x32xf32> -> vector<4x8x32xf32>
    %cst_104 = arith.constant dense<0.000000e+00> : vector<8x32xf32>
    %176 = vector.multi_reduction <add>, %175, %cst_104 [0] : vector<4x8x32xf32> to vector<8x32xf32>
    %177 = vector.broadcast %154 : vector<1x32xf32> to vector<8x32xf32>
    %178 = arith.addf %176, %177 : vector<8x32xf32>
    %179 = arith.addf %140, %178 : vector<8x32xf32>
    %c1_105 = arith.constant 1 : index
    %c0_106 = arith.constant 0 : index
    %c0_107 = arith.constant 0 : index
    %180 = vector.load %arg10[%c1_105, %c0_106, %c0_107] : memref<2x1x32xf32, #tpu.memory_space<vmem>>, vector<1x1x32xf32>
    %181 = vector.shape_cast %180 : vector<1x1x32xf32> to vector<1x32xf32>
    %c1_108 = arith.constant 1 : index
    %c0_109 = arith.constant 0 : index
    %c0_110 = arith.constant 0 : index
    %182 = vector.load %arg11[%c1_108, %c0_109, %c0_110] : memref<2x1x32xf32, #tpu.memory_space<vmem>>, vector<1x1x32xf32>
    %183 = vector.shape_cast %182 : vector<1x1x32xf32> to vector<1x32xf32>
    %cst_111 = arith.constant dense<0.000000e+00> : vector<8xf32>
    %184 = vector.multi_reduction <add>, %179, %cst_111 [1] : vector<8x32xf32> to vector<8xf32>
    %185 = vector.shape_cast %184 : vector<8xf32> to vector<8x1xf32>
    %cst_112 = arith.constant 3.200000e+01 : f32
    %186 = vector.broadcast %cst_112 : f32 to vector<8x1xf32>
    %187 = arith.divf %185, %186 : vector<8x1xf32>
    %188 = vector.broadcast %187 : vector<8x1xf32> to vector<8x32xf32>
    %189 = arith.subf %179, %188 : vector<8x32xf32>
    %190 = arith.mulf %189, %189 : vector<8x32xf32>
    %cst_113 = arith.constant dense<0.000000e+00> : vector<8xf32>
    %191 = vector.multi_reduction <add>, %190, %cst_113 [1] : vector<8x32xf32> to vector<8xf32>
    %192 = vector.shape_cast %191 : vector<8xf32> to vector<8x1xf32>
    %cst_114 = arith.constant 3.200000e+01 : f32
    %193 = vector.broadcast %cst_114 : f32 to vector<8x1xf32>
    %194 = arith.divf %192, %193 : vector<8x1xf32>
    %cst_115 = arith.constant 9.99999996E-13 : f32
    %195 = vector.broadcast %cst_115 : f32 to vector<8x1xf32>
    %196 = arith.addf %194, %195 : vector<8x1xf32>
    %197 = math.rsqrt %196 : vector<8x1xf32>
    %198 = vector.broadcast %197 : vector<8x1xf32> to vector<8x32xf32>
    %199 = arith.mulf %189, %198 : vector<8x32xf32>
    %200 = vector.broadcast %181 : vector<1x32xf32> to vector<8x32xf32>
    %201 = arith.mulf %199, %200 : vector<8x32xf32>
    %202 = vector.broadcast %183 : vector<1x32xf32> to vector<8x32xf32>
    %203 = arith.addf %201, %202 : vector<8x32xf32>
    %c1_116 = arith.constant 1 : index
    %c0_117 = arith.constant 0 : index
    %c0_118 = arith.constant 0 : index
    %204 = vector.load %arg12[%c1_116, %c0_117, %c0_118] : memref<2x32x64xbf16, #tpu.memory_space<vmem>>, vector<1x32x64xbf16>
    %205 = vector.shape_cast %204 : vector<1x32x64xbf16> to vector<32x64xbf16>
    %c1_119 = arith.constant 1 : index
    %c0_120 = arith.constant 0 : index
    %c0_121 = arith.constant 0 : index
    %206 = vector.load %arg13[%c1_119, %c0_120, %c0_121] : memref<2x1x64xf32, #tpu.memory_space<vmem>>, vector<1x1x64xf32>
    %207 = vector.shape_cast %206 : vector<1x1x64xf32> to vector<1x64xf32>
    %208 = arith.truncf %203 : vector<8x32xf32> to vector<8x32xbf16>
    %cst_122 = arith.constant dense<0.000000e+00> : vector<8x64xf32>
    %209 = tpu.matmul %208, %205, %cst_122 {dimension_numbers = #tpu.dot_dimension_numbers<[1], [0], [0], [1], [0, 0, 1, 1], [], []>} : vector<8x32xbf16>, vector<32x64xbf16>, vector<8x64xf32> -> vector<8x64xf32>
    %210 = vector.broadcast %207 : vector<1x64xf32> to vector<8x64xf32>
    %211 = arith.addf %209, %210 : vector<8x64xf32>
    %212 = arith.mulf %211, %211 : vector<8x64xf32>
    %213 = arith.mulf %211, %212 : vector<8x64xf32>
    %cst_123 = arith.constant 4.471500e-02 : f32
    %214 = vector.broadcast %cst_123 : f32 to vector<8x64xf32>
    %215 = arith.mulf %214, %213 : vector<8x64xf32>
    %216 = arith.addf %211, %215 : vector<8x64xf32>
    %cst_124 = arith.constant 0.797884583 : f32
    %217 = vector.broadcast %cst_124 : f32 to vector<8x64xf32>
    %218 = arith.mulf %217, %216 : vector<8x64xf32>
    %219 = math.tanh %218 : vector<8x64xf32>
    %cst_125 = arith.constant 1.000000e+00 : f32
    %220 = vector.broadcast %cst_125 : f32 to vector<8x64xf32>
    %221 = arith.addf %220, %219 : vector<8x64xf32>
    %cst_126 = arith.constant 5.000000e-01 : f32
    %222 = vector.broadcast %cst_126 : f32 to vector<8x64xf32>
    %223 = arith.mulf %222, %221 : vector<8x64xf32>
    %224 = arith.mulf %211, %223 : vector<8x64xf32>
    %c1_127 = arith.constant 1 : index
    %c0_128 = arith.constant 0 : index
    %c0_129 = arith.constant 0 : index
    %225 = vector.load %arg14[%c1_127, %c0_128, %c0_129] : memref<2x64x32xbf16, #tpu.memory_space<vmem>>, vector<1x64x32xbf16>
    %226 = vector.shape_cast %225 : vector<1x64x32xbf16> to vector<64x32xbf16>
    %c1_130 = arith.constant 1 : index
    %c0_131 = arith.constant 0 : index
    %c0_132 = arith.constant 0 : index
    %227 = vector.load %arg15[%c1_130, %c0_131, %c0_132] : memref<2x1x32xf32, #tpu.memory_space<vmem>>, vector<1x1x32xf32>
    %228 = vector.shape_cast %227 : vector<1x1x32xf32> to vector<1x32xf32>
    %229 = arith.truncf %224 : vector<8x64xf32> to vector<8x64xbf16>
    %cst_133 = arith.constant dense<0.000000e+00> : vector<8x32xf32>
    %230 = tpu.matmul %229, %226, %cst_133 {dimension_numbers = #tpu.dot_dimension_numbers<[1], [0], [0], [1], [0, 0, 1, 1], [], []>} : vector<8x64xbf16>, vector<64x32xbf16>, vector<8x32xf32> -> vector<8x32xf32>
    %231 = vector.broadcast %228 : vector<1x32xf32> to vector<8x32xf32>
    %232 = arith.addf %230, %231 : vector<8x32xf32>
    %233 = arith.addf %203, %232 : vector<8x32xf32>
    %c1_134 = arith.constant 1 : index
    %c0_135 = arith.constant 0 : index
    %c0_136 = arith.constant 0 : index
    %234 = vector.load %arg16[%c1_134, %c0_135, %c0_136] : memref<2x1x32xf32, #tpu.memory_space<vmem>>, vector<1x1x32xf32>
    %235 = vector.shape_cast %234 : vector<1x1x32xf32> to vector<1x32xf32>
    %c1_137 = arith.constant 1 : index
    %c0_138 = arith.constant 0 : index
    %c0_139 = arith.constant 0 : index
    %236 = vector.load %arg17[%c1_137, %c0_138, %c0_139] : memref<2x1x32xf32, #tpu.memory_space<vmem>>, vector<1x1x32xf32>
    %237 = vector.shape_cast %236 : vector<1x1x32xf32> to vector<1x32xf32>
    %cst_140 = arith.constant dense<0.000000e+00> : vector<8xf32>
    %238 = vector.multi_reduction <add>, %233, %cst_140 [1] : vector<8x32xf32> to vector<8xf32>
    %239 = vector.shape_cast %238 : vector<8xf32> to vector<8x1xf32>
    %cst_141 = arith.constant 3.200000e+01 : f32
    %240 = vector.broadcast %cst_141 : f32 to vector<8x1xf32>
    %241 = arith.divf %239, %240 : vector<8x1xf32>
    %242 = vector.broadcast %241 : vector<8x1xf32> to vector<8x32xf32>
    %243 = arith.subf %233, %242 : vector<8x32xf32>
    %244 = arith.mulf %243, %243 : vector<8x32xf32>
    %cst_142 = arith.constant dense<0.000000e+00> : vector<8xf32>
    %245 = vector.multi_reduction <add>, %244, %cst_142 [1] : vector<8x32xf32> to vector<8xf32>
    %246 = vector.shape_cast %245 : vector<8xf32> to vector<8x1xf32>
    %cst_143 = arith.constant 3.200000e+01 : f32
    %247 = vector.broadcast %cst_143 : f32 to vector<8x1xf32>
    %248 = arith.divf %246, %247 : vector<8x1xf32>
    %cst_144 = arith.constant 9.99999996E-13 : f32
    %249 = vector.broadcast %cst_144 : f32 to vector<8x1xf32>
    %250 = arith.addf %248, %249 : vector<8x1xf32>
    %251 = math.rsqrt %250 : vector<8x1xf32>
    %252 = vector.broadcast %251 : vector<8x1xf32> to vector<8x32xf32>
    %253 = arith.mulf %243, %252 : vector<8x32xf32>
    %254 = vector.broadcast %235 : vector<1x32xf32> to vector<8x32xf32>
    %255 = arith.mulf %253, %254 : vector<8x32xf32>
    %256 = vector.broadcast %237 : vector<1x32xf32> to vector<8x32xf32>
    %257 = arith.addf %255, %256 : vector<8x32xf32>
    %258 = arith.truncf %257 : vector<8x32xf32> to vector<8x32xbf16>
    %259 = vector.shape_cast %258 : vector<8x32xbf16> to vector<1x8x32xbf16>
    %260 = vector.shape_cast %259 : vector<1x8x32xbf16> to vector<1x8x32xbf16>
    %261 = vector.broadcast %260 : vector<1x8x32xbf16> to vector<4x8x32xbf16>
    %c0_145 = arith.constant 0 : index
    %c0_146 = arith.constant 0 : index
    %c0_147 = arith.constant 0 : index
    %262 = vector.load %arg2[%c0_145, %c0_146, %c0_147] : memref<1x8x32xf32, #tpu.memory_space<vmem>>, vector<1x8x32xf32>
    %263 = vector.shape_cast %262 : vector<1x8x32xf32> to vector<8x32xf32>
    %c0_148 = arith.constant 0 : index
    %c0_149 = arith.constant 0 : index
    %264 = vector.load %arg18[%c0_148, %c0_149] : memref<1x32xf32, #tpu.memory_space<vmem>>, vector<1x32xf32>
    %c0_150 = arith.constant 0 : index
    %c0_151 = arith.constant 0 : index
    %265 = vector.load %arg19[%c0_150, %c0_151] : memref<1x32xf32, #tpu.memory_space<vmem>>, vector<1x32xf32>
    %cst_152 = arith.constant dense<0.000000e+00> : vector<8xf32>
    %266 = vector.multi_reduction <add>, %263, %cst_152 [1] : vector<8x32xf32> to vector<8xf32>
    %267 = vector.shape_cast %266 : vector<8xf32> to vector<8x1xf32>
    %cst_153 = arith.constant 3.200000e+01 : f32
    %268 = vector.broadcast %cst_153 : f32 to vector<8x1xf32>
    %269 = arith.divf %267, %268 : vector<8x1xf32>
    %270 = vector.broadcast %269 : vector<8x1xf32> to vector<8x32xf32>
    %271 = arith.subf %263, %270 : vector<8x32xf32>
    %272 = arith.mulf %271, %271 : vector<8x32xf32>
    %cst_154 = arith.constant dense<0.000000e+00> : vector<8xf32>
    %273 = vector.multi_reduction <add>, %272, %cst_154 [1] : vector<8x32xf32> to vector<8xf32>
    %274 = vector.shape_cast %273 : vector<8xf32> to vector<8x1xf32>
    %cst_155 = arith.constant 3.200000e+01 : f32
    %275 = vector.broadcast %cst_155 : f32 to vector<8x1xf32>
    %276 = arith.divf %274, %275 : vector<8x1xf32>
    %cst_156 = arith.constant 9.99999996E-13 : f32
    %277 = vector.broadcast %cst_156 : f32 to vector<8x1xf32>
    %278 = arith.addf %276, %277 : vector<8x1xf32>
    %279 = math.rsqrt %278 : vector<8x1xf32>
    %280 = vector.broadcast %279 : vector<8x1xf32> to vector<8x32xf32>
    %281 = arith.mulf %271, %280 : vector<8x32xf32>
    %282 = vector.broadcast %264 : vector<1x32xf32> to vector<8x32xf32>
    %283 = arith.mulf %281, %282 : vector<8x32xf32>
    %284 = vector.broadcast %265 : vector<1x32xf32> to vector<8x32xf32>
    %285 = arith.addf %283, %284 : vector<8x32xf32>
    %286 = tpu.iota {dimensions = array<i32: 0>} : vector<8x8xi32>
    %287 = tpu.iota {dimensions = array<i32: 1>} : vector<8x8xi32>
    %288 = arith.cmpi sge, %286, %287 : vector<8x8xi32>
    %cst_157 = arith.constant 0.000000e+00 : f32
    %cst_158 = arith.constant -1.000000e+09 : f32
    %289 = vector.broadcast %cst_157 : f32 to vector<8x8xf32>
    %290 = vector.broadcast %cst_158 : f32 to vector<8x8xf32>
    %291 = arith.select %288, %289, %290 : vector<8x8xi1>, vector<8x8xf32>
    %292 = arith.truncf %285 : vector<8x32xf32> to vector<8x32xbf16>
    %293 = vector.shape_cast %292 : vector<8x32xbf16> to vector<1x8x32xbf16>
    %294 = vector.shape_cast %293 : vector<1x8x32xbf16> to vector<1x8x32xbf16>
    %295 = vector.broadcast %294 : vector<1x8x32xbf16> to vector<4x8x32xbf16>
    %c0_159 = arith.constant 0 : index
    %c0_160 = arith.constant 0 : index
    %c0_161 = arith.constant 0 : index
    %c0_162 = arith.constant 0 : index
    %296 = vector.load %arg20[%c0_159, %c0_160, %c0_161, %c0_162] : memref<2x4x32x8xbf16, #tpu.memory_space<vmem>>, vector<1x4x32x8xbf16>
    %297 = vector.shape_cast %296 : vector<1x4x32x8xbf16> to vector<4x32x8xbf16>
    %c0_163 = arith.constant 0 : index
    %c0_164 = arith.constant 0 : index
    %c0_165 = arith.constant 0 : index
    %c0_166 = arith.constant 0 : index
    %298 = vector.load %arg21[%c0_163, %c0_164, %c0_165, %c0_166] : memref<2x4x32x8xbf16, #tpu.memory_space<vmem>>, vector<1x4x32x8xbf16>
    %299 = vector.shape_cast %298 : vector<1x4x32x8xbf16> to vector<4x32x8xbf16>
    %c0_167 = arith.constant 0 : index
    %c0_168 = arith.constant 0 : index
    %c0_169 = arith.constant 0 : index
    %c0_170 = arith.constant 0 : index
    %300 = vector.load %arg22[%c0_167, %c0_168, %c0_169, %c0_170] : memref<2x4x32x8xbf16, #tpu.memory_space<vmem>>, vector<1x4x32x8xbf16>
    %301 = vector.shape_cast %300 : vector<1x4x32x8xbf16> to vector<4x32x8xbf16>
    %c0_171 = arith.constant 0 : index
    %c0_172 = arith.constant 0 : index
    %c0_173 = arith.constant 0 : index
    %c0_174 = arith.constant 0 : index
    %302 = vector.load %arg23[%c0_171, %c0_172, %c0_173, %c0_174] : memref<2x4x8x32xbf16, #tpu.memory_space<vmem>>, vector<1x4x8x32xbf16>
    %303 = vector.shape_cast %302 : vector<1x4x8x32xbf16> to vector<4x8x32xbf16>
    %c0_175 = arith.constant 0 : index
    %c0_176 = arith.constant 0 : index
    %c0_177 = arith.constant 0 : index
    %304 = vector.load %arg24[%c0_175, %c0_176, %c0_177] : memref<2x1x32xf32, #tpu.memory_space<vmem>>, vector<1x1x32xf32>
    %305 = vector.shape_cast %304 : vector<1x1x32xf32> to vector<1x32xf32>
    %cst_178 = arith.constant dense<0.000000e+00> : vector<4x8x8xf32>
    %306 = tpu.matmul %295, %297, %cst_178 {dimension_numbers = #tpu.dot_dimension_numbers<[2], [1], [1], [2], [0, 0, 0, 1, 1, 2], [0], [0]>} : vector<4x8x32xbf16>, vector<4x32x8xbf16>, vector<4x8x8xf32> -> vector<4x8x8xf32>
    %307 = arith.truncf %306 : vector<4x8x8xf32> to vector<4x8x8xbf16>
    %cst_179 = arith.constant dense<0.000000e+00> : vector<4x8x8xf32>
    %308 = tpu.matmul %295, %299, %cst_179 {dimension_numbers = #tpu.dot_dimension_numbers<[2], [1], [1], [2], [0, 0, 0, 1, 1, 2], [0], [0]>} : vector<4x8x32xbf16>, vector<4x32x8xbf16>, vector<4x8x8xf32> -> vector<4x8x8xf32>
    %309 = arith.truncf %308 : vector<4x8x8xf32> to vector<4x8x8xbf16>
    %cst_180 = arith.constant dense<0.000000e+00> : vector<4x8x8xf32>
    %310 = tpu.matmul %295, %301, %cst_180 {dimension_numbers = #tpu.dot_dimension_numbers<[2], [1], [1], [2], [0, 0, 0, 1, 1, 2], [0], [0]>} : vector<4x8x32xbf16>, vector<4x32x8xbf16>, vector<4x8x8xf32> -> vector<4x8x8xf32>
    %311 = arith.truncf %310 : vector<4x8x8xf32> to vector<4x8x8xbf16>
    %cst_181 = arith.constant dense<0.000000e+00> : vector<4x8x8xf32>
    %312 = tpu.matmul %307, %309, %cst_181 {dimension_numbers = #tpu.dot_dimension_numbers<[2], [2], [1], [1], [0, 0, 0, 1, 1, 1], [0], [0]>} : vector<4x8x8xbf16>, vector<4x8x8xbf16>, vector<4x8x8xf32> -> vector<4x8x8xf32>
    %313 = vector.shape_cast %291 : vector<8x8xf32> to vector<1x8x8xf32>
    %314 = vector.broadcast %313 : vector<1x8x8xf32> to vector<4x8x8xf32>
    %315 = arith.addf %312, %314 : vector<4x8x8xf32>
    %cst_182 = arith.constant dense<0xFF800000> : vector<4x8xf32>
    %316 = vector.multi_reduction <maximumf>, %315, %cst_182 [2] : vector<4x8x8xf32> to vector<4x8xf32>
    %317 = vector.shape_cast %316 : vector<4x8xf32> to vector<4x8x1xf32>
    %318 = vector.broadcast %317 : vector<4x8x1xf32> to vector<4x8x8xf32>
    %319 = arith.subf %315, %318 : vector<4x8x8xf32>
    %320 = math.exp %319 : vector<4x8x8xf32>
    %cst_183 = arith.constant dense<0.000000e+00> : vector<4x8xf32>
    %321 = vector.multi_reduction <add>, %320, %cst_183 [2] : vector<4x8x8xf32> to vector<4x8xf32>
    %322 = vector.shape_cast %321 : vector<4x8xf32> to vector<4x8x1xf32>
    %323 = tpu.reciprocal %322 {approx = true} : vector<4x8x1xf32> -> vector<4x8x1xf32>
    %324 = vector.broadcast %323 : vector<4x8x1xf32> to vector<4x8x8xf32>
    %325 = arith.mulf %320, %324 : vector<4x8x8xf32>
    %326 = arith.truncf %325 : vector<4x8x8xf32> to vector<4x8x8xbf16>
    %cst_184 = arith.constant dense<0.000000e+00> : vector<4x8x8xf32>
    %327 = tpu.matmul %326, %311, %cst_184 {dimension_numbers = #tpu.dot_dimension_numbers<[2], [1], [1], [2], [0, 0, 0, 1, 1, 2], [0], [0]>} : vector<4x8x8xbf16>, vector<4x8x8xbf16>, vector<4x8x8xf32> -> vector<4x8x8xf32>
    %328 = arith.truncf %327 : vector<4x8x8xf32> to vector<4x8x8xbf16>
    %cst_185 = arith.constant dense<0.000000e+00> : vector<4x8x32xf32>
    %329 = tpu.matmul %328, %303, %cst_185 {dimension_numbers = #tpu.dot_dimension_numbers<[2], [1], [1], [2], [0, 0, 0, 1, 1, 2], [0], [0]>} : vector<4x8x8xbf16>, vector<4x8x32xbf16>, vector<4x8x32xf32> -> vector<4x8x32xf32>
    %cst_186 = arith.constant dense<0.000000e+00> : vector<8x32xf32>
    %330 = vector.multi_reduction <add>, %329, %cst_186 [0] : vector<4x8x32xf32> to vector<8x32xf32>
    %331 = vector.broadcast %305 : vector<1x32xf32> to vector<8x32xf32>
    %332 = arith.addf %330, %331 : vector<8x32xf32>
    %333 = arith.addf %285, %332 : vector<8x32xf32>
    %c0_187 = arith.constant 0 : index
    %c0_188 = arith.constant 0 : index
    %c0_189 = arith.constant 0 : index
    %334 = vector.load %arg25[%c0_187, %c0_188, %c0_189] : memref<2x1x32xf32, #tpu.memory_space<vmem>>, vector<1x1x32xf32>
    %335 = vector.shape_cast %334 : vector<1x1x32xf32> to vector<1x32xf32>
    %c0_190 = arith.constant 0 : index
    %c0_191 = arith.constant 0 : index
    %c0_192 = arith.constant 0 : index
    %336 = vector.load %arg26[%c0_190, %c0_191, %c0_192] : memref<2x1x32xf32, #tpu.memory_space<vmem>>, vector<1x1x32xf32>
    %337 = vector.shape_cast %336 : vector<1x1x32xf32> to vector<1x32xf32>
    %cst_193 = arith.constant dense<0.000000e+00> : vector<8xf32>
    %338 = vector.multi_reduction <add>, %333, %cst_193 [1] : vector<8x32xf32> to vector<8xf32>
    %339 = vector.shape_cast %338 : vector<8xf32> to vector<8x1xf32>
    %cst_194 = arith.constant 3.200000e+01 : f32
    %340 = vector.broadcast %cst_194 : f32 to vector<8x1xf32>
    %341 = arith.divf %339, %340 : vector<8x1xf32>
    %342 = vector.broadcast %341 : vector<8x1xf32> to vector<8x32xf32>
    %343 = arith.subf %333, %342 : vector<8x32xf32>
    %344 = arith.mulf %343, %343 : vector<8x32xf32>
    %cst_195 = arith.constant dense<0.000000e+00> : vector<8xf32>
    %345 = vector.multi_reduction <add>, %344, %cst_195 [1] : vector<8x32xf32> to vector<8xf32>
    %346 = vector.shape_cast %345 : vector<8xf32> to vector<8x1xf32>
    %cst_196 = arith.constant 3.200000e+01 : f32
    %347 = vector.broadcast %cst_196 : f32 to vector<8x1xf32>
    %348 = arith.divf %346, %347 : vector<8x1xf32>
    %cst_197 = arith.constant 9.99999996E-13 : f32
    %349 = vector.broadcast %cst_197 : f32 to vector<8x1xf32>
    %350 = arith.addf %348, %349 : vector<8x1xf32>
    %351 = math.rsqrt %350 : vector<8x1xf32>
    %352 = vector.broadcast %351 : vector<8x1xf32> to vector<8x32xf32>
    %353 = arith.mulf %343, %352 : vector<8x32xf32>
    %354 = vector.broadcast %335 : vector<1x32xf32> to vector<8x32xf32>
    %355 = arith.mulf %353, %354 : vector<8x32xf32>
    %356 = vector.broadcast %337 : vector<1x32xf32> to vector<8x32xf32>
    %357 = arith.addf %355, %356 : vector<8x32xf32>
    %358 = arith.truncf %357 : vector<8x32xf32> to vector<8x32xbf16>
    %359 = vector.shape_cast %358 : vector<8x32xbf16> to vector<1x8x32xbf16>
    %360 = vector.shape_cast %359 : vector<1x8x32xbf16> to vector<1x8x32xbf16>
    %361 = vector.broadcast %360 : vector<1x8x32xbf16> to vector<4x8x32xbf16>
    %c0_198 = arith.constant 0 : index
    %c0_199 = arith.constant 0 : index
    %c0_200 = arith.constant 0 : index
    %c0_201 = arith.constant 0 : index
    %362 = vector.load %arg27[%c0_198, %c0_199, %c0_200, %c0_201] : memref<2x4x32x8xbf16, #tpu.memory_space<vmem>>, vector<1x4x32x8xbf16>
    %363 = vector.shape_cast %362 : vector<1x4x32x8xbf16> to vector<4x32x8xbf16>
    %c0_202 = arith.constant 0 : index
    %c0_203 = arith.constant 0 : index
    %c0_204 = arith.constant 0 : index
    %c0_205 = arith.constant 0 : index
    %364 = vector.load %arg28[%c0_202, %c0_203, %c0_204, %c0_205] : memref<2x4x32x8xbf16, #tpu.memory_space<vmem>>, vector<1x4x32x8xbf16>
    %365 = vector.shape_cast %364 : vector<1x4x32x8xbf16> to vector<4x32x8xbf16>
    %c0_206 = arith.constant 0 : index
    %c0_207 = arith.constant 0 : index
    %c0_208 = arith.constant 0 : index
    %c0_209 = arith.constant 0 : index
    %366 = vector.load %arg29[%c0_206, %c0_207, %c0_208, %c0_209] : memref<2x4x32x8xbf16, #tpu.memory_space<vmem>>, vector<1x4x32x8xbf16>
    %367 = vector.shape_cast %366 : vector<1x4x32x8xbf16> to vector<4x32x8xbf16>
    %c0_210 = arith.constant 0 : index
    %c0_211 = arith.constant 0 : index
    %c0_212 = arith.constant 0 : index
    %c0_213 = arith.constant 0 : index
    %368 = vector.load %arg30[%c0_210, %c0_211, %c0_212, %c0_213] : memref<2x4x8x32xbf16, #tpu.memory_space<vmem>>, vector<1x4x8x32xbf16>
    %369 = vector.shape_cast %368 : vector<1x4x8x32xbf16> to vector<4x8x32xbf16>
    %c0_214 = arith.constant 0 : index
    %c0_215 = arith.constant 0 : index
    %c0_216 = arith.constant 0 : index
    %370 = vector.load %arg31[%c0_214, %c0_215, %c0_216] : memref<2x1x32xf32, #tpu.memory_space<vmem>>, vector<1x1x32xf32>
    %371 = vector.shape_cast %370 : vector<1x1x32xf32> to vector<1x32xf32>
    %cst_217 = arith.constant dense<0.000000e+00> : vector<4x8x8xf32>
    %372 = tpu.matmul %361, %363, %cst_217 {dimension_numbers = #tpu.dot_dimension_numbers<[2], [1], [1], [2], [0, 0, 0, 1, 1, 2], [0], [0]>} : vector<4x8x32xbf16>, vector<4x32x8xbf16>, vector<4x8x8xf32> -> vector<4x8x8xf32>
    %373 = arith.truncf %372 : vector<4x8x8xf32> to vector<4x8x8xbf16>
    %cst_218 = arith.constant dense<0.000000e+00> : vector<4x8x8xf32>
    %374 = tpu.matmul %261, %365, %cst_218 {dimension_numbers = #tpu.dot_dimension_numbers<[2], [1], [1], [2], [0, 0, 0, 1, 1, 2], [0], [0]>} : vector<4x8x32xbf16>, vector<4x32x8xbf16>, vector<4x8x8xf32> -> vector<4x8x8xf32>
    %375 = arith.truncf %374 : vector<4x8x8xf32> to vector<4x8x8xbf16>
    %cst_219 = arith.constant dense<0.000000e+00> : vector<4x8x8xf32>
    %376 = tpu.matmul %261, %367, %cst_219 {dimension_numbers = #tpu.dot_dimension_numbers<[2], [1], [1], [2], [0, 0, 0, 1, 1, 2], [0], [0]>} : vector<4x8x32xbf16>, vector<4x32x8xbf16>, vector<4x8x8xf32> -> vector<4x8x8xf32>
    %377 = arith.truncf %376 : vector<4x8x8xf32> to vector<4x8x8xbf16>
    %cst_220 = arith.constant dense<0.000000e+00> : vector<4x8x8xf32>
    %378 = tpu.matmul %373, %375, %cst_220 {dimension_numbers = #tpu.dot_dimension_numbers<[2], [2], [1], [1], [0, 0, 0, 1, 1, 1], [0], [0]>} : vector<4x8x8xbf16>, vector<4x8x8xbf16>, vector<4x8x8xf32> -> vector<4x8x8xf32>
    %cst_221 = arith.constant dense<0xFF800000> : vector<4x8xf32>
    %379 = vector.multi_reduction <maximumf>, %378, %cst_221 [2] : vector<4x8x8xf32> to vector<4x8xf32>
    %380 = vector.shape_cast %379 : vector<4x8xf32> to vector<4x8x1xf32>
    %381 = vector.broadcast %380 : vector<4x8x1xf32> to vector<4x8x8xf32>
    %382 = arith.subf %378, %381 : vector<4x8x8xf32>
    %383 = math.exp %382 : vector<4x8x8xf32>
    %cst_222 = arith.constant dense<0.000000e+00> : vector<4x8xf32>
    %384 = vector.multi_reduction <add>, %383, %cst_222 [2] : vector<4x8x8xf32> to vector<4x8xf32>
    %385 = vector.shape_cast %384 : vector<4x8xf32> to vector<4x8x1xf32>
    %386 = tpu.reciprocal %385 {approx = true} : vector<4x8x1xf32> -> vector<4x8x1xf32>
    %387 = vector.broadcast %386 : vector<4x8x1xf32> to vector<4x8x8xf32>
    %388 = arith.mulf %383, %387 : vector<4x8x8xf32>
    %389 = arith.truncf %388 : vector<4x8x8xf32> to vector<4x8x8xbf16>
    %cst_223 = arith.constant dense<0.000000e+00> : vector<4x8x8xf32>
    %390 = tpu.matmul %389, %377, %cst_223 {dimension_numbers = #tpu.dot_dimension_numbers<[2], [1], [1], [2], [0, 0, 0, 1, 1, 2], [0], [0]>} : vector<4x8x8xbf16>, vector<4x8x8xbf16>, vector<4x8x8xf32> -> vector<4x8x8xf32>
    %391 = arith.truncf %390 : vector<4x8x8xf32> to vector<4x8x8xbf16>
    %cst_224 = arith.constant dense<0.000000e+00> : vector<4x8x32xf32>
    %392 = tpu.matmul %391, %369, %cst_224 {dimension_numbers = #tpu.dot_dimension_numbers<[2], [1], [1], [2], [0, 0, 0, 1, 1, 2], [0], [0]>} : vector<4x8x8xbf16>, vector<4x8x32xbf16>, vector<4x8x32xf32> -> vector<4x8x32xf32>
    %cst_225 = arith.constant dense<0.000000e+00> : vector<8x32xf32>
    %393 = vector.multi_reduction <add>, %392, %cst_225 [0] : vector<4x8x32xf32> to vector<8x32xf32>
    %394 = vector.broadcast %371 : vector<1x32xf32> to vector<8x32xf32>
    %395 = arith.addf %393, %394 : vector<8x32xf32>
    %396 = arith.addf %357, %395 : vector<8x32xf32>
    %c0_226 = arith.constant 0 : index
    %c0_227 = arith.constant 0 : index
    %c0_228 = arith.constant 0 : index
    %397 = vector.load %arg32[%c0_226, %c0_227, %c0_228] : memref<2x1x32xf32, #tpu.memory_space<vmem>>, vector<1x1x32xf32>
    %398 = vector.shape_cast %397 : vector<1x1x32xf32> to vector<1x32xf32>
    %c0_229 = arith.constant 0 : index
    %c0_230 = arith.constant 0 : index
    %c0_231 = arith.constant 0 : index
    %399 = vector.load %arg33[%c0_229, %c0_230, %c0_231] : memref<2x1x32xf32, #tpu.memory_space<vmem>>, vector<1x1x32xf32>
    %400 = vector.shape_cast %399 : vector<1x1x32xf32> to vector<1x32xf32>
    %cst_232 = arith.constant dense<0.000000e+00> : vector<8xf32>
    %401 = vector.multi_reduction <add>, %396, %cst_232 [1] : vector<8x32xf32> to vector<8xf32>
    %402 = vector.shape_cast %401 : vector<8xf32> to vector<8x1xf32>
    %cst_233 = arith.constant 3.200000e+01 : f32
    %403 = vector.broadcast %cst_233 : f32 to vector<8x1xf32>
    %404 = arith.divf %402, %403 : vector<8x1xf32>
    %405 = vector.broadcast %404 : vector<8x1xf32> to vector<8x32xf32>
    %406 = arith.subf %396, %405 : vector<8x32xf32>
    %407 = arith.mulf %406, %406 : vector<8x32xf32>
    %cst_234 = arith.constant dense<0.000000e+00> : vector<8xf32>
    %408 = vector.multi_reduction <add>, %407, %cst_234 [1] : vector<8x32xf32> to vector<8xf32>
    %409 = vector.shape_cast %408 : vector<8xf32> to vector<8x1xf32>
    %cst_235 = arith.constant 3.200000e+01 : f32
    %410 = vector.broadcast %cst_235 : f32 to vector<8x1xf32>
    %411 = arith.divf %409, %410 : vector<8x1xf32>
    %cst_236 = arith.constant 9.99999996E-13 : f32
    %412 = vector.broadcast %cst_236 : f32 to vector<8x1xf32>
    %413 = arith.addf %411, %412 : vector<8x1xf32>
    %414 = math.rsqrt %413 : vector<8x1xf32>
    %415 = vector.broadcast %414 : vector<8x1xf32> to vector<8x32xf32>
    %416 = arith.mulf %406, %415 : vector<8x32xf32>
    %417 = vector.broadcast %398 : vector<1x32xf32> to vector<8x32xf32>
    %418 = arith.mulf %416, %417 : vector<8x32xf32>
    %419 = vector.broadcast %400 : vector<1x32xf32> to vector<8x32xf32>
    %420 = arith.addf %418, %419 : vector<8x32xf32>
    %c0_237 = arith.constant 0 : index
    %c0_238 = arith.constant 0 : index
    %c0_239 = arith.constant 0 : index
    %421 = vector.load %arg34[%c0_237, %c0_238, %c0_239] : memref<2x32x64xbf16, #tpu.memory_space<vmem>>, vector<1x32x64xbf16>
    %422 = vector.shape_cast %421 : vector<1x32x64xbf16> to vector<32x64xbf16>
    %c0_240 = arith.constant 0 : index
    %c0_241 = arith.constant 0 : index
    %c0_242 = arith.constant 0 : index
    %423 = vector.load %arg35[%c0_240, %c0_241, %c0_242] : memref<2x1x64xf32, #tpu.memory_space<vmem>>, vector<1x1x64xf32>
    %424 = vector.shape_cast %423 : vector<1x1x64xf32> to vector<1x64xf32>
    %425 = arith.truncf %420 : vector<8x32xf32> to vector<8x32xbf16>
    %cst_243 = arith.constant dense<0.000000e+00> : vector<8x64xf32>
    %426 = tpu.matmul %425, %422, %cst_243 {dimension_numbers = #tpu.dot_dimension_numbers<[1], [0], [0], [1], [0, 0, 1, 1], [], []>} : vector<8x32xbf16>, vector<32x64xbf16>, vector<8x64xf32> -> vector<8x64xf32>
    %427 = vector.broadcast %424 : vector<1x64xf32> to vector<8x64xf32>
    %428 = arith.addf %426, %427 : vector<8x64xf32>
    %429 = arith.mulf %428, %428 : vector<8x64xf32>
    %430 = arith.mulf %428, %429 : vector<8x64xf32>
    %cst_244 = arith.constant 4.471500e-02 : f32
    %431 = vector.broadcast %cst_244 : f32 to vector<8x64xf32>
    %432 = arith.mulf %431, %430 : vector<8x64xf32>
    %433 = arith.addf %428, %432 : vector<8x64xf32>
    %cst_245 = arith.constant 0.797884583 : f32
    %434 = vector.broadcast %cst_245 : f32 to vector<8x64xf32>
    %435 = arith.mulf %434, %433 : vector<8x64xf32>
    %436 = math.tanh %435 : vector<8x64xf32>
    %cst_246 = arith.constant 1.000000e+00 : f32
    %437 = vector.broadcast %cst_246 : f32 to vector<8x64xf32>
    %438 = arith.addf %437, %436 : vector<8x64xf32>
    %cst_247 = arith.constant 5.000000e-01 : f32
    %439 = vector.broadcast %cst_247 : f32 to vector<8x64xf32>
    %440 = arith.mulf %439, %438 : vector<8x64xf32>
    %441 = arith.mulf %428, %440 : vector<8x64xf32>
    %c0_248 = arith.constant 0 : index
    %c0_249 = arith.constant 0 : index
    %c0_250 = arith.constant 0 : index
    %442 = vector.load %arg36[%c0_248, %c0_249, %c0_250] : memref<2x64x32xbf16, #tpu.memory_space<vmem>>, vector<1x64x32xbf16>
    %443 = vector.shape_cast %442 : vector<1x64x32xbf16> to vector<64x32xbf16>
    %c0_251 = arith.constant 0 : index
    %c0_252 = arith.constant 0 : index
    %c0_253 = arith.constant 0 : index
    %444 = vector.load %arg37[%c0_251, %c0_252, %c0_253] : memref<2x1x32xf32, #tpu.memory_space<vmem>>, vector<1x1x32xf32>
    %445 = vector.shape_cast %444 : vector<1x1x32xf32> to vector<1x32xf32>
    %446 = arith.truncf %441 : vector<8x64xf32> to vector<8x64xbf16>
    %cst_254 = arith.constant dense<0.000000e+00> : vector<8x32xf32>
    %447 = tpu.matmul %446, %443, %cst_254 {dimension_numbers = #tpu.dot_dimension_numbers<[1], [0], [0], [1], [0, 0, 1, 1], [], []>} : vector<8x64xbf16>, vector<64x32xbf16>, vector<8x32xf32> -> vector<8x32xf32>
    %448 = vector.broadcast %445 : vector<1x32xf32> to vector<8x32xf32>
    %449 = arith.addf %447, %448 : vector<8x32xf32>
    %450 = arith.addf %420, %449 : vector<8x32xf32>
    %c0_255 = arith.constant 0 : index
    %c0_256 = arith.constant 0 : index
    %c0_257 = arith.constant 0 : index
    %451 = vector.load %arg38[%c0_255, %c0_256, %c0_257] : memref<2x1x32xf32, #tpu.memory_space<vmem>>, vector<1x1x32xf32>
    %452 = vector.shape_cast %451 : vector<1x1x32xf32> to vector<1x32xf32>
    %c0_258 = arith.constant 0 : index
    %c0_259 = arith.constant 0 : index
    %c0_260 = arith.constant 0 : index
    %453 = vector.load %arg39[%c0_258, %c0_259, %c0_260] : memref<2x1x32xf32, #tpu.memory_space<vmem>>, vector<1x1x32xf32>
    %454 = vector.shape_cast %453 : vector<1x1x32xf32> to vector<1x32xf32>
    %cst_261 = arith.constant dense<0.000000e+00> : vector<8xf32>
    %455 = vector.multi_reduction <add>, %450, %cst_261 [1] : vector<8x32xf32> to vector<8xf32>
    %456 = vector.shape_cast %455 : vector<8xf32> to vector<8x1xf32>
    %cst_262 = arith.constant 3.200000e+01 : f32
    %457 = vector.broadcast %cst_262 : f32 to vector<8x1xf32>
    %458 = arith.divf %456, %457 : vector<8x1xf32>
    %459 = vector.broadcast %458 : vector<8x1xf32> to vector<8x32xf32>
    %460 = arith.subf %450, %459 : vector<8x32xf32>
    %461 = arith.mulf %460, %460 : vector<8x32xf32>
    %cst_263 = arith.constant dense<0.000000e+00> : vector<8xf32>
    %462 = vector.multi_reduction <add>, %461, %cst_263 [1] : vector<8x32xf32> to vector<8xf32>
    %463 = vector.shape_cast %462 : vector<8xf32> to vector<8x1xf32>
    %cst_264 = arith.constant 3.200000e+01 : f32
    %464 = vector.broadcast %cst_264 : f32 to vector<8x1xf32>
    %465 = arith.divf %463, %464 : vector<8x1xf32>
    %cst_265 = arith.constant 9.99999996E-13 : f32
    %466 = vector.broadcast %cst_265 : f32 to vector<8x1xf32>
    %467 = arith.addf %465, %466 : vector<8x1xf32>
    %468 = math.rsqrt %467 : vector<8x1xf32>
    %469 = vector.broadcast %468 : vector<8x1xf32> to vector<8x32xf32>
    %470 = arith.mulf %460, %469 : vector<8x32xf32>
    %471 = vector.broadcast %452 : vector<1x32xf32> to vector<8x32xf32>
    %472 = arith.mulf %470, %471 : vector<8x32xf32>
    %473 = vector.broadcast %454 : vector<1x32xf32> to vector<8x32xf32>
    %474 = arith.addf %472, %473 : vector<8x32xf32>
    %475 = arith.truncf %474 : vector<8x32xf32> to vector<8x32xbf16>
    %476 = vector.shape_cast %475 : vector<8x32xbf16> to vector<1x8x32xbf16>
    %477 = vector.shape_cast %476 : vector<1x8x32xbf16> to vector<1x8x32xbf16>
    %478 = vector.broadcast %477 : vector<1x8x32xbf16> to vector<4x8x32xbf16>
    %c1_266 = arith.constant 1 : index
    %c0_267 = arith.constant 0 : index
    %c0_268 = arith.constant 0 : index
    %c0_269 = arith.constant 0 : index
    %479 = vector.load %arg20[%c1_266, %c0_267, %c0_268, %c0_269] : memref<2x4x32x8xbf16, #tpu.memory_space<vmem>>, vector<1x4x32x8xbf16>
    %480 = vector.shape_cast %479 : vector<1x4x32x8xbf16> to vector<4x32x8xbf16>
    %c1_270 = arith.constant 1 : index
    %c0_271 = arith.constant 0 : index
    %c0_272 = arith.constant 0 : index
    %c0_273 = arith.constant 0 : index
    %481 = vector.load %arg21[%c1_270, %c0_271, %c0_272, %c0_273] : memref<2x4x32x8xbf16, #tpu.memory_space<vmem>>, vector<1x4x32x8xbf16>
    %482 = vector.shape_cast %481 : vector<1x4x32x8xbf16> to vector<4x32x8xbf16>
    %c1_274 = arith.constant 1 : index
    %c0_275 = arith.constant 0 : index
    %c0_276 = arith.constant 0 : index
    %c0_277 = arith.constant 0 : index
    %483 = vector.load %arg22[%c1_274, %c0_275, %c0_276, %c0_277] : memref<2x4x32x8xbf16, #tpu.memory_space<vmem>>, vector<1x4x32x8xbf16>
    %484 = vector.shape_cast %483 : vector<1x4x32x8xbf16> to vector<4x32x8xbf16>
    %c1_278 = arith.constant 1 : index
    %c0_279 = arith.constant 0 : index
    %c0_280 = arith.constant 0 : index
    %c0_281 = arith.constant 0 : index
    %485 = vector.load %arg23[%c1_278, %c0_279, %c0_280, %c0_281] : memref<2x4x8x32xbf16, #tpu.memory_space<vmem>>, vector<1x4x8x32xbf16>
    %486 = vector.shape_cast %485 : vector<1x4x8x32xbf16> to vector<4x8x32xbf16>
    %c1_282 = arith.constant 1 : index
    %c0_283 = arith.constant 0 : index
    %c0_284 = arith.constant 0 : index
    %487 = vector.load %arg24[%c1_282, %c0_283, %c0_284] : memref<2x1x32xf32, #tpu.memory_space<vmem>>, vector<1x1x32xf32>
    %488 = vector.shape_cast %487 : vector<1x1x32xf32> to vector<1x32xf32>
    %cst_285 = arith.constant dense<0.000000e+00> : vector<4x8x8xf32>
    %489 = tpu.matmul %478, %480, %cst_285 {dimension_numbers = #tpu.dot_dimension_numbers<[2], [1], [1], [2], [0, 0, 0, 1, 1, 2], [0], [0]>} : vector<4x8x32xbf16>, vector<4x32x8xbf16>, vector<4x8x8xf32> -> vector<4x8x8xf32>
    %490 = arith.truncf %489 : vector<4x8x8xf32> to vector<4x8x8xbf16>
    %cst_286 = arith.constant dense<0.000000e+00> : vector<4x8x8xf32>
    %491 = tpu.matmul %478, %482, %cst_286 {dimension_numbers = #tpu.dot_dimension_numbers<[2], [1], [1], [2], [0, 0, 0, 1, 1, 2], [0], [0]>} : vector<4x8x32xbf16>, vector<4x32x8xbf16>, vector<4x8x8xf32> -> vector<4x8x8xf32>
    %492 = arith.truncf %491 : vector<4x8x8xf32> to vector<4x8x8xbf16>
    %cst_287 = arith.constant dense<0.000000e+00> : vector<4x8x8xf32>
    %493 = tpu.matmul %478, %484, %cst_287 {dimension_numbers = #tpu.dot_dimension_numbers<[2], [1], [1], [2], [0, 0, 0, 1, 1, 2], [0], [0]>} : vector<4x8x32xbf16>, vector<4x32x8xbf16>, vector<4x8x8xf32> -> vector<4x8x8xf32>
    %494 = arith.truncf %493 : vector<4x8x8xf32> to vector<4x8x8xbf16>
    %cst_288 = arith.constant dense<0.000000e+00> : vector<4x8x8xf32>
    %495 = tpu.matmul %490, %492, %cst_288 {dimension_numbers = #tpu.dot_dimension_numbers<[2], [2], [1], [1], [0, 0, 0, 1, 1, 1], [0], [0]>} : vector<4x8x8xbf16>, vector<4x8x8xbf16>, vector<4x8x8xf32> -> vector<4x8x8xf32>
    %496 = vector.shape_cast %291 : vector<8x8xf32> to vector<1x8x8xf32>
    %497 = vector.broadcast %496 : vector<1x8x8xf32> to vector<4x8x8xf32>
    %498 = arith.addf %495, %497 : vector<4x8x8xf32>
    %cst_289 = arith.constant dense<0xFF800000> : vector<4x8xf32>
    %499 = vector.multi_reduction <maximumf>, %498, %cst_289 [2] : vector<4x8x8xf32> to vector<4x8xf32>
    %500 = vector.shape_cast %499 : vector<4x8xf32> to vector<4x8x1xf32>
    %501 = vector.broadcast %500 : vector<4x8x1xf32> to vector<4x8x8xf32>
    %502 = arith.subf %498, %501 : vector<4x8x8xf32>
    %503 = math.exp %502 : vector<4x8x8xf32>
    %cst_290 = arith.constant dense<0.000000e+00> : vector<4x8xf32>
    %504 = vector.multi_reduction <add>, %503, %cst_290 [2] : vector<4x8x8xf32> to vector<4x8xf32>
    %505 = vector.shape_cast %504 : vector<4x8xf32> to vector<4x8x1xf32>
    %506 = tpu.reciprocal %505 {approx = true} : vector<4x8x1xf32> -> vector<4x8x1xf32>
    %507 = vector.broadcast %506 : vector<4x8x1xf32> to vector<4x8x8xf32>
    %508 = arith.mulf %503, %507 : vector<4x8x8xf32>
    %509 = arith.truncf %508 : vector<4x8x8xf32> to vector<4x8x8xbf16>
    %cst_291 = arith.constant dense<0.000000e+00> : vector<4x8x8xf32>
    %510 = tpu.matmul %509, %494, %cst_291 {dimension_numbers = #tpu.dot_dimension_numbers<[2], [1], [1], [2], [0, 0, 0, 1, 1, 2], [0], [0]>} : vector<4x8x8xbf16>, vector<4x8x8xbf16>, vector<4x8x8xf32> -> vector<4x8x8xf32>
    %511 = arith.truncf %510 : vector<4x8x8xf32> to vector<4x8x8xbf16>
    %cst_292 = arith.constant dense<0.000000e+00> : vector<4x8x32xf32>
    %512 = tpu.matmul %511, %486, %cst_292 {dimension_numbers = #tpu.dot_dimension_numbers<[2], [1], [1], [2], [0, 0, 0, 1, 1, 2], [0], [0]>} : vector<4x8x8xbf16>, vector<4x8x32xbf16>, vector<4x8x32xf32> -> vector<4x8x32xf32>
    %cst_293 = arith.constant dense<0.000000e+00> : vector<8x32xf32>
    %513 = vector.multi_reduction <add>, %512, %cst_293 [0] : vector<4x8x32xf32> to vector<8x32xf32>
    %514 = vector.broadcast %488 : vector<1x32xf32> to vector<8x32xf32>
    %515 = arith.addf %513, %514 : vector<8x32xf32>
    %516 = arith.addf %474, %515 : vector<8x32xf32>
    %c1_294 = arith.constant 1 : index
    %c0_295 = arith.constant 0 : index
    %c0_296 = arith.constant 0 : index
    %517 = vector.load %arg25[%c1_294, %c0_295, %c0_296] : memref<2x1x32xf32, #tpu.memory_space<vmem>>, vector<1x1x32xf32>
    %518 = vector.shape_cast %517 : vector<1x1x32xf32> to vector<1x32xf32>
    %c1_297 = arith.constant 1 : index
    %c0_298 = arith.constant 0 : index
    %c0_299 = arith.constant 0 : index
    %519 = vector.load %arg26[%c1_297, %c0_298, %c0_299] : memref<2x1x32xf32, #tpu.memory_space<vmem>>, vector<1x1x32xf32>
    %520 = vector.shape_cast %519 : vector<1x1x32xf32> to vector<1x32xf32>
    %cst_300 = arith.constant dense<0.000000e+00> : vector<8xf32>
    %521 = vector.multi_reduction <add>, %516, %cst_300 [1] : vector<8x32xf32> to vector<8xf32>
    %522 = vector.shape_cast %521 : vector<8xf32> to vector<8x1xf32>
    %cst_301 = arith.constant 3.200000e+01 : f32
    %523 = vector.broadcast %cst_301 : f32 to vector<8x1xf32>
    %524 = arith.divf %522, %523 : vector<8x1xf32>
    %525 = vector.broadcast %524 : vector<8x1xf32> to vector<8x32xf32>
    %526 = arith.subf %516, %525 : vector<8x32xf32>
    %527 = arith.mulf %526, %526 : vector<8x32xf32>
    %cst_302 = arith.constant dense<0.000000e+00> : vector<8xf32>
    %528 = vector.multi_reduction <add>, %527, %cst_302 [1] : vector<8x32xf32> to vector<8xf32>
    %529 = vector.shape_cast %528 : vector<8xf32> to vector<8x1xf32>
    %cst_303 = arith.constant 3.200000e+01 : f32
    %530 = vector.broadcast %cst_303 : f32 to vector<8x1xf32>
    %531 = arith.divf %529, %530 : vector<8x1xf32>
    %cst_304 = arith.constant 9.99999996E-13 : f32
    %532 = vector.broadcast %cst_304 : f32 to vector<8x1xf32>
    %533 = arith.addf %531, %532 : vector<8x1xf32>
    %534 = math.rsqrt %533 : vector<8x1xf32>
    %535 = vector.broadcast %534 : vector<8x1xf32> to vector<8x32xf32>
    %536 = arith.mulf %526, %535 : vector<8x32xf32>
    %537 = vector.broadcast %518 : vector<1x32xf32> to vector<8x32xf32>
    %538 = arith.mulf %536, %537 : vector<8x32xf32>
    %539 = vector.broadcast %520 : vector<1x32xf32> to vector<8x32xf32>
    %540 = arith.addf %538, %539 : vector<8x32xf32>
    %541 = arith.truncf %540 : vector<8x32xf32> to vector<8x32xbf16>
    %542 = vector.shape_cast %541 : vector<8x32xbf16> to vector<1x8x32xbf16>
    %543 = vector.shape_cast %542 : vector<1x8x32xbf16> to vector<1x8x32xbf16>
    %544 = vector.broadcast %543 : vector<1x8x32xbf16> to vector<4x8x32xbf16>
    %c1_305 = arith.constant 1 : index
    %c0_306 = arith.constant 0 : index
    %c0_307 = arith.constant 0 : index
    %c0_308 = arith.constant 0 : index
    %545 = vector.load %arg27[%c1_305, %c0_306, %c0_307, %c0_308] : memref<2x4x32x8xbf16, #tpu.memory_space<vmem>>, vector<1x4x32x8xbf16>
    %546 = vector.shape_cast %545 : vector<1x4x32x8xbf16> to vector<4x32x8xbf16>
    %c1_309 = arith.constant 1 : index
    %c0_310 = arith.constant 0 : index
    %c0_311 = arith.constant 0 : index
    %c0_312 = arith.constant 0 : index
    %547 = vector.load %arg28[%c1_309, %c0_310, %c0_311, %c0_312] : memref<2x4x32x8xbf16, #tpu.memory_space<vmem>>, vector<1x4x32x8xbf16>
    %548 = vector.shape_cast %547 : vector<1x4x32x8xbf16> to vector<4x32x8xbf16>
    %c1_313 = arith.constant 1 : index
    %c0_314 = arith.constant 0 : index
    %c0_315 = arith.constant 0 : index
    %c0_316 = arith.constant 0 : index
    %549 = vector.load %arg29[%c1_313, %c0_314, %c0_315, %c0_316] : memref<2x4x32x8xbf16, #tpu.memory_space<vmem>>, vector<1x4x32x8xbf16>
    %550 = vector.shape_cast %549 : vector<1x4x32x8xbf16> to vector<4x32x8xbf16>
    %c1_317 = arith.constant 1 : index
    %c0_318 = arith.constant 0 : index
    %c0_319 = arith.constant 0 : index
    %c0_320 = arith.constant 0 : index
    %551 = vector.load %arg30[%c1_317, %c0_318, %c0_319, %c0_320] : memref<2x4x8x32xbf16, #tpu.memory_space<vmem>>, vector<1x4x8x32xbf16>
    %552 = vector.shape_cast %551 : vector<1x4x8x32xbf16> to vector<4x8x32xbf16>
    %c1_321 = arith.constant 1 : index
    %c0_322 = arith.constant 0 : index
    %c0_323 = arith.constant 0 : index
    %553 = vector.load %arg31[%c1_321, %c0_322, %c0_323] : memref<2x1x32xf32, #tpu.memory_space<vmem>>, vector<1x1x32xf32>
    %554 = vector.shape_cast %553 : vector<1x1x32xf32> to vector<1x32xf32>
    %cst_324 = arith.constant dense<0.000000e+00> : vector<4x8x8xf32>
    %555 = tpu.matmul %544, %546, %cst_324 {dimension_numbers = #tpu.dot_dimension_numbers<[2], [1], [1], [2], [0, 0, 0, 1, 1, 2], [0], [0]>} : vector<4x8x32xbf16>, vector<4x32x8xbf16>, vector<4x8x8xf32> -> vector<4x8x8xf32>
    %556 = arith.truncf %555 : vector<4x8x8xf32> to vector<4x8x8xbf16>
    %cst_325 = arith.constant dense<0.000000e+00> : vector<4x8x8xf32>
    %557 = tpu.matmul %261, %548, %cst_325 {dimension_numbers = #tpu.dot_dimension_numbers<[2], [1], [1], [2], [0, 0, 0, 1, 1, 2], [0], [0]>} : vector<4x8x32xbf16>, vector<4x32x8xbf16>, vector<4x8x8xf32> -> vector<4x8x8xf32>
    %558 = arith.truncf %557 : vector<4x8x8xf32> to vector<4x8x8xbf16>
    %cst_326 = arith.constant dense<0.000000e+00> : vector<4x8x8xf32>
    %559 = tpu.matmul %261, %550, %cst_326 {dimension_numbers = #tpu.dot_dimension_numbers<[2], [1], [1], [2], [0, 0, 0, 1, 1, 2], [0], [0]>} : vector<4x8x32xbf16>, vector<4x32x8xbf16>, vector<4x8x8xf32> -> vector<4x8x8xf32>
    %560 = arith.truncf %559 : vector<4x8x8xf32> to vector<4x8x8xbf16>
    %cst_327 = arith.constant dense<0.000000e+00> : vector<4x8x8xf32>
    %561 = tpu.matmul %556, %558, %cst_327 {dimension_numbers = #tpu.dot_dimension_numbers<[2], [2], [1], [1], [0, 0, 0, 1, 1, 1], [0], [0]>} : vector<4x8x8xbf16>, vector<4x8x8xbf16>, vector<4x8x8xf32> -> vector<4x8x8xf32>
    %cst_328 = arith.constant dense<0xFF800000> : vector<4x8xf32>
    %562 = vector.multi_reduction <maximumf>, %561, %cst_328 [2] : vector<4x8x8xf32> to vector<4x8xf32>
    %563 = vector.shape_cast %562 : vector<4x8xf32> to vector<4x8x1xf32>
    %564 = vector.broadcast %563 : vector<4x8x1xf32> to vector<4x8x8xf32>
    %565 = arith.subf %561, %564 : vector<4x8x8xf32>
    %566 = math.exp %565 : vector<4x8x8xf32>
    %cst_329 = arith.constant dense<0.000000e+00> : vector<4x8xf32>
    %567 = vector.multi_reduction <add>, %566, %cst_329 [2] : vector<4x8x8xf32> to vector<4x8xf32>
    %568 = vector.shape_cast %567 : vector<4x8xf32> to vector<4x8x1xf32>
    %569 = tpu.reciprocal %568 {approx = true} : vector<4x8x1xf32> -> vector<4x8x1xf32>
    %570 = vector.broadcast %569 : vector<4x8x1xf32> to vector<4x8x8xf32>
    %571 = arith.mulf %566, %570 : vector<4x8x8xf32>
    %572 = arith.truncf %571 : vector<4x8x8xf32> to vector<4x8x8xbf16>
    %cst_330 = arith.constant dense<0.000000e+00> : vector<4x8x8xf32>
    %573 = tpu.matmul %572, %560, %cst_330 {dimension_numbers = #tpu.dot_dimension_numbers<[2], [1], [1], [2], [0, 0, 0, 1, 1, 2], [0], [0]>} : vector<4x8x8xbf16>, vector<4x8x8xbf16>, vector<4x8x8xf32> -> vector<4x8x8xf32>
    %574 = arith.truncf %573 : vector<4x8x8xf32> to vector<4x8x8xbf16>
    %cst_331 = arith.constant dense<0.000000e+00> : vector<4x8x32xf32>
    %575 = tpu.matmul %574, %552, %cst_331 {dimension_numbers = #tpu.dot_dimension_numbers<[2], [1], [1], [2], [0, 0, 0, 1, 1, 2], [0], [0]>} : vector<4x8x8xbf16>, vector<4x8x32xbf16>, vector<4x8x32xf32> -> vector<4x8x32xf32>
    %cst_332 = arith.constant dense<0.000000e+00> : vector<8x32xf32>
    %576 = vector.multi_reduction <add>, %575, %cst_332 [0] : vector<4x8x32xf32> to vector<8x32xf32>
    %577 = vector.broadcast %554 : vector<1x32xf32> to vector<8x32xf32>
    %578 = arith.addf %576, %577 : vector<8x32xf32>
    %579 = arith.addf %540, %578 : vector<8x32xf32>
    %c1_333 = arith.constant 1 : index
    %c0_334 = arith.constant 0 : index
    %c0_335 = arith.constant 0 : index
    %580 = vector.load %arg32[%c1_333, %c0_334, %c0_335] : memref<2x1x32xf32, #tpu.memory_space<vmem>>, vector<1x1x32xf32>
    %581 = vector.shape_cast %580 : vector<1x1x32xf32> to vector<1x32xf32>
    %c1_336 = arith.constant 1 : index
    %c0_337 = arith.constant 0 : index
    %c0_338 = arith.constant 0 : index
    %582 = vector.load %arg33[%c1_336, %c0_337, %c0_338] : memref<2x1x32xf32, #tpu.memory_space<vmem>>, vector<1x1x32xf32>
    %583 = vector.shape_cast %582 : vector<1x1x32xf32> to vector<1x32xf32>
    %cst_339 = arith.constant dense<0.000000e+00> : vector<8xf32>
    %584 = vector.multi_reduction <add>, %579, %cst_339 [1] : vector<8x32xf32> to vector<8xf32>
    %585 = vector.shape_cast %584 : vector<8xf32> to vector<8x1xf32>
    %cst_340 = arith.constant 3.200000e+01 : f32
    %586 = vector.broadcast %cst_340 : f32 to vector<8x1xf32>
    %587 = arith.divf %585, %586 : vector<8x1xf32>
    %588 = vector.broadcast %587 : vector<8x1xf32> to vector<8x32xf32>
    %589 = arith.subf %579, %588 : vector<8x32xf32>
    %590 = arith.mulf %589, %589 : vector<8x32xf32>
    %cst_341 = arith.constant dense<0.000000e+00> : vector<8xf32>
    %591 = vector.multi_reduction <add>, %590, %cst_341 [1] : vector<8x32xf32> to vector<8xf32>
    %592 = vector.shape_cast %591 : vector<8xf32> to vector<8x1xf32>
    %cst_342 = arith.constant 3.200000e+01 : f32
    %593 = vector.broadcast %cst_342 : f32 to vector<8x1xf32>
    %594 = arith.divf %592, %593 : vector<8x1xf32>
    %cst_343 = arith.constant 9.99999996E-13 : f32
    %595 = vector.broadcast %cst_343 : f32 to vector<8x1xf32>
    %596 = arith.addf %594, %595 : vector<8x1xf32>
    %597 = math.rsqrt %596 : vector<8x1xf32>
    %598 = vector.broadcast %597 : vector<8x1xf32> to vector<8x32xf32>
    %599 = arith.mulf %589, %598 : vector<8x32xf32>
    %600 = vector.broadcast %581 : vector<1x32xf32> to vector<8x32xf32>
    %601 = arith.mulf %599, %600 : vector<8x32xf32>
    %602 = vector.broadcast %583 : vector<1x32xf32> to vector<8x32xf32>
    %603 = arith.addf %601, %602 : vector<8x32xf32>
    %c1_344 = arith.constant 1 : index
    %c0_345 = arith.constant 0 : index
    %c0_346 = arith.constant 0 : index
    %604 = vector.load %arg34[%c1_344, %c0_345, %c0_346] : memref<2x32x64xbf16, #tpu.memory_space<vmem>>, vector<1x32x64xbf16>
    %605 = vector.shape_cast %604 : vector<1x32x64xbf16> to vector<32x64xbf16>
    %c1_347 = arith.constant 1 : index
    %c0_348 = arith.constant 0 : index
    %c0_349 = arith.constant 0 : index
    %606 = vector.load %arg35[%c1_347, %c0_348, %c0_349] : memref<2x1x64xf32, #tpu.memory_space<vmem>>, vector<1x1x64xf32>
    %607 = vector.shape_cast %606 : vector<1x1x64xf32> to vector<1x64xf32>
    %608 = arith.truncf %603 : vector<8x32xf32> to vector<8x32xbf16>
    %cst_350 = arith.constant dense<0.000000e+00> : vector<8x64xf32>
    %609 = tpu.matmul %608, %605, %cst_350 {dimension_numbers = #tpu.dot_dimension_numbers<[1], [0], [0], [1], [0, 0, 1, 1], [], []>} : vector<8x32xbf16>, vector<32x64xbf16>, vector<8x64xf32> -> vector<8x64xf32>
    %610 = vector.broadcast %607 : vector<1x64xf32> to vector<8x64xf32>
    %611 = arith.addf %609, %610 : vector<8x64xf32>
    %612 = arith.mulf %611, %611 : vector<8x64xf32>
    %613 = arith.mulf %611, %612 : vector<8x64xf32>
    %cst_351 = arith.constant 4.471500e-02 : f32
    %614 = vector.broadcast %cst_351 : f32 to vector<8x64xf32>
    %615 = arith.mulf %614, %613 : vector<8x64xf32>
    %616 = arith.addf %611, %615 : vector<8x64xf32>
    %cst_352 = arith.constant 0.797884583 : f32
    %617 = vector.broadcast %cst_352 : f32 to vector<8x64xf32>
    %618 = arith.mulf %617, %616 : vector<8x64xf32>
    %619 = math.tanh %618 : vector<8x64xf32>
    %cst_353 = arith.constant 1.000000e+00 : f32
    %620 = vector.broadcast %cst_353 : f32 to vector<8x64xf32>
    %621 = arith.addf %620, %619 : vector<8x64xf32>
    %cst_354 = arith.constant 5.000000e-01 : f32
    %622 = vector.broadcast %cst_354 : f32 to vector<8x64xf32>
    %623 = arith.mulf %622, %621 : vector<8x64xf32>
    %624 = arith.mulf %611, %623 : vector<8x64xf32>
    %c1_355 = arith.constant 1 : index
    %c0_356 = arith.constant 0 : index
    %c0_357 = arith.constant 0 : index
    %625 = vector.load %arg36[%c1_355, %c0_356, %c0_357] : memref<2x64x32xbf16, #tpu.memory_space<vmem>>, vector<1x64x32xbf16>
    %626 = vector.shape_cast %625 : vector<1x64x32xbf16> to vector<64x32xbf16>
    %c1_358 = arith.constant 1 : index
    %c0_359 = arith.constant 0 : index
    %c0_360 = arith.constant 0 : index
    %627 = vector.load %arg37[%c1_358, %c0_359, %c0_360] : memref<2x1x32xf32, #tpu.memory_space<vmem>>, vector<1x1x32xf32>
    %628 = vector.shape_cast %627 : vector<1x1x32xf32> to vector<1x32xf32>
    %629 = arith.truncf %624 : vector<8x64xf32> to vector<8x64xbf16>
    %cst_361 = arith.constant dense<0.000000e+00> : vector<8x32xf32>
    %630 = tpu.matmul %629, %626, %cst_361 {dimension_numbers = #tpu.dot_dimension_numbers<[1], [0], [0], [1], [0, 0, 1, 1], [], []>} : vector<8x64xbf16>, vector<64x32xbf16>, vector<8x32xf32> -> vector<8x32xf32>
    %631 = vector.broadcast %628 : vector<1x32xf32> to vector<8x32xf32>
    %632 = arith.addf %630, %631 : vector<8x32xf32>
    %633 = arith.addf %603, %632 : vector<8x32xf32>
    %c1_362 = arith.constant 1 : index
    %c0_363 = arith.constant 0 : index
    %c0_364 = arith.constant 0 : index
    %634 = vector.load %arg38[%c1_362, %c0_363, %c0_364] : memref<2x1x32xf32, #tpu.memory_space<vmem>>, vector<1x1x32xf32>
    %635 = vector.shape_cast %634 : vector<1x1x32xf32> to vector<1x32xf32>
    %c1_365 = arith.constant 1 : index
    %c0_366 = arith.constant 0 : index
    %c0_367 = arith.constant 0 : index
    %636 = vector.load %arg39[%c1_365, %c0_366, %c0_367] : memref<2x1x32xf32, #tpu.memory_space<vmem>>, vector<1x1x32xf32>
    %637 = vector.shape_cast %636 : vector<1x1x32xf32> to vector<1x32xf32>
    %cst_368 = arith.constant dense<0.000000e+00> : vector<8xf32>
    %638 = vector.multi_reduction <add>, %633, %cst_368 [1] : vector<8x32xf32> to vector<8xf32>
    %639 = vector.shape_cast %638 : vector<8xf32> to vector<8x1xf32>
    %cst_369 = arith.constant 3.200000e+01 : f32
    %640 = vector.broadcast %cst_369 : f32 to vector<8x1xf32>
    %641 = arith.divf %639, %640 : vector<8x1xf32>
    %642 = vector.broadcast %641 : vector<8x1xf32> to vector<8x32xf32>
    %643 = arith.subf %633, %642 : vector<8x32xf32>
    %644 = arith.mulf %643, %643 : vector<8x32xf32>
    %cst_370 = arith.constant dense<0.000000e+00> : vector<8xf32>
    %645 = vector.multi_reduction <add>, %644, %cst_370 [1] : vector<8x32xf32> to vector<8xf32>
    %646 = vector.shape_cast %645 : vector<8xf32> to vector<8x1xf32>
    %cst_371 = arith.constant 3.200000e+01 : f32
    %647 = vector.broadcast %cst_371 : f32 to vector<8x1xf32>
    %648 = arith.divf %646, %647 : vector<8x1xf32>
    %cst_372 = arith.constant 9.99999996E-13 : f32
    %649 = vector.broadcast %cst_372 : f32 to vector<8x1xf32>
    %650 = arith.addf %648, %649 : vector<8x1xf32>
    %651 = math.rsqrt %650 : vector<8x1xf32>
    %652 = vector.broadcast %651 : vector<8x1xf32> to vector<8x32xf32>
    %653 = arith.mulf %643, %652 : vector<8x32xf32>
    %654 = vector.broadcast %635 : vector<1x32xf32> to vector<8x32xf32>
    %655 = arith.mulf %653, %654 : vector<8x32xf32>
    %656 = vector.broadcast %637 : vector<1x32xf32> to vector<8x32xf32>
    %657 = arith.addf %655, %656 : vector<8x32xf32>
    %c0_373 = arith.constant 0 : index
    %c0_374 = arith.constant 0 : index
    %658 = vector.load %arg40[%c0_373, %c0_374] : memref<32x128xbf16, #tpu.memory_space<vmem>>, vector<32x128xbf16>
    %c0_375 = arith.constant 0 : index
    %c0_376 = arith.constant 0 : index
    %659 = vector.load %arg41[%c0_375, %c0_376] : memref<1x128xf32, #tpu.memory_space<vmem>>, vector<1x128xf32>
    %660 = arith.truncf %657 : vector<8x32xf32> to vector<8x32xbf16>
    %cst_377 = arith.constant dense<0.000000e+00> : vector<8x128xf32>
    %661 = tpu.matmul %660, %658, %cst_377 {dimension_numbers = #tpu.dot_dimension_numbers<[1], [0], [0], [1], [0, 0, 1, 1], [], []>} : vector<8x32xbf16>, vector<32x128xbf16>, vector<8x128xf32> -> vector<8x128xf32>
    %662 = vector.broadcast %659 : vector<1x128xf32> to vector<8x128xf32>
    %663 = arith.addf %661, %662 : vector<8x128xf32>
    %c0_378 = arith.constant 0 : index
    %c0_379 = arith.constant 0 : index
    %c0_380 = arith.constant 0 : index
    %664 = vector.load %arg42[%c0_378, %c0_379, %c0_380] : memref<1x8x128xf32, #tpu.memory_space<vmem>>, vector<1x8x128xf32>
    %665 = vector.shape_cast %664 : vector<1x8x128xf32> to vector<8x128xf32>
    %666 = vector.shape_cast %663 : vector<8x128xf32> to vector<1x8x128xf32>
    tpu.vector_store %arg42[%c0_378, %c0_379, %c0_380], %666 {strides = array<i32>} : memref<1x8x128xf32, #tpu.memory_space<vmem>>, vector<1x8x128xf32>,
    return
  }
  func.func @transform_0(%arg0: i32) -> (i32, i32, i32) {
    %c0_i32 = arith.constant 0 : i32
    %c0_i32_0 = arith.constant 0 : i32
    %c0_i32_1 = arith.constant 0 : i32
    return %arg0, %c0_i32, %c0_i32_0 : i32, i32, i32
  }
  func.func @transform_1(%arg0: i32) -> (i32, i32, i32) {
    %c0_i32 = arith.constant 0 : i32
    %c0_i32_0 = arith.constant 0 : i32
    %c0_i32_1 = arith.constant 0 : i32
    return %arg0, %c0_i32, %c0_i32_0 : i32, i32, i32
  }
  func.func @transform_2(%arg0: i32) -> (i32, i32) {
    %c0_i32 = arith.constant 0 : i32
    %c0_i32_0 = arith.constant 0 : i32
    %c0_i32_1 = arith.constant 0 : i32
    return %c0_i32, %c0_i32_0 : i32, i32
  }
  func.func @transform_3(%arg0: i32) -> (i32, i32) {
    %c0_i32 = arith.constant 0 : i32
    %c0_i32_0 = arith.constant 0 : i32
    %c0_i32_1 = arith.constant 0 : i32
    return %c0_i32, %c0_i32_0 : i32, i32
  }
  func.func @transform_4(%arg0: i32) -> (i32, i32, i32, i32) {
    %c0_i32 = arith.constant 0 : i32
    %c0_i32_0 = arith.constant 0 : i32
    %c0_i32_1 = arith.constant 0 : i32
    %c0_i32_2 = arith.constant 0 : i32
    %c0_i32_3 = arith.constant 0 : i32
    return %c0_i32, %c0_i32_0, %c0_i32_1, %c0_i32_2 : i32, i32, i32, i32
  }
  func.func @transform_5(%arg0: i32) -> (i32, i32, i32, i32) {
    %c0_i32 = arith.constant 0 : i32
    %c0_i32_0 = arith.constant 0 : i32
    %c0_i32_1 = arith.constant 0 : i32
    %c0_i32_2 = arith.constant 0 : i32
    %c0_i32_3 = arith.constant 0 : i32
    return %c0_i32, %c0_i32_0, %c0_i32_1, %c0_i32_2 : i32, i32, i32, i32
  }
  func.func @transform_6(%arg0: i32) -> (i32, i32, i32, i32) {
    %c0_i32 = arith.constant 0 : i32
    %c0_i32_0 = arith.constant 0 : i32
    %c0_i32_1 = arith.constant 0 : i32
    %c0_i32_2 = arith.constant 0 : i32
    %c0_i32_3 = arith.constant 0 : i32
    return %c0_i32, %c0_i32_0, %c0_i32_1, %c0_i32_2 : i32, i32, i32, i32
  }
  func.func @transform_7(%arg0: i32) -> (i32, i32, i32, i32) {
    %c0_i32 = arith.constant 0 : i32
    %c0_i32_0 = arith.constant 0 : i32
    %c0_i32_1 = arith.constant 0 : i32
    %c0_i32_2 = arith.constant 0 : i32
    %c0_i32_3 = arith.constant 0 : i32
    return %c0_i32, %c0_i32_0, %c0_i32_1, %c0_i32_2 : i32, i32, i32, i32
  }
  func.func @transform_8(%arg0: i32) -> (i32, i32, i32) {
    %c0_i32 = arith.constant 0 : i32
    %c0_i32_0 = arith.constant 0 : i32
    %c0_i32_1 = arith.constant 0 : i32
    %c0_i32_2 = arith.constant 0 : i32
    return %c0_i32, %c0_i32_0, %c0_i32_1 : i32, i32, i32
  }
  func.func @transform_9(%arg0: i32) -> (i32, i32, i32) {
    %c0_i32 = arith.constant 0 : i32
    %c0_i32_0 = arith.constant 0 : i32
    %c0_i32_1 = arith.constant 0 : i32
    %c0_i32_2 = arith.constant 0 : i32
    return %c0_i32, %c0_i32_0, %c0_i32_1 : i32, i32, i32
  }
  func.func @transform_10(%arg0: i32) -> (i32, i32, i32) {
    %c0_i32 = arith.constant 0 : i32
    %c0_i32_0 = arith.constant 0 : i32
    %c0_i32_1 = arith.constant 0 : i32
    %c0_i32_2 = arith.constant 0 : i32
    return %c0_i32, %c0_i32_0, %c0_i32_1 : i32, i32, i32
  }
  func.func @transform_11(%arg0: i32) -> (i32, i32, i32) {
    %c0_i32 = arith.constant 0 : i32
    %c0_i32_0 = arith.constant 0 : i32
    %c0_i32_1 = arith.constant 0 : i32
    %c0_i32_2 = arith.constant 0 : i32
    return %c0_i32, %c0_i32_0, %c0_i32_1 : i32, i32, i32
  }
  func.func @transform_12(%arg0: i32) -> (i32, i32, i32) {
    %c0_i32 = arith.constant 0 : i32
    %c0_i32_0 = arith.constant 0 : i32
    %c0_i32_1 = arith.constant 0 : i32
    %c0_i32_2 = arith.constant 0 : i32
    return %c0_i32, %c0_i32_0, %c0_i32_1 : i32, i32, i32
  }
  func.func @transform_13(%arg0: i32) -> (i32, i32, i32) {
    %c0_i32 = arith.constant 0 : i32
    %c0_i32_0 = arith.constant 0 : i32
    %c0_i32_1 = arith.constant 0 : i32
    %c0_i32_2 = arith.constant 0 : i32
    return %c0_i32, %c0_i32_0, %c0_i32_1 : i32, i32, i32
  }
  func.func @transform_14(%arg0: i32) -> (i32, i32, i32) {
    %c0_i32 = arith.constant 0 : i32
    %c0_i32_0 = arith.constant 0 : i32
    %c0_i32_1 = arith.constant 0 : i32
    %c0_i32_2 = arith.constant 0 : i32
    return %c0_i32, %c0_i32_0, %c0_i32_1 : i32, i32, i32
  }
  func.func @transform_15(%arg0: i32) -> (i32, i32, i32) {
    %c0_i32 = arith.constant 0 : i32
    %c0_i32_0 = arith.constant 0 : i32
    %c0_i32_1 = arith.constant 0 : i32
    %c0_i32_2 = arith.constant 0 : i32
    return %c0_i32, %c0_i32_0, %c0_i32_1 : i32, i32, i32
  }
  func.func @transform_16(%arg0: i32) -> (i32, i32, i32) {
    %c0_i32 = arith.constant 0 : i32
    %c0_i32_0 = arith.constant 0 : i32
    %c0_i32_1 = arith.constant 0 : i32
    %c0_i32_2 = arith.constant 0 : i32
    return %c0_i32, %c0_i32_0, %c0_i32_1 : i32, i32, i32
  }
  func.func @transform_17(%arg0: i32) -> (i32, i32) {
    %c0_i32 = arith.constant 0 : i32
    %c0_i32_0 = arith.constant 0 : i32
    %c0_i32_1 = arith.constant 0 : i32
    return %c0_i32, %c0_i32_0 : i32, i32
  }
  func.func @transform_18(%arg0: i32) -> (i32, i32) {
    %c0_i32 = arith.constant 0 : i32
    %c0_i32_0 = arith.constant 0 : i32
    %c0_i32_1 = arith.constant 0 : i32
    return %c0_i32, %c0_i32_0 : i32, i32
  }
  func.func @transform_19(%arg0: i32) -> (i32, i32, i32, i32) {
    %c0_i32 = arith.constant 0 : i32
    %c0_i32_0 = arith.constant 0 : i32
    %c0_i32_1 = arith.constant 0 : i32
    %c0_i32_2 = arith.constant 0 : i32
    %c0_i32_3 = arith.constant 0 : i32
    return %c0_i32, %c0_i32_0, %c0_i32_1, %c0_i32_2 : i32, i32, i32, i32
  }
  func.func @transform_20(%arg0: i32) -> (i32, i32, i32, i32) {
    %c0_i32 = arith.constant 0 : i32
    %c0_i32_0 = arith.constant 0 : i32
    %c0_i32_1 = arith.constant 0 : i32
    %c0_i32_2 = arith.constant 0 : i32
    %c0_i32_3 = arith.constant 0 : i32
    return %c0_i32, %c0_i32_0, %c0_i32_1, %c0_i32_2 : i32, i32, i32, i32
  }
  func.func @transform_21(%arg0: i32) -> (i32, i32, i32, i32) {
    %c0_i32 = arith.constant 0 : i32
    %c0_i32_0 = arith.constant 0 : i32
    %c0_i32_1 = arith.constant 0 : i32
    %c0_i32_2 = arith.constant 0 : i32
    %c0_i32_3 = arith.constant 0 : i32
    return %c0_i32, %c0_i32_0, %c0_i32_1, %c0_i32_2 : i32, i32, i32, i32
  }
  func.func @transform_22(%arg0: i32) -> (i32, i32, i32, i32) {
    %c0_i32 = arith.constant 0 : i32
    %c0_i32_0 = arith.constant 0 : i32
    %c0_i32_1 = arith.constant 0 : i32
    %c0_i32_2 = arith.constant 0 : i32
    %c0_i32_3 = arith.constant 0 : i32
    return %c0_i32, %c0_i32_0, %c0_i32_1, %c0_i32_2 : i32, i32, i32, i32
  }
  func.func @transform_23(%arg0: i32) -> (i32, i32, i32) {
    %c0_i32 = arith.constant 0 : i32
    %c0_i32_0 = arith.constant 0 : i32
    %c0_i32_1 = arith.constant 0 : i32
    %c0_i32_2 = arith.constant 0 : i32
    return %c0_i32, %c0_i32_0, %c0_i32_1 : i32, i32, i32
  }
  func.func @transform_24(%arg0: i32) -> (i32, i32, i32) {
    %c0_i32 = arith.constant 0 : i32
    %c0_i32_0 = arith.constant 0 : i32
    %c0_i32_1 = arith.constant 0 : i32
    %c0_i32_2 = arith.constant 0 : i32
    return %c0_i32, %c0_i32_0, %c0_i32_1 : i32, i32, i32
  }
  func.func @transform_25(%arg0: i32) -> (i32, i32, i32) {
    %c0_i32 = arith.constant 0 : i32
    %c0_i32_0 = arith.constant 0 : i32
    %c0_i32_1 = arith.constant 0 : i32
    %c0_i32_2 = arith.constant 0 : i32
    return %c0_i32, %c0_i32_0, %c0_i32_1 : i32, i32, i32
  }
  func.func @transform_26(%arg0: i32) -> (i32, i32, i32, i32) {
    %c0_i32 = arith.constant 0 : i32
    %c0_i32_0 = arith.constant 0 : i32
    %c0_i32_1 = arith.constant 0 : i32
    %c0_i32_2 = arith.constant 0 : i32
    %c0_i32_3 = arith.constant 0 : i32
    return %c0_i32, %c0_i32_0, %c0_i32_1, %c0_i32_2 : i32, i32, i32, i32
  }
  func.func @transform_27(%arg0: i32) -> (i32, i32, i32, i32) {
    %c0_i32 = arith.constant 0 : i32
    %c0_i32_0 = arith.constant 0 : i32
    %c0_i32_1 = arith.constant 0 : i32
    %c0_i32_2 = arith.constant 0 : i32
    %c0_i32_3 = arith.constant 0 : i32
    return %c0_i32, %c0_i32_0, %c0_i32_1, %c0_i32_2 : i32, i32, i32, i32
  }
  func.func @transform_28(%arg0: i32) -> (i32, i32, i32, i32) {
    %c0_i32 = arith.constant 0 : i32
    %c0_i32_0 = arith.constant 0 : i32
    %c0_i32_1 = arith.constant 0 : i32
    %c0_i32_2 = arith.constant 0 : i32
    %c0_i32_3 = arith.constant 0 : i32
    return %c0_i32, %c0_i32_0, %c0_i32_1, %c0_i32_2 : i32, i32, i32, i32
  }
  func.func @transform_29(%arg0: i32) -> (i32, i32, i32, i32) {
    %c0_i32 = arith.constant 0 : i32
    %c0_i32_0 = arith.constant 0 : i32
    %c0_i32_1 = arith.constant 0 : i32
    %c0_i32_2 = arith.constant 0 : i32
    %c0_i32_3 = arith.constant 0 : i32
    return %c0_i32, %c0_i32_0, %c0_i32_1, %c0_i32_2 : i32, i32, i32, i32
  }
  func.func @transform_30(%arg0: i32) -> (i32, i32, i32) {
    %c0_i32 = arith.constant 0 : i32
    %c0_i32_0 = arith.constant 0 : i32
    %c0_i32_1 = arith.constant 0 : i32
    %c0_i32_2 = arith.constant 0 : i32
    return %c0_i32, %c0_i32_0, %c0_i32_1 : i32, i32, i32
  }
  func.func @transform_31(%arg0: i32) -> (i32, i32, i32) {
    %c0_i32 = arith.constant 0 : i32
    %c0_i32_0 = arith.constant 0 : i32
    %c0_i32_1 = arith.constant 0 : i32
    %c0_i32_2 = arith.constant 0 : i32
    return %c0_i32, %c0_i32_0, %c0_i32_1 : i32, i32, i32
  }
  func.func @transform_32(%arg0: i32) -> (i32, i32, i32) {
    %c0_i32 = arith.constant 0 : i32
    %c0_i32_0 = arith.constant 0 : i32
    %c0_i32_1 = arith.constant 0 : i32
    %c0_i32_2 = arith.constant 0 : i32
    return %c0_i32, %c0_i32_0, %c0_i32_1 : i32, i32, i32
  }
  func.func @transform_33(%arg0: i32) -> (i32, i32, i32) {
    %c0_i32 = arith.constant 0 : i32
    %c0_i32_0 = arith.constant 0 : i32
    %c0_i32_1 = arith.constant 0 : i32
    %c0_i32_2 = arith.constant 0 : i32
    return %c0_i32, %c0_i32_0, %c0_i32_1 : i32, i32, i32
  }
  func.func @transform_34(%arg0: i32) -> (i32, i32, i32) {
    %c0_i32 = arith.constant 0 : i32
    %c0_i32_0 = arith.constant 0 : i32
    %c0_i32_1 = arith.constant 0 : i32
    %c0_i32_2 = arith.constant 0 : i32
    return %c0_i32, %c0_i32_0, %c0_i32_1 : i32, i32, i32
  }
  func.func @transform_35(%arg0: i32) -> (i32, i32, i32) {
    %c0_i32 = arith.constant 0 : i32
    %c0_i32_0 = arith.constant 0 : i32
    %c0_i32_1 = arith.constant 0 : i32
    %c0_i32_2 = arith.constant 0 : i32
    return %c0_i32, %c0_i32_0, %c0_i32_1 : i32, i32, i32
  }
  func.func @transform_36(%arg0: i32) -> (i32, i32, i32) {
    %c0_i32 = arith.constant 0 : i32
    %c0_i32_0 = arith.constant 0 : i32
    %c0_i32_1 = arith.constant 0 : i32
    %c0_i32_2 = arith.constant 0 : i32
    return %c0_i32, %c0_i32_0, %c0_i32_1 : i32, i32, i32
  }
  func.func @transform_37(%arg0: i32) -> (i32, i32, i32) {
    %c0_i32 = arith.constant 0 : i32
    %c0_i32_0 = arith.constant 0 : i32
    %c0_i32_1 = arith.constant 0 : i32
    %c0_i32_2 = arith.constant 0 : i32
    return %c0_i32, %c0_i32_0, %c0_i32_1 : i32, i32, i32
  }
  func.func @transform_38(%arg0: i32) -> (i32, i32, i32) {
    %c0_i32 = arith.constant 0 : i32
    %c0_i32_0 = arith.constant 0 : i32
    %c0_i32_1 = arith.constant 0 : i32
    %c0_i32_2 = arith.constant 0 : i32
    return %c0_i32, %c0_i32_0, %c0_i32_1 : i32, i32, i32
  }
  func.func @transform_39(%arg0: i32) -> (i32, i32) {
    %c0_i32 = arith.constant 0 : i32
    %c0_i32_0 = arith.constant 0 : i32
    %c0_i32_1 = arith.constant 0 : i32
    return %c0_i32, %c0_i32_0 : i32, i32
  }
  func.func @transform_40(%arg0: i32) -> (i32, i32) {
    %c0_i32 = arith.constant 0 : i32
    %c0_i32_0 = arith.constant 0 : i32
    %c0_i32_1 = arith.constant 0 : i32
    return %c0_i32, %c0_i32_0 : i32, i32
  }
  func.func @transform_41(%arg0: i32) -> (i32, i32, i32) {
    %c0_i32 = arith.constant 0 : i32
    %c0_i32_0 = arith.constant 0 : i32
    %c0_i32_1 = arith.constant 0 : i32
    return %arg0, %c0_i32, %c0_i32_0 : i32, i32, i32
  }
}

</mosaic_0001>

<bundles_post_ra>
// kernel: _lambda_.1
= control target key start
LH: loop header
LB: loop body
LE: loop exit
PB: predicated region body
PF: predicated region fallthrough
CT: control target
= control target key end

     0   :  { %s13604_s6 = smov 1   ;;  %s13605_s10 = smov 2   ;;  %s15357_s0 = inlined_call_operand.smem [shape: u32[42], index: -1, kind: input, shape index: {}] }
   0x1   :  { %s13672_s5 = sld [smem:[%s15357_s0]]   ;;  %s13606_s14 = smov 3  }
   0x2   :  { %s13677_s9 = sld [smem:[%s15357_s0 + %s13604_s6]]   ;;  %s13607_s18 = smov 4  }
   0x3   :  { %s13682_s13 = sld [smem:[%s15357_s0 + %s13605_s10]]   ;;  %s13608_s22 = smov 5  }
   0x4   :  { %s13687_s17 = sld [smem:[%s15357_s0 + %s13606_s14]]   ;;  %s13609_s26 = smov 6  }
   0x5   :  { %s13692_s21 = sld [smem:[%s15357_s0 + %s13607_s18]]   ;;  %s13610_s30 = smov 7  }
   0x6   :  { %s13697_s25 = sld [smem:[%s15357_s0 + %s13608_s22]]   ;;  %s13611_s4 = smov 8  }
   0x7   :  { %15405 = sst [smem:[#allocation32_spill]] %s13672_s5  ;;  %s13612_s10 = smov 9  }
   0x8   :  { %15406 = sst [smem:[#allocation33_spill]] %s13677_s9  ;;  %s13613_s15 = smov 10  }
   0x9   :  { %15407 = sst [smem:[#allocation34_spill]] %s13682_s13  ;;  %s13614_s20 = smov 11  }
   0xa   :  { %15408 = sst [smem:[#allocation35_spill]] %s13687_s17  ;;  %s13616_s1 = smov 13  }
   0xb   :  { %s13702_s29 = sld [smem:[%s15357_s0 + %s13609_s26]]   ;;  %s13615_s26 = smov 12  }
   0xc   :  { %15409 = sst [smem:[#allocation36_spill]] %s13697_s25  ;;  %s13617_s7 = smov 14  }
   0xd   :  { %s13707_s3 = sld [smem:[%s15357_s0 + %s13610_s30]]   ;;  %s13619_s22 = smov 16  }
   0xe   :  { %s13712_s8 = sld [smem:[%s15357_s0 + %s13611_s4]]   ;;  %s13620_s28 = smov 17  }
   0xf   :  { %s13717_s14 = sld [smem:[%s15357_s0 + %s13612_s10]]  }
  0x10   :  { %s13722_s19 = sld [smem:[%s15357_s0 + %s13613_s15]]   ;;  %s13618_s15 = smov 15  }
  0x11   :  { %15410 = sst [smem:[#allocation37_spill]] %s13702_s29 }
  0x12   :  { %s13727_s24 = sld [smem:[%s15357_s0 + %s13614_s20]]  }
  0x13   :  { %15411 = sst [smem:[#allocation38_spill]] %s13707_s3 }
  0x14   :  { %15412 = sst [smem:[#allocation39_spill]] %s13712_s8 }
  0x15   :  { %15413 = sst [smem:[#allocation40_spill]] %s13717_s14 }
  0x16   :  { %15414 = sst [smem:[#allocation41_spill]] %s13722_s19 }
  0x17   :  { %s13732_s30 = sld [smem:[%s15357_s0 + %s13615_s26]]  }
  0x18   :  { %s13737_s6 = sld [smem:[%s15357_s0 + %s13616_s1]]  }
  0x19   :  { %s13742_s12 = sld [smem:[%s15357_s0 + %s13617_s7]]   ;;  %s13621_s7 = smov 18  }
  0x1a   :  { %s13747_s20 = sld [smem:[%s15357_s0 + %s13618_s15]]   ;;  %s13622_s15 = smov 19  }
  0x1b   :  { %s13752_s27 = sld [smem:[%s15357_s0 + %s13619_s22]]   ;;  %s13623_s22 = smov 20  }
  0x1c   :  { %s13757_s4 = sld [smem:[%s15357_s0 + %s13620_s28]]   ;;  %s13624_s28 = smov 21  }
  0x1d   :  { %15415 = sst [smem:[#allocation42_spill]] %s13732_s30 }
  0x1e   :  { %15416 = sst [smem:[#allocation43_spill]] %s13737_s6 }
  0x1f   :  { %15417 = sst [smem:[#allocation44_spill]] %s13742_s12 }
  0x20   :  { %15418 = sst [smem:[#allocation45_spill]] %s13747_s20 }
  0x21   :  { %15419 = sst [smem:[#allocation46_spill]] %s13752_s27 }
  0x22   :  { %15420 = sst [smem:[#allocation47_spill]] %s13757_s4 }
  0x23   :  { %s13762_s9 = sld [smem:[%s15357_s0 + %s13621_s7]]   ;;  %s13625_s7 = smov 22  }
  0x24   :  { %s13767_s20 = sld [smem:[%s15357_s0 + %s13622_s15]]   ;;  %s13626_s15 = smov 23  }
  0x25   :  { %s13772_s27 = sld [smem:[%s15357_s0 + %s13623_s22]]   ;;  %s13627_s22 = smov 24  }
  0x26   :  { %s13777_s4 = sld [smem:[%s15357_s0 + %s13624_s28]]   ;;  %s13628_s28 = smov 25  }
  0x27   :  { %s13792_s12 = sld [smem:[%s15357_s0 + %s13627_s22]]   ;;  %s13631_s22 = smov 28  }
  0x28   :  { %s13797_s30 = sld [smem:[%s15357_s0 + %s13628_s28]]   ;;  %s13632_s28 = smov 29  }
  0x29   :  { %15421 = sst [smem:[#allocation48_spill]] %s13762_s9 }
  0x2a   :  { %15422 = sst [smem:[#allocation49_spill]] %s13767_s20 }
  0x2b   :  { %15423 = sst [smem:[#allocation50_spill]] %s13772_s27 }
  0x2c   :  { %15424 = sst [smem:[#allocation51_spill]] %s13777_s4 }
  0x2d   :  { %s13782_s9 = sld [smem:[%s15357_s0 + %s13625_s7]]   ;;  %s13629_s7 = smov 26  }
  0x2e   :  { %s13787_s20 = sld [smem:[%s15357_s0 + %s13626_s15]]   ;;  %s13630_s15 = smov 27  }
  0x2f   :  { %15427 = sst [smem:[#allocation54_spill]] %s13792_s12 }
  0x30   :  { %15428 = sst [smem:[#allocation55_spill]] %s13797_s30 }
  0x31   :  { %s13802_s6 = sld [smem:[%s15357_s0 + %s13629_s7]]   ;;  %s13633_s7 = smov 30  }
  0x32   :  { %s13812_s12 = sld [smem:[%s15357_s0 + %s13631_s22]]   ;;  %s13635_s22 = smov 32  }
  0x33   :  { %15425 = sst [smem:[#allocation52_spill]] %s13782_s9 }
  0x34   :  { %15426 = sst [smem:[#allocation53_spill]] %s13787_s20 }
  0x35   :  { %s13807_s20 = sld [smem:[%s15357_s0 + %s13630_s15]]   ;;  %s13634_s15 = smov 31  }
  0x36   :  { %s13817_s30 = sld [smem:[%s15357_s0 + %s13632_s28]]   ;;  %s13636_s28 = smov 33  }
  0x37   :  { %15429 = sst [smem:[#allocation56_spill]] %s13802_s6 }
  0x38   :  { %15430 = sst [smem:[#allocation57_spill]] %s13812_s12 }
  0x39   :  { %s13822_s19 = sld [smem:[%s15357_s0 + %s13633_s7]]   ;;  %s13637_s7 = smov 34  }
  0x3a   :  { %s13827_s14 = sld [smem:[%s15357_s0 + %s13634_s15]]   ;;  %s13638_s15 = smov 35  }
  0x3b   :  { %s13832_s8 = sld [smem:[%s15357_s0 + %s13635_s22]]   ;;  %s13639_s22 = smov 36  }
  0x3c   :  { %s13837_s29 = sld [smem:[%s15357_s0 + %s13636_s28]]   ;;  %s13640_s28 = smov 37  }
  0x3d   :  { %s13857_s25 = sld [smem:[%s15357_s0 + %s13640_s28]]   ;;  %s13644_s28 = smov 41  }
  0x3f   :  { %15431 = sst [smem:[#allocation58_spill]] %s13822_s19 }
  0x40   :  { %15432 = sst [smem:[#allocation59_spill]] %s13827_s14 }
  0x41   :  { %15433 = sst [smem:[#allocation60_spill]] %s13832_s8 }
  0x42   :  { %s13842_s19 = sld [smem:[%s15357_s0 + %s13637_s7]]   ;;  %s13641_s7 = smov 38  }
  0x43   :  { %s13847_s14 = sld [smem:[%s15357_s0 + %s13638_s15]]   ;;  %s13642_s15 = smov 39  }
  0x44   :  { %s13852_s8 = sld [smem:[%s15357_s0 + %s13639_s22]]   ;;  %s13643_s22 = smov 40  }
  0x45   :  { %15437 = sst [smem:[#allocation64_spill]] %s13857_s25 }
  0x46   :  { %s13867_s17 = sld [smem:[%s15357_s0 + %s13642_s15]]  }
  0x47   :  { %s13877_s25 = sld [smem:[%s15357_s0 + %s13644_s28]]  }
  0x48   :  { %15434 = sst [smem:[#allocation61_spill]] %s13842_s19 }
  0x49   :  { %15435 = sst [smem:[#allocation62_spill]] %s13847_s14 }
  0x4a   :  { %15436 = sst [smem:[#allocation63_spill]] %s13852_s8 }
  0x4b   :  { %s13862_s19 = sld [smem:[%s15357_s0 + %s13641_s7]]  }
  0x4c   :  { %s13872_s8 = sld [smem:[%s15357_s0 + %s13643_s22]]  }
  0x4d   :  { %88 = vsyncpa [#allocation3], 0 }
  0x4e   :  { %89 = vsyncpa [#allocation6], 0 }
  0x4f   :  { %90 = vsyncpa [#allocation9], 0 }
  0x50   :  { %91 = vsyncpa [#allocation12], 0 }
  0x51   :  { %92 = vsyncpa [#allocation15], 0 }
  0x52   :  { %93 = vsyncpa [#allocation18], 0 }
  0x53   :  { %94 = vsyncpa [#allocation21], 0 }
  0x54   :  { %95 = vsyncpa [#allocation4], 0 }
  0x55   :  { %97 = vsyncpa [#allocation4 + $0x1], 0  ;;  %s13879_s7 = smov 0   ;;  %s13881_s10 = smov 0  }
  0x56   :  { %s13883_s11 = smov 0   ;;  %s13885_s15 = smov 0  }
  0x57 LB: > { %s15438_s14 = sld [smem:[#allocation62_spill]]  ;;  %s15439_s12 = sld [smem:[#allocation57_spill]]  ;;  %s13598_s11 = sphi %s13883_s11, %s15521_s11   ;;  %s13594_s10 = sphi %s13881_s10, %s15523_s10   ;;  %s13590_s7 = sphi %s13879_s7, %s15522_s7   ;;  %s13602_s15 = sphi %s13885_s15, %s15519_s15  }
  0x58   : > { %s15440_s9 = sld [smem:[#allocation52_spill]]  ;;  %s15441_s6 = sld [smem:[#allocation56_spill]] }
  0x59   : > { %s15442_s4 = sld [smem:[#allocation51_spill]]  ;;  %s15443_s27 = sld [smem:[#allocation50_spill]] }
  0x5a   : > { %s15444_s3 = sld [smem:[#allocation38_spill]]  ;;  %15445 = sst [smem:[#allocation65_spill]] %s13590_s7 }
  0x5b   : > { %15446 = sst [smem:[#allocation66_spill]] %s13598_s11  ;;  %s13900_s0 = sadd.s32 4294967295, %s13602_s15  }
  0x5c   : > { %15447 = sst [smem:[#allocation67_spill]] %s13602_s15  ;;  %s10671_s16 = sadd.s32 4294967294, %s13602_s15  }
  0x5d   : > { %s13904_s18 = sadd.s32 1, %s13602_s15   ;;  %s981_s22 = sadd.s32 1, %s13598_s11 }
  0x5e   : > { %15448 = sst [smem:[#allocation68_spill]] %s13904_s18  ;;  %s978_s23 = ssub.s32 %s13602_s15, %s13904_s18 }
  0x5f   : > { %p991_p0 = scmp.ne.s32.totalorder %s13598_s11, %s13594_s10  ;;  %p979_p1 = scmp.eq.s32.totalorder %s978_s23, 0 }
  0x60   : > { %p992_p2 = scmp.eq.s32.totalorder %s13900_s0, 1  ;;  %p997_p3 = scmp.ne.s32.totalorder %s13594_s10, %s13590_s7 }
  0x61   : > { %p998_p4 = scmp.eq.s32.totalorder %s10671_s16, 1  ;;  %p10672_p7 = scmp.ge.s32.totalorder %s13602_s15, 1 }
  0x62   : > { %s13915_s26 = scalar_select %p979_p1, %s13598_s11, %s981_s22  }
  0x63   : > { %p13917_p5 = por %p992_p2, %p991_p0  ;;  %p13921_p6 = por %p998_p4, %p997_p3 }
  0x64   : > { %15449 = sst [smem:[#allocation69_spill]] %s13915_s26  ;;  %p1005_p8 = scmp.lt.s32.totalorder %s13602_s15, 3 }
  0x65   : > { %s15450_s28 = scalar_select %p13917_p5, 1, 0 }
  0x66   : > { %s15451_s1 = scalar_select %p13921_p6, 1, 0 }
  0x67   : > { %p15383_p9 = scmp.eq.s32.totalorder %s13900_s0, 0  ;;  %p13928_p10 = pnand %p10672_p7, %p1005_p8 }
  0x68   : > { %15452 = sst [smem:[#allocation70_spill]] %s15451_s1  ;;  %s13645_s16 = smov [#allocation5]  }
  0x69   : > { %s15453_s2 = scalar_select %p13928_p10, 1, 0 }
  0x6a   : > { %p12688_p11 = pneg %p13928_p10  ;;  %s1042_s22 = sshll.u32 %s13645_s16, 4  ;;  %s13934_s22 = int_to_ptr.vmem [resolvable:$true] %s1042_s22 }
  0x6b   : > { %s13646_s26 = smov [#allocation8]   ;;  %s13647_s18 = smov [#allocation11]  }
  0x6c   : > { %p13938_p12 = pnand %p15383_p9, %p12688_p11  ;;  %s1101_s11 = sshll.u32 %s13646_s26, 4  ;;  %s13942_s11 = int_to_ptr.vmem [resolvable:$true] %s1101_s11 }
  0x6d   : > { %s13944_s1 = sshll.u32 %s13647_s18, 4  ;;  %s13148_s7 = scalar_lea.hbm %s15444_s3, 512  ;;  %s1128_s1 = int_to_ptr.vmem [resolvable:$true] %s13944_s1 }
  0x6e   : > { %p13149_p13 = scmp.ne.s32.totalorder %s15444_s3, %s13148_s7  ;;  %p13950_p0 = pneg %p13938_p12 }
  0x6f   : > { %p13155_p3 = scmp.lt.u32.totalorder %s13148_s7, %s15444_s3 }
  0x70   : > { %p13151_p1 = pnand %p13950_p0, %p13149_p13 }
  0x72   : > { %p13152_p2 = pneg %p13151_p1 }
  0x74   : > { %p13157_p4 = pnand %p13155_p3, %p13152_p2 }
  0x76   : > { %13160 = shalt.err (!%p13157_p4)
}
  0x77   : > { %s13161_s18 = scalar_lea.vmem %s13934_s22, 512  ;;  %p13169_p9 = scmp.lt.s32.totalorder %s13934_s22, %s13934_s22 }
  0x78   : > { %p13162_p7 = scmp.ne.s32.totalorder %s13934_s22, %s13161_s18  ;;  %p13170_p6 = scmp.lt.s32.totalorder %s13161_s18, %s13161_s18 }
  0x7a   : > { %p13164_p8 = pnand %p13162_p7, %p13950_p0  ;;  %p13171_p5 = por %p13170_p6, %p13169_p9 }
  0x7c   : > { %p13165_p11 = pneg %p13164_p8 }
  0x7e   : > { %p13172_p10 = pnand %p13171_p5, %p13165_p11 }
  0x80   : > { %13175 = shalt.err (!%p13172_p10)
}
  0x81   : > { %s13648_s26 = smov 64   ;;  %s13649_s7 = smov 4  }
  0x82   : > { %12694 = dma.hbm_to_vmem [thread:$0]  (!%p13938_p12), %s15444_s3, 512, %s13934_s22, [#allocation6], %s13648_s26, %s13648_s26, %s13649_s7  }
  0x83   : > { %s13176_s15 = scalar_lea.hbm %s15443_s27, 2048 }
  0x84   : > { %p13177_p13 = scmp.ne.s32.totalorder %s15443_s27, %s13176_s15  ;;  %p13183_p9 = scmp.lt.u32.totalorder %s13176_s15, %s15443_s27 }
  0x86   : > { %p13179_p6 = pnand %p13177_p13, %p13950_p0 }
  0x88   : > { %p13180_p5 = pneg %p13179_p6 }
  0x8a   : > { %p13185_p10 = pnand %p13183_p9, %p13180_p5 }
  0x8c   : > { %13188 = shalt.err (!%p13185_p10)
}
  0x8d   : > { %s13189_s18 = scalar_lea.vmem %s13942_s11, 2048  ;;  %p13197_p4 = scmp.lt.s32.totalorder %s13942_s11, %s13942_s11 }
  0x8e   : > { %p13190_p1 = scmp.ne.s32.totalorder %s13942_s11, %s13189_s18  ;;  %p13198_p7 = scmp.lt.s32.totalorder %s13189_s18, %s13189_s18 }
  0x90   : > { %p13192_p2 = pnand %p13190_p1, %p13950_p0  ;;  %p13199_p8 = por %p13198_p7, %p13197_p4 }
  0x92   : > { %p13193_p3 = pneg %p13192_p2 }
  0x94   : > { %p13200_p11 = pnand %p13199_p8, %p13193_p3 }
  0x96   : > { %13203 = shalt.err (!%p13200_p11)
}
  0x97   : > { %12700 = dma.hbm_to_vmem [thread:$0]  (!%p13938_p12), %s15443_s27, 2048, %s13942_s11, [#allocation9], %s13648_s26, %s13648_s26, %s13649_s7  }
  0x98   : > { %s13204_s15 = scalar_lea.hbm %s15440_s9, 512 }
  0x99   : > { %p13205_p13 = scmp.ne.s32.totalorder %s15440_s9, %s13204_s15  ;;  %p13211_p9 = scmp.lt.u32.totalorder %s13204_s15, %s15440_s9 }
  0x9b   : > { %p13207_p6 = pnand %p13205_p13, %p13950_p0 }
  0x9d   : > { %p13208_p5 = pneg %p13207_p6 }
  0x9f   : > { %p13213_p10 = pnand %p13211_p9, %p13208_p5 }
  0xa1   : > { %13216 = shalt.err (!%p13213_p10)
}
  0xa2   : > { %s13217_s22 = scalar_lea.vmem %s1128_s1, 512  ;;  %p13225_p4 = scmp.lt.s32.totalorder %s1128_s1, %s1128_s1 }
  0xa3   : > { %p13218_p1 = scmp.ne.s32.totalorder %s1128_s1, %s13217_s22  ;;  %p13226_p7 = scmp.lt.s32.totalorder %s13217_s22, %s13217_s22 }
  0xa5   : > { %p13220_p2 = pnand %p13218_p1, %p13950_p0  ;;  %p13227_p8 = por %p13226_p7, %p13225_p4 }
  0xa7   : > { %p13221_p3 = pneg %p13220_p2 }
  0xa9   : > { %p13228_p11 = pnand %p13227_p8, %p13221_p3 }
  0xab   : > { %13231 = shalt.err (!%p13228_p11)
}
  0xac   : > { %12706 = dma.hbm_to_vmem [thread:$0]  (!%p13938_p12), %s15440_s9, 512, %s1128_s1, [#allocation12], %s13648_s26, %s13648_s26, %s13649_s7  }
  0xad   : > { %s13650_s11 = smov [#allocation14]   ;;  %s13651_s15 = smov [#allocation17]  }
  0xae   : > { %s1162_s18 = sshll.u32 %s13650_s11, 4  ;;  %s1188_s3 = sshll.u32 %s13651_s15, 4  ;;  %s1163_s18 = int_to_ptr.vmem [resolvable:$true] %s1162_s18  ;;  %s1189_s3 = int_to_ptr.vmem [resolvable:$true] %s1188_s3 }
  0xaf   : > { %s13232_s22 = scalar_lea.hbm %s13807_s20, 2048 }
  0xb0   : > { %p13233_p13 = scmp.ne.s32.totalorder %s13807_s20, %s13232_s22  ;;  %p13239_p9 = scmp.lt.u32.totalorder %s13232_s22, %s13807_s20 }
  0xb2   : > { %p13235_p6 = pnand %p13233_p13, %p13950_p0 }
  0xb4   : > { %p13236_p5 = pneg %p13235_p6 }
  0xb6   : > { %p13241_p10 = pnand %p13239_p9, %p13236_p5 }
  0xb8   : > { %13244 = shalt.err (!%p13241_p10)
}
  0xb9   : > { %s13245_s27 = scalar_lea.vmem %s1163_s18, 2048  ;;  %p13253_p4 = scmp.lt.s32.totalorder %s1163_s18, %s1163_s18 }
  0xba   : > { %p13246_p1 = scmp.ne.s32.totalorder %s1163_s18, %s13245_s27  ;;  %p13254_p7 = scmp.lt.s32.totalorder %s13245_s27, %s13245_s27 }
  0xbc   : > { %p13248_p2 = pnand %p13246_p1, %p13950_p0  ;;  %p13255_p8 = por %p13254_p7, %p13253_p4 }
  0xbe   : > { %p13249_p3 = pneg %p13248_p2 }
  0xc0   : > { %p13256_p11 = pnand %p13255_p8, %p13249_p3 }
  0xc2   : > { %13259 = shalt.err (!%p13256_p11)
}
  0xc3   : > { %12712 = dma.hbm_to_vmem [thread:$0]  (!%p13938_p12), %s13807_s20, 2048, %s1163_s18, [#allocation15], %s13648_s26, %s13648_s26, %s13649_s7  }
  0xc4   : > { %s13260_s1 = scalar_lea.hbm %s13817_s30, 512 }
  0xc5   : > { %p13261_p13 = scmp.ne.s32.totalorder %s13817_s30, %s13260_s1  ;;  %p13267_p9 = scmp.lt.u32.totalorder %s13260_s1, %s13817_s30 }
  0xc7   : > { %p13263_p6 = pnand %p13261_p13, %p13950_p0 }
  0xc9   : > { %p13264_p5 = pneg %p13263_p6 }
  0xcb   : > { %p13269_p10 = pnand %p13267_p9, %p13264_p5 }
  0xcd   : > { %13272 = shalt.err (!%p13269_p10)
}
  0xce   : > { %s13273_s27 = scalar_lea.vmem %s1189_s3, 512  ;;  %p13281_p4 = scmp.lt.s32.totalorder %s1189_s3, %s1189_s3 }
  0xcf   : > { %p13274_p1 = scmp.ne.s32.totalorder %s1189_s3, %s13273_s27  ;;  %p13282_p7 = scmp.lt.s32.totalorder %s13273_s27, %s13273_s27 }
  0xd1   : > { %p13276_p2 = pnand %p13274_p1, %p13950_p0  ;;  %p13283_p8 = por %p13282_p7, %p13281_p4 }
  0xd3   : > { %p13277_p3 = pneg %p13276_p2 }
  0xd5   : > { %p13284_p11 = pnand %p13283_p8, %p13277_p3 }
  0xd7   : > { %13287 = shalt.err (!%p13284_p11)
}
  0xd8   : > { %12718 = dma.hbm_to_vmem [thread:$0]  (!%p13938_p12), %s13817_s30, 512, %s1189_s3, [#allocation18], %s13648_s26, %s13648_s26, %s13649_s7  }
  0xd9   : > { %s13652_s11 = smov [#allocation20]   ;;  %s13653_s15 = smov [#allocation2]  }
  0xda   : > { %s1226_s18 = sshll.u32 %s13652_s11, 4  ;;  %s1023_s22 = sshll.u32 %s13653_s15, 4  ;;  %s1227_s18 = int_to_ptr.vmem [resolvable:$true] %s1226_s18  ;;  %s1024_s22 = int_to_ptr.vmem [resolvable:$true] %s1023_s22 }
  0xdb   : > { %s13288_s1 = scalar_lea.hbm %s15438_s14, 1024 }
  0xdc   : > { %p13289_p13 = scmp.ne.s32.totalorder %s15438_s14, %s13288_s1  ;;  %p13295_p9 = scmp.lt.u32.totalorder %s13288_s1, %s15438_s14 }
  0xde   : > { %p13291_p6 = pnand %p13289_p13, %p13950_p0 }
  0xe0   : > { %p13292_p5 = pneg %p13291_p6 }
  0xe2   : > { %p13297_p10 = pnand %p13295_p9, %p13292_p5 }
  0xe4   : > { %13300 = shalt.err (!%p13297_p10)
}
  0xe5   : > { %s13301_s27 = scalar_lea.vmem %s1227_s18, 1024  ;;  %p13309_p4 = scmp.lt.s32.totalorder %s1227_s18, %s1227_s18 }
  0xe6   : > { %p13302_p1 = scmp.ne.s32.totalorder %s1227_s18, %s13301_s27  ;;  %p13310_p7 = scmp.lt.s32.totalorder %s13301_s27, %s13301_s27 }
  0xe8   : > { %p13304_p2 = pnand %p13302_p1, %p13950_p0  ;;  %p13311_p8 = por %p13310_p7, %p13309_p4 }
  0xea   : > { %p13305_p3 = pneg %p13304_p2 }
  0xec   : > { %p13312_p11 = pnand %p13311_p8, %p13305_p3 }
  0xee   : > { %13315 = shalt.err (!%p13312_p11)
}
  0xef   : > { %12724 = dma.hbm_to_vmem [thread:$0]  (!%p13938_p12), %s15438_s14, 1024, %s1227_s18, [#allocation21], %s13648_s26, %s13648_s26, %s13649_s7  }
  0xf0   : > { %s13316_s3 = scalar_lea.hbm %s13692_s21, 2048 }
  0xf1   : > { %p13317_p13 = scmp.ne.s32.totalorder %s13692_s21, %s13316_s3  ;;  %p13323_p9 = scmp.lt.u32.totalorder %s13316_s3, %s13692_s21 }
  0xf3   : > { %p13319_p6 = pnand %p13317_p13, %p13950_p0 }
  0xf5   : > { %p13320_p5 = pneg %p13319_p6 }
  0xf7   : > { %p13325_p10 = pnand %p13323_p9, %p13320_p5 }
  0xf9   : > { %13328 = shalt.err (!%p13325_p10)
}
  0xfa   : > { %s13329_s11 = scalar_lea.vmem %s1024_s22, 2048  ;;  %p13337_p4 = scmp.lt.s32.totalorder %s1024_s22, %s1024_s22 }
  0xfb   : > { %p13330_p1 = scmp.ne.s32.totalorder %s1024_s22, %s13329_s11  ;;  %p13338_p7 = scmp.lt.s32.totalorder %s13329_s11, %s13329_s11 }
  0xfd   : > { %p13332_p2 = pnand %p13330_p1, %p13950_p0  ;;  %p13339_p8 = por %p13338_p7, %p13337_p4 }
  0xff   : > { %p13333_p3 = pneg %p13332_p2 }
 0x101   : > { %p13340_p11 = pnand %p13339_p8, %p13333_p3 }
 0x103   : > { %13343 = shalt.err (!%p13340_p11)
}
 0x104   : > { %12691 = dma.hbm_to_vmem [thread:$0]  (!%p13938_p12), %s13692_s21, 2048, %s1024_s22, [#allocation3], %s13648_s26, %s13648_s26, %s13649_s7  }
 0x105   : > { %s13654_s18 = smov [#allocation7]   ;;  %s13655_s1 = smov [#allocation10]  }
 0x106   : > { %s1064_s15 = sshll.u32 %s13654_s18, 4  ;;  %s1114_s27 = sshll.u32 %s13655_s1, 4  ;;  %s1065_s15 = int_to_ptr.vmem [resolvable:$true] %s1064_s15  ;;  %s1115_s27 = int_to_ptr.vmem [resolvable:$true] %s1114_s27 }
 0x107   : > { %s13344_s3 = scalar_lea.hbm %s13727_s24, 512 }
 0x108   : > { %p13345_p13 = scmp.ne.s32.totalorder %s13727_s24, %s13344_s3  ;;  %p13351_p9 = scmp.lt.u32.totalorder %s13344_s3, %s13727_s24 }
 0x10a   : > { %p13347_p6 = pnand %p13345_p13, %p13950_p0 }
 0x10c   : > { %p13348_p5 = pneg %p13347_p6 }
 0x10e   : > { %p13353_p10 = pnand %p13351_p9, %p13348_p5 }
 0x110   : > { %13356 = shalt.err (!%p13353_p10)
}
 0x111   : > { %s13357_s11 = scalar_lea.vmem %s1065_s15, 512  ;;  %p13365_p4 = scmp.lt.s32.totalorder %s1065_s15, %s1065_s15 }
 0x112   : > { %p13358_p1 = scmp.ne.s32.totalorder %s1065_s15, %s13357_s11  ;;  %p13366_p7 = scmp.lt.s32.totalorder %s13357_s11, %s13357_s11 }
 0x114   : > { %p13360_p2 = pnand %p13358_p1, %p13950_p0  ;;  %p13367_p8 = por %p13366_p7, %p13365_p4 }
 0x116   : > { %p13361_p3 = pneg %p13360_p2 }
 0x118   : > { %p13368_p11 = pnand %p13367_p8, %p13361_p3 }
 0x11a   : > { %13371 = shalt.err (!%p13368_p11)
}
 0x11b   : > { %12697 = dma.hbm_to_vmem [thread:$0]  (!%p13938_p12), %s13727_s24, 512, %s1065_s15, [#allocation6], %s13648_s26, %s13648_s26, %s13649_s7  }
 0x11c   : > { %s13372_s22 = scalar_lea.hbm %s15442_s4, 2048 }
 0x11d   : > { %p13373_p13 = scmp.ne.s32.totalorder %s15442_s4, %s13372_s22  ;;  %p13379_p9 = scmp.lt.u32.totalorder %s13372_s22, %s15442_s4 }
 0x11f   : > { %p13375_p6 = pnand %p13373_p13, %p13950_p0 }
 0x121   : > { %p13376_p5 = pneg %p13375_p6 }
 0x123   : > { %p13381_p10 = pnand %p13379_p9, %p13376_p5 }
 0x125   : > { %13384 = shalt.err (!%p13381_p10)
}
 0x126   : > { %s13385_s18 = scalar_lea.vmem %s1115_s27, 2048  ;;  %p13393_p4 = scmp.lt.s32.totalorder %s1115_s27, %s1115_s27 }
 0x127   : > { %p13386_p1 = scmp.ne.s32.totalorder %s1115_s27, %s13385_s18  ;;  %p13394_p7 = scmp.lt.s32.totalorder %s13385_s18, %s13385_s18 }
 0x129   : > { %p13388_p2 = pnand %p13386_p1, %p13950_p0  ;;  %p13395_p8 = por %p13394_p7, %p13393_p4 }
 0x12b   : > { %p13389_p3 = pneg %p13388_p2 }
 0x12d   : > { %p13396_p11 = pnand %p13395_p8, %p13389_p3 }
 0x12f   : > { %13399 = shalt.err (!%p13396_p11)
}
 0x130   : > { %12703 = dma.hbm_to_vmem [thread:$0]  (!%p13938_p12), %s15442_s4, 2048, %s1115_s27, [#allocation9], %s13648_s26, %s13648_s26, %s13649_s7  }
 0x131   : > { %s13656_s15 = smov [#allocation13]   ;;  %s13657_s3 = smov [#allocation16]  }
 0x132   : > { %s1149_s1 = sshll.u32 %s13656_s15, 4  ;;  %s1175_s11 = sshll.u32 %s13657_s3, 4  ;;  %s1150_s1 = int_to_ptr.vmem [resolvable:$true] %s1149_s1  ;;  %s1176_s11 = int_to_ptr.vmem [resolvable:$true] %s1175_s11 }
 0x133   : > { %s13400_s22 = scalar_lea.hbm %s15441_s6, 2048 }
 0x134   : > { %p13401_p13 = scmp.ne.s32.totalorder %s15441_s6, %s13400_s22  ;;  %p13407_p9 = scmp.lt.u32.totalorder %s13400_s22, %s15441_s6 }
 0x136   : > { %p13403_p6 = pnand %p13401_p13, %p13950_p0 }
 0x138   : > { %p13404_p5 = pneg %p13403_p6 }
 0x13a   : > { %p13409_p10 = pnand %p13407_p9, %p13404_p5 }
 0x13c   : > { %13412 = shalt.err (!%p13409_p10)
}
 0x13d   : > { %s13413_s18 = scalar_lea.vmem %s1150_s1, 2048  ;;  %p13421_p4 = scmp.lt.s32.totalorder %s1150_s1, %s1150_s1 }
 0x13e   : > { %p13414_p1 = scmp.ne.s32.totalorder %s1150_s1, %s13413_s18  ;;  %p13422_p7 = scmp.lt.s32.totalorder %s13413_s18, %s13413_s18 }
 0x140   : > { %p13416_p2 = pnand %p13414_p1, %p13950_p0  ;;  %p13423_p8 = por %p13422_p7, %p13421_p4 }
 0x142   : > { %p13417_p3 = pneg %p13416_p2 }
 0x144   : > { %p13424_p11 = pnand %p13423_p8, %p13417_p3 }
 0x146   : > { %13427 = shalt.err (!%p13424_p11)
}
 0x147   : > { %12709 = dma.hbm_to_vmem [thread:$0]  (!%p13938_p12), %s15441_s6, 2048, %s1150_s1, [#allocation12], %s13648_s26, %s13648_s26, %s13649_s7  }
 0x148   : > { %s13428_s27 = scalar_lea.hbm %s15439_s12, 2048 }
 0x149   : > { %p13429_p13 = scmp.ne.s32.totalorder %s15439_s12, %s13428_s27  ;;  %p13435_p9 = scmp.lt.u32.totalorder %s13428_s27, %s15439_s12 }
 0x14b   : > { %p13431_p6 = pnand %p13429_p13, %p13950_p0 }
 0x14d   : > { %p13432_p5 = pneg %p13431_p6 }
 0x14f   : > { %p13437_p10 = pnand %p13435_p9, %p13432_p5 }
 0x151   : > { %13440 = shalt.err (!%p13437_p10)
}
 0x152   : > { %s13441_s15 = scalar_lea.vmem %s1176_s11, 2048  ;;  %p13449_p4 = scmp.lt.s32.totalorder %s1176_s11, %s1176_s11 }
 0x153   : > { %p13442_p1 = scmp.ne.s32.totalorder %s1176_s11, %s13441_s15  ;;  %p13450_p7 = scmp.lt.s32.totalorder %s13441_s15, %s13441_s15 }
 0x155   : > { %p13444_p2 = pnand %p13442_p1, %p13950_p0  ;;  %p13451_p8 = por %p13450_p7, %p13449_p4 }
 0x157   : > { %p13445_p3 = pneg %p13444_p2 }
 0x159   : > { %p13452_p11 = pnand %p13451_p8, %p13445_p3 }
 0x15b   : > { %13455 = shalt.err (!%p13452_p11)
}
 0x15c   : > { %12715 = dma.hbm_to_vmem [thread:$0]  (!%p13938_p12), %s15439_s12, 2048, %s1176_s11, [#allocation15], %s13648_s26, %s13648_s26, %s13649_s7  }
 0x15d   : > { %s13658_s1 = smov [#allocation19]   ;;  %s13659_s22 = smov [#allocation22]  }
 0x15e   : > { %s1210_s3 = sshll.u32 %s13658_s1, 4  ;;  %s1248_s18 = sshll.u32 %s13659_s22, 4  ;;  %s1211_s3 = int_to_ptr.vmem [resolvable:$true] %s1210_s3  ;;  %s1249_s18 = int_to_ptr.vmem [resolvable:$true] %s1248_s18 }
 0x15f   : > { %s13456_s27 = scalar_lea.hbm %s13837_s29, 512 }
 0x160   : > { %p13457_p13 = scmp.ne.s32.totalorder %s13837_s29, %s13456_s27  ;;  %p13463_p9 = scmp.lt.u32.totalorder %s13456_s27, %s13837_s29 }
 0x162   : > { %p13459_p6 = pnand %p13457_p13, %p13950_p0 }
 0x164   : > { %p13460_p5 = pneg %p13459_p6 }
 0x166   : > { %p13465_p10 = pnand %p13463_p9, %p13460_p5 }
 0x168   : > { %13468 = shalt.err (!%p13465_p10)
}
 0x169   : > { %s13469_s15 = scalar_lea.vmem %s1211_s3, 512  ;;  %p13477_p4 = scmp.lt.s32.totalorder %s1211_s3, %s1211_s3 }
 0x16a   : > { %p13470_p1 = scmp.ne.s32.totalorder %s1211_s3, %s13469_s15  ;;  %p13478_p7 = scmp.lt.s32.totalorder %s13469_s15, %s13469_s15 }
 0x16c   : > { %p13472_p2 = pnand %p13470_p1, %p13950_p0  ;;  %p13479_p8 = por %p13478_p7, %p13477_p4 }
 0x16e   : > { %p13473_p3 = pneg %p13472_p2 }
 0x170   : > { %p13480_p11 = pnand %p13479_p8, %p13473_p3 }
 0x172   : > { %13483 = shalt.err (!%p13480_p11)
}
 0x173   : > { %12721 = dma.hbm_to_vmem [thread:$0]  (!%p13938_p12), %s13837_s29, 512, %s1211_s3, [#allocation18], %s13648_s26, %s13648_s26, %s13649_s7  }
 0x174   : > { %s13484_s11 = scalar_lea.hbm %s13867_s17, 256 }
 0x175   : > { %p13485_p13 = scmp.ne.s32.totalorder %s13867_s17, %s13484_s11  ;;  %p13491_p9 = scmp.lt.u32.totalorder %s13484_s11, %s13867_s17 }
 0x177   : > { %p13487_p6 = pnand %p13485_p13, %p13950_p0 }
 0x179   : > { %p13488_p5 = pneg %p13487_p6 }
 0x17b   : > { %p13493_p10 = pnand %p13491_p9, %p13488_p5 }
 0x17d   : > { %13496 = shalt.err (!%p13493_p10)
}
 0x17e   : > { %s13497_s1 = scalar_lea.vmem %s1249_s18, 256  ;;  %p13505_p4 = scmp.lt.s32.totalorder %s1249_s18, %s1249_s18 }
 0x17f   : > { %p13498_p1 = scmp.ne.s32.totalorder %s1249_s18, %s13497_s1  ;;  %p13506_p7 = scmp.lt.s32.totalorder %s13497_s1, %s13497_s1 }
 0x181   : > { %p13500_p2 = pnand %p13498_p1, %p13950_p0  ;;  %p13507_p8 = por %p13506_p7, %p13505_p4 }
 0x183   : > { %p13501_p3 = pneg %p13500_p2 }
 0x185   : > { %p13508_p11 = pnand %p13507_p8, %p13501_p3 }
 0x187   : > { %13511 = shalt.err (!%p13508_p11)
}
 0x188   : > { %12727 = dma.hbm_to_vmem [thread:$0]  (!%p13938_p12), %s13867_s17, 256, %s1249_s18, [#allocation21], %s13648_s26, %s13648_s26, %s13649_s7  }
 0x189   : > { %p15456_p13 = scmp.ne.s32.totalorder %s15453_s2, 0 }
 0x18a   : > { %p15457_p6 = scmp.eq.s32.totalorder (!%p15456_p13), %s13900_s0, 0 }
 0x18b   : > { %1281 = sbr.rel (%p15456_p13) target bundleno = 12701 (0x319d), region = 184 }
 0x192   : > { %13557 = dma.done.wait (%p15457_p6), [#allocation3], 2048   ;;  %p15458_p0 = pmov %p15457_p6 }
 0x194   : > { %13559 = vsyncadd (%p15458_p0), [#allocation3], 4294965248  ;;  %p15459_p5 = pmov %p15458_p0 }
 0x195   : > { %p15460_p9 = pmov %p15458_p0 }
 0x196   : > { %13561 = dma.done.wait (%p15459_p5), [#allocation6], 1024  }
 0x197   : > { %13563 = vsyncadd (%p15460_p9), [#allocation6], 4294966272  ;;  %p15461_p10 = pmov %p15458_p0 }
 0x198   : > { %p15462_p12 = pmov %p15458_p0 }
 0x199   : > { %13565 = dma.done.wait (%p15461_p10), [#allocation9], 4096  }
 0x19a   : > { %13567 = vsyncadd (%p15462_p12), [#allocation9], 4294963200  ;;  %p15463_p1 = pmov %p15458_p0 }
 0x19b   : > { %p15464_p2 = pmov %p15458_p0 }
 0x19c   : > { %13569 = dma.done.wait (%p15463_p1), [#allocation12], 2560  }
 0x19d   : > { %13571 = vsyncadd (%p15464_p2), [#allocation12], 4294964736  ;;  %p15465_p3 = pmov %p15458_p0 }
 0x19e   : > { %p15466_p4 = pmov %p15458_p0 }
 0x19f   : > { %13573 = dma.done.wait (%p15465_p3), [#allocation15], 4096  }
 0x1a0   : > { %13575 = vsyncadd (%p15466_p4), [#allocation15], 4294963200  ;;  %p15467_p7 = pmov %p15458_p0 }
 0x1a1   : > { %p15468_p8 = pmov %p15458_p0 }
 0x1a2   : > { %13577 = dma.done.wait (%p15467_p7), [#allocation18], 1024  }
 0x1a3   : > { %13579 = vsyncadd (%p15468_p8), [#allocation18], 4294966272  ;;  %p15469_p11 = pmov %p15458_p0 }
 0x1a4   : > { %p15470_p13 = pmov %p15458_p0 }
 0x1a5   : > { %13581 = dma.done.wait (%p15469_p11), [#allocation21], 1280  }
 0x1a6   : > { %13583 = vsyncadd (%p15470_p13), [#allocation21], 4294966016  ;;  %s15471_s5 = sld [smem:[#allocation32_spill]]  ;;  %p1432_p6 = scmp.lt.s32.totalorder %s13900_s0, 1  ;;  %vm1444_vm0 = vcmask 261120   ;;  %v12850_v7 = vld [vmem:[#allocation2] sm:$0xff]  }
 0x1a7   : > { %v12851_v8 = vld [vmem:[#allocation2 + $0x10] sm:$0xff]   ;;  %v13660_v9 = vmov 0.0   ;;  %s15472_s13 = sld [smem:[#allocation34_spill]]  ;;  %v12852_v10 = vld [vmem:[#allocation2 + $0x8] sm:$0xff]   ;;  %s15473_s26 = sld [smem:[#allocation35_spill]]  ;;  %v12853_v11 = vld [vmem:[#allocation2 + $0x18] sm:$0xff]  }
 0x1a8   : > { %s14164_s2 = scalar_select %p1432_p6, %s13900_s0, 1  ;;  %11538 = vmatprep.subr.bf16.mxu0 %v13660_v9  ;;  %11546 = vmatprep.subr.bf16.mxu1 %v13660_v9  ;;  %vm13661_vm1 = vmmov 0   ;;  %v12854_v21 = vld [vmem:[#allocation2 + $0x20] sm:$0xff]   ;;  %v12855_v22 = vld [vmem:[#allocation2 + $0x30] sm:$0xff]   ;;  %v12856_v24 = vld [vmem:[#allocation2 + $0x28] sm:$0xff]   ;;  %vm2166_vm2 = vcmask 64512  }
 0x1a9   : > { %11539 = vmatpush3.bf16.msra.mxu0 %v12850_v7  ;;  %11547 = vmatpush3.bf16.msra.mxu1 %v12851_v8  ;;  %s15474_s7 = sld [smem:[#allocation36_spill]]  ;;  %v12857_v25 = vld [vmem:[#allocation2 + $0x38] sm:$0xff]   ;;  %s15476_s22 = sld [smem:[#allocation37_spill]]  ;;  %vm2402_vm3 = vcmask 1043456   ;;  %vm2932_vm4 = vcmask 523264  }
 0x1aa   : > { %s15389_s23 = sshll.u32 %s14164_s2, 3  ;;  %11540 = vmatprep.subr.bf16.mxu0 %v13660_v9  ;;  %11548 = vmatprep.subr.bf16.mxu1 %v13660_v9  ;;  %s15477_s18 = sld [smem:[#allocation39_spill]] }
 0x1ab   : > { %11542 = vmatprep.mubr.msk.bf16.mxu0 %vm13661_vm1, %v13660_v9  ;;  %11550 = vmatprep.mubr.msk.bf16.mxu1 %vm13661_vm1, %v13660_v9  ;;  %s15478_s27 = sld [smem:[#allocation40_spill]]  ;;  %s15479_s15 = sld [smem:[#allocation41_spill]] }
 0x1ac   : > { %s1435_s16 = scalar_lea.vmem %s15471_s5, %s15389_s23  ;;  %s15481_s11 = sld [smem:[#allocation43_spill]] }
 0x1ad   : > { %v1441_v0 = vld [vmem:[%s1435_s16] sm:$0xff]  ;;  %11541 = vmatpush3.bf16.msra.mxu0 %v12852_v10  ;;  %11549 = vmatpush3.bf16.msra.mxu1 %v12853_v11  ;;  %p15514_p5 = scmp.ne.s32.totalorder %s15450_s28, 0 }
 0x1ae   : > { %v1445_v1 = vsel %vm1444_vm0, %v1441_v0, 0.0  ;;  %11554 = vmatprep.subr.bf16.mxu0 %v13660_v9  ;;  %11562 = vmatprep.subr.bf16.mxu1 %v13660_v9  ;;  %v10704_v16 = vld [vmem:[%s15472_s13] ss:$0 sm:$0xff] }
 0x1af   : > { %1446 = vadd.xlane.f32.xlu0 %v1445_v1  ;;  %v10705_v18 = vld [vmem:[%s15473_s26] ss:$0 sm:$0xff]  ;;  %s15475_s3 = smov %s15474_s7  ;;  %v12867_v35 = vld [vmem:[%s15476_s22 + $0x10] sm:$0xff]   ;;  %v12868_v36 = vld [vmem:[%s15476_s22 + $0x8] sm:$0xff]   ;;  %s15483_s26 = sld [smem:[#allocation42_spill]] }
 0x1b0   : > { %v12858_v26 = vld [vmem:[%s15474_s7] sm:$0xff]   ;;  %v12859_v27 = vld [vmem:[%s15475_s3 + $0x10] sm:$0xff]   ;;  %v12860_v28 = vld [vmem:[%s15475_s3 + $0x8] sm:$0xff]   ;;  %s15484_s7 = sld [smem:[#allocation44_spill]] }
 0x1b1   : > { %v12861_v29 = vld [vmem:[%s15475_s3 + $0x18] sm:$0xff]   ;;  %v12862_v30 = vld [vmem:[%s15475_s3 + $0x20] sm:$0xff]   ;;  %v12863_v31 = vld [vmem:[%s15475_s3 + $0x30] sm:$0xff]   ;;  %s15480_s1 = smov %s15479_s15 }
 0x1b2   : > { %v12864_v32 = vld [vmem:[%s15475_s3 + $0x28] sm:$0xff]   ;;  %v12865_v33 = vld [vmem:[%s15475_s3 + $0x38] sm:$0xff]   ;;  %v12866_v34 = vld [vmem:[%s15476_s22] sm:$0xff]   ;;  %s15482_s16 = smov %s15481_s11 }
 0x1b3   : > { %v12869_v37 = vld [vmem:[%s15476_s22 + $0x18] sm:$0xff]   ;;  %v12870_v38 = vld [vmem:[%s15476_s22 + $0x20] sm:$0xff]   ;;  %v12871_v39 = vld [vmem:[%s15476_s22 + $0x30] sm:$0xff]  }
 0x1b4   : > { %v12872_v40 = vld [vmem:[%s15476_s22 + $0x28] sm:$0xff]   ;;  %v12873_v41 = vld [vmem:[%s15476_s22 + $0x38] sm:$0xff]  }
 0x1b6   : > { %s15485_s23 = smov %s15484_s7 }
 0x23c   : > { %v1447_v2 = vpop.xlane.xlu0 %1446 }
 0x23d   : > { %v1449_v3 = vmul.f32 0.03125, %v1447_v2 }
 0x23f   : > { %v1450_v4 = vsub.f32 %v1441_v0, %v1449_v3 }
 0x241   : > { %v1451_v5 = vmul.f32 %v1450_v4, %v1450_v4 }
 0x243   : > { %v1452_v6 = vsel %vm1444_vm0, %v1451_v5, 0.0 }
 0x244   : > { %1453 = vadd.xlane.f32.xlu0 %v1452_v6 }
 0x2d1   : > { %v1454_v12 = vpop.xlane.xlu0 %1453 }
 0x2d2   : > { %v1455_v13 = vmul.f32 0.03125, %v1454_v12 }
 0x2d4   : > { %v1456_v14 = vadd.f32 1e-12, %v1455_v13 }
 0x2d6   : > { %13020 = vrsqrt.f32 %v1456_v14 }
 0x2e0   : > { %v13021_v15 = vpop.eup %13020 }
 0x2e1   : > { %v1458_v17 = vmul.f32 %v13021_v15, %v1450_v4 }
 0x2e3   : > { %v1465_v19 = vmul.f32 %v10704_v16, %v1458_v17 }
 0x2e5   : > { %v14184_v20 = vadd.f32 %v10705_v18, %v1465_v19 }
 0x2e7   : > { %v14188_v23 = vpack.c.bf16 %v14184_v20, %v14184_v20 }
 0x2e9   : > { %11543 = vmatmul.mubr.msk.bf16.vlgmr.msra.gmra.mrb[0].mxu0 %vm1444_vm0, %v14188_v23  ;;  %11551 = vmatmul.mubr.msk.bf16.vlgmr.msra.gmra.mrb[0].mxu1 %vm1444_vm0, %v14188_v23 }
 0x2ea   : > { %11555 = vmatpush3.bf16.msra.mxu0 %v12854_v21  ;;  %11563 = vmatpush3.bf16.msra.mxu1 %v12855_v22 }
 0x2eb   : > { %11556 = vmatprep.subr.bf16.mxu0 %v13660_v9  ;;  %11564 = vmatprep.subr.bf16.mxu1 %v13660_v9 }
 0x2ec   : > { %11558 = vmatprep.mubr.msk.bf16.mxu0 %vm13661_vm1, %v13660_v9  ;;  %11566 = vmatprep.mubr.msk.bf16.mxu1 %vm13661_vm1, %v13660_v9 }
 0x2ee   : > { %11557 = vmatpush3.bf16.msra.mxu0 %v12856_v24  ;;  %11565 = vmatpush3.bf16.msra.mxu1 %v12857_v25 }
 0x2ef   : > { %11570 = vmatprep.subr.bf16.mxu0 %v13660_v9  ;;  %11578 = vmatprep.subr.bf16.mxu1 %v13660_v9 }
 0x2f1   : > { %11559 = vmatmul.mubr.msk.bf16.vlgmr.msra.gmra.mrb[4].mxu0 %vm1444_vm0, %v14188_v23  ;;  %11567 = vmatmul.mubr.msk.bf16.vlgmr.msra.gmra.mrb[4].mxu1 %vm1444_vm0, %v14188_v23 }
 0x2f2   : > { %11571 = vmatpush3.bf16.msra.mxu0 %v12858_v26  ;;  %11579 = vmatpush3.bf16.msra.mxu1 %v12859_v27 }
 0x2f3   : > { %11572 = vmatprep.subr.bf16.mxu0 %v13660_v9  ;;  %11580 = vmatprep.subr.bf16.mxu1 %v13660_v9 }
 0x2f4   : > { %11574 = vmatprep.mubr.msk.bf16.mxu0 %vm13661_vm1, %v13660_v9  ;;  %11582 = vmatprep.mubr.msk.bf16.mxu1 %vm13661_vm1, %v13660_v9 }
 0x2f6   : > { %11573 = vmatpush3.bf16.msra.mxu0 %v12860_v28  ;;  %11581 = vmatpush3.bf16.msra.mxu1 %v12861_v29 }
 0x2f7   : > { %11586 = vmatprep.subr.bf16.mxu0 %v13660_v9  ;;  %11594 = vmatprep.subr.bf16.mxu1 %v13660_v9 }
 0x2f9   : > { %11575 = vmatmul.mubr.msk.bf16.vlgmr.msra.gmra.mrb[8].mxu0 %vm1444_vm0, %v14188_v23  ;;  %11583 = vmatmul.mubr.msk.bf16.vlgmr.msra.gmra.mrb[8].mxu1 %vm1444_vm0, %v14188_v23 }
 0x2fa   : > { %11587 = vmatpush3.bf16.msra.mxu0 %v12862_v30  ;;  %11595 = vmatpush3.bf16.msra.mxu1 %v12863_v31 }
 0x2fb   : > { %11588 = vmatprep.subr.bf16.mxu0 %v13660_v9  ;;  %11596 = vmatprep.subr.bf16.mxu1 %v13660_v9 }
 0x2fc   : > { %11590 = vmatprep.mubr.msk.bf16.mxu0 %vm13661_vm1, %v13660_v9  ;;  %11598 = vmatprep.mubr.msk.bf16.mxu1 %vm13661_vm1, %v13660_v9 }
 0x2fe   : > { %11589 = vmatpush3.bf16.msra.mxu0 %v12864_v32  ;;  %11597 = vmatpush3.bf16.msra.mxu1 %v12865_v33 }
 0x2ff   : > { %11602 = vmatprep.subr.bf16.mxu0 %v13660_v9  ;;  %11610 = vmatprep.subr.bf16.mxu1 %v13660_v9 }
 0x301   : > { %11591 = vmatmul.mubr.msk.bf16.vlgmr.msra.gmra.mrb[12].mxu0 %vm1444_vm0, %v14188_v23  ;;  %11599 = vmatmul.mubr.msk.bf16.vlgmr.msra.gmra.mrb[12].mxu1 %vm1444_vm0, %v14188_v23 }
 0x302   : > { %11603 = vmatpush3.bf16.msra.mxu0 %v12866_v34  ;;  %11611 = vmatpush3.bf16.msra.mxu1 %v12867_v35 }
 0x303   : > { %11604 = vmatprep.subr.bf16.mxu0 %v13660_v9  ;;  %11612 = vmatprep.subr.bf16.mxu1 %v13660_v9 }
 0x304   : > { %11606 = vmatprep.mubr.msk.bf16.mxu0 %vm13661_vm1, %v13660_v9  ;;  %11614 = vmatprep.mubr.msk.bf16.mxu1 %vm13661_vm1, %v13660_v9 }
 0x306   : > { %11605 = vmatpush3.bf16.msra.mxu0 %v12868_v36  ;;  %11613 = vmatpush3.bf16.msra.mxu1 %v12869_v37 }
 0x307   : > { %11618 = vmatprep.subr.bf16.mxu0 %v13660_v9  ;;  %11626 = vmatprep.subr.bf16.mxu1 %v13660_v9 }
 0x309   : > { %11607 = vmatmul.mubr.msk.bf16.vlgmr.msra.gmra.mrb[16].mxu0 %vm1444_vm0, %v14188_v23  ;;  %11615 = vmatmul.mubr.msk.bf16.vlgmr.msra.gmra.mrb[16].mxu1 %vm1444_vm0, %v14188_v23 }
 0x30a   : > { %11619 = vmatpush3.bf16.msra.mxu0 %v12870_v38  ;;  %11627 = vmatpush3.bf16.msra.mxu1 %v12871_v39 }
 0x30b   : > { %11620 = vmatprep.subr.bf16.mxu0 %v13660_v9  ;;  %11628 = vmatprep.subr.bf16.mxu1 %v13660_v9 }
 0x30c   : > { %11622 = vmatprep.mubr.msk.bf16.mxu0 %vm13661_vm1, %v13660_v9  ;;  %11630 = vmatprep.mubr.msk.bf16.mxu1 %vm13661_vm1, %v13660_v9 }
 0x30e   : > { %11621 = vmatpush3.bf16.msra.mxu0 %v12872_v40  ;;  %11629 = vmatpush3.bf16.msra.mxu1 %v12873_v41 }
 0x30f   : > { %11634 = vmatprep.subr.bf16.mxu0 %v13660_v9  ;;  %11640 = vmatprep.subr.bf16.mxu1 %v13660_v9 }
 0x311   : > { %11623 = vmatmul.mubr.msk.bf16.vlgmr.msra.gmra.mrb[20].mxu0 %vm1444_vm0, %v14188_v23  ;;  %11631 = vmatmul.mubr.msk.bf16.vlgmr.msra.gmra.mrb[20].mxu1 %vm1444_vm0, %v14188_v23 }
 0x312   : > { %11636 = vmatprep.mubr.msk.bf16.mxu0 %vm13661_vm1, %v13660_v9  ;;  %11642 = vmatprep.mubr.msk.bf16.mxu1 %vm13661_vm1, %v13660_v9 }
 0x3bc   : > { %v1576_v42 = vpop.f32.mrb[0].mxu0  ;;  %v1628_v43 = vpop.f32.mrb[0].mxu1 }
 0x3bd   : > { %v11544_v44 = vpop.f32.mrb[1].mxu0  ;;  %v11552_v45 = vpop.f32.mrb[1].mxu1  ;;  %v1738_v8 = vpack.c.bf16 %v1576_v42, %v1576_v42  ;;  %v1739_v10 = vpack.c.bf16 %v1628_v43, %v1628_v43 }
 0x3be   : > { %v1579_v46 = vpop.f32.mrb[2].mxu0  ;;  %v1631_v47 = vpop.f32.mrb[2].mxu1 }
 0x3bf   : > { %v11545_v48 = vpop.f32.mrb[3].mxu0  ;;  %v11553_v49 = vpop.f32.mrb[3].mxu1 }
 0x3c4   : > { %v1680_v50 = vpop.f32.mrb[4].mxu0  ;;  %v1732_v51 = vpop.f32.mrb[4].mxu1 }
 0x3c5   : > { %v11560_v52 = vpop.f32.mrb[5].mxu0  ;;  %v11568_v53 = vpop.f32.mrb[5].mxu1  ;;  %v1740_v24 = vpack.c.bf16 %v1680_v50, %v1680_v50  ;;  %v1741_v25 = vpack.c.bf16 %v1732_v51, %v1732_v51 }
 0x3c6   : > { %v1683_v54 = vpop.f32.mrb[6].mxu0  ;;  %v1735_v55 = vpop.f32.mrb[6].mxu1 }
 0x3c7   : > { %v11561_v56 = vpop.f32.mrb[7].mxu0  ;;  %v11569_v57 = vpop.f32.mrb[7].mxu1 }
 0x3cc   : > { %v1788_v58 = vpop.f32.mrb[8].mxu0  ;;  %v1840_v59 = vpop.f32.mrb[8].mxu1 }
 0x3cd   : > { %v1950_v60 = vpack.c.bf16 %v1788_v58, %v1788_v58  ;;  %v1951_v61 = vpack.c.bf16 %v1840_v59, %v1840_v59  ;;  %v11576_v62 = vpop.f32.mrb[9].mxu0  ;;  %v11584_v63 = vpop.f32.mrb[9].mxu1 }
 0x3ce   : > { %v1791_v0 = vpop.f32.mrb[10].mxu0  ;;  %v1843_v1 = vpop.f32.mrb[10].mxu1 }
 0x3cf   : > { %v11577_v2 = vpop.f32.mrb[11].mxu0  ;;  %v11585_v3 = vpop.f32.mrb[11].mxu1  ;;  %v2171_v4 = vsel %vm2166_vm2, %v1950_v60, 0  ;;  %v2217_v5 = vsel %vm2166_vm2, %v1951_v61, 0 }
 0x3d0   : > { %11635 = vmatpush3.bf16.xpose.msra.mxu0 %v2171_v4  ;;  %11641 = vmatpush3.bf16.xpose.msra.mxu1 %v2217_v5 }
 0x3d1   : > { %11646 = vmatprep.subr.bf16.mxu0 %v13660_v9  ;;  %11652 = vmatprep.subr.bf16.mxu1 %v13660_v9 }
 0x3d4   : > { %v1892_v6 = vpop.f32.mrb[12].mxu0  ;;  %v1944_v7 = vpop.f32.mrb[12].mxu1 }
 0x3d5   : > { %v1952_v11 = vpack.c.bf16 %v1892_v6, %v1892_v6  ;;  %v1953_v12 = vpack.c.bf16 %v1944_v7, %v1944_v7  ;;  %v11592_v13 = vpop.f32.mrb[13].mxu0  ;;  %v11600_v14 = vpop.f32.mrb[13].mxu1 }
 0x3d6   : > { %v1895_v15 = vpop.f32.mrb[14].mxu0  ;;  %v1947_v16 = vpop.f32.mrb[14].mxu1 }
 0x3d7   : > { %v11593_v17 = vpop.f32.mrb[15].mxu0  ;;  %v11601_v18 = vpop.f32.mrb[15].mxu1  ;;  %11637 = vmatmul.mubr.msk.bf16.vlgmr.msra.gmra.mrb[24].mxu0 %vm2166_vm2, %v1738_v8  ;;  %11643 = vmatmul.mubr.msk.bf16.vlgmr.msra.gmra.mrb[24].mxu1 %vm2166_vm2, %v1739_v10  ;;  %v2263_v19 = vsel %vm2166_vm2, %v1952_v11, 0  ;;  %v2309_v21 = vsel %vm2166_vm2, %v1953_v12, 0 }
 0x3d8   : > { %11647 = vmatpush3.bf16.xpose.msra.mxu0 %v2263_v19  ;;  %11653 = vmatpush3.bf16.xpose.msra.mxu1 %v2309_v21 }
 0x3d9   : > { %11648 = vmatprep.mubr.msk.bf16.mxu0 %vm13661_vm1, %v13660_v9  ;;  %11654 = vmatprep.mubr.msk.bf16.mxu1 %vm13661_vm1, %v13660_v9 }
 0x3da   : > { %11658 = vmatprep.subr.bf16.mxu0 %v13660_v9  ;;  %11664 = vmatprep.subr.bf16.mxu1 %v13660_v9 }
 0x3dc   : > { %v2000_v22 = vpop.f32.mrb[16].mxu0  ;;  %v2052_v23 = vpop.f32.mrb[16].mxu1 }
 0x3dd   : > { %v2162_v26 = vpack.c.bf16 %v2000_v22, %v2000_v22  ;;  %v2163_v27 = vpack.c.bf16 %v2052_v23, %v2052_v23  ;;  %v11608_v28 = vpop.f32.mrb[17].mxu0  ;;  %v11616_v29 = vpop.f32.mrb[17].mxu1 }
 0x3de   : > { %v2003_v30 = vpop.f32.mrb[18].mxu0  ;;  %v2055_v31 = vpop.f32.mrb[18].mxu1 }
 0x3df   : > { %v11609_v32 = vpop.f32.mrb[19].mxu0  ;;  %v11617_v33 = vpop.f32.mrb[19].mxu1  ;;  %11649 = vmatmul.mubr.msk.bf16.vlgmr.msra.gmra.mrb[28].mxu0 %vm2166_vm2, %v1740_v24  ;;  %11655 = vmatmul.mubr.msk.bf16.vlgmr.msra.gmra.mrb[28].mxu1 %vm2166_vm2, %v1741_v25  ;;  %v2404_v34 = vsel %vm2402_vm3, %v2162_v26, 0  ;;  %v2450_v35 = vsel %vm2402_vm3, %v2163_v27, 0 }
 0x3e0   : > { %11659 = vmatpush3.bf16.msra.mxu0 %v2404_v34  ;;  %11665 = vmatpush3.bf16.msra.mxu1 %v2450_v35 }
 0x3e1   : > { %11660 = vmatprep.mubr.msk.bf16.mxu0 %vm13661_vm1, %v13660_v9  ;;  %11670 = vmatprep.subr.bf16.mxu0 %v13660_v9 }
 0x3e2   : > { %11666 = vmatprep.mubr.msk.bf16.mxu1 %vm13661_vm1, %v13660_v9  ;;  %11676 = vmatprep.subr.bf16.mxu1 %v13660_v9 }
 0x3e4   : > { %v14298_v36 = vpop.f32.mrb[20].mxu0  ;;  %v14300_v37 = vpop.f32.mrb[20].mxu1 }
 0x3e5   : > { %v11624_v38 = vpop.f32.mrb[21].mxu0  ;;  %v11632_v39 = vpop.f32.mrb[21].mxu1  ;;  %v2164_v27 = vpack.c.bf16 %v14298_v36, %v14298_v36  ;;  %v2165_v31 = vpack.c.bf16 %v14300_v37, %v14300_v37 }
 0x3e6   : > { %v2107_v40 = vpop.f32.mrb[22].mxu0  ;;  %v2159_v41 = vpop.f32.mrb[22].mxu1  ;;  %v1522_v39 = vld [vmem:[#allocation5] sm:$0xf] }
 0x3e7   : > { %v11625_v42 = vpop.f32.mrb[23].mxu0  ;;  %v11633_v43 = vpop.f32.mrb[23].mxu1  ;;  %v2496_v33 = vsel %vm2402_vm3, %v2164_v27, 0  ;;  %v2542_v38 = vsel %vm2402_vm3, %v2165_v31, 0 }
 0x3e8   : > { %v2592_v42 = vsel %vm2402_vm3, %v1522_v39, 0 }
 0x4aa   : > { %v2207_v44 = vpop.f32.mrb[24].mxu0  ;;  %v2253_v45 = vpop.f32.mrb[24].mxu1 }
 0x4ab   : > { %v11638_v46 = vpop.f32.mrb[25].mxu0  ;;  %v11644_v47 = vpop.f32.mrb[25].mxu1  ;;  %v2351_v48 = vsel %vm2166_vm2, %v2207_v44, -inf  ;;  %v2354_v53 = vsel %vm2166_vm2, %v2253_v45, -inf }
 0x4ac   : > { %v2256_v49 = vpop.f32.mrb[26].mxu1  ;;  %2352 = vmax.xlane.f32.xlu1 %v2351_v48  ;;  %v2210_v50 = vpop.f32.mrb[26].mxu0  ;;  %v1524_v46 = vld [vmem:[#allocation5 + $0x8] sm:$0xf] }
 0x4ad   : > { %v11639_v51 = vpop.f32.mrb[27].mxu0  ;;  %v11645_v52 = vpop.f32.mrb[27].mxu1  ;;  %v2684_v50 = vsel %vm2402_vm3, %v1524_v46, 0 }
 0x4ae   : > { %v1525_v52 = vld [vmem:[#allocation5 + $0xc] sm:$0xf] }
 0x4b0   : > { %2355 = vmax.xlane.f32.xlu1 %v2354_v53 }
 0x4b2   : > { %v2299_v54 = vpop.f32.mrb[28].mxu0  ;;  %v2345_v55 = vpop.f32.mrb[28].mxu1 }
 0x4b3   : > { %v11650_v56 = vpop.f32.mrb[29].mxu0  ;;  %v11656_v57 = vpop.f32.mrb[29].mxu1  ;;  %v2360_v58 = vsel %vm2166_vm2, %v2345_v55, -inf  ;;  %v2357_v59 = vsel %vm2166_vm2, %v2299_v54, -inf }
 0x4b4   : > { %v2348_v60 = vpop.f32.mrb[30].mxu1  ;;  %2361 = vmax.xlane.f32.xlu1 %v2360_v58  ;;  %2358 = vmax.xlane.f32.xlu0 %v2357_v59  ;;  %v2302_v61 = vpop.f32.mrb[30].mxu0  ;;  %v2730_v57 = vsel %vm2402_vm3, %v1525_v52, 0  ;;  %v12877_v52 = vld [vmem:[%s15482_s16 + $0x8] sm:$0xff]  }
 0x4b5   : > { %v11651_v62 = vpop.f32.mrb[31].mxu0  ;;  %v11657_v63 = vpop.f32.mrb[31].mxu1 }
 0x539   : > { %v2353_v0 = vpop.xlane.xlu1 %2352 }
 0x53a   : > { %v2363_v1 = vsub.f32 %v2207_v44, %v2353_v0  ;;  %v1523_v44 = vld [vmem:[#allocation5 + $0x4] sm:$0xf] }
 0x53c   : > { %v2367_v2 = vmul.f32 1.442695, %v2363_v1 }
 0x53d   : > { %v2356_v3 = vpop.xlane.xlu1 %2355 }
 0x53e   : > { %13022 = vpow2.f32 %v2367_v2  ;;  %v2364_v4 = vsub.f32 %v2253_v45, %v2356_v3  ;;  %v2638_v45 = vsel %vm2402_vm3, %v1523_v44, 0 }
 0x540   : > { %v2369_v5 = vmul.f32 1.442695, %v2364_v4 }
 0x541   : > { %v2362_v6 = vpop.xlane.xlu1 %2361  ;;  %v2359_v7 = vpop.xlane.xlu0 %2358 }
 0x542   : > { %13024 = vpow2.f32 %v2369_v5  ;;  %v2366_v8 = vsub.f32 %v2345_v55, %v2362_v6  ;;  %v2365_v10 = vsub.f32 %v2299_v54, %v2359_v7 }
 0x544   : > { %v2373_v11 = vmul.f32 1.442695, %v2366_v8  ;;  %v2371_v12 = vmul.f32 1.442695, %v2365_v10 }
 0x546   : > { %13026 = vpow2.f32 %v2373_v11 }
 0x547   : > { %13028 = vpow2.f32 %v2371_v12 }
 0x548   : > { %v13023_v13 = vpop.eup %13022 }
 0x549   : > { %v2375_v14 = vsel %vm2166_vm2, %v13023_v13, 0.0 }
 0x54a   : > { %2376 = vadd.xlane.f32.xlu0 %v2375_v14 }
 0x54c   : > { %v13025_v15 = vpop.eup %13024 }
 0x54d   : > { %v2378_v16 = vsel %vm2166_vm2, %v13025_v15, 0.0 }
 0x54e   : > { %2379 = vadd.xlane.f32.xlu1 %v2378_v16 }
 0x550   : > { %v13027_v17 = vpop.eup %13026 }
 0x551   : > { %v13029_v18 = vpop.eup %13028  ;;  %v2384_v19 = vsel %vm2166_vm2, %v13027_v17, 0.0 }
 0x552   : > { %2385 = vadd.xlane.f32.xlu1 %v2384_v19  ;;  %v2381_v21 = vsel %vm2166_vm2, %v13029_v18, 0.0 }
 0x553   : > { %2382 = vadd.xlane.f32.xlu0 %v2381_v21 }
 0x5d7   : > { %v2377_v22 = vpop.xlane.xlu0 %2376 }
 0x5d8   : > { %13030 = vrcp.f32 %v2377_v22 }
 0x5db   : > { %v2380_v23 = vpop.xlane.xlu1 %2379 }
 0x5dc   : > { %13032 = vrcp.f32 %v2380_v23 }
 0x5df   : > { %v2386_v24 = vpop.xlane.xlu1 %2385 }
 0x5e0   : > { %13034 = vrcp.f32 %v2386_v24  ;;  %v2383_v25 = vpop.xlane.xlu0 %2382 }
 0x5e1   : > { %13036 = vrcp.f32 %v2383_v25 }
 0x5e2   : > { %v13031_v26 = vpop.eup %13030 }
 0x5e3   : > { %v2391_v28 = vmul.f32 %v13031_v26, %v13023_v13 }
 0x5e5   : > { %v2395_v29 = vpack.c.bf16 %v2391_v28, %v2391_v28  ;;  %v10754_v28 = vld [vmem:[%s15477_s18] ss:$0 sm:$0xff] }
 0x5e6   : > { %v13033_v30 = vpop.eup %13032 }
 0x5e7   : > { %v2392_v32 = vmul.f32 %v13033_v30, %v13025_v15  ;;  %11661 = vmatmul.mubr.msk.bf16.vlgmr.msra.gmra.mrb[32].mxu0 %vm2166_vm2, %v2395_v29 }
 0x5e8   : > { %11671 = vmatpush3.bf16.msra.mxu0 %v2496_v33  ;;  %11672 = vmatprep.mubr.msk.bf16.mxu0 %vm13661_vm1, %v13660_v9 }
 0x5e9   : > { %v2396_v34 = vpack.c.bf16 %v2392_v32, %v2392_v32  ;;  %11682 = vmatprep.subr.bf16.mxu0 %v13660_v9 }
 0x5ea   : > { %v13035_v35 = vpop.eup %13034 }
 0x5eb   : > { %v13037_v36 = vpop.eup %13036  ;;  %11667 = vmatmul.mubr.msk.bf16.vlgmr.msra.gmra.mrb[32].mxu1 %vm2166_vm2, %v2396_v34  ;;  %v2394_v40 = vmul.f32 %v13035_v35, %v13027_v17 }
 0x5ec   : > { %v2393_v37 = vmul.f32 %v13037_v36, %v13029_v18  ;;  %11677 = vmatpush3.bf16.msra.mxu1 %v2542_v38  ;;  %11678 = vmatprep.mubr.msk.bf16.mxu1 %vm13661_vm1, %v13660_v9 }
 0x5ed   : > { %11688 = vmatprep.subr.bf16.mxu1 %v13660_v9  ;;  %v2398_v43 = vpack.c.bf16 %v2394_v40, %v2394_v40  ;;  %v12874_v40 = vld [vmem:[#allocation7] sm:$0xff]  }
 0x5ee   : > { %v2397_v41 = vpack.c.bf16 %v2393_v37, %v2393_v37 }
 0x5f0   : > { %11673 = vmatmul.mubr.msk.bf16.vlgmr.msra.gmra.mrb[36].mxu0 %vm2166_vm2, %v2397_v41  ;;  %v12875_v41 = vld [vmem:[#allocation7 + $0x8] sm:$0xff]  }
 0x5f1   : > { %11683 = vmatpush3.bf16.msra.mxu0 %v2592_v42  ;;  %11684 = vmatprep.mubr.msk.bf16.mxu0 %vm13661_vm1, %v13660_v9 }
 0x5f2   : > { %11694 = vmatprep.subr.bf16.mxu0 %v13660_v9 }
 0x5f3   : > { %11679 = vmatmul.mubr.msk.bf16.vlgmr.msra.gmra.mrb[36].mxu1 %vm2166_vm2, %v2398_v43 }
 0x5f4   : > { %11690 = vmatprep.mubr.msk.bf16.mxu1 %vm13661_vm1, %v13660_v9  ;;  %11689 = vmatpush3.bf16.msra.mxu1 %v2638_v45  ;;  %v10755_v45 = vld [vmem:[%s15478_s27] ss:$0 sm:$0xff] }
 0x5f5   : > { %11700 = vmatprep.subr.bf16.mxu1 %v13660_v9 }
 0x6ba   : > { %v2440_v47 = vpop.f32.mrb[32].mxu0 }
 0x6bb   : > { %v2584_v48 = vpack.c.bf16 %v2440_v47, %v2440_v47  ;;  %v11662_v49 = vpop.f32.mrb[33].mxu0  ;;  %v10756_v47 = vld [vmem:[%s15479_s15] ss:$0 sm:$0xff]  ;;  %s15486_s15 = sld [smem:[#allocation45_spill]] }
 0x6bc   : > { %v2443_v51 = vpop.f32.mrb[34].mxu0 }
 0x6bd   : > { %v11663_v53 = vpop.f32.mrb[35].mxu0  ;;  %11685 = vmatmul.mubr.msk.bf16.vlgmr.msra.gmra.mrb[40].mxu0 %vm2166_vm2, %v2584_v48  ;;  %v12876_v51 = vld [vmem:[%s15481_s11] sm:$0xff]   ;;  %s15488_s11 = sld [smem:[#allocation46_spill]] }
 0x6be   : > { %v2486_v54 = vpop.f32.mrb[32].mxu1  ;;  %11695 = vmatpush3.bf16.msra.mxu0 %v2684_v50  ;;  %11696 = vmatprep.mubr.msk.bf16.mxu0 %vm13661_vm1, %v13660_v9  ;;  %v12878_v53 = vld [vmem:[%s15482_s16 + $0x10] sm:$0xff]  }
 0x6bf   : > { %v2585_v55 = vpack.c.bf16 %v2486_v54, %v2486_v54  ;;  %v11668_v56 = vpop.f32.mrb[33].mxu1  ;;  %11706 = vmatprep.subr.bf16.mxu0 %v13660_v9  ;;  %v12879_v54 = vld [vmem:[%s15482_s16 + $0x18] sm:$0xff]  }
 0x6c0   : > { %v2489_v58 = vpop.f32.mrb[34].mxu1 }
 0x6c1   : > { %v11669_v59 = vpop.f32.mrb[35].mxu1  ;;  %11691 = vmatmul.mubr.msk.bf16.vlgmr.msra.gmra.mrb[40].mxu1 %vm2166_vm2, %v2585_v55  ;;  %v10757_v55 = vld [vmem:[%s15483_s26] ss:$0 sm:$0xff]  ;;  %s15487_s4 = smov %s15486_s15 }
 0x6c2   : > { %11701 = vmatpush3.bf16.msra.mxu1 %v2730_v57  ;;  %11702 = vmatprep.mubr.msk.bf16.mxu1 %vm13661_vm1, %v13660_v9 }
 0x6c3   : > { %v2532_v60 = vpop.f32.mrb[36].mxu0  ;;  %11714 = vmatprep.subr.bf16.mxu1 %v13660_v9  ;;  %s15489_s5 = smov %s15488_s11 }
 0x6c4   : > { %v2586_v61 = vpack.c.bf16 %v2532_v60, %v2532_v60  ;;  %v11674_v62 = vpop.f32.mrb[37].mxu0 }
 0x6c5   : > { %v2535_v63 = vpop.f32.mrb[38].mxu0 }
 0x6c6   : > { %v11675_v0 = vpop.f32.mrb[39].mxu0  ;;  %11697 = vmatmul.mubr.msk.bf16.vlgmr.msra.gmra.mrb[44].mxu0 %vm2166_vm2, %v2586_v61  ;;  %v2578_v1 = vpop.f32.mrb[36].mxu1 }
 0x6c7   : > { %v2587_v2 = vpack.c.bf16 %v2578_v1, %v2578_v1  ;;  %v11680_v3 = vpop.f32.mrb[37].mxu1  ;;  %11710 = vmatprep.mubr.msk.bf16.mxu0 %vm13661_vm1, %v13660_v9  ;;  %11707 = vmatpush3.bf16.msra.mxu0 %v12874_v40  ;;  %v12888_v40 = vld [vmem:[#allocation2 + $0x70] sm:$0xff]  }
 0x6c8   : > { %v2581_v4 = vpop.f32.mrb[38].mxu1  ;;  %11708 = vmatprep.subr.bf16.mxu0 %v13660_v9 }
 0x6c9   : > { %v11681_v5 = vpop.f32.mrb[39].mxu1  ;;  %11703 = vmatmul.mubr.msk.bf16.vlgmr.msra.gmra.mrb[44].mxu1 %vm2166_vm2, %v2587_v2 }
 0x6ca   : > { %11722 = vmatprep.mubr.msk.bf16.mxu1 %vm13661_vm1, %v13660_v9  ;;  %11715 = vmatpush3.bf16.msra.mxu1 %v12876_v51  ;;  %v12900_v51 = vld [vmem:[%s15476_s22 + $0x50] sm:$0xff]  }
 0x6cb   : > { %11709 = vmatpush3.bf16.msra.mxu0 %v12875_v41  ;;  %11716 = vmatprep.subr.bf16.mxu1 %v13660_v9  ;;  %v12889_v41 = vld [vmem:[%s15475_s3 + $0x60] sm:$0xff]  }
 0x6cc   : > { %11726 = vmatprep.subr.bf16.mxu0 %v13660_v9 }
 0x6ce   : > { %11717 = vmatpush3.bf16.msra.mxu1 %v12877_v52  ;;  %v12901_v52 = vld [vmem:[%s15476_s22 + $0x58] sm:$0xff]  }
 0x6cf   : > { %11718 = vmatprep.subr.bf16.mxu1 %v13660_v9 }
 0x6d2   : > { %11719 = vmatpush3.bf16.msra.mxu1 %v12878_v53  ;;  %v12902_v53 = vld [vmem:[%s15476_s22 + $0x70] sm:$0xff]  }
 0x6d3   : > { %11720 = vmatprep.subr.bf16.mxu1 %v13660_v9 }
 0x6d6   : > { %11721 = vmatpush3.bf16.msra.mxu1 %v12879_v54  ;;  %v12903_v54 = vld [vmem:[%s15476_s22 + $0x78] sm:$0xff]  }
 0x6d7   : > { %11742 = vmatprep.subr.bf16.mxu1 %v13660_v9 }
 0x790   : > { %v2628_v6 = vpop.f32.mrb[40].mxu0 }
 0x791   : > { %v11686_v7 = vpop.f32.mrb[41].mxu0  ;;  %v2772_v12 = vsel %vm1444_vm0, %v2628_v6, 0.0 }
 0x792   : > { %v2631_v8 = vpop.f32.mrb[42].mxu0  ;;  %v10761_v7 = vld [vmem:[%s15484_s7] ss:$0 sm:$0xff]  ;;  %s15490_s7 = sld [smem:[#allocation33_spill]] }
 0x793   : > { %v11687_v10 = vpop.f32.mrb[43].mxu0 }
 0x794   : > { %v2674_v11 = vpop.f32.mrb[40].mxu1 }
 0x795   : > { %v2773_v13 = vsel %vm1444_vm0, %v2674_v11, 0.0  ;;  %v11692_v14 = vpop.f32.mrb[41].mxu1 }
 0x796   : > { %v2774_v15 = vadd.f32 %v2773_v13, %v2772_v12  ;;  %v2677_v16 = vpop.f32.mrb[42].mxu1 }
 0x797   : > { %v11693_v17 = vpop.f32.mrb[43].mxu1 }
 0x799   : > { %v2720_v18 = vpop.f32.mrb[44].mxu0 }
 0x79a   : > { %v2775_v19 = vsel %vm1444_vm0, %v2720_v18, 0.0  ;;  %v11698_v21 = vpop.f32.mrb[45].mxu0 }
 0x79b   : > { %v2776_v22 = vadd.f32 %v2775_v19, %v2774_v15  ;;  %v2723_v23 = vpop.f32.mrb[46].mxu0 }
 0x79c   : > { %v11699_v24 = vpop.f32.mrb[47].mxu0  ;;  %v2766_v25 = vpop.f32.mrb[44].mxu1  ;;  %v12881_v23 = vld [vmem:[#allocation2 + $0x60] sm:$0xff]  }
 0x79d   : > { %v2777_v26 = vsel %vm1444_vm0, %v2766_v25, 0.0  ;;  %v11704_v27 = vpop.f32.mrb[45].mxu1  ;;  %v12882_v24 = vld [vmem:[#allocation2 + $0x48] sm:$0xff]  }
 0x79e   : > { %v2778_v29 = vadd.f32 %v2777_v26, %v2776_v22  ;;  %v2769_v30 = vpop.f32.mrb[46].mxu1  ;;  %v12880_v22 = vld [vmem:[#allocation2 + $0x40] sm:$0xff]   ;;  %v12883_v25 = vld [vmem:[#allocation2 + $0x68] sm:$0xff]  }
 0x79f   : > { %v11705_v31 = vpop.f32.mrb[47].mxu1  ;;  %v10767_v30 = vld [vmem:[%s15486_s15] ss:$0 sm:$0xff]  ;;  %s15491_s15 = sshll.u32 %s14164_s2, 3  ;;  %s15492_s2 = sld [smem:[#allocation47_spill]] }
 0x7a0   : > { %v2785_v32 = vadd.f32 %v10754_v28, %v2778_v29 }
 0x7a2   : > { %v2786_v33 = vadd.f32 %v2785_v32, %v14184_v20  ;;  %v10768_v32 = vld [vmem:[%s15488_s11] ss:$0 sm:$0xff]  ;;  %s1439_s11 = scalar_lea.vmem %s15490_s7, %s15491_s15  ;;  %s15493_s7 = sld [smem:[#allocation48_spill]] }
 0x7a3   : > { %s15494_s15 = sld [smem:[#allocation49_spill]] }
 0x7a4   : > { %v2789_v34 = vsel %vm1444_vm0, %v2786_v33, 0.0 }
 0x7a5   : > { %2790 = vadd.xlane.f32.xlu0 %v2789_v34 }
 0x832   : > { %v2791_v35 = vpop.xlane.xlu0 %2790 }
 0x833   : > { %v2792_v36 = vmul.f32 0.03125, %v2791_v35  ;;  %v12884_v35 = vld [vmem:[#allocation2 + $0x50] sm:$0xff]  }
 0x835   : > { %v2793_v38 = vsub.f32 %v2786_v33, %v2792_v36  ;;  %v12885_v36 = vld [vmem:[%s15475_s3 + $0x40] sm:$0xff]  }
 0x837   : > { %v2794_v39 = vmul.f32 %v2793_v38, %v2793_v38 }
 0x839   : > { %v2795_v37 = vsel %vm1444_vm0, %v2794_v39, 0.0  ;;  %v12886_v39 = vld [vmem:[#allocation2 + $0x58] sm:$0xff]  }
 0x83a   : > { %2796 = vadd.xlane.f32.xlu1 %v2795_v37  ;;  %v12887_v37 = vld [vmem:[%s15475_s3 + $0x48] sm:$0xff]  }
 0x8c7   : > { %v2797_v20 = vpop.xlane.xlu1 %2796 }
 0x8c8   : > { %v2798_v42 = vmul.f32 0.03125, %v2797_v20  ;;  %v12890_v20 = vld [vmem:[#allocation2 + $0x78] sm:$0xff]  }
 0x8ca   : > { %v2799_v43 = vadd.f32 1e-12, %v2798_v42  ;;  %v12891_v42 = vld [vmem:[%s15475_s3 + $0x68] sm:$0xff]  }
 0x8cc   : > { %13038 = vrsqrt.f32 %v2799_v43  ;;  %v12892_v43 = vld [vmem:[%s15475_s3 + $0x50] sm:$0xff]  }
 0x8d6   : > { %v13039_v44 = vpop.eup %13038 }
 0x8d7   : > { %v2801_v46 = vmul.f32 %v13039_v44, %v2793_v38  ;;  %v12893_v44 = vld [vmem:[%s15476_s22 + $0x40] sm:$0xff]  }
 0x8d9   : > { %v2808_v48 = vmul.f32 %v10755_v45, %v2801_v46  ;;  %v12894_v45 = vld [vmem:[%s15475_s3 + $0x58] sm:$0xff]   ;;  %v12895_v46 = vld [vmem:[%s15476_s22 + $0x48] sm:$0xff]  }
 0x8db   : > { %v2815_v49 = vadd.f32 %v10756_v47, %v2808_v48  ;;  %v12896_v47 = vld [vmem:[%s15475_s3 + $0x70] sm:$0xff]   ;;  %v12897_v48 = vld [vmem:[%s15476_s22 + $0x60] sm:$0xff]  }
 0x8dd   : > { %v2821_v50 = vpack.c.bf16 %v2815_v49, %v2815_v49 }
 0x8df   : > { %11711 = vmatmul.mubr.msk.bf16.vlgmr.msra.gmra.mrb[48].mxu0 %vm1444_vm0, %v2821_v50  ;;  %v12899_v50 = vld [vmem:[%s15476_s22 + $0x68] sm:$0xff]  }
 0x8e0   : > { %11730 = vmatprep.mubr.msk.bf16.mxu0 %vm13661_vm1, %v13660_v9  ;;  %11727 = vmatpush3.bf16.msra.mxu0 %v12880_v22 }
 0x8e1   : > { %11728 = vmatprep.subr.bf16.mxu0 %v13660_v9 }
 0x8e4   : > { %11729 = vmatpush3.bf16.msra.mxu0 %v12882_v24 }
 0x8e5   : > { %11734 = vmatprep.subr.bf16.mxu0 %v13660_v9 }
 0x9b2   : > { %v2877_v56 = vpop.f32.mrb[48].mxu0 }
 0x9b3   : > { %v2878_v57 = vadd.f32 %v10757_v55, %v2877_v56  ;;  %v11712_v58 = vpop.f32.mrb[49].mxu0 }
 0x9b4   : > { %v2880_v59 = vpop.f32.mrb[50].mxu0 }
 0x9b5   : > { %v2883_v60 = vmul.f32 %v2878_v57, %v2878_v57  ;;  %v11713_v61 = vpop.f32.mrb[51].mxu0 }
 0x9b7   : > { %v2884_v62 = vmul.f32 %v2883_v60, %v2878_v57 }
 0x9b9   : > { %v2885_v63 = vmul.f32 0.044715, %v2884_v62 }
 0x9bb   : > { %v2886_v0 = vadd.f32 %v2885_v63, %v2878_v57 }
 0x9bd   : > { %v2887_v1 = vmul.f32 0.7978846, %v2886_v0 }
 0x9bf   : > { %13040 = vtanh.f32 %v2887_v1 }
 0x9c9   : > { %v13041_v2 = vpop.eup %13040 }
 0x9ca   : > { %v2889_v3 = vadd.f32 1.0, %v13041_v2 }
 0x9cc   : > { %v2890_v4 = vmul.f32 0.5, %v2889_v3 }
 0x9ce   : > { %v2891_v5 = vmul.f32 %v2890_v4, %v2878_v57 }
 0x9d0   : > { %v2901_v6 = vpack.c.bf16 %v2891_v5, %v2891_v5 }
 0x9d2   : > { %11723 = vmatmul.mubr.msk.bf16.vlgmr.msra.gmra.mrb[48].mxu1 %vm2932_vm4, %v2901_v6 }
 0x9d3   : > { %11746 = vmatprep.mubr.msk.bf16.mxu1 %vm13661_vm1, %v13660_v9  ;;  %11743 = vmatpush3.bf16.msra.mxu1 %v12881_v23 }
 0x9d4   : > { %11744 = vmatprep.subr.bf16.mxu1 %v13660_v9 }
 0x9d7   : > { %11745 = vmatpush3.bf16.msra.mxu1 %v12883_v25 }
 0x9d8   : > { %11758 = vmatprep.subr.bf16.mxu1 %v13660_v9 }
 0xaa5   : > { %v2970_v8 = vpop.f32.mrb[48].mxu1 }
 0xaa6   : > { %v2971_v10 = vadd.f32 %v10761_v7, %v2970_v8  ;;  %v11724_v11 = vpop.f32.mrb[49].mxu1 }
 0xaa7   : > { %v2973_v12 = vpop.f32.mrb[50].mxu1 }
 0xaa8   : > { %v11725_v13 = vpop.f32.mrb[51].mxu1  ;;  %v2976_v14 = vadd.f32 %v2971_v10, %v2815_v49  ;;  %v12898_v49 = vld [vmem:[%s15475_s3 + $0x78] sm:$0xff]   ;;  %s15495_s3 = smov %s15494_s15 }
 0xaaa   : > { %v2979_v15 = vsel %vm1444_vm0, %v2976_v14, 0.0 }
 0xaab   : > { %2980 = vadd.xlane.f32.xlu0 %v2979_v15 }
 0xb38   : > { %v2981_v16 = vpop.xlane.xlu0 %2980 }
 0xb39   : > { %v2982_v17 = vmul.f32 0.03125, %v2981_v16 }
 0xb3b   : > { %v2983_v18 = vsub.f32 %v2976_v14, %v2982_v17 }
 0xb3d   : > { %v2984_v19 = vmul.f32 %v2983_v18, %v2983_v18 }
 0xb3f   : > { %v2985_v21 = vsel %vm1444_vm0, %v2984_v19, 0.0 }
 0xb40   : > { %2986 = vadd.xlane.f32.xlu1 %v2985_v21 }
 0xbcd   : > { %v2987_v26 = vpop.xlane.xlu1 %2986 }
 0xbce   : > { %v2988_v27 = vmul.f32 0.03125, %v2987_v26 }
 0xbd0   : > { %v2989_v28 = vadd.f32 1e-12, %v2988_v27 }
 0xbd2   : > { %13042 = vrsqrt.f32 %v2989_v28 }
 0xbdc   : > { %v13043_v29 = vpop.eup %13042 }
 0xbdd   : > { %v2991_v31 = vmul.f32 %v13043_v29, %v2983_v18 }
 0xbdf   : > { %v2998_v33 = vmul.f32 %v10767_v30, %v2991_v31 }
 0xbe1   : > { %v14386_v34 = vadd.f32 %v10768_v32, %v2998_v33 }
 0xbe3   : > { %v14391_v38 = vpack.c.bf16 %v14386_v34, %v14386_v34 }
 0xbe5   : > { %11731 = vmatmul.mubr.msk.bf16.vlgmr.msra.gmra.mrb[52].mxu0 %vm1444_vm0, %v14391_v38  ;;  %11747 = vmatmul.mubr.msk.bf16.vlgmr.msra.gmra.mrb[52].mxu1 %vm1444_vm0, %v14391_v38 }
 0xbe6   : > { %11735 = vmatpush3.bf16.msra.mxu0 %v12884_v35  ;;  %11759 = vmatpush3.bf16.msra.mxu1 %v12885_v36 }
 0xbe7   : > { %11736 = vmatprep.subr.bf16.mxu0 %v13660_v9  ;;  %11760 = vmatprep.subr.bf16.mxu1 %v13660_v9 }
 0xbe8   : > { %11738 = vmatprep.mubr.msk.bf16.mxu0 %vm13661_vm1, %v13660_v9  ;;  %11762 = vmatprep.mubr.msk.bf16.mxu1 %vm13661_vm1, %v13660_v9 }
 0xbea   : > { %11737 = vmatpush3.bf16.msra.mxu0 %v12886_v39  ;;  %11761 = vmatpush3.bf16.msra.mxu1 %v12887_v37 }
 0xbeb   : > { %11750 = vmatprep.subr.bf16.mxu0 %v13660_v9  ;;  %11774 = vmatprep.subr.bf16.mxu1 %v13660_v9 }
 0xbed   : > { %11739 = vmatmul.mubr.msk.bf16.vlgmr.msra.gmra.mrb[56].mxu0 %vm1444_vm0, %v14391_v38  ;;  %11763 = vmatmul.mubr.msk.bf16.vlgmr.msra.gmra.mrb[56].mxu1 %vm1444_vm0, %v14391_v38 }
 0xbee   : > { %11751 = vmatpush3.bf16.msra.mxu0 %v12888_v40  ;;  %11775 = vmatpush3.bf16.msra.mxu1 %v12889_v41 }
 0xbef   : > { %11752 = vmatprep.subr.bf16.mxu0 %v13660_v9  ;;  %11776 = vmatprep.subr.bf16.mxu1 %v13660_v9 }
 0xbf0   : > { %11754 = vmatprep.mubr.msk.bf16.mxu0 %vm13661_vm1, %v13660_v9  ;;  %11778 = vmatprep.mubr.msk.bf16.mxu1 %vm13661_vm1, %v13660_v9 }
 0xbf2   : > { %11753 = vmatpush3.bf16.msra.mxu0 %v12890_v20  ;;  %11777 = vmatpush3.bf16.msra.mxu1 %v12891_v42 }
 0xbf3   : > { %11766 = vmatprep.subr.bf16.mxu0 %v13660_v9  ;;  %11790 = vmatprep.subr.bf16.mxu1 %v13660_v9 }
 0xbf5   : > { %11755 = vmatmul.mubr.msk.bf16.vlgmr.msra.gmra.mrb[60].mxu0 %vm1444_vm0, %v14391_v38  ;;  %11779 = vmatmul.mubr.msk.bf16.vlgmr.msra.gmra.mrb[60].mxu1 %vm1444_vm0, %v14391_v38 }
 0xbf6   : > { %11767 = vmatpush3.bf16.msra.mxu0 %v12892_v43  ;;  %11791 = vmatpush3.bf16.msra.mxu1 %v12893_v44 }
 0xbf7   : > { %11768 = vmatprep.subr.bf16.mxu0 %v13660_v9  ;;  %11792 = vmatprep.subr.bf16.mxu1 %v13660_v9 }
 0xbf8   : > { %11770 = vmatprep.mubr.msk.bf16.mxu0 %vm13661_vm1, %v13660_v9  ;;  %11794 = vmatprep.mubr.msk.bf16.mxu1 %vm13661_vm1, %v13660_v9 }
 0xbfa   : > { %11769 = vmatpush3.bf16.msra.mxu0 %v12894_v45  ;;  %11793 = vmatpush3.bf16.msra.mxu1 %v12895_v46 }
 0xbfb   : > { %11782 = vmatprep.subr.bf16.mxu0 %v13660_v9  ;;  %11806 = vmatprep.subr.bf16.mxu1 %v13660_v9 }
 0xbfd   : > { %11771 = vmatmul.mubr.msk.bf16.vlgmr.msra.gmra.mrb[64].mxu0 %vm1444_vm0, %v14391_v38  ;;  %11795 = vmatmul.mubr.msk.bf16.vlgmr.msra.gmra.mrb[64].mxu1 %vm1444_vm0, %v14391_v38 }
 0xbfe   : > { %11783 = vmatpush3.bf16.msra.mxu0 %v12896_v47  ;;  %11807 = vmatpush3.bf16.msra.mxu1 %v12897_v48 }
 0xbff   : > { %11784 = vmatprep.subr.bf16.mxu0 %v13660_v9  ;;  %11808 = vmatprep.subr.bf16.mxu1 %v13660_v9 }
 0xc00   : > { %11786 = vmatprep.mubr.msk.bf16.mxu0 %vm13661_vm1, %v13660_v9  ;;  %11810 = vmatprep.mubr.msk.bf16.mxu1 %vm13661_vm1, %v13660_v9 }
 0xc02   : > { %11785 = vmatpush3.bf16.msra.mxu0 %v12898_v49  ;;  %11809 = vmatpush3.bf16.msra.mxu1 %v12899_v50 }
 0xc03   : > { %11798 = vmatprep.subr.bf16.mxu0 %v13660_v9  ;;  %11822 = vmatprep.subr.bf16.mxu1 %v13660_v9 }
 0xc05   : > { %11787 = vmatmul.mubr.msk.bf16.vlgmr.msra.gmra.mrb[68].mxu0 %vm1444_vm0, %v14391_v38  ;;  %11811 = vmatmul.mubr.msk.bf16.vlgmr.msra.gmra.mrb[68].mxu1 %vm1444_vm0, %v14391_v38 }
 0xc06   : > { %11799 = vmatpush3.bf16.msra.mxu0 %v12900_v51  ;;  %11802 = vmatprep.mubr.msk.bf16.mxu0 %vm13661_vm1, %v13660_v9 }
 0xc07   : > { %11800 = vmatprep.subr.bf16.mxu0 %v13660_v9  ;;  %11824 = vmatprep.mubr.msk.bf16.mxu1 %vm13661_vm1, %v13660_v9 }
 0xc0a   : > { %11801 = vmatpush3.bf16.msra.mxu0 %v12901_v52 }
 0xc0b   : > { %11814 = vmatprep.subr.bf16.mxu0 %v13660_v9 }
 0xc0d   : > { %11803 = vmatmul.mubr.msk.bf16.vlgmr.msra.gmra.mrb[72].mxu0 %vm1444_vm0, %v14391_v38 }
 0xc0e   : > { %11815 = vmatpush3.bf16.msra.mxu0 %v12902_v53  ;;  %11818 = vmatprep.mubr.msk.bf16.mxu0 %vm13661_vm1, %v13660_v9 }
 0xc0f   : > { %11816 = vmatprep.subr.bf16.mxu0 %v13660_v9 }
 0xc12   : > { %11817 = vmatpush3.bf16.msra.mxu0 %v12903_v54 }
 0xc13   : > { %11828 = vmatprep.subr.bf16.mxu0 %v13660_v9 }
 0xc15   : > { %11819 = vmatmul.mubr.msk.bf16.vlgmr.msra.gmra.mrb[76].mxu0 %vm1444_vm0, %v14391_v38 }
 0xc16   : > { %11830 = vmatprep.mubr.msk.bf16.mxu0 %vm13661_vm1, %v13660_v9 }
 0xcb8   : > { %v3114_v55 = vpop.f32.mrb[52].mxu0  ;;  %v3218_v56 = vpop.f32.mrb[52].mxu1 }
 0xcb9   : > { %v11732_v57 = vpop.f32.mrb[53].mxu0  ;;  %v11748_v58 = vpop.f32.mrb[53].mxu1  ;;  %v3276_v12 = vpack.c.bf16 %v3114_v55, %v3114_v55  ;;  %v3278_v24 = vpack.c.bf16 %v3218_v56, %v3218_v56 }
 0xcba   : > { %v3117_v59 = vpop.f32.mrb[54].mxu0  ;;  %v3221_v60 = vpop.f32.mrb[54].mxu1 }
 0xcbb   : > { %v11733_v61 = vpop.f32.mrb[55].mxu0  ;;  %v11749_v62 = vpop.f32.mrb[55].mxu1 }
 0xcc0   : > { %v3166_v63 = vpop.f32.mrb[56].mxu0  ;;  %v3326_v0 = vpop.f32.mrb[56].mxu1 }
 0xcc1   : > { %v3488_v1 = vpack.c.bf16 %v3326_v0, %v3326_v0  ;;  %v11740_v2 = vpop.f32.mrb[57].mxu0  ;;  %v11764_v3 = vpop.f32.mrb[57].mxu1  ;;  %v3277_v39 = vpack.c.bf16 %v3166_v63, %v3166_v63 }
 0xcc2   : > { %v3169_v4 = vpop.f32.mrb[58].mxu0  ;;  %v3329_v5 = vpop.f32.mrb[58].mxu1 }
 0xcc3   : > { %v3708_v6 = vsel %vm2166_vm2, %v3488_v1, 0  ;;  %v11741_v7 = vpop.f32.mrb[59].mxu0  ;;  %v11765_v8 = vpop.f32.mrb[59].mxu1 }
 0xcc4   : > { %11823 = vmatpush3.bf16.xpose.msra.mxu1 %v3708_v6 }
 0xcc5   : > { %11834 = vmatprep.subr.bf16.mxu1 %v13660_v9 }
 0xcc8   : > { %v3270_v10 = vpop.f32.mrb[60].mxu0  ;;  %v3430_v11 = vpop.f32.mrb[60].mxu1 }
 0xcc9   : > { %v3490_v13 = vpack.c.bf16 %v3430_v11, %v3430_v11  ;;  %v11756_v14 = vpop.f32.mrb[61].mxu0  ;;  %v11780_v15 = vpop.f32.mrb[61].mxu1  ;;  %v3279_v47 = vpack.c.bf16 %v3270_v10, %v3270_v10 }
 0xcca   : > { %v3273_v16 = vpop.f32.mrb[62].mxu0  ;;  %v3433_v17 = vpop.f32.mrb[62].mxu1 }
 0xccb   : > { %v3800_v18 = vsel %vm2166_vm2, %v3490_v13, 0  ;;  %v11757_v19 = vpop.f32.mrb[63].mxu0  ;;  %v11781_v21 = vpop.f32.mrb[63].mxu1  ;;  %11825 = vmatmul.mubr.msk.bf16.vlgmr.msra.gmra.mrb[72].mxu1 %vm2166_vm2, %v3276_v12 }
 0xccc   : > { %11835 = vmatpush3.bf16.xpose.msra.mxu1 %v3800_v18  ;;  %11836 = vmatprep.mubr.msk.bf16.mxu1 %vm13661_vm1, %v13660_v9 }
 0xccd   : > { %11846 = vmatprep.subr.bf16.mxu1 %v13660_v9 }
 0xcd0   : > { %v3378_v22 = vpop.f32.mrb[64].mxu0  ;;  %v3538_v23 = vpop.f32.mrb[64].mxu1 }
 0xcd1   : > { %v3489_v25 = vpack.c.bf16 %v3378_v22, %v3378_v22  ;;  %v3700_v26 = vpack.c.bf16 %v3538_v23, %v3538_v23  ;;  %v11772_v27 = vpop.f32.mrb[65].mxu0  ;;  %v11796_v28 = vpop.f32.mrb[65].mxu1 }
 0xcd2   : > { %v3381_v29 = vpop.f32.mrb[66].mxu0  ;;  %v3541_v30 = vpop.f32.mrb[66].mxu1 }
 0xcd3   : > { %v3754_v31 = vsel %vm2166_vm2, %v3489_v25, 0  ;;  %v3940_v32 = vsel %vm2402_vm3, %v3700_v26, 0  ;;  %v11773_v33 = vpop.f32.mrb[67].mxu0  ;;  %v11797_v35 = vpop.f32.mrb[67].mxu1  ;;  %11837 = vmatmul.mubr.msk.bf16.vlgmr.msra.gmra.mrb[76].mxu1 %vm2166_vm2, %v3278_v24 }
 0xcd4   : > { %11829 = vmatpush3.bf16.xpose.msra.mxu0 %v3754_v31  ;;  %11847 = vmatpush3.bf16.msra.mxu1 %v3940_v32 }
 0xcd5   : > { %11840 = vmatprep.subr.bf16.mxu0 %v13660_v9  ;;  %11848 = vmatprep.mubr.msk.bf16.mxu1 %vm13661_vm1, %v13660_v9 }
 0xcd6   : > { %11858 = vmatprep.subr.bf16.mxu1 %v13660_v9 }
 0xcd8   : > { %v3482_v36 = vpop.f32.mrb[68].mxu0  ;;  %v14490_v38 = vpop.f32.mrb[68].mxu1 }
 0xcd9   : > { %v3491_v37 = vpack.c.bf16 %v3482_v36, %v3482_v36  ;;  %v11788_v40 = vpop.f32.mrb[69].mxu0  ;;  %v11812_v41 = vpop.f32.mrb[69].mxu1 }
 0xcda   : > { %v3485_v20 = vpop.f32.mrb[70].mxu0  ;;  %v3645_v42 = vpop.f32.mrb[70].mxu1  ;;  %v3702_v40 = vpack.c.bf16 %v14490_v38, %v14490_v38 }
 0xcdb   : > { %v3846_v43 = vsel %vm2166_vm2, %v3491_v37, 0  ;;  %v11789_v44 = vpop.f32.mrb[71].mxu0  ;;  %v11813_v45 = vpop.f32.mrb[71].mxu1  ;;  %11831 = vmatmul.mubr.msk.bf16.vlgmr.msra.gmra.mrb[80].mxu0 %vm2166_vm2, %v3277_v39 }
 0xcdc   : > { %11841 = vmatpush3.bf16.xpose.msra.mxu0 %v3846_v43  ;;  %11842 = vmatprep.mubr.msk.bf16.mxu0 %vm13661_vm1, %v13660_v9  ;;  %v4032_v42 = vsel %vm2402_vm3, %v3702_v40, 0 }
 0xcdd   : > { %11852 = vmatprep.subr.bf16.mxu0 %v13660_v9 }
 0xce0   : > { %v3590_v46 = vpop.f32.mrb[72].mxu0 }
 0xce1   : > { %v3701_v48 = vpack.c.bf16 %v3590_v46, %v3590_v46  ;;  %v11804_v49 = vpop.f32.mrb[73].mxu0 }
 0xce2   : > { %v3593_v50 = vpop.f32.mrb[74].mxu0 }
 0xce3   : > { %v3986_v51 = vsel %vm2402_vm3, %v3701_v48, 0  ;;  %v11805_v52 = vpop.f32.mrb[75].mxu0  ;;  %11843 = vmatmul.mubr.msk.bf16.vlgmr.msra.gmra.mrb[84].mxu0 %vm2166_vm2, %v3279_v47 }
 0xce4   : > { %11853 = vmatpush3.bf16.msra.mxu0 %v3986_v51  ;;  %11854 = vmatprep.mubr.msk.bf16.mxu0 %vm13661_vm1, %v13660_v9 }
 0xce5   : > { %11864 = vmatprep.subr.bf16.mxu0 %v13660_v9 }
 0xce8   : > { %v14502_v53 = vpop.f32.mrb[76].mxu0 }
 0xce9   : > { %v11820_v54 = vpop.f32.mrb[77].mxu0  ;;  %v3703_v48 = vpack.c.bf16 %v14502_v53, %v14502_v53  ;;  %v3059_v53 = vld [vmem:[#allocation5 + $0x10] sm:$0xf] }
 0xcea   : > { %v3697_v55 = vpop.f32.mrb[78].mxu0 }
 0xceb   : > { %v11821_v56 = vpop.f32.mrb[79].mxu0  ;;  %v4078_v51 = vsel %vm2402_vm3, %v3703_v48, 0 }
 0xcec   : > { %v4128_v56 = vsel %vm2402_vm3, %v3059_v53, 0 }
 0xd9e   : > { %v3744_v57 = vpop.f32.mrb[72].mxu1 }
 0xd9f   : > { %v11826_v58 = vpop.f32.mrb[73].mxu1  ;;  %v3888_v59 = vsel %vm2166_vm2, %v3744_v57, -inf }
 0xda0   : > { %3889 = vmax.xlane.f32.xlu0 %v3888_v59  ;;  %v3747_v60 = vpop.f32.mrb[74].mxu1  ;;  %v3061_v59 = vld [vmem:[#allocation5 + $0x18] sm:$0xf] }
 0xda1   : > { %v11827_v61 = vpop.f32.mrb[75].mxu1 }
 0xda6   : > { %v3836_v62 = vpop.f32.mrb[76].mxu1 }
 0xda7   : > { %v11838_v63 = vpop.f32.mrb[77].mxu1  ;;  %v3894_v0 = vsel %vm2166_vm2, %v3836_v62, -inf }
 0xda8   : > { %3895 = vmax.xlane.f32.xlu0 %v3894_v0  ;;  %v3839_v1 = vpop.f32.mrb[78].mxu1  ;;  %v4220_v63 = vsel %vm2402_vm3, %v3061_v59, 0  ;;  %v12904_v59 = vld [vmem:[#allocation7 + $0x10] sm:$0xff]  }
 0xda9   : > { %v11839_v2 = vpop.f32.mrb[79].mxu1 }
 0xdae   : > { %v3790_v3 = vpop.f32.mrb[80].mxu0 }
 0xdaf   : > { %v11832_v4 = vpop.f32.mrb[81].mxu0  ;;  %v3891_v5 = vsel %vm2166_vm2, %v3790_v3, -inf }
 0xdb0   : > { %3892 = vmax.xlane.f32.xlu1 %v3891_v5  ;;  %v3793_v6 = vpop.f32.mrb[82].mxu0 }
 0xdb1   : > { %v11833_v7 = vpop.f32.mrb[83].mxu0 }
 0xdb2   : > { %v3062_v7 = vld [vmem:[#allocation5 + $0x1c] sm:$0xf] }
 0xdb6   : > { %v3882_v8 = vpop.f32.mrb[84].mxu0 }
 0xdb7   : > { %v11844_v10 = vpop.f32.mrb[85].mxu0  ;;  %v3897_v11 = vsel %vm2166_vm2, %v3882_v8, -inf }
 0xdb8   : > { %3898 = vmax.xlane.f32.xlu1 %v3897_v11  ;;  %v3885_v12 = vpop.f32.mrb[86].mxu0 }
 0xdb9   : > { %v11845_v13 = vpop.f32.mrb[87].mxu0  ;;  %v4266_v12 = vsel %vm2402_vm3, %v3062_v7, 0 }
 0xe2d   : > { %v3890_v14 = vpop.xlane.xlu0 %3889 }
 0xe2e   : > { %v3900_v15 = vsub.f32 %v3744_v57, %v3890_v14  ;;  %v3060_v57 = vld [vmem:[#allocation5 + $0x14] sm:$0xf] }
 0xe2f   : > { %v4174_v58 = vsel %vm2402_vm3, %v3060_v57, 0 }
 0xe30   : > { %v3904_v16 = vmul.f32 1.442695, %v3900_v15 }
 0xe32   : > { %13044 = vpow2.f32 %v3904_v16 }
 0xe35   : > { %v3896_v17 = vpop.xlane.xlu0 %3895 }
 0xe36   : > { %v3902_v18 = vsub.f32 %v3836_v62, %v3896_v17 }
 0xe38   : > { %v3908_v19 = vmul.f32 1.442695, %v3902_v18 }
 0xe3a   : > { %13046 = vpow2.f32 %v3908_v19 }
 0xe3c   : > { %v13045_v21 = vpop.eup %13044 }
 0xe3d   : > { %v3893_v22 = vpop.xlane.xlu1 %3892  ;;  %v3912_v23 = vsel %vm2166_vm2, %v13045_v21, 0.0 }
 0xe3e   : > { %v3901_v24 = vsub.f32 %v3790_v3, %v3893_v22  ;;  %3913 = vadd.xlane.f32.xlu0 %v3912_v23 }
 0xe40   : > { %v3906_v25 = vmul.f32 1.442695, %v3901_v24 }
 0xe42   : > { %13048 = vpow2.f32 %v3906_v25 }
 0xe44   : > { %v13047_v26 = vpop.eup %13046 }
 0xe45   : > { %v3899_v27 = vpop.xlane.xlu1 %3898  ;;  %v3918_v28 = vsel %vm2166_vm2, %v13047_v26, 0.0 }
 0xe46   : > { %v3903_v29 = vsub.f32 %v3882_v8, %v3899_v27  ;;  %3919 = vadd.xlane.f32.xlu0 %v3918_v28 }
 0xe48   : > { %v3910_v30 = vmul.f32 1.442695, %v3903_v29 }
 0xe4a   : > { %13050 = vpow2.f32 %v3910_v30 }
 0xe4c   : > { %v13049_v31 = vpop.eup %13048 }
 0xe4d   : > { %v3915_v32 = vsel %vm2166_vm2, %v13049_v31, 0.0 }
 0xe4e   : > { %3916 = vadd.xlane.f32.xlu1 %v3915_v32 }
 0xe54   : > { %v13051_v33 = vpop.eup %13050 }
 0xe55   : > { %v3921_v35 = vsel %vm2166_vm2, %v13051_v33, 0.0 }
 0xe56   : > { %3922 = vadd.xlane.f32.xlu1 %v3921_v35 }
 0xecb   : > { %v3914_v36 = vpop.xlane.xlu0 %3913 }
 0xecc   : > { %13052 = vrcp.f32 %v3914_v36 }
 0xed3   : > { %v3920_v39 = vpop.xlane.xlu0 %3919 }
 0xed4   : > { %13054 = vrcp.f32 %v3920_v39 }
 0xed6   : > { %v13053_v37 = vpop.eup %13052 }
 0xed7   : > { %v3928_v41 = vmul.f32 %v13053_v37, %v13045_v21 }
 0xed9   : > { %v3932_v20 = vpack.c.bf16 %v3928_v41, %v3928_v41  ;;  %v10850_v41 = vld [vmem:[%s15477_s18 + $0x1] ss:$0 sm:$0xff] }
 0xedb   : > { %11849 = vmatmul.mubr.msk.bf16.vlgmr.msra.gmra.mrb[80].mxu1 %vm2166_vm2, %v3932_v20  ;;  %v3917_v43 = vpop.xlane.xlu1 %3916 }
 0xedc   : > { %11859 = vmatpush3.bf16.msra.mxu1 %v4032_v42  ;;  %13056 = vrcp.f32 %v3917_v43  ;;  %11860 = vmatprep.mubr.msk.bf16.mxu1 %vm13661_vm1, %v13660_v9 }
 0xedd   : > { %11870 = vmatprep.subr.bf16.mxu1 %v13660_v9 }
 0xede   : > { %v13055_v44 = vpop.eup %13054 }
 0xedf   : > { %v3930_v45 = vmul.f32 %v13055_v44, %v13047_v26 }
 0xee1   : > { %v3934_v46 = vpack.c.bf16 %v3930_v45, %v3930_v45 }
 0xee3   : > { %11861 = vmatmul.mubr.msk.bf16.vlgmr.msra.gmra.mrb[84].mxu1 %vm2166_vm2, %v3934_v46  ;;  %v3923_v38 = vpop.xlane.xlu1 %3922 }
 0xee4   : > { %13058 = vrcp.f32 %v3923_v38  ;;  %11872 = vmatprep.mubr.msk.bf16.mxu1 %vm13661_vm1, %v13660_v9  ;;  %11871 = vmatpush3.bf16.msra.mxu1 %v4128_v56 }
 0xee5   : > { %11882 = vmatprep.subr.bf16.mxu1 %v13660_v9 }
 0xee6   : > { %v13057_v47 = vpop.eup %13056 }
 0xee7   : > { %v3929_v49 = vmul.f32 %v13057_v47, %v13049_v31  ;;  %v4550_v47 = vld [vmem:[%s1439_s11] sm:$0xff]  ;;  %s15496_s11 = sld [smem:[#allocation53_spill]] }
 0xee9   : > { %v3933_v50 = vpack.c.bf16 %v3929_v49, %v3929_v49  ;;  %v4553_v49 = vsel %vm1444_vm0, %v4550_v47, 0.0 }
 0xeeb   : > { %11855 = vmatmul.mubr.msk.bf16.vlgmr.msra.gmra.mrb[88].mxu0 %vm2166_vm2, %v3933_v50 }
 0xeec   : > { %11865 = vmatpush3.bf16.msra.mxu0 %v4078_v51  ;;  %11866 = vmatprep.mubr.msk.bf16.mxu0 %vm13661_vm1, %v13660_v9 }
 0xeed   : > { %11876 = vmatprep.subr.bf16.mxu0 %v13660_v9 }
 0xeee   : > { %v13059_v52 = vpop.eup %13058 }
 0xeef   : > { %v3931_v54 = vmul.f32 %v13059_v52, %v13051_v33 }
 0xef1   : > { %v3935_v55 = vpack.c.bf16 %v3931_v54, %v3931_v54 }
 0xef3   : > { %11867 = vmatmul.mubr.msk.bf16.vlgmr.msra.gmra.mrb[92].mxu0 %vm2166_vm2, %v3935_v55 }
 0xef4   : > { %11878 = vmatprep.mubr.msk.bf16.mxu0 %vm13661_vm1, %v13660_v9  ;;  %11877 = vmatpush3.bf16.msra.mxu0 %v4174_v58 }
 0xef5   : > { %11888 = vmatprep.subr.bf16.mxu0 %v13660_v9 }
 0xfae   : > { %v3976_v60 = vpop.f32.mrb[80].mxu1 }
 0xfaf   : > { %v4120_v61 = vpack.c.bf16 %v3976_v60, %v3976_v60  ;;  %v11850_v62 = vpop.f32.mrb[81].mxu1  ;;  %v12905_v60 = vld [vmem:[#allocation7 + $0x18] sm:$0xff]  }
 0xfb0   : > { %v3979_v0 = vpop.f32.mrb[82].mxu1 }
 0xfb1   : > { %v11851_v1 = vpop.f32.mrb[83].mxu1  ;;  %11873 = vmatmul.mubr.msk.bf16.vlgmr.msra.gmra.mrb[88].mxu1 %vm2166_vm2, %v4120_v61 }
 0xfb2   : > { %11883 = vmatpush3.bf16.msra.mxu1 %v4220_v63  ;;  %11884 = vmatprep.mubr.msk.bf16.mxu1 %vm13661_vm1, %v13660_v9 }
 0xfb3   : > { %11894 = vmatprep.subr.bf16.mxu1 %v13660_v9 }
 0xfb6   : > { %v4068_v2 = vpop.f32.mrb[84].mxu1 }
 0xfb7   : > { %v4122_v3 = vpack.c.bf16 %v4068_v2, %v4068_v2  ;;  %v11862_v4 = vpop.f32.mrb[85].mxu1 }
 0xfb8   : > { %v4071_v5 = vpop.f32.mrb[86].mxu1  ;;  %v10853_v4 = vld [vmem:[%s15478_s27 + $0x1] ss:$0 sm:$0xff] }
 0xfb9   : > { %v11863_v6 = vpop.f32.mrb[87].mxu1  ;;  %11885 = vmatmul.mubr.msk.bf16.vlgmr.msra.gmra.mrb[92].mxu1 %vm2166_vm2, %v4122_v3 }
 0xfba   : > { %11898 = vmatprep.mubr.msk.bf16.mxu1 %vm13661_vm1, %v13660_v9  ;;  %11895 = vmatpush3.bf16.msra.mxu1 %v12904_v59  ;;  %v10854_v6 = vld [vmem:[%s15480_s1 + $0x1] ss:$0 sm:$0xff] }
 0xfbb   : > { %11896 = vmatprep.subr.bf16.mxu1 %v13660_v9 }
 0xfbe   : > { %v4022_v8 = vpop.f32.mrb[88].mxu0  ;;  %11897 = vmatpush3.bf16.msra.mxu1 %v12905_v60 }
 0xfbf   : > { %v4121_v10 = vpack.c.bf16 %v4022_v8, %v4022_v8  ;;  %v11856_v11 = vpop.f32.mrb[89].mxu0  ;;  %11914 = vmatprep.subr.bf16.mxu1 %v13660_v9 }
 0xfc0   : > { %v4025_v13 = vpop.f32.mrb[90].mxu0 }
 0xfc1   : > { %v11857_v14 = vpop.f32.mrb[91].mxu0  ;;  %11879 = vmatmul.mubr.msk.bf16.vlgmr.msra.gmra.mrb[96].mxu0 %vm2166_vm2, %v4121_v10  ;;  %v10879_v10 = vld [vmem:[%s15492_s2] ss:$0 sm:$0xff]  ;;  %s15497_s2 = smov %s15496_s11 }
 0xfc2   : > { %11889 = vmatpush3.bf16.msra.mxu0 %v4266_v12  ;;  %11890 = vmatprep.mubr.msk.bf16.mxu0 %vm13661_vm1, %v13660_v9  ;;  %v10880_v13 = vld [vmem:[%s15493_s7] ss:$0 sm:$0xff]  ;;  %s15498_s7 = sld [smem:[#allocation54_spill]] }
 0xfc3   : > { %11902 = vmatprep.subr.bf16.mxu0 %v13660_v9  ;;  %v12906_v14 = vld [vmem:[%s15494_s15] sm:$0xff]   ;;  %s15500_s15 = sld [smem:[#allocation55_spill]] }
 0xfc6   : > { %v4114_v15 = vpop.f32.mrb[92].mxu0 }
 0xfc7   : > { %v4123_v16 = vpack.c.bf16 %v4114_v15, %v4114_v15  ;;  %v11868_v17 = vpop.f32.mrb[93].mxu0 }
 0xfc8   : > { %v4117_v18 = vpop.f32.mrb[94].mxu0  ;;  %s15499_s1 = smov %s15498_s7 }
 0xfc9   : > { %v11869_v19 = vpop.f32.mrb[95].mxu0  ;;  %11891 = vmatmul.mubr.msk.bf16.vlgmr.msra.gmra.mrb[100].mxu0 %vm2166_vm2, %v4123_v16  ;;  %v12907_v18 = vld [vmem:[%s15495_s3 + $0x8] sm:$0xff]   ;;  %s15501_s6 = smov %s15500_s15 }
 0xfca   : > { %11910 = vmatprep.mubr.msk.bf16.mxu0 %vm13661_vm1, %v13660_v9 }
0x1084   : > { %v4164_v21 = vpop.f32.mrb[88].mxu1 }
0x1085   : > { %v11874_v22 = vpop.f32.mrb[89].mxu1  ;;  %v4308_v30 = vsel %vm1444_vm0, %v4164_v21, 0.0  ;;  %v12908_v21 = vld [vmem:[%s15495_s3 + $0x10] sm:$0xff]  }
0x1086   : > { %v4167_v23 = vpop.f32.mrb[90].mxu1  ;;  %v12909_v22 = vld [vmem:[%s15495_s3 + $0x18] sm:$0xff]  }
0x1087   : > { %v11875_v24 = vpop.f32.mrb[91].mxu1  ;;  %v12910_v23 = vld [vmem:[%s15495_s3 + $0x30] sm:$0xff]  }
0x1088   : > { %v12911_v24 = vld [vmem:[%s15495_s3 + $0x38] sm:$0xff]  }
0x108c   : > { %v4256_v25 = vpop.f32.mrb[92].mxu1 }
0x108d   : > { %v11886_v26 = vpop.f32.mrb[93].mxu1  ;;  %v4311_v36 = vsel %vm1444_vm0, %v4256_v25, 0.0  ;;  %v12912_v25 = vld [vmem:[#allocation8 + $0x10] sm:$0xff]  }
0x108e   : > { %v4259_v27 = vpop.f32.mrb[94].mxu1  ;;  %v12913_v26 = vld [vmem:[#allocation8 + $0x18] sm:$0xff]  }
0x108f   : > { %v11887_v28 = vpop.f32.mrb[95].mxu1  ;;  %v12914_v27 = vld [vmem:[#allocation8 + $0x30] sm:$0xff]  }
0x1090   : > { %v12915_v28 = vld [vmem:[#allocation8 + $0x38] sm:$0xff]  }
0x1094   : > { %v4210_v29 = vpop.f32.mrb[96].mxu0 }
0x1095   : > { %v4309_v31 = vsel %vm1444_vm0, %v4210_v29, 0.0  ;;  %v11880_v32 = vpop.f32.mrb[97].mxu0  ;;  %v12916_v29 = vld [vmem:[#allocation10 + $0x10] sm:$0xff]  }
0x1096   : > { %v4310_v33 = vadd.f32 %v4309_v31, %v4308_v30  ;;  %v4213_v35 = vpop.f32.mrb[98].mxu0  ;;  %v12917_v30 = vld [vmem:[#allocation10 + $0x18] sm:$0xff]   ;;  %v12918_v31 = vld [vmem:[#allocation10 + $0x30] sm:$0xff]  }
0x1097   : > { %v11881_v39 = vpop.f32.mrb[99].mxu0  ;;  %v12919_v32 = vld [vmem:[#allocation10 + $0x38] sm:$0xff]   ;;  %v12921_v35 = vld [vmem:[%s15482_s16 + $0x28] sm:$0xff]  }
0x1098   : > { %v4312_v37 = vadd.f32 %v4311_v36, %v4310_v33  ;;  %v12920_v33 = vld [vmem:[%s15482_s16 + $0x20] sm:$0xff]   ;;  %v12922_v36 = vld [vmem:[%s15482_s16 + $0x30] sm:$0xff]   ;;  %v12923_v39 = vld [vmem:[%s15482_s16 + $0x38] sm:$0xff]  }
0x1099   : > { %11903 = vmatpush3.bf16.msra.mxu0 %v12920_v33  ;;  %v12931_v33 = vld [vmem:[#allocation10 + $0x8] sm:$0xff]  }
0x109a   : > { %11904 = vmatprep.subr.bf16.mxu0 %v13660_v9 }
0x109c   : > { %v4302_v40 = vpop.f32.mrb[100].mxu0 }
0x109d   : > { %v4313_v20 = vsel %vm1444_vm0, %v4302_v40, 0.0  ;;  %v11892_v42 = vpop.f32.mrb[101].mxu0  ;;  %11905 = vmatpush3.bf16.msra.mxu0 %v12921_v35 }
0x109e   : > { %v4314_v43 = vadd.f32 %v4313_v20, %v4312_v37  ;;  %v4305_v44 = vpop.f32.mrb[102].mxu0  ;;  %11906 = vmatprep.subr.bf16.mxu0 %v13660_v9  ;;  %v10856_v37 = vld [vmem:[%s15483_s26 + $0x1] ss:$0 sm:$0xff] }
0x109f   : > { %v11893_v45 = vpop.f32.mrb[103].mxu0 }
0x10a0   : > { %v4321_v46 = vadd.f32 %v10850_v41, %v4314_v43 }
0x10a1   : > { %11907 = vmatpush3.bf16.msra.mxu0 %v12922_v36 }
0x10a2   : > { %v4322_v38 = vadd.f32 %v4321_v46, %v14386_v34  ;;  %11908 = vmatprep.subr.bf16.mxu0 %v13660_v9 }
0x10a4   : > { %v4327_v48 = vsel %vm1444_vm0, %v4322_v38, 0.0 }
0x10a5   : > { %4328 = vadd.xlane.f32.xlu0 %v4327_v48  ;;  %11909 = vmatpush3.bf16.msra.mxu0 %v12923_v39 }
0x10a6   : > { %11930 = vmatprep.subr.bf16.mxu0 %v13660_v9 }
0x10a9   : > { %4554 = vadd.xlane.f32.xlu0 %v4553_v49 }
0x1132   : > { %v4329_v50 = vpop.xlane.xlu0 %4328 }
0x1133   : > { %v4330_v51 = vmul.f32 0.03125, %v4329_v50 }
0x1135   : > { %v4331_v52 = vsub.f32 %v4322_v38, %v4330_v51 }
0x1136   : > { %v4555_v54 = vpop.xlane.xlu0 %4554 }
0x1137   : > { %v4332_v55 = vmul.f32 %v4331_v52, %v4331_v52  ;;  %v4556_v53 = vmul.f32 0.03125, %v4555_v54 }
0x1139   : > { %v4333_v56 = vsel %vm1444_vm0, %v4332_v55, 0.0  ;;  %v4557_v57 = vsub.f32 %v4550_v47, %v4556_v53 }
0x113a   : > { %4334 = vadd.xlane.f32.xlu1 %v4333_v56 }
0x113b   : > { %v4558_v58 = vmul.f32 %v4557_v57, %v4557_v57 }
0x113d   : > { %v4559_v34 = vsel %vm1444_vm0, %v4558_v58, 0.0 }
0x113e   : > { %4560 = vadd.xlane.f32.xlu1 %v4559_v34 }
0x11c7   : > { %v4335_v61 = vpop.xlane.xlu1 %4334 }
0x11c8   : > { %v4336_v62 = vmul.f32 0.03125, %v4335_v61 }
0x11ca   : > { %v4337_v63 = vadd.f32 1e-12, %v4336_v62 }
0x11cb   : > { %v4561_v0 = vpop.xlane.xlu1 %4560 }
0x11cc   : > { %13060 = vrsqrt.f32 %v4337_v63  ;;  %v4562_v1 = vmul.f32 0.03125, %v4561_v0  ;;  %v12924_v63 = vld [vmem:[%s15495_s3 + $0x20] sm:$0xff]  }
0x11ce   : > { %v4563_v2 = vadd.f32 1e-12, %v4562_v1 }
0x11d0   : > { %13062 = vrsqrt.f32 %v4563_v2 }
0x11d6   : > { %v13061_v3 = vpop.eup %13060 }
0x11d7   : > { %v4339_v5 = vmul.f32 %v13061_v3, %v4331_v52  ;;  %v12925_v3 = vld [vmem:[%s15495_s3 + $0x28] sm:$0xff]  }
0x11d9   : > { %v4346_v7 = vmul.f32 %v10853_v4, %v4339_v5 }
0x11da   : > { %v13063_v8 = vpop.eup %13062 }
0x11db   : > { %v4565_v11 = vmul.f32 %v13063_v8, %v4557_v57  ;;  %v14570_v12 = vadd.f32 %v10854_v6, %v4346_v7  ;;  %v12926_v8 = vld [vmem:[#allocation8] sm:$0xff]  }
0x11dd   : > { %v4572_v15 = vmul.f32 %v10879_v10, %v4565_v11  ;;  %v4361_v16 = vpack.c.bf16 %v14570_v12, %v14570_v12 }
0x11df   : > { %v14576_v17 = vadd.f32 %v10880_v13, %v4572_v15  ;;  %11899 = vmatmul.mubr.msk.bf16.vlgmr.msra.gmra.mrb[96].mxu1 %vm1444_vm0, %v4361_v16 }
0x11e0   : > { %11915 = vmatpush3.bf16.msra.mxu1 %v12906_v14  ;;  %11918 = vmatprep.mubr.msk.bf16.mxu1 %vm13661_vm1, %v13660_v9  ;;  %v12927_v14 = vld [vmem:[#allocation8 + $0x8] sm:$0xff]  }
0x11e1   : > { %11916 = vmatprep.subr.bf16.mxu1 %v13660_v9  ;;  %v14585_v19 = vpack.c.bf16 %v14576_v17, %v14576_v17 }
0x11e4   : > { %11917 = vmatpush3.bf16.msra.mxu1 %v12907_v18 }
0x11e5   : > { %11922 = vmatprep.subr.bf16.mxu1 %v13660_v9 }
0x11e7   : > { %11919 = vmatmul.mubr.msk.bf16.vlgmr.msra.gmra.mrb[100].mxu1 %vm1444_vm0, %v14585_v19 }
0x11e8   : > { %11923 = vmatpush3.bf16.msra.mxu1 %v12908_v21  ;;  %11926 = vmatprep.mubr.msk.bf16.mxu1 %vm13661_vm1, %v13660_v9 }
0x11e9   : > { %11924 = vmatprep.subr.bf16.mxu1 %v13660_v9 }
0x11ec   : > { %11925 = vmatpush3.bf16.msra.mxu1 %v12909_v22  ;;  %v12928_v22 = vld [vmem:[#allocation8 + $0x20] sm:$0xff]  }
0x11ed   : > { %11938 = vmatprep.subr.bf16.mxu1 %v13660_v9 }
0x11ef   : > { %11927 = vmatmul.mubr.msk.bf16.vlgmr.msra.gmra.mrb[104].mxu1 %vm1444_vm0, %v14585_v19 }
0x11f0   : > { %11939 = vmatpush3.bf16.msra.mxu1 %v12910_v23  ;;  %11942 = vmatprep.mubr.msk.bf16.mxu1 %vm13661_vm1, %v13660_v9 }
0x11f1   : > { %11940 = vmatprep.subr.bf16.mxu1 %v13660_v9 }
0x11f4   : > { %11941 = vmatpush3.bf16.msra.mxu1 %v12911_v24 }
0x11f5   : > { %11954 = vmatprep.subr.bf16.mxu1 %v13660_v9 }
0x11f7   : > { %11943 = vmatmul.mubr.msk.bf16.vlgmr.msra.gmra.mrb[108].mxu1 %vm1444_vm0, %v14585_v19 }
0x11f8   : > { %11955 = vmatpush3.bf16.msra.mxu1 %v12912_v25  ;;  %11958 = vmatprep.mubr.msk.bf16.mxu1 %vm13661_vm1, %v13660_v9  ;;  %v12929_v25 = vld [vmem:[#allocation8 + $0x28] sm:$0xff]  }
0x11f9   : > { %11956 = vmatprep.subr.bf16.mxu1 %v13660_v9 }
0x11fc   : > { %11957 = vmatpush3.bf16.msra.mxu1 %v12913_v26 }
0x11fd   : > { %11970 = vmatprep.subr.bf16.mxu1 %v13660_v9 }
0x11ff   : > { %11959 = vmatmul.mubr.msk.bf16.vlgmr.msra.gmra.mrb[112].mxu1 %vm1444_vm0, %v14585_v19 }
0x1200   : > { %11971 = vmatpush3.bf16.msra.mxu1 %v12914_v27  ;;  %11974 = vmatprep.mubr.msk.bf16.mxu1 %vm13661_vm1, %v13660_v9 }
0x1201   : > { %11972 = vmatprep.subr.bf16.mxu1 %v13660_v9 }
0x1204   : > { %11973 = vmatpush3.bf16.msra.mxu1 %v12915_v28 }
0x1205   : > { %11986 = vmatprep.subr.bf16.mxu1 %v13660_v9 }
0x1207   : > { %11975 = vmatmul.mubr.msk.bf16.vlgmr.msra.gmra.mrb[116].mxu1 %vm1444_vm0, %v14585_v19 }
0x1208   : > { %11987 = vmatpush3.bf16.msra.mxu1 %v12916_v29  ;;  %11990 = vmatprep.mubr.msk.bf16.mxu1 %vm13661_vm1, %v13660_v9 }
0x1209   : > { %11988 = vmatprep.subr.bf16.mxu1 %v13660_v9 }
0x120c   : > { %11989 = vmatpush3.bf16.msra.mxu1 %v12917_v30 }
0x120d   : > { %12002 = vmatprep.subr.bf16.mxu1 %v13660_v9 }
0x120f   : > { %11991 = vmatmul.mubr.msk.bf16.vlgmr.msra.gmra.mrb[120].mxu1 %vm1444_vm0, %v14585_v19 }
0x1210   : > { %12003 = vmatpush3.bf16.msra.mxu1 %v12918_v31  ;;  %12006 = vmatprep.mubr.msk.bf16.mxu1 %vm13661_vm1, %v13660_v9  ;;  %v12930_v31 = vld [vmem:[#allocation10] sm:$0xff]  }
0x1211   : > { %12004 = vmatprep.subr.bf16.mxu1 %v13660_v9 }
0x1214   : > { %12005 = vmatpush3.bf16.msra.mxu1 %v12919_v32 }
0x1215   : > { %12016 = vmatprep.subr.bf16.mxu1 %v13660_v9 }
0x1217   : > { %12007 = vmatmul.mubr.msk.bf16.vlgmr.msra.gmra.mrb[124].mxu1 %vm1444_vm0, %v14585_v19 }
0x1218   : > { %12018 = vmatprep.mubr.msk.bf16.mxu1 %vm13661_vm1, %v13660_v9 }
0x12b2   : > { %v4417_v40 = vpop.f32.mrb[96].mxu1 }
0x12b3   : > { %v4418_v41 = vadd.f32 %v10856_v37, %v4417_v40  ;;  %v11900_v20 = vpop.f32.mrb[97].mxu1  ;;  %v12932_v37 = vld [vmem:[#allocation10 + $0x20] sm:$0xff]   ;;  %v12933_v40 = vld [vmem:[#allocation10 + $0x28] sm:$0xff]  }
0x12b4   : > { %v4420_v42 = vpop.f32.mrb[98].mxu1 }
0x12b5   : > { %v4423_v43 = vmul.f32 %v4418_v41, %v4418_v41  ;;  %v11901_v44 = vpop.f32.mrb[99].mxu1 }
0x12b7   : > { %v4424_v45 = vmul.f32 %v4423_v43, %v4418_v41 }
0x12b9   : > { %v4425_v46 = vmul.f32 0.044715, %v4424_v45 }
0x12ba   : > { %v14641_v38 = vpop.f32.mrb[100].mxu1 }
0x12bb   : > { %v4426_v47 = vadd.f32 %v4425_v46, %v4418_v41  ;;  %v11920_v48 = vpop.f32.mrb[101].mxu1 }
0x12bc   : > { %v4692_v49 = vpop.f32.mrb[102].mxu1 }
0x12bd   : > { %v4427_v50 = vmul.f32 0.7978846, %v4426_v47  ;;  %v11921_v51 = vpop.f32.mrb[103].mxu1  ;;  %v13662_v49 = vmov -1e+09  }
0x12bf   : > { %13064 = vtanh.f32 %v4427_v50 }
0x12c2   : > { %v4741_v52 = vpop.f32.mrb[104].mxu1 }
0x12c3   : > { %v11928_v54 = vpop.f32.mrb[105].mxu1  ;;  %v4852_v10 = vpack.c.bf16 %v4741_v52, %v4741_v52 }
0x12c4   : > { %v4744_v55 = vpop.f32.mrb[106].mxu1 }
0x12c5   : > { %v11929_v53 = vpop.f32.mrb[107].mxu1 }
0x12c9   : > { %v13065_v56 = vpop.eup %13064 }
0x12ca   : > { %v4429_v57 = vadd.f32 1.0, %v13065_v56  ;;  %v4845_v58 = vpop.f32.mrb[108].mxu1 }
0x12cb   : > { %v11944_v34 = vpop.f32.mrb[109].mxu1  ;;  %v4854_v23 = vpack.c.bf16 %v4845_v58, %v4845_v58 }
0x12cc   : > { %v4430_v59 = vmul.f32 0.5, %v4429_v57  ;;  %v4848_v60 = vpop.f32.mrb[110].mxu1 }
0x12cd   : > { %v11945_v61 = vpop.f32.mrb[111].mxu1 }
0x12ce   : > { %v4431_v62 = vmul.f32 %v4430_v59, %v4418_v41  ;;  %v4580_v41 = vlaneseq }
0x12d0   : > { %v4443_v0 = vpack.c.bf16 %v4431_v62, %v4431_v62  ;;  %v4581_v44 = vshrl.u32 %v4580_v41, 7  ;;  %v4583_v45 = vand.u32 127, %v4580_v41 }
0x12d2   : > { %11911 = vmatmul.mubr.msk.bf16.vlgmr.msra.gmra.mrb[104].mxu0 %vm2932_vm4, %v4443_v0  ;;  %v4953_v1 = vpop.f32.mrb[112].mxu1  ;;  %vm4584_vm5 = vcmp.ge.s32.totalorder %v4581_v44, %v4583_v45 }
0x12d3   : > { %v5064_v2 = vpack.c.bf16 %v4953_v1, %v4953_v1  ;;  %11931 = vmatpush3.bf16.msra.mxu0 %v12924_v63  ;;  %v11960_v4 = vpop.f32.mrb[113].mxu1  ;;  %11934 = vmatprep.mubr.msk.bf16.mxu0 %vm13661_vm1, %v13660_v9  ;;  %v14694_v50 = vsel %vm4584_vm5, 0.0, %v13662_v49 }
0x12d4   : > { %11932 = vmatprep.subr.bf16.mxu0 %v13660_v9  ;;  %v4956_v5 = vpop.f32.mrb[114].mxu1 }
0x12d5   : > { %v5329_v6 = vsel %vm2166_vm2, %v5064_v2, 0  ;;  %v11961_v7 = vpop.f32.mrb[115].mxu1 }
0x12d6   : > { %12017 = vmatpush3.bf16.xpose.msra.mxu1 %v5329_v6  ;;  %v4851_v6 = vpack.c.bf16 %v14641_v38, %v14641_v38 }
0x12d7   : > { %11933 = vmatpush3.bf16.msra.mxu0 %v12925_v3  ;;  %12028 = vmatprep.subr.bf16.mxu1 %v13660_v9 }
0x12d8   : > { %11946 = vmatprep.subr.bf16.mxu0 %v13660_v9 }
0x12da   : > { %11935 = vmatmul.mubr.msk.bf16.vlgmr.msra.gmra.mrb[108].mxu0 %vm1444_vm0, %v14585_v19  ;;  %v5057_v11 = vpop.f32.mrb[116].mxu1 }
0x12db   : > { %v5066_v13 = vpack.c.bf16 %v5057_v11, %v5057_v11  ;;  %11947 = vmatpush3.bf16.msra.mxu0 %v12926_v8  ;;  %11950 = vmatprep.mubr.msk.bf16.mxu0 %vm13661_vm1, %v13660_v9  ;;  %v11976_v15 = vpop.f32.mrb[117].mxu1 }
0x12dc   : > { %11948 = vmatprep.subr.bf16.mxu0 %v13660_v9  ;;  %v5060_v16 = vpop.f32.mrb[118].mxu1 }
0x12dd   : > { %v5421_v18 = vsel %vm2166_vm2, %v5066_v13, 0  ;;  %12019 = vmatmul.mubr.msk.bf16.vlgmr.msra.gmra.mrb[128].mxu1 %vm2166_vm2, %v4852_v10  ;;  %v11977_v21 = vpop.f32.mrb[119].mxu1 }
0x12de   : > { %12029 = vmatpush3.bf16.xpose.msra.mxu1 %v5421_v18  ;;  %12030 = vmatprep.mubr.msk.bf16.mxu1 %vm13661_vm1, %v13660_v9 }
0x12df   : > { %11949 = vmatpush3.bf16.msra.mxu0 %v12927_v14  ;;  %12040 = vmatprep.subr.bf16.mxu1 %v13660_v9 }
0x12e0   : > { %11962 = vmatprep.subr.bf16.mxu0 %v13660_v9 }
0x12e2   : > { %11951 = vmatmul.mubr.msk.bf16.vlgmr.msra.gmra.mrb[112].mxu0 %vm1444_vm0, %v14585_v19  ;;  %v5165_v24 = vpop.f32.mrb[120].mxu1 }
0x12e3   : > { %11963 = vmatpush3.bf16.msra.mxu0 %v12928_v22  ;;  %11966 = vmatprep.mubr.msk.bf16.mxu0 %vm13661_vm1, %v13660_v9  ;;  %v5276_v26 = vpack.c.bf16 %v5165_v24, %v5165_v24  ;;  %v11992_v27 = vpop.f32.mrb[121].mxu1 }
0x12e4   : > { %11964 = vmatprep.subr.bf16.mxu0 %v13660_v9  ;;  %v5168_v28 = vpop.f32.mrb[122].mxu1 }
0x12e5   : > { %12031 = vmatmul.mubr.msk.bf16.vlgmr.msra.gmra.mrb[132].mxu1 %vm2166_vm2, %v4854_v23  ;;  %v5561_v29 = vsel %vm2402_vm3, %v5276_v26, 0  ;;  %v11993_v30 = vpop.f32.mrb[123].mxu1 }
0x12e6   : > { %12041 = vmatpush3.bf16.msra.mxu1 %v5561_v29  ;;  %12042 = vmatprep.mubr.msk.bf16.mxu1 %vm13661_vm1, %v13660_v9 }
0x12e7   : > { %11965 = vmatpush3.bf16.msra.mxu0 %v12929_v25  ;;  %12052 = vmatprep.subr.bf16.mxu1 %v13660_v9 }
0x12e8   : > { %11978 = vmatprep.subr.bf16.mxu0 %v13660_v9 }
0x12ea   : > { %11967 = vmatmul.mubr.msk.bf16.vlgmr.msra.gmra.mrb[116].mxu0 %vm1444_vm0, %v14585_v19  ;;  %v14676_v32 = vpop.f32.mrb[124].mxu1 }
0x12eb   : > { %11979 = vmatpush3.bf16.msra.mxu0 %v12930_v31  ;;  %11982 = vmatprep.mubr.msk.bf16.mxu0 %vm13661_vm1, %v13660_v9  ;;  %v12008_v35 = vpop.f32.mrb[125].mxu1 }
0x12ec   : > { %11980 = vmatprep.subr.bf16.mxu0 %v13660_v9  ;;  %v5272_v36 = vpop.f32.mrb[126].mxu1 }
0x12ed   : > { %v12009_v39 = vpop.f32.mrb[127].mxu1 }
0x12ee   : > { %v10869_v39 = vld [vmem:[%s15485_s23 + $0x1] ss:$0 sm:$0xff] }
0x12ef   : > { %11981 = vmatpush3.bf16.msra.mxu0 %v12931_v33 }
0x12f0   : > { %11994 = vmatprep.subr.bf16.mxu0 %v13660_v9 }
0x12f2   : > { %11983 = vmatmul.mubr.msk.bf16.vlgmr.msra.gmra.mrb[120].mxu0 %vm1444_vm0, %v14585_v19 }
0x12f3   : > { %11995 = vmatpush3.bf16.msra.mxu0 %v12932_v37  ;;  %11998 = vmatprep.mubr.msk.bf16.mxu0 %vm13661_vm1, %v13660_v9 }
0x12f4   : > { %11996 = vmatprep.subr.bf16.mxu0 %v13660_v9 }
0x12f7   : > { %11997 = vmatpush3.bf16.msra.mxu0 %v12933_v40 }
0x12f8   : > { %12010 = vmatprep.subr.bf16.mxu0 %v13660_v9 }
0x12fa   : > { %11999 = vmatmul.mubr.msk.bf16.vlgmr.msra.gmra.mrb[124].mxu0 %vm1444_vm0, %v14585_v19 }
0x12fb   : > { %12012 = vmatprep.mubr.msk.bf16.mxu0 %vm13661_vm1, %v13660_v9 }
0x13a5   : > { %v14692_v20 = vpop.f32.mrb[104].mxu0 }
0x13a6   : > { %v11912_v42 = vpop.f32.mrb[105].mxu0  ;;  %v4512_v37 = vadd.f32 %v10869_v39, %v14692_v20 }
0x13a7   : > { %v4514_v43 = vpop.f32.mrb[106].mxu0 }
0x13a8   : > { %v11913_v46 = vpop.f32.mrb[107].mxu0  ;;  %v4517_v42 = vadd.f32 %v4512_v37, %v14570_v12 }
0x13aa   : > { %v4522_v43 = vsel %vm1444_vm0, %v4517_v42, 0.0 }
0x13ad   : > { %v4793_v47 = vpop.f32.mrb[108].mxu0 }
0x13ae   : > { %v11936_v48 = vpop.f32.mrb[109].mxu0  ;;  %v4853_v15 = vpack.c.bf16 %v4793_v47, %v4793_v47 }
0x13af   : > { %v4796_v51 = vpop.f32.mrb[110].mxu0 }
0x13b0   : > { %v11937_v52 = vpop.f32.mrb[111].mxu0  ;;  %v5365_v19 = vpop.f32.mrb[128].mxu1 }
0x13b1   : > { %v5366_v54 = vadd.f32 %v5365_v19, %v14694_v50  ;;  %v12020_v55 = vpop.f32.mrb[129].mxu1 }
0x13b2   : > { %v5368_v53 = vpop.f32.mrb[130].mxu1 }
0x13b3   : > { %v5466_v56 = vsel %vm2166_vm2, %v5366_v54, -inf  ;;  %v12021_v57 = vpop.f32.mrb[131].mxu1 }
0x13b4   : > { %5467 = vmax.xlane.f32.xlu1 %v5466_v56  ;;  %v5278_v57 = vpack.c.bf16 %v14676_v32, %v14676_v32 }
0x13b5   : > { %v4901_v58 = vpop.f32.mrb[112].mxu0 }
0x13b6   : > { %v5063_v34 = vpack.c.bf16 %v4901_v58, %v4901_v58  ;;  %v11952_v59 = vpop.f32.mrb[113].mxu0 }
0x13b7   : > { %v4904_v60 = vpop.f32.mrb[114].mxu0 }
0x13b8   : > { %v5283_v61 = vsel %vm2166_vm2, %v5063_v34, 0  ;;  %v11953_v62 = vpop.f32.mrb[115].mxu0  ;;  %v5457_v63 = vpop.f32.mrb[132].mxu1 }
0x13b9   : > { %v5458_v0 = vadd.f32 %v5457_v63, %v14694_v50  ;;  %12011 = vmatpush3.bf16.xpose.msra.mxu0 %v5283_v61  ;;  %v12032_v1 = vpop.f32.mrb[133].mxu1  ;;  %v5653_v62 = vsel %vm2402_vm3, %v5278_v57, 0 }
0x13ba   : > { %12022 = vmatprep.subr.bf16.mxu0 %v13660_v9  ;;  %v5460_v2 = vpop.f32.mrb[134].mxu1 }
0x13bb   : > { %v5472_v3 = vsel %vm2166_vm2, %v5458_v0, -inf  ;;  %v12033_v4 = vpop.f32.mrb[135].mxu1 }
0x13bc   : > { %5473 = vmax.xlane.f32.xlu1 %v5472_v3 }
0x13bd   : > { %v5005_v5 = vpop.f32.mrb[116].mxu0 }
0x13be   : > { %v5065_v7 = vpack.c.bf16 %v5005_v5, %v5005_v5  ;;  %v11968_v8 = vpop.f32.mrb[117].mxu0 }
0x13bf   : > { %v5008_v10 = vpop.f32.mrb[118].mxu0 }
0x13c0   : > { %v5375_v11 = vsel %vm2166_vm2, %v5065_v7, 0  ;;  %v11969_v13 = vpop.f32.mrb[119].mxu0  ;;  %12013 = vmatmul.mubr.msk.bf16.vlgmr.msra.gmra.mrb[128].mxu0 %vm2166_vm2, %v4851_v6 }
0x13c1   : > { %12023 = vmatpush3.bf16.xpose.msra.mxu0 %v5375_v11  ;;  %12024 = vmatprep.mubr.msk.bf16.mxu0 %vm13661_vm1, %v13660_v9 }
0x13c2   : > { %12034 = vmatprep.subr.bf16.mxu0 %v13660_v9 }
0x13c5   : > { %v5113_v14 = vpop.f32.mrb[120].mxu0 }
0x13c6   : > { %v5275_v16 = vpack.c.bf16 %v5113_v14, %v5113_v14  ;;  %v11984_v18 = vpop.f32.mrb[121].mxu0 }
0x13c7   : > { %v5116_v21 = vpop.f32.mrb[122].mxu0  ;;  %v4638_v18 = vld [vmem:[#allocation11 + $0xc] sm:$0xf] }
0x13c8   : > { %v5515_v38 = vsel %vm2402_vm3, %v5275_v16, 0  ;;  %v11985_v22 = vpop.f32.mrb[123].mxu0  ;;  %12025 = vmatmul.mubr.msk.bf16.vlgmr.msra.gmra.mrb[132].mxu0 %vm2166_vm2, %v4853_v15  ;;  %v4636_v15 = vld [vmem:[#allocation11 + $0x4] sm:$0xf] }
0x13c9   : > { %12035 = vmatpush3.bf16.msra.mxu0 %v5515_v38  ;;  %12036 = vmatprep.mubr.msk.bf16.mxu0 %vm13661_vm1, %v13660_v9  ;;  %v5749_v16 = vsel %vm2402_vm3, %v4636_v15, 0  ;;  %v10929_v15 = vld [vmem:[%s15496_s11] ss:$0 sm:$0xff]  ;;  %s15502_s11 = sld [smem:[#allocation58_spill]] }
0x13ca   : > { %12046 = vmatprep.subr.bf16.mxu0 %v13660_v9 }
0x13cd   : > { %v14714_v23 = vpop.f32.mrb[124].mxu0 }
0x13ce   : > { %v12000_v24 = vpop.f32.mrb[125].mxu0  ;;  %v5277_v39 = vpack.c.bf16 %v14714_v23, %v14714_v23  ;;  %v4635_v23 = vld [vmem:[#allocation11] sm:$0xf] }
0x13cf   : > { %v5220_v25 = vpop.f32.mrb[126].mxu0 }
0x13d0   : > { %v12001_v26 = vpop.f32.mrb[127].mxu0  ;;  %v5841_v25 = vsel %vm2402_vm3, %v4638_v18, 0 }
0x1441   : > { %v5468_v27 = vpop.xlane.xlu1 %5467 }
0x1442   : > { %v5476_v28 = vsub.f32 %v5366_v54, %v5468_v27 }
0x1444   : > { %v5481_v29 = vmul.f32 1.442695, %v5476_v28 }
0x1446   : > { %13066 = vpow2.f32 %v5481_v29 }
0x1449   : > { %v5474_v30 = vpop.xlane.xlu1 %5473 }
0x144a   : > { %v5478_v31 = vsub.f32 %v5458_v0, %v5474_v30 }
0x144c   : > { %v5485_v33 = vmul.f32 1.442695, %v5478_v31 }
0x144e   : > { %13068 = vpow2.f32 %v5485_v33 }
0x1450   : > { %v13067_v35 = vpop.eup %13066 }
0x1451   : > { %v5490_v36 = vsel %vm2166_vm2, %v13067_v35, 0.0 }
0x1452   : > { %5491 = vadd.xlane.f32.xlu1 %v5490_v36 }
0x1458   : > { %v13069_v40 = vpop.eup %13068 }
0x1459   : > { %v5496_v41 = vsel %vm2166_vm2, %v13069_v40, 0.0 }
0x145a   : > { %5497 = vadd.xlane.f32.xlu1 %v5496_v41  ;;  %v5607_v41 = vsel %vm2402_vm3, %v5277_v39, 0 }
0x145e   : > { %4523 = vadd.xlane.f32.xlu1 %v4522_v43 }
0x1493   : > { %v5319_v44 = vpop.f32.mrb[128].mxu0 }
0x1494   : > { %v5320_v45 = vadd.f32 %v5319_v44, %v14694_v50  ;;  %v12014_v46 = vpop.f32.mrb[129].mxu0 }
0x1495   : > { %v5322_v47 = vpop.f32.mrb[130].mxu0 }
0x1496   : > { %v12015_v48 = vpop.f32.mrb[131].mxu0  ;;  %v5463_v49 = vsel %vm2166_vm2, %v5320_v45, -inf }
0x1497   : > { %5464 = vmax.xlane.f32.xlu0 %v5463_v49 }
0x149b   : > { %v5411_v51 = vpop.f32.mrb[132].mxu0 }
0x149c   : > { %v5412_v20 = vadd.f32 %v5411_v51, %v14694_v50  ;;  %v12026_v52 = vpop.f32.mrb[133].mxu0 }
0x149d   : > { %v5414_v19 = vpop.f32.mrb[134].mxu0 }
0x149e   : > { %v12027_v54 = vpop.f32.mrb[135].mxu0  ;;  %v5469_v12 = vsel %vm2166_vm2, %v5412_v20, -inf }
0x149f   : > { %5470 = vmax.xlane.f32.xlu0 %v5469_v12  ;;  %v4637_v54 = vld [vmem:[#allocation11 + $0x8] sm:$0xf] }
0x14df   : > { %v5492_v55 = vpop.xlane.xlu1 %5491 }
0x14e0   : > { %13070 = vrcp.f32 %v5492_v55 }
0x14e7   : > { %v5498_v53 = vpop.xlane.xlu1 %5497 }
0x14e8   : > { %13072 = vrcp.f32 %v5498_v53 }
0x14ea   : > { %v13071_v56 = vpop.eup %13070 }
0x14eb   : > { %v5504_v58 = vmul.f32 %v13071_v56, %v13067_v35  ;;  %v4524_v34 = vpop.xlane.xlu1 %4523  ;;  %v5795_v56 = vsel %vm2402_vm3, %v4637_v54, 0  ;;  %v12943_v54 = vld [vmem:[#allocation14 + $0x10] sm:$0xff]  }
0x14ec   : > { %v4525_v59 = vmul.f32 0.03125, %v4524_v34 }
0x14ed   : > { %v5508_v60 = vpack.c.bf16 %v5504_v58, %v5504_v58 }
0x14ee   : > { %v14728_v61 = vsub.f32 %v4517_v42, %v4525_v59 }
0x14ef   : > { %12043 = vmatmul.mubr.msk.bf16.vlgmr.msra.gmra.mrb[136].mxu1 %vm2166_vm2, %v5508_v60 }
0x14f0   : > { %12053 = vmatpush3.bf16.msra.mxu1 %v5653_v62  ;;  %v4527_v63 = vmul.f32 %v14728_v61, %v14728_v61  ;;  %12054 = vmatprep.mubr.msk.bf16.mxu1 %vm13661_vm1, %v13660_v9 }
0x14f1   : > { %12064 = vmatprep.subr.bf16.mxu1 %v13660_v9 }
0x14f2   : > { %v13073_v32 = vpop.eup %13072  ;;  %v4528_v0 = vsel %vm1444_vm0, %v4527_v63, 0.0 }
0x14f3   : > { %v5506_v1 = vmul.f32 %v13073_v32, %v13069_v40  ;;  %4529 = vadd.xlane.f32.xlu1 %v4528_v0 }
0x14f5   : > { %v5510_v2 = vpack.c.bf16 %v5506_v1, %v5506_v1 }
0x14f7   : > { %12055 = vmatmul.mubr.msk.bf16.vlgmr.msra.gmra.mrb[140].mxu1 %vm2166_vm2, %v5510_v2 }
0x14f8   : > { %12066 = vmatprep.mubr.msk.bf16.mxu1 %vm13661_vm1, %v13660_v9  ;;  %12065 = vmatpush3.bf16.msra.mxu1 %v5749_v16 }
0x14f9   : > { %12076 = vmatprep.subr.bf16.mxu1 %v13660_v9 }
0x1524   : > { %v5465_v3 = vpop.xlane.xlu0 %5464 }
0x1525   : > { %v5475_v4 = vsub.f32 %v5320_v45, %v5465_v3  ;;  %v5703_v45 = vsel %vm2402_vm3, %v4635_v23, 0 }
0x1527   : > { %v5479_v5 = vmul.f32 1.442695, %v5475_v4 }
0x1529   : > { %13074 = vpow2.f32 %v5479_v5 }
0x152c   : > { %v5471_v6 = vpop.xlane.xlu0 %5470 }
0x152d   : > { %v5477_v7 = vsub.f32 %v5412_v20, %v5471_v6 }
0x152f   : > { %v5483_v8 = vmul.f32 1.442695, %v5477_v7 }
0x1531   : > { %13076 = vpow2.f32 %v5483_v8 }
0x1533   : > { %v13075_v10 = vpop.eup %13074 }
0x1534   : > { %v5487_v11 = vsel %vm2166_vm2, %v13075_v10, 0.0 }
0x1535   : > { %5488 = vadd.xlane.f32.xlu0 %v5487_v11 }
0x153b   : > { %v13077_v13 = vpop.eup %13076 }
0x153c   : > { %v5493_v14 = vsel %vm2166_vm2, %v13077_v13, 0.0 }
0x153d   : > { %5494 = vadd.xlane.f32.xlu0 %v5493_v14 }
0x15c2   : > { %v5597_v21 = vpop.f32.mrb[136].mxu1  ;;  %v5489_v38 = vpop.xlane.xlu0 %5488 }
0x15c3   : > { %v5696_v22 = vpack.c.bf16 %v5597_v21, %v5597_v21  ;;  %13078 = vrcp.f32 %v5489_v38  ;;  %v12044_v24 = vpop.f32.mrb[137].mxu1 }
0x15c4   : > { %v5600_v26 = vpop.f32.mrb[138].mxu1 }
0x15c5   : > { %v12045_v27 = vpop.f32.mrb[139].mxu1  ;;  %12067 = vmatmul.mubr.msk.bf16.vlgmr.msra.gmra.mrb[144].mxu1 %vm2166_vm2, %v5696_v22 }
0x15c6   : > { %12077 = vmatpush3.bf16.msra.mxu1 %v5841_v25  ;;  %12078 = vmatprep.mubr.msk.bf16.mxu1 %vm13661_vm1, %v13660_v9 }
0x15c7   : > { %12090 = vmatprep.subr.bf16.mxu1 %v13660_v9 }
0x15ca   : > { %v5689_v28 = vpop.f32.mrb[140].mxu1  ;;  %v5495_v29 = vpop.xlane.xlu0 %5494 }
0x15cb   : > { %v5698_v30 = vpack.c.bf16 %v5689_v28, %v5689_v28  ;;  %13080 = vrcp.f32 %v5495_v29  ;;  %v12056_v31 = vpop.f32.mrb[141].mxu1  ;;  %v12934_v28 = vld [vmem:[#allocation13] sm:$0xff]   ;;  %v12935_v29 = vld [vmem:[#allocation13 + $0x10] sm:$0xff]  }
0x15cc   : > { %v5692_v33 = vpop.f32.mrb[142].mxu1  ;;  %v12937_v31 = vld [vmem:[#allocation13 + $0x18] sm:$0xff]  }
0x15cd   : > { %v13079_v35 = vpop.eup %13078  ;;  %v12057_v36 = vpop.f32.mrb[143].mxu1  ;;  %12079 = vmatmul.mubr.msk.bf16.vlgmr.msra.gmra.mrb[148].mxu1 %vm2166_vm2, %v5698_v30  ;;  %v12936_v30 = vld [vmem:[#allocation13 + $0x8] sm:$0xff]  }
0x15ce   : > { %v5503_v37 = vmul.f32 %v13079_v35, %v13075_v10  ;;  %12094 = vmatprep.mubr.msk.bf16.mxu1 %vm13661_vm1, %v13660_v9  ;;  %12091 = vmatpush3.bf16.msra.mxu1 %v12935_v29  ;;  %v4530_v35 = vpop.xlane.xlu1 %4529 }
0x15cf   : > { %12092 = vmatprep.subr.bf16.mxu1 %v13660_v9  ;;  %v4531_v39 = vmul.f32 0.03125, %v4530_v35 }
0x15d0   : > { %v5507_v40 = vpack.c.bf16 %v5503_v37, %v5503_v37 }
0x15d1   : > { %v4532_v37 = vadd.f32 1e-12, %v4531_v39 }
0x15d2   : > { %12037 = vmatmul.mubr.msk.bf16.vlgmr.msra.gmra.mrb[136].mxu0 %vm2166_vm2, %v5507_v40  ;;  %12093 = vmatpush3.bf16.msra.mxu1 %v12937_v31 }
0x15d3   : > { %12047 = vmatpush3.bf16.msra.mxu0 %v5607_v41  ;;  %12048 = vmatprep.mubr.msk.bf16.mxu0 %vm13661_vm1, %v13660_v9  ;;  %v10930_v41 = vld [vmem:[%s15498_s7] ss:$0 sm:$0xff]  ;;  %s15504_s7 = sld [smem:[#allocation59_spill]] }
0x15d4   : > { %12058 = vmatprep.subr.bf16.mxu0 %v13660_v9  ;;  %12106 = vmatprep.subr.bf16.mxu1 %v13660_v9 }
0x15d5   : > { %v13081_v42 = vpop.eup %13080 }
0x15d6   : > { %v5505_v43 = vmul.f32 %v13081_v42, %v13077_v13 }
0x15d8   : > { %v5509_v44 = vpack.c.bf16 %v5505_v43, %v5505_v43  ;;  %v10931_v43 = vld [vmem:[%s15500_s15] ss:$0 sm:$0xff]  ;;  %s15506_s15 = sld [smem:[#allocation60_spill]] }
0x15da   : > { %12049 = vmatmul.mubr.msk.bf16.vlgmr.msra.gmra.mrb[140].mxu0 %vm2166_vm2, %v5509_v44 }
0x15db   : > { %12060 = vmatprep.mubr.msk.bf16.mxu0 %vm13661_vm1, %v13660_v9  ;;  %12059 = vmatpush3.bf16.msra.mxu0 %v5703_v45  ;;  %v12938_v45 = vld [vmem:[#allocation13 + $0x20] sm:$0xff]  }
0x15dc   : > { %12070 = vmatprep.subr.bf16.mxu0 %v13660_v9 }
0x15de   : > { %s15507_s9 = smov %s15506_s15 }
0x1698   : > { %v5785_v46 = vpop.f32.mrb[144].mxu1 }
0x1699   : > { %v12068_v47 = vpop.f32.mrb[145].mxu1  ;;  %v5884_v0 = vsel %vm1444_vm0, %v5785_v46, 0.0  ;;  %v12939_v46 = vld [vmem:[#allocation13 + $0x30] sm:$0xff]  }
0x169a   : > { %v5788_v48 = vpop.f32.mrb[146].mxu1 }
0x169b   : > { %v12069_v49 = vpop.f32.mrb[147].mxu1 }
0x169c   : > { %v12940_v49 = vld [vmem:[#allocation13 + $0x28] sm:$0xff]  }
0x16a0   : > { %v5877_v51 = vpop.f32.mrb[148].mxu1 }
0x16a1   : > { %v12080_v20 = vpop.f32.mrb[149].mxu1  ;;  %v5888_v13 = vsel %vm1444_vm0, %v5877_v51, 0.0  ;;  %v12941_v51 = vld [vmem:[#allocation13 + $0x38] sm:$0xff]  }
0x16a2   : > { %v5880_v52 = vpop.f32.mrb[150].mxu1 }
0x16a3   : > { %v12081_v19 = vpop.f32.mrb[151].mxu1  ;;  %v10877_v52 = vld [vmem:[%s15487_s4 + $0x1] ss:$0 sm:$0xff]  ;;  %s15503_s4 = smov %s15502_s11 }
0x16a4   : > { %v12942_v19 = vld [vmem:[#allocation14] sm:$0xff]  }
0x16a5   : > { %v5551_v12 = vpop.f32.mrb[136].mxu0 }
0x16a6   : > { %v5695_v55 = vpack.c.bf16 %v5551_v12, %v5551_v12  ;;  %v12038_v53 = vpop.f32.mrb[137].mxu0 }
0x16a7   : > { %v5554_v57 = vpop.f32.mrb[138].mxu0  ;;  %v12945_v53 = vld [vmem:[#allocation14 + $0x18] sm:$0xff]  }
0x16a8   : > { %v12039_v58 = vpop.f32.mrb[139].mxu0  ;;  %12061 = vmatmul.mubr.msk.bf16.vlgmr.msra.gmra.mrb[144].mxu0 %vm2166_vm2, %v5695_v55  ;;  %v12944_v55 = vld [vmem:[#allocation14 + $0x8] sm:$0xff]   ;;  %v12946_v57 = vld [vmem:[#allocation14 + $0x20] sm:$0xff]  }
0x16a9   : > { %12071 = vmatpush3.bf16.msra.mxu0 %v5795_v56  ;;  %12072 = vmatprep.mubr.msk.bf16.mxu0 %vm13661_vm1, %v13660_v9  ;;  %v12947_v58 = vld [vmem:[#allocation14 + $0x30] sm:$0xff]  }
0x16aa   : > { %12082 = vmatprep.subr.bf16.mxu0 %v13660_v9 }
0x16ad   : > { %v5643_v34 = vpop.f32.mrb[140].mxu0 }
0x16ae   : > { %v5697_v59 = vpack.c.bf16 %v5643_v34, %v5643_v34  ;;  %v12050_v60 = vpop.f32.mrb[141].mxu0 }
0x16af   : > { %v5646_v62 = vpop.f32.mrb[142].mxu0  ;;  %v12949_v60 = vld [vmem:[#allocation14 + $0x38] sm:$0xff]  }
0x16b0   : > { %v12051_v63 = vpop.f32.mrb[143].mxu0  ;;  %12073 = vmatmul.mubr.msk.bf16.vlgmr.msra.gmra.mrb[148].mxu0 %vm2166_vm2, %v5697_v59  ;;  %v12948_v59 = vld [vmem:[#allocation14 + $0x28] sm:$0xff]   ;;  %v12950_v62 = vld [vmem:[#allocation16] sm:$0xff]  }
0x16b1   : > { %12086 = vmatprep.mubr.msk.bf16.mxu0 %vm13661_vm1, %v13660_v9  ;;  %12083 = vmatpush3.bf16.msra.mxu0 %v12934_v28  ;;  %v12951_v63 = vld [vmem:[#allocation16 + $0x10] sm:$0xff]  }
0x16b2   : > { %12084 = vmatprep.subr.bf16.mxu0 %v13660_v9 }
0x16b5   : > { %12085 = vmatpush3.bf16.msra.mxu0 %v12936_v30 }
0x16b6   : > { %12098 = vmatprep.subr.bf16.mxu0 %v13660_v9 }
0x177b   : > { %v5739_v32 = vpop.f32.mrb[144].mxu0 }
0x177c   : > { %v5883_v1 = vsel %vm1444_vm0, %v5739_v32, 0.0  ;;  %v12062_v2 = vpop.f32.mrb[145].mxu0  ;;  %v12952_v32 = vld [vmem:[#allocation16 + $0x8] sm:$0xff]  }
0x177d   : > { %v5885_v3 = vadd.f32 %v5884_v0, %v5883_v1  ;;  %v5742_v4 = vpop.f32.mrb[146].mxu0  ;;  %v12953_v0 = vld [vmem:[#allocation16 + $0x18] sm:$0xff]   ;;  %v12954_v1 = vld [vmem:[#allocation16 + $0x20] sm:$0xff]   ;;  %v12955_v2 = vld [vmem:[#allocation16 + $0x30] sm:$0xff]  }
0x177e   : > { %v12063_v5 = vpop.f32.mrb[147].mxu0  ;;  %v12957_v4 = vld [vmem:[#allocation16 + $0x38] sm:$0xff]  }
0x1783   : > { %v5831_v6 = vpop.f32.mrb[148].mxu0 }
0x1784   : > { %v5886_v7 = vsel %vm1444_vm0, %v5831_v6, 0.0  ;;  %v12074_v8 = vpop.f32.mrb[149].mxu0 }
0x1785   : > { %v5887_v10 = vadd.f32 %v5886_v7, %v5885_v3  ;;  %v5834_v11 = vpop.f32.mrb[150].mxu0  ;;  %v12956_v3 = vld [vmem:[#allocation16 + $0x28] sm:$0xff]  }
0x1786   : > { %v12075_v14 = vpop.f32.mrb[151].mxu0 }
0x1787   : > { %v5889_v16 = vadd.f32 %v5888_v13, %v5887_v10 }
0x1789   : > { %v5896_v18 = vadd.f32 %v10929_v15, %v5889_v16 }
0x178b   : > { %v5897_v21 = vadd.f32 %v5896_v18, %v14576_v17 }
0x178d   : > { %v5900_v38 = vsel %vm1444_vm0, %v5897_v21, 0.0 }
0x178e   : > { %5901 = vadd.xlane.f32.xlu0 %v5900_v38 }
0x181b   : > { %v5902_v22 = vpop.xlane.xlu0 %5901 }
0x181c   : > { %v5903_v24 = vmul.f32 0.03125, %v5902_v22 }
0x181e   : > { %v5904_v25 = vsub.f32 %v5897_v21, %v5903_v24 }
0x1820   : > { %v5905_v26 = vmul.f32 %v5904_v25, %v5904_v25 }
0x1822   : > { %v5906_v27 = vsel %vm1444_vm0, %v5905_v26, 0.0 }
0x1823   : > { %5907 = vadd.xlane.f32.xlu0 %v5906_v27 }
0x18b0   : > { %v5908_v17 = vpop.xlane.xlu0 %5907 }
0x18b1   : > { %v5909_v33 = vmul.f32 0.03125, %v5908_v17 }
0x18b3   : > { %v5910_v36 = vadd.f32 1e-12, %v5909_v33 }
0x18b5   : > { %13082 = vrsqrt.f32 %v5910_v36 }
0x18b6   : > { %13084 = vrsqrt.f32 %v4532_v37 }
0x18bf   : > { %v13083_v40 = vpop.eup %13082 }
0x18c0   : > { %v5912_v42 = vmul.f32 %v13083_v40, %v5904_v25  ;;  %v13085_v48 = vpop.eup %13084 }
0x18c1   : > { %v4534_v20 = vmul.f32 %v13085_v48, %v14728_v61  ;;  %v10878_v61 = vld [vmem:[%s15489_s5 + $0x1] ss:$0 sm:$0xff]  ;;  %s15505_s5 = smov %s15504_s7 }
0x18c2   : > { %v5919_v44 = vmul.f32 %v10930_v41, %v5912_v42 }
0x18c3   : > { %v4541_v12 = vmul.f32 %v10877_v52, %v4534_v20 }
0x18c4   : > { %v14787_v23 = vadd.f32 %v10931_v43, %v5919_v44 }
0x18c5   : > { %v4548_v56 = vadd.f32 %v10878_v61, %v4541_v12 }
0x18c6   : > { %v5927_v47 = vpack.c.bf16 %v14787_v23, %v14787_v23 }
0x18c7   : > { %v14812_v34 = vpack.c.bf16 %v4548_v56, %v4548_v56 }
0x18c8   : > { %12087 = vmatmul.mubr.msk.bf16.vlgmr.msra.gmra.mrb[152].mxu0 %vm1444_vm0, %v5927_v47  ;;  %12095 = vmatmul.mubr.msk.bf16.vlgmr.msra.gmra.mrb[152].mxu1 %vm1444_vm0, %v5927_v47 }
0x18c9   : > { %12099 = vmatpush3.bf16.msra.mxu0 %v12938_v45  ;;  %12107 = vmatpush3.bf16.msra.mxu1 %v12939_v46 }
0x18ca   : > { %12100 = vmatprep.subr.bf16.mxu0 %v13660_v9  ;;  %12108 = vmatprep.subr.bf16.mxu1 %v13660_v9 }
0x18cb   : > { %12102 = vmatprep.mubr.msk.bf16.mxu0 %vm13661_vm1, %v13660_v9  ;;  %12110 = vmatprep.mubr.msk.bf16.mxu1 %vm13661_vm1, %v13660_v9 }
0x18cd   : > { %12101 = vmatpush3.bf16.msra.mxu0 %v12940_v49  ;;  %12109 = vmatpush3.bf16.msra.mxu1 %v12941_v51 }
0x18ce   : > { %12114 = vmatprep.subr.bf16.mxu0 %v13660_v9  ;;  %12122 = vmatprep.subr.bf16.mxu1 %v13660_v9 }
0x18d0   : > { %12103 = vmatmul.mubr.msk.bf16.vlgmr.msra.gmra.mrb[156].mxu0 %vm1444_vm0, %v5927_v47  ;;  %12111 = vmatmul.mubr.msk.bf16.vlgmr.msra.gmra.mrb[156].mxu1 %vm1444_vm0, %v5927_v47 }
0x18d1   : > { %12115 = vmatpush3.bf16.msra.mxu0 %v12942_v19  ;;  %12123 = vmatpush3.bf16.msra.mxu1 %v12943_v54 }
0x18d2   : > { %12116 = vmatprep.subr.bf16.mxu0 %v13660_v9  ;;  %12124 = vmatprep.subr.bf16.mxu1 %v13660_v9 }
0x18d3   : > { %12118 = vmatprep.mubr.msk.bf16.mxu0 %vm13661_vm1, %v13660_v9  ;;  %12126 = vmatprep.mubr.msk.bf16.mxu1 %vm13661_vm1, %v13660_v9 }
0x18d5   : > { %12117 = vmatpush3.bf16.msra.mxu0 %v12944_v55  ;;  %12125 = vmatpush3.bf16.msra.mxu1 %v12945_v53 }
0x18d6   : > { %12130 = vmatprep.subr.bf16.mxu0 %v13660_v9  ;;  %12138 = vmatprep.subr.bf16.mxu1 %v13660_v9 }
0x18d8   : > { %12119 = vmatmul.mubr.msk.bf16.vlgmr.msra.gmra.mrb[160].mxu0 %vm1444_vm0, %v14812_v34  ;;  %12127 = vmatmul.mubr.msk.bf16.vlgmr.msra.gmra.mrb[160].mxu1 %vm1444_vm0, %v14812_v34 }
0x18d9   : > { %12131 = vmatpush3.bf16.msra.mxu0 %v12946_v57  ;;  %12139 = vmatpush3.bf16.msra.mxu1 %v12947_v58 }
0x18da   : > { %12132 = vmatprep.subr.bf16.mxu0 %v13660_v9  ;;  %12140 = vmatprep.subr.bf16.mxu1 %v13660_v9 }
0x18db   : > { %12134 = vmatprep.mubr.msk.bf16.mxu0 %vm13661_vm1, %v13660_v9  ;;  %12142 = vmatprep.mubr.msk.bf16.mxu1 %vm13661_vm1, %v13660_v9 }
0x18dd   : > { %12133 = vmatpush3.bf16.msra.mxu0 %v12948_v59  ;;  %12141 = vmatpush3.bf16.msra.mxu1 %v12949_v60 }
0x18de   : > { %12146 = vmatprep.subr.bf16.mxu0 %v13660_v9  ;;  %12154 = vmatprep.subr.bf16.mxu1 %v13660_v9 }
0x18e0   : > { %12135 = vmatmul.mubr.msk.bf16.vlgmr.msra.gmra.mrb[164].mxu0 %vm1444_vm0, %v14812_v34  ;;  %12143 = vmatmul.mubr.msk.bf16.vlgmr.msra.gmra.mrb[164].mxu1 %vm1444_vm0, %v14812_v34 }
0x18e1   : > { %12147 = vmatpush3.bf16.msra.mxu0 %v12950_v62  ;;  %12155 = vmatpush3.bf16.msra.mxu1 %v12951_v63 }
0x18e2   : > { %12148 = vmatprep.subr.bf16.mxu0 %v13660_v9  ;;  %12156 = vmatprep.subr.bf16.mxu1 %v13660_v9 }
0x18e3   : > { %12150 = vmatprep.mubr.msk.bf16.mxu0 %vm13661_vm1, %v13660_v9  ;;  %12158 = vmatprep.mubr.msk.bf16.mxu1 %vm13661_vm1, %v13660_v9 }
0x18e5   : > { %12149 = vmatpush3.bf16.msra.mxu0 %v12952_v32  ;;  %12157 = vmatpush3.bf16.msra.mxu1 %v12953_v0 }
0x18e6   : > { %12162 = vmatprep.subr.bf16.mxu0 %v13660_v9  ;;  %12170 = vmatprep.subr.bf16.mxu1 %v13660_v9 }
0x18e8   : > { %12151 = vmatmul.mubr.msk.bf16.vlgmr.msra.gmra.mrb[168].mxu0 %vm1444_vm0, %v14812_v34  ;;  %12159 = vmatmul.mubr.msk.bf16.vlgmr.msra.gmra.mrb[168].mxu1 %vm1444_vm0, %v14812_v34 }
0x18e9   : > { %12163 = vmatpush3.bf16.msra.mxu0 %v12954_v1  ;;  %12171 = vmatpush3.bf16.msra.mxu1 %v12955_v2 }
0x18ea   : > { %12164 = vmatprep.subr.bf16.mxu0 %v13660_v9  ;;  %12172 = vmatprep.subr.bf16.mxu1 %v13660_v9 }
0x18eb   : > { %12166 = vmatprep.mubr.msk.bf16.mxu0 %vm13661_vm1, %v13660_v9  ;;  %12174 = vmatprep.mubr.msk.bf16.mxu1 %vm13661_vm1, %v13660_v9 }
0x18ed   : > { %12165 = vmatpush3.bf16.msra.mxu0 %v12956_v3  ;;  %12173 = vmatpush3.bf16.msra.mxu1 %v12957_v4 }
0x18ee   : > { %12178 = vmatprep.subr.bf16.mxu0 %v13660_v9  ;;  %12184 = vmatprep.subr.bf16.mxu1 %v13660_v9 }
0x18f0   : > { %12167 = vmatmul.mubr.msk.bf16.vlgmr.msra.gmra.mrb[172].mxu0 %vm1444_vm0, %v14812_v34  ;;  %12175 = vmatmul.mubr.msk.bf16.vlgmr.msra.gmra.mrb[172].mxu1 %vm1444_vm0, %v14812_v34 }
0x18f1   : > { %12180 = vmatprep.mubr.msk.bf16.mxu0 %vm13661_vm1, %v13660_v9  ;;  %12186 = vmatprep.mubr.msk.bf16.mxu1 %vm13661_vm1, %v13660_v9 }
0x199b   : > { %v6030_v5 = vpop.f32.mrb[152].mxu0  ;;  %v6082_v6 = vpop.f32.mrb[152].mxu1 }
0x199c   : > { %v12088_v7 = vpop.f32.mrb[153].mxu0  ;;  %v12096_v8 = vpop.f32.mrb[153].mxu1  ;;  %v6192_v42 = vpack.c.bf16 %v6030_v5, %v6030_v5  ;;  %v6193_v43 = vpack.c.bf16 %v6082_v6, %v6082_v6 }
0x199d   : > { %v6033_v10 = vpop.f32.mrb[154].mxu0  ;;  %v6085_v11 = vpop.f32.mrb[154].mxu1 }
0x199e   : > { %v12089_v13 = vpop.f32.mrb[155].mxu0  ;;  %v12097_v14 = vpop.f32.mrb[155].mxu1 }
0x19a3   : > { %v6134_v15 = vpop.f32.mrb[156].mxu0  ;;  %v6186_v16 = vpop.f32.mrb[156].mxu1 }
0x19a4   : > { %v12104_v18 = vpop.f32.mrb[157].mxu0  ;;  %v12112_v21 = vpop.f32.mrb[157].mxu1  ;;  %v6194_v61 = vpack.c.bf16 %v6134_v15, %v6134_v15  ;;  %v6195_v55 = vpack.c.bf16 %v6186_v16, %v6186_v16 }
0x19a5   : > { %v6137_v38 = vpop.f32.mrb[158].mxu0  ;;  %v6189_v22 = vpop.f32.mrb[158].mxu1 }
0x19a6   : > { %v12105_v24 = vpop.f32.mrb[159].mxu0  ;;  %v12113_v25 = vpop.f32.mrb[159].mxu1 }
0x19ab   : > { %v6245_v26 = vpop.f32.mrb[160].mxu0  ;;  %v6297_v27 = vpop.f32.mrb[160].mxu1 }
0x19ac   : > { %v6407_v28 = vpack.c.bf16 %v6245_v26, %v6245_v26  ;;  %v6408_v29 = vpack.c.bf16 %v6297_v27, %v6297_v27  ;;  %v12120_v30 = vpop.f32.mrb[161].mxu0  ;;  %v12128_v31 = vpop.f32.mrb[161].mxu1 }
0x19ad   : > { %v6248_v17 = vpop.f32.mrb[162].mxu0  ;;  %v6300_v33 = vpop.f32.mrb[162].mxu1 }
0x19ae   : > { %v6627_v35 = vsel %vm2166_vm2, %v6407_v28, 0  ;;  %v6673_v36 = vsel %vm2166_vm2, %v6408_v29, 0  ;;  %v12121_v39 = vpop.f32.mrb[163].mxu0  ;;  %v12129_v37 = vpop.f32.mrb[163].mxu1 }
0x19af   : > { %12179 = vmatpush3.bf16.xpose.msra.mxu0 %v6627_v35  ;;  %12185 = vmatpush3.bf16.xpose.msra.mxu1 %v6673_v36 }
0x19b0   : > { %12190 = vmatprep.subr.bf16.mxu0 %v13660_v9  ;;  %12196 = vmatprep.subr.bf16.mxu1 %v13660_v9 }
0x19b3   : > { %v6349_v40 = vpop.f32.mrb[164].mxu0  ;;  %v6401_v41 = vpop.f32.mrb[164].mxu1 }
0x19b4   : > { %v6409_v44 = vpack.c.bf16 %v6349_v40, %v6349_v40  ;;  %v6410_v45 = vpack.c.bf16 %v6401_v41, %v6401_v41  ;;  %v12136_v46 = vpop.f32.mrb[165].mxu0  ;;  %v12144_v47 = vpop.f32.mrb[165].mxu1 }
0x19b5   : > { %v6352_v48 = vpop.f32.mrb[166].mxu0  ;;  %v6404_v49 = vpop.f32.mrb[166].mxu1 }
0x19b6   : > { %v6719_v51 = vsel %vm2166_vm2, %v6409_v44, 0  ;;  %v6765_v20 = vsel %vm2166_vm2, %v6410_v45, 0  ;;  %v12137_v52 = vpop.f32.mrb[167].mxu0  ;;  %v12145_v19 = vpop.f32.mrb[167].mxu1  ;;  %12181 = vmatmul.mubr.msk.bf16.vlgmr.msra.gmra.mrb[176].mxu0 %vm2166_vm2, %v6192_v42  ;;  %12187 = vmatmul.mubr.msk.bf16.vlgmr.msra.gmra.mrb[176].mxu1 %vm2166_vm2, %v6193_v43 }
0x19b7   : > { %12191 = vmatpush3.bf16.xpose.msra.mxu0 %v6719_v51  ;;  %12197 = vmatpush3.bf16.xpose.msra.mxu1 %v6765_v20 }
0x19b8   : > { %12192 = vmatprep.mubr.msk.bf16.mxu0 %vm13661_vm1, %v13660_v9  ;;  %12198 = vmatprep.mubr.msk.bf16.mxu1 %vm13661_vm1, %v13660_v9 }
0x19b9   : > { %12202 = vmatprep.subr.bf16.mxu0 %v13660_v9  ;;  %12208 = vmatprep.subr.bf16.mxu1 %v13660_v9 }
0x19bb   : > { %v6457_v54 = vpop.f32.mrb[168].mxu0  ;;  %v6509_v12 = vpop.f32.mrb[168].mxu1 }
0x19bc   : > { %v6619_v53 = vpack.c.bf16 %v6457_v54, %v6457_v54  ;;  %v6620_v56 = vpack.c.bf16 %v6509_v12, %v6509_v12  ;;  %v12152_v57 = vpop.f32.mrb[169].mxu0  ;;  %v12160_v58 = vpop.f32.mrb[169].mxu1 }
0x19bd   : > { %v6460_v59 = vpop.f32.mrb[170].mxu0  ;;  %v6512_v60 = vpop.f32.mrb[170].mxu1 }
0x19be   : > { %v6859_v62 = vsel %vm2402_vm3, %v6619_v53, 0  ;;  %v6905_v63 = vsel %vm2402_vm3, %v6620_v56, 0  ;;  %v12153_v32 = vpop.f32.mrb[171].mxu0  ;;  %v12161_v0 = vpop.f32.mrb[171].mxu1  ;;  %12193 = vmatmul.mubr.msk.bf16.vlgmr.msra.gmra.mrb[180].mxu0 %vm2166_vm2, %v6194_v61  ;;  %12199 = vmatmul.mubr.msk.bf16.vlgmr.msra.gmra.mrb[180].mxu1 %vm2166_vm2, %v6195_v55 }
0x19bf   : > { %12203 = vmatpush3.bf16.msra.mxu0 %v6859_v62  ;;  %12209 = vmatpush3.bf16.msra.mxu1 %v6905_v63 }
0x19c0   : > { %12204 = vmatprep.mubr.msk.bf16.mxu0 %vm13661_vm1, %v13660_v9  ;;  %12210 = vmatprep.mubr.msk.bf16.mxu1 %vm13661_vm1, %v13660_v9 }
0x19c1   : > { %12214 = vmatprep.subr.bf16.mxu0 %v13660_v9  ;;  %12220 = vmatprep.subr.bf16.mxu1 %v13660_v9 }
0x19c3   : > { %v14884_v1 = vpop.f32.mrb[172].mxu0  ;;  %v14886_v2 = vpop.f32.mrb[172].mxu1 }
0x19c4   : > { %v12168_v3 = vpop.f32.mrb[173].mxu0  ;;  %v12176_v4 = vpop.f32.mrb[173].mxu1  ;;  %v6622_v59 = vpack.c.bf16 %v14886_v2, %v14886_v2  ;;  %v6621_v62 = vpack.c.bf16 %v14884_v1, %v14884_v1  ;;  %v5977_v1 = vld [vmem:[#allocation17 + $0x4] sm:$0xf] }
0x19c5   : > { %v6564_v5 = vpop.f32.mrb[174].mxu0  ;;  %v6616_v6 = vpop.f32.mrb[174].mxu1 }
0x19c6   : > { %v12169_v7 = vpop.f32.mrb[175].mxu0  ;;  %v12177_v8 = vpop.f32.mrb[175].mxu1  ;;  %v6997_v3 = vsel %vm2402_vm3, %v6622_v59, 0  ;;  %v6951_v4 = vsel %vm2402_vm3, %v6621_v62, 0  ;;  %v10980_v62 = vld [vmem:[%s15502_s11] ss:$0 sm:$0xff] }
0x19c7   : > { %v5976_v7 = vld [vmem:[#allocation17] sm:$0xf]  ;;  %s15508_s11 = sld [smem:[#allocation61_spill]] }
0x19cd   : > { %s15509_s12 = smov %s15508_s11 }
0x1a89   : > { %v6663_v10 = vpop.f32.mrb[176].mxu0  ;;  %v6709_v11 = vpop.f32.mrb[176].mxu1 }
0x1a8a   : > { %v12182_v13 = vpop.f32.mrb[177].mxu0  ;;  %v12188_v14 = vpop.f32.mrb[177].mxu1  ;;  %v6810_v15 = vsel %vm2166_vm2, %v6709_v11, -inf  ;;  %v6807_v16 = vsel %vm2166_vm2, %v6663_v10, -inf }
0x1a8b   : > { %6811 = vmax.xlane.f32.xlu1 %v6810_v15  ;;  %v6712_v18 = vpop.f32.mrb[178].mxu1  ;;  %6808 = vmax.xlane.f32.xlu0 %v6807_v16  ;;  %v6666_v21 = vpop.f32.mrb[178].mxu0  ;;  %v7047_v14 = vsel %vm2402_vm3, %v5976_v7, 0  ;;  %v5979_v15 = vld [vmem:[#allocation17 + $0xc] sm:$0xf] }
0x1a8c   : > { %v12183_v38 = vpop.f32.mrb[179].mxu0  ;;  %v12189_v22 = vpop.f32.mrb[179].mxu1  ;;  %v5978_v16 = vld [vmem:[#allocation17 + $0x8] sm:$0xf] }
0x1a91   : > { %v6755_v24 = vpop.f32.mrb[180].mxu0  ;;  %v6801_v25 = vpop.f32.mrb[180].mxu1 }
0x1a92   : > { %v12194_v26 = vpop.f32.mrb[181].mxu0  ;;  %v12200_v27 = vpop.f32.mrb[181].mxu1  ;;  %v6816_v28 = vsel %vm2166_vm2, %v6801_v25, -inf  ;;  %v6813_v29 = vsel %vm2166_vm2, %v6755_v24, -inf }
0x1a93   : > { %6817 = vmax.xlane.f32.xlu1 %v6816_v28  ;;  %v6804_v30 = vpop.f32.mrb[182].mxu1  ;;  %6814 = vmax.xlane.f32.xlu0 %v6813_v29  ;;  %v6758_v31 = vpop.f32.mrb[182].mxu0  ;;  %v7139_v28 = vsel %vm2402_vm3, %v5978_v16, 0  ;;  %v10981_v16 = vld [vmem:[%s15504_s7] ss:$0 sm:$0xff]  ;;  %s15510_s7 = sld [smem:[#allocation63_spill]] }
0x1a94   : > { %v12195_v17 = vpop.f32.mrb[183].mxu0  ;;  %v12201_v33 = vpop.f32.mrb[183].mxu1 }
0x1a99   : > { %s15511_s13 = smov %s15510_s7 }
0x1b18   : > { %v6812_v35 = vpop.xlane.xlu1 %6811  ;;  %v6809_v36 = vpop.xlane.xlu0 %6808 }
0x1b19   : > { %v6820_v39 = vsub.f32 %v6709_v11, %v6812_v35  ;;  %v6819_v37 = vsub.f32 %v6663_v10, %v6809_v36  ;;  %v7093_v11 = vsel %vm2402_vm3, %v5977_v1, 0 }
0x1b1b   : > { %v6825_v40 = vmul.f32 1.442695, %v6820_v39  ;;  %v6823_v41 = vmul.f32 1.442695, %v6819_v37 }
0x1b1d   : > { %13086 = vpow2.f32 %v6825_v40 }
0x1b1e   : > { %13088 = vpow2.f32 %v6823_v41 }
0x1b20   : > { %v6818_v42 = vpop.xlane.xlu1 %6817  ;;  %v6815_v43 = vpop.xlane.xlu0 %6814 }
0x1b21   : > { %v6822_v44 = vsub.f32 %v6801_v25, %v6818_v42  ;;  %v6821_v45 = vsub.f32 %v6755_v24, %v6815_v43  ;;  %v7185_v24 = vsel %vm2402_vm3, %v5979_v15, 0 }
0x1b23   : > { %v6829_v46 = vmul.f32 1.442695, %v6822_v44  ;;  %v6827_v47 = vmul.f32 1.442695, %v6821_v45 }
0x1b25   : > { %13090 = vpow2.f32 %v6829_v46 }
0x1b26   : > { %13092 = vpow2.f32 %v6827_v47 }
0x1b27   : > { %v13087_v48 = vpop.eup %13086 }
0x1b28   : > { %v13089_v49 = vpop.eup %13088  ;;  %v6834_v51 = vsel %vm2166_vm2, %v13087_v48, 0.0 }
0x1b29   : > { %6835 = vadd.xlane.f32.xlu1 %v6834_v51  ;;  %v6831_v20 = vsel %vm2166_vm2, %v13089_v49, 0.0 }
0x1b2a   : > { %6832 = vadd.xlane.f32.xlu0 %v6831_v20 }
0x1b2f   : > { %v13091_v52 = vpop.eup %13090 }
0x1b30   : > { %v13093_v19 = vpop.eup %13092  ;;  %v6840_v54 = vsel %vm2166_vm2, %v13091_v52, 0.0 }
0x1b31   : > { %6841 = vadd.xlane.f32.xlu1 %v6840_v54  ;;  %v6837_v12 = vsel %vm2166_vm2, %v13093_v19, 0.0 }
0x1b32   : > { %6838 = vadd.xlane.f32.xlu0 %v6837_v12 }
0x1bb6   : > { %v6836_v61 = vpop.xlane.xlu1 %6835 }
0x1bb7   : > { %13094 = vrcp.f32 %v6836_v61  ;;  %v6833_v55 = vpop.xlane.xlu0 %6832 }
0x1bb8   : > { %13096 = vrcp.f32 %v6833_v55 }
0x1bbe   : > { %v6842_v53 = vpop.xlane.xlu1 %6841 }
0x1bbf   : > { %13098 = vrcp.f32 %v6842_v53  ;;  %v6839_v56 = vpop.xlane.xlu0 %6838 }
0x1bc0   : > { %13100 = vrcp.f32 %v6839_v56 }
0x1bc1   : > { %v13095_v57 = vpop.eup %13094 }
0x1bc2   : > { %v13097_v58 = vpop.eup %13096  ;;  %v6848_v60 = vmul.f32 %v13095_v57, %v13087_v48 }
0x1bc3   : > { %v6847_v63 = vmul.f32 %v13097_v58, %v13089_v49 }
0x1bc4   : > { %v6852_v32 = vpack.c.bf16 %v6848_v60, %v6848_v60 }
0x1bc5   : > { %v6851_v0 = vpack.c.bf16 %v6847_v63, %v6847_v63 }
0x1bc6   : > { %12211 = vmatmul.mubr.msk.bf16.vlgmr.msra.gmra.mrb[184].mxu1 %vm2166_vm2, %v6852_v32 }
0x1bc7   : > { %12205 = vmatmul.mubr.msk.bf16.vlgmr.msra.gmra.mrb[184].mxu0 %vm2166_vm2, %v6851_v0  ;;  %12221 = vmatpush3.bf16.msra.mxu1 %v6997_v3 }
0x1bc8   : > { %12215 = vmatpush3.bf16.msra.mxu0 %v6951_v4  ;;  %12216 = vmatprep.mubr.msk.bf16.mxu0 %vm13661_vm1, %v13660_v9 }
0x1bc9   : > { %v13099_v2 = vpop.eup %13098  ;;  %12222 = vmatprep.mubr.msk.bf16.mxu1 %vm13661_vm1, %v13660_v9  ;;  %12226 = vmatprep.subr.bf16.mxu0 %v13660_v9 }
0x1bca   : > { %v13101_v5 = vpop.eup %13100  ;;  %v6850_v6 = vmul.f32 %v13099_v2, %v13091_v52  ;;  %12232 = vmatprep.subr.bf16.mxu1 %v13660_v9 }
0x1bcb   : > { %v6849_v8 = vmul.f32 %v13101_v5, %v13093_v19 }
0x1bcc   : > { %v6854_v10 = vpack.c.bf16 %v6850_v6, %v6850_v6 }
0x1bcd   : > { %v6853_v13 = vpack.c.bf16 %v6849_v8, %v6849_v8 }
0x1bce   : > { %12223 = vmatmul.mubr.msk.bf16.vlgmr.msra.gmra.mrb[188].mxu1 %vm2166_vm2, %v6854_v10  ;;  %v12958_v10 = vld [vmem:[#allocation19] sm:$0xff]  }
0x1bcf   : > { %12217 = vmatmul.mubr.msk.bf16.vlgmr.msra.gmra.mrb[188].mxu0 %vm2166_vm2, %v6853_v13  ;;  %12233 = vmatpush3.bf16.msra.mxu1 %v7093_v11  ;;  %v12959_v11 = vld [vmem:[#allocation19 + $0x8] sm:$0xff]  }
0x1bd0   : > { %12227 = vmatpush3.bf16.msra.mxu0 %v7047_v14  ;;  %12228 = vmatprep.mubr.msk.bf16.mxu0 %vm13661_vm1, %v13660_v9 }
0x1bd1   : > { %12234 = vmatprep.mubr.msk.bf16.mxu1 %vm13661_vm1, %v13660_v9  ;;  %12238 = vmatprep.subr.bf16.mxu0 %v13660_v9 }
0x1bd2   : > { %12244 = vmatprep.subr.bf16.mxu1 %v13660_v9 }
0x1c99   : > { %v6941_v18 = vpop.f32.mrb[184].mxu1 }
0x1c9a   : > { %v6895_v21 = vpop.f32.mrb[184].mxu0  ;;  %v7040_v38 = vpack.c.bf16 %v6941_v18, %v6941_v18  ;;  %v12212_v22 = vpop.f32.mrb[185].mxu1 }
0x1c9b   : > { %v7039_v25 = vpack.c.bf16 %v6895_v21, %v6895_v21  ;;  %v12206_v26 = vpop.f32.mrb[185].mxu0  ;;  %v6944_v27 = vpop.f32.mrb[186].mxu1  ;;  %v10982_v21 = vld [vmem:[%s15506_s15] ss:$0 sm:$0xff]  ;;  %s15512_s15 = sld [smem:[#allocation64_spill]] }
0x1c9c   : > { %v6898_v29 = vpop.f32.mrb[186].mxu0  ;;  %v12213_v30 = vpop.f32.mrb[187].mxu1  ;;  %12235 = vmatmul.mubr.msk.bf16.vlgmr.msra.gmra.mrb[192].mxu1 %vm2166_vm2, %v7040_v38  ;;  %v12961_v26 = vld [vmem:[#allocation20 + $0x8] sm:$0xff]   ;;  %v12962_v27 = vld [vmem:[#allocation20 + $0x10] sm:$0xff]  }
0x1c9d   : > { %v12207_v31 = vpop.f32.mrb[187].mxu0  ;;  %12229 = vmatmul.mubr.msk.bf16.vlgmr.msra.gmra.mrb[192].mxu0 %vm2166_vm2, %v7039_v25  ;;  %12245 = vmatpush3.bf16.msra.mxu1 %v7185_v24  ;;  %v12960_v25 = vld [vmem:[#allocation20] sm:$0xff]  }
0x1c9e   : > { %12239 = vmatpush3.bf16.msra.mxu0 %v7139_v28  ;;  %12240 = vmatprep.mubr.msk.bf16.mxu0 %vm13661_vm1, %v13660_v9  ;;  %v12963_v28 = vld [vmem:[#allocation20 + $0x18] sm:$0xff]   ;;  %v10983_v29 = vld [vmem:[%s15508_s11] ss:$0 sm:$0xff]  ;;  %s1429_s11 = sand.u32 1, %s13594_s10  }
0x1c9f   : > { %12246 = vmatprep.mubr.msk.bf16.mxu1 %vm13661_vm1, %v13660_v9  ;;  %12250 = vmatprep.subr.bf16.mxu0 %v13660_v9 }
0x1ca0   : > { %12258 = vmatprep.subr.bf16.mxu1 %v13660_v9 }
0x1ca1   : > { %v7033_v17 = vpop.f32.mrb[188].mxu1  ;;  %s15513_s14 = smov %s15512_s15 }
0x1ca2   : > { %v6987_v33 = vpop.f32.mrb[188].mxu0  ;;  %v7042_v35 = vpack.c.bf16 %v7033_v17, %v7033_v17  ;;  %v12224_v36 = vpop.f32.mrb[189].mxu1 }
0x1ca3   : > { %v7041_v39 = vpack.c.bf16 %v6987_v33, %v6987_v33  ;;  %v12218_v37 = vpop.f32.mrb[189].mxu0  ;;  %v7036_v40 = vpop.f32.mrb[190].mxu1 }
0x1ca4   : > { %v6990_v41 = vpop.f32.mrb[190].mxu0  ;;  %v12225_v42 = vpop.f32.mrb[191].mxu1  ;;  %12247 = vmatmul.mubr.msk.bf16.vlgmr.msra.gmra.mrb[196].mxu1 %vm2166_vm2, %v7042_v35 }
0x1ca5   : > { %v12219_v43 = vpop.f32.mrb[191].mxu0  ;;  %12241 = vmatmul.mubr.msk.bf16.vlgmr.msra.gmra.mrb[196].mxu0 %vm2166_vm2, %v7041_v39  ;;  %12266 = vmatprep.mubr.msk.bf16.mxu1 %vm13661_vm1, %v13660_v9 }
0x1ca6   : > { %12254 = vmatprep.mubr.msk.bf16.mxu0 %vm13661_vm1, %v13660_v9  ;;  %12251 = vmatpush3.bf16.msra.mxu0 %v12958_v10  ;;  %v12970_v10 = vld [vmem:[%s15495_s3 + $0x58] sm:$0xff]  }
0x1ca7   : > { %12252 = vmatprep.subr.bf16.mxu0 %v13660_v9  ;;  %12259 = vmatpush3.bf16.msra.mxu1 %v12960_v25  ;;  %v12982_v25 = vld [vmem:[#allocation8 + $0x78] sm:$0xff]  }
0x1ca8   : > { %12260 = vmatprep.subr.bf16.mxu1 %v13660_v9 }
0x1caa   : > { %12253 = vmatpush3.bf16.msra.mxu0 %v12959_v11  ;;  %v12971_v11 = vld [vmem:[#allocation8 + $0x48] sm:$0xff]  }
0x1cab   : > { %12270 = vmatprep.subr.bf16.mxu0 %v13660_v9  ;;  %12261 = vmatpush3.bf16.msra.mxu1 %v12961_v26  ;;  %v12983_v26 = vld [vmem:[#allocation10 + $0x68] sm:$0xff]  }
0x1cac   : > { %12262 = vmatprep.subr.bf16.mxu1 %v13660_v9 }
0x1caf   : > { %12263 = vmatpush3.bf16.msra.mxu1 %v12962_v27  ;;  %v12984_v27 = vld [vmem:[#allocation10 + $0x50] sm:$0xff]  }
0x1cb0   : > { %12264 = vmatprep.subr.bf16.mxu1 %v13660_v9 }
0x1cb3   : > { %12265 = vmatpush3.bf16.msra.mxu1 %v12963_v28  ;;  %v12985_v28 = vld [vmem:[#allocation10 + $0x58] sm:$0xff]  }
0x1cb4   : > { %12286 = vmatprep.subr.bf16.mxu1 %v13660_v9 }
0x1d6f   : > { %v7129_v44 = vpop.f32.mrb[192].mxu1 }
0x1d70   : > { %v7083_v45 = vpop.f32.mrb[192].mxu0  ;;  %v7228_v46 = vsel %vm1444_vm0, %v7129_v44, 0.0  ;;  %v12236_v47 = vpop.f32.mrb[193].mxu1 }
0x1d71   : > { %v7227_v48 = vsel %vm1444_vm0, %v7083_v45, 0.0  ;;  %v12230_v49 = vpop.f32.mrb[193].mxu0  ;;  %v7132_v51 = vpop.f32.mrb[194].mxu1  ;;  %v10987_v47 = vld [vmem:[%s15510_s7] ss:$0 sm:$0xff]  ;;  %s10701_s7 = sshll.u32 %s1429_s11, 3 }
0x1d72   : > { %v7229_v20 = vadd.f32 %v7228_v46, %v7227_v48  ;;  %v7086_v52 = vpop.f32.mrb[194].mxu0  ;;  %v12237_v19 = vpop.f32.mrb[195].mxu1 }
0x1d73   : > { %v12231_v54 = vpop.f32.mrb[195].mxu0 }
0x1d77   : > { %v7221_v12 = vpop.f32.mrb[196].mxu1 }
0x1d78   : > { %v7175_v61 = vpop.f32.mrb[196].mxu0  ;;  %v12248_v55 = vpop.f32.mrb[197].mxu1  ;;  %v7232_v63 = vsel %vm1444_vm0, %v7221_v12, 0.0 }
0x1d79   : > { %v7230_v53 = vsel %vm1444_vm0, %v7175_v61, 0.0  ;;  %v12242_v56 = vpop.f32.mrb[197].mxu0  ;;  %v7224_v57 = vpop.f32.mrb[198].mxu1 }
0x1d7a   : > { %v7231_v58 = vadd.f32 %v7230_v53, %v7229_v20  ;;  %v7178_v59 = vpop.f32.mrb[198].mxu0  ;;  %v12249_v60 = vpop.f32.mrb[199].mxu1  ;;  %v12964_v57 = vld [vmem:[%s15495_s3 + $0x40] sm:$0xff]  }
0x1d7b   : > { %v12243_v32 = vpop.f32.mrb[199].mxu0  ;;  %v12966_v59 = vld [vmem:[%s15495_s3 + $0x48] sm:$0xff]  }
0x1d7c   : > { %v7233_v0 = vadd.f32 %v7232_v63, %v7231_v58  ;;  %v12965_v58 = vld [vmem:[%s15495_s3 + $0x60] sm:$0xff]   ;;  %v12967_v60 = vld [vmem:[%s15495_s3 + $0x68] sm:$0xff]  }
0x1d7e   : > { %v7240_v3 = vadd.f32 %v10980_v62, %v7233_v0 }
0x1d80   : > { %v7241_v4 = vadd.f32 %v7240_v3, %v14787_v23  ;;  %v10993_v3 = vld [vmem:[%s15512_s15] ss:$0 sm:$0xff]  ;;  %s11140_s15 = sshll.u32 %s13900_s0, 7  ;;  %s13663_s0 = smov [#allocation23]  }
0x1d82   : > { %v7244_v2 = vsel %vm1444_vm0, %v7241_v4, 0.0 }
0x1d83   : > { %7245 = vadd.xlane.f32.xlu0 %v7244_v2  ;;  %v10994_v2 = vld [vmem:[%s13862_s19] ss:$0 sm:$0xff] }
0x1e10   : > { %v7246_v1 = vpop.xlane.xlu0 %7245 }
0x1e11   : > { %v7247_v5 = vmul.f32 0.03125, %v7246_v1 }
0x1e13   : > { %v7248_v6 = vsub.f32 %v7241_v4, %v7247_v5 }
0x1e15   : > { %v7249_v7 = vmul.f32 %v7248_v6, %v7248_v6 }
0x1e17   : > { %v7250_v8 = vsel %vm1444_vm0, %v7249_v7, 0.0  ;;  %v12969_v7 = vld [vmem:[#allocation8 + $0x40] sm:$0xff]  }
0x1e18   : > { %7251 = vadd.xlane.f32.xlu1 %v7250_v8 }
0x1ea5   : > { %v7252_v23 = vpop.xlane.xlu1 %7251 }
0x1ea6   : > { %v7253_v13 = vmul.f32 0.03125, %v7252_v23  ;;  %v12972_v23 = vld [vmem:[%s15495_s3 + $0x70] sm:$0xff]  }
0x1ea8   : > { %v7254_v14 = vadd.f32 1e-12, %v7253_v13  ;;  %v12973_v13 = vld [vmem:[#allocation8 + $0x60] sm:$0xff]  }
0x1eaa   : > { %13102 = vrsqrt.f32 %v7254_v14  ;;  %v12974_v14 = vld [vmem:[%s15495_s3 + $0x78] sm:$0xff]  }
0x1eb4   : > { %v13103_v15 = vpop.eup %13102 }
0x1eb5   : > { %v7256_v18 = vmul.f32 %v13103_v15, %v7248_v6  ;;  %v12968_v6 = vld [vmem:[%s15495_s3 + $0x50] sm:$0xff]   ;;  %v12975_v15 = vld [vmem:[#allocation8 + $0x68] sm:$0xff]   ;;  %s15319_s3 = scalar_lea.hbm %s13877_s25, %s11140_s15 }
0x1eb7   : > { %v7263_v38 = vmul.f32 %v10981_v16, %v7256_v18  ;;  %v12976_v16 = vld [vmem:[#allocation8 + $0x50] sm:$0xff]   ;;  %v12977_v18 = vld [vmem:[#allocation10 + $0x40] sm:$0xff]  }
0x1eb9   : > { %v7270_v22 = vadd.f32 %v10982_v21, %v7263_v38  ;;  %v12978_v21 = vld [vmem:[#allocation8 + $0x58] sm:$0xff]   ;;  %v12979_v38 = vld [vmem:[#allocation10 + $0x48] sm:$0xff]  }
0x1ebb   : > { %v7276_v24 = vpack.c.bf16 %v7270_v22, %v7270_v22 }
0x1ebd   : > { %12255 = vmatmul.mubr.msk.bf16.vlgmr.msra.gmra.mrb[200].mxu0 %vm1444_vm0, %v7276_v24  ;;  %v12981_v24 = vld [vmem:[#allocation10 + $0x60] sm:$0xff]  }
0x1ebe   : > { %12274 = vmatprep.mubr.msk.bf16.mxu0 %vm13661_vm1, %v13660_v9  ;;  %12271 = vmatpush3.bf16.msra.mxu0 %v12964_v57 }
0x1ebf   : > { %12272 = vmatprep.subr.bf16.mxu0 %v13660_v9 }
0x1ec2   : > { %12273 = vmatpush3.bf16.msra.mxu0 %v12966_v59 }
0x1ec3   : > { %12278 = vmatprep.subr.bf16.mxu0 %v13660_v9 }
0x1f90   : > { %v7332_v30 = vpop.f32.mrb[200].mxu0 }
0x1f91   : > { %v7333_v31 = vadd.f32 %v10983_v29, %v7332_v30  ;;  %v12256_v17 = vpop.f32.mrb[201].mxu0  ;;  %v12986_v29 = vld [vmem:[#allocation10 + $0x70] sm:$0xff]   ;;  %v12987_v30 = vld [vmem:[#allocation10 + $0x78] sm:$0xff]  }
0x1f92   : > { %v7335_v33 = vpop.f32.mrb[202].mxu0 }
0x1f93   : > { %v7338_v35 = vmul.f32 %v7333_v31, %v7333_v31  ;;  %v12257_v36 = vpop.f32.mrb[203].mxu0 }
0x1f95   : > { %v7339_v39 = vmul.f32 %v7338_v35, %v7333_v31 }
0x1f97   : > { %v7340_v37 = vmul.f32 0.044715, %v7339_v39 }
0x1f99   : > { %v7341_v40 = vadd.f32 %v7340_v37, %v7333_v31 }
0x1f9b   : > { %v7342_v41 = vmul.f32 0.7978846, %v7341_v40 }
0x1f9d   : > { %13104 = vtanh.f32 %v7342_v41 }
0x1fa7   : > { %v13105_v42 = vpop.eup %13104 }
0x1fa8   : > { %v7344_v43 = vadd.f32 1.0, %v13105_v42 }
0x1faa   : > { %v7345_v44 = vmul.f32 0.5, %v7344_v43 }
0x1fac   : > { %v7346_v45 = vmul.f32 %v7345_v44, %v7333_v31 }
0x1fae   : > { %v7356_v46 = vpack.c.bf16 %v7346_v45, %v7346_v45 }
0x1fb0   : > { %12267 = vmatmul.mubr.msk.bf16.vlgmr.msra.gmra.mrb[200].mxu1 %vm2932_vm4, %v7356_v46 }
0x1fb1   : > { %12290 = vmatprep.mubr.msk.bf16.mxu1 %vm13661_vm1, %v13660_v9  ;;  %12287 = vmatpush3.bf16.msra.mxu1 %v12965_v58 }
0x1fb2   : > { %12288 = vmatprep.subr.bf16.mxu1 %v13660_v9 }
0x1fb5   : > { %12289 = vmatpush3.bf16.msra.mxu1 %v12967_v60 }
0x1fb6   : > { %12302 = vmatprep.subr.bf16.mxu1 %v13660_v9 }
0x2083   : > { %v7424_v48 = vpop.f32.mrb[200].mxu1 }
0x2084   : > { %v7425_v49 = vadd.f32 %v10987_v47, %v7424_v48  ;;  %v12268_v51 = vpop.f32.mrb[201].mxu1 }
0x2085   : > { %v7427_v20 = vpop.f32.mrb[202].mxu1 }
0x2086   : > { %v12269_v52 = vpop.f32.mrb[203].mxu1  ;;  %v7430_v19 = vadd.f32 %v7425_v49, %v7270_v22  ;;  %v12980_v22 = vld [vmem:[#allocation8 + $0x70] sm:$0xff]  }
0x2088   : > { %v7433_v54 = vsel %vm1444_vm0, %v7430_v19, 0.0 }
0x2089   : > { %7434 = vadd.xlane.f32.xlu0 %v7433_v54 }
0x2116   : > { %v7435_v12 = vpop.xlane.xlu0 %7434 }
0x2117   : > { %v7436_v61 = vmul.f32 0.03125, %v7435_v12 }
0x2119   : > { %v7437_v55 = vsub.f32 %v7430_v19, %v7436_v61 }
0x211b   : > { %v7438_v53 = vmul.f32 %v7437_v55, %v7437_v55 }
0x211d   : > { %v7439_v56 = vsel %vm1444_vm0, %v7438_v53, 0.0 }
0x211e   : > { %7440 = vadd.xlane.f32.xlu1 %v7439_v56 }
0x21ab   : > { %v7441_v62 = vpop.xlane.xlu1 %7440 }
0x21ac   : > { %v7442_v63 = vmul.f32 0.03125, %v7441_v62 }
0x21ae   : > { %v7443_v32 = vadd.f32 1e-12, %v7442_v63 }
0x21b0   : > { %13106 = vrsqrt.f32 %v7443_v32 }
0x21ba   : > { %v13107_v0 = vpop.eup %13106 }
0x21bb   : > { %v7445_v4 = vmul.f32 %v13107_v0, %v7437_v55 }
0x21bd   : > { %v7452_v1 = vmul.f32 %v10993_v3, %v7445_v4 }
0x21bf   : > { %v14972_v5 = vadd.f32 %v10994_v2, %v7452_v1 }
0x21c1   : > { %v14977_v8 = vpack.c.bf16 %v14972_v5, %v14972_v5 }
0x21c3   : > { %12275 = vmatmul.mubr.msk.bf16.vlgmr.msra.gmra.mrb[204].mxu0 %vm1444_vm0, %v14977_v8  ;;  %12291 = vmatmul.mubr.msk.bf16.vlgmr.msra.gmra.mrb[204].mxu1 %vm1444_vm0, %v14977_v8 }
0x21c4   : > { %12279 = vmatpush3.bf16.msra.mxu0 %v12968_v6  ;;  %12303 = vmatpush3.bf16.msra.mxu1 %v12969_v7 }
0x21c5   : > { %12280 = vmatprep.subr.bf16.mxu0 %v13660_v9  ;;  %12304 = vmatprep.subr.bf16.mxu1 %v13660_v9 }
0x21c6   : > { %12282 = vmatprep.mubr.msk.bf16.mxu0 %vm13661_vm1, %v13660_v9  ;;  %12306 = vmatprep.mubr.msk.bf16.mxu1 %vm13661_vm1, %v13660_v9 }
0x21c8   : > { %12281 = vmatpush3.bf16.msra.mxu0 %v12970_v10  ;;  %12305 = vmatpush3.bf16.msra.mxu1 %v12971_v11 }
0x21c9   : > { %12294 = vmatprep.subr.bf16.mxu0 %v13660_v9  ;;  %12318 = vmatprep.subr.bf16.mxu1 %v13660_v9 }
0x21cb   : > { %12283 = vmatmul.mubr.msk.bf16.vlgmr.msra.gmra.mrb[208].mxu0 %vm1444_vm0, %v14977_v8  ;;  %12307 = vmatmul.mubr.msk.bf16.vlgmr.msra.gmra.mrb[208].mxu1 %vm1444_vm0, %v14977_v8 }
0x21cc   : > { %12295 = vmatpush3.bf16.msra.mxu0 %v12972_v23  ;;  %12319 = vmatpush3.bf16.msra.mxu1 %v12973_v13 }
0x21cd   : > { %12296 = vmatprep.subr.bf16.mxu0 %v13660_v9  ;;  %12320 = vmatprep.subr.bf16.mxu1 %v13660_v9 }
0x21ce   : > { %12298 = vmatprep.mubr.msk.bf16.mxu0 %vm13661_vm1, %v13660_v9  ;;  %12322 = vmatprep.mubr.msk.bf16.mxu1 %vm13661_vm1, %v13660_v9 }
0x21d0   : > { %12297 = vmatpush3.bf16.msra.mxu0 %v12974_v14  ;;  %12321 = vmatpush3.bf16.msra.mxu1 %v12975_v15 }
0x21d1   : > { %12310 = vmatprep.subr.bf16.mxu0 %v13660_v9  ;;  %12334 = vmatprep.subr.bf16.mxu1 %v13660_v9 }
0x21d3   : > { %12299 = vmatmul.mubr.msk.bf16.vlgmr.msra.gmra.mrb[212].mxu0 %vm1444_vm0, %v14977_v8  ;;  %12323 = vmatmul.mubr.msk.bf16.vlgmr.msra.gmra.mrb[212].mxu1 %vm1444_vm0, %v14977_v8 }
0x21d4   : > { %12311 = vmatpush3.bf16.msra.mxu0 %v12976_v16  ;;  %12335 = vmatpush3.bf16.msra.mxu1 %v12977_v18 }
0x21d5   : > { %12312 = vmatprep.subr.bf16.mxu0 %v13660_v9  ;;  %12336 = vmatprep.subr.bf16.mxu1 %v13660_v9 }
0x21d6   : > { %12314 = vmatprep.mubr.msk.bf16.mxu0 %vm13661_vm1, %v13660_v9  ;;  %12338 = vmatprep.mubr.msk.bf16.mxu1 %vm13661_vm1, %v13660_v9 }
0x21d8   : > { %12313 = vmatpush3.bf16.msra.mxu0 %v12978_v21  ;;  %12337 = vmatpush3.bf16.msra.mxu1 %v12979_v38 }
0x21d9   : > { %12326 = vmatprep.subr.bf16.mxu0 %v13660_v9  ;;  %12350 = vmatprep.subr.bf16.mxu1 %v13660_v9 }
0x21db   : > { %12315 = vmatmul.mubr.msk.bf16.vlgmr.msra.gmra.mrb[216].mxu0 %vm1444_vm0, %v14977_v8  ;;  %12339 = vmatmul.mubr.msk.bf16.vlgmr.msra.gmra.mrb[216].mxu1 %vm1444_vm0, %v14977_v8 }
0x21dc   : > { %12327 = vmatpush3.bf16.msra.mxu0 %v12980_v22  ;;  %12351 = vmatpush3.bf16.msra.mxu1 %v12981_v24 }
0x21dd   : > { %12328 = vmatprep.subr.bf16.mxu0 %v13660_v9  ;;  %12352 = vmatprep.subr.bf16.mxu1 %v13660_v9 }
0x21de   : > { %12330 = vmatprep.mubr.msk.bf16.mxu0 %vm13661_vm1, %v13660_v9  ;;  %12354 = vmatprep.mubr.msk.bf16.mxu1 %vm13661_vm1, %v13660_v9 }
0x21e0   : > { %12329 = vmatpush3.bf16.msra.mxu0 %v12982_v25  ;;  %12353 = vmatpush3.bf16.msra.mxu1 %v12983_v26 }
0x21e1   : > { %12342 = vmatprep.subr.bf16.mxu0 %v13660_v9  ;;  %12366 = vmatprep.subr.bf16.mxu1 %v13660_v9 }
0x21e3   : > { %12331 = vmatmul.mubr.msk.bf16.vlgmr.msra.gmra.mrb[220].mxu0 %vm1444_vm0, %v14977_v8  ;;  %12355 = vmatmul.mubr.msk.bf16.vlgmr.msra.gmra.mrb[220].mxu1 %vm1444_vm0, %v14977_v8 }
0x21e4   : > { %12343 = vmatpush3.bf16.msra.mxu0 %v12984_v27  ;;  %12346 = vmatprep.mubr.msk.bf16.mxu0 %vm13661_vm1, %v13660_v9 }
0x21e5   : > { %12344 = vmatprep.subr.bf16.mxu0 %v13660_v9  ;;  %12368 = vmatprep.mubr.msk.bf16.mxu1 %vm13661_vm1, %v13660_v9 }
0x21e8   : > { %12345 = vmatpush3.bf16.msra.mxu0 %v12985_v28 }
0x21e9   : > { %12358 = vmatprep.subr.bf16.mxu0 %v13660_v9 }
0x21eb   : > { %12347 = vmatmul.mubr.msk.bf16.vlgmr.msra.gmra.mrb[224].mxu0 %vm1444_vm0, %v14977_v8 }
0x21ec   : > { %12359 = vmatpush3.bf16.msra.mxu0 %v12986_v29  ;;  %12362 = vmatprep.mubr.msk.bf16.mxu0 %vm13661_vm1, %v13660_v9 }
0x21ed   : > { %12360 = vmatprep.subr.bf16.mxu0 %v13660_v9 }
0x21f0   : > { %12361 = vmatpush3.bf16.msra.mxu0 %v12987_v30 }
0x21f1   : > { %12372 = vmatprep.subr.bf16.mxu0 %v13660_v9 }
0x21f3   : > { %12363 = vmatmul.mubr.msk.bf16.vlgmr.msra.gmra.mrb[228].mxu0 %vm1444_vm0, %v14977_v8 }
0x21f4   : > { %12374 = vmatprep.mubr.msk.bf16.mxu0 %vm13661_vm1, %v13660_v9 }
0x2296   : > { %v7568_v31 = vpop.f32.mrb[204].mxu0  ;;  %v7672_v17 = vpop.f32.mrb[204].mxu1 }
0x2297   : > { %v12276_v33 = vpop.f32.mrb[205].mxu0  ;;  %v12292_v35 = vpop.f32.mrb[205].mxu1  ;;  %v7730_v19 = vpack.c.bf16 %v7568_v31, %v7568_v31  ;;  %v7732_v62 = vpack.c.bf16 %v7672_v17, %v7672_v17 }
0x2298   : > { %v7571_v36 = vpop.f32.mrb[206].mxu0  ;;  %v7675_v39 = vpop.f32.mrb[206].mxu1 }
0x2299   : > { %v12277_v37 = vpop.f32.mrb[207].mxu0  ;;  %v12293_v40 = vpop.f32.mrb[207].mxu1 }
0x229e   : > { %v7620_v41 = vpop.f32.mrb[208].mxu0  ;;  %v7780_v42 = vpop.f32.mrb[208].mxu1 }
0x229f   : > { %v7942_v43 = vpack.c.bf16 %v7780_v42, %v7780_v42  ;;  %v12284_v44 = vpop.f32.mrb[209].mxu0  ;;  %v12308_v45 = vpop.f32.mrb[209].mxu1  ;;  %v7731_v23 = vpack.c.bf16 %v7620_v41, %v7620_v41 }
0x22a0   : > { %v7623_v46 = vpop.f32.mrb[210].mxu0  ;;  %v7783_v47 = vpop.f32.mrb[210].mxu1 }
0x22a1   : > { %v8162_v48 = vsel %vm2166_vm2, %v7942_v43, 0  ;;  %v12285_v49 = vpop.f32.mrb[211].mxu0  ;;  %v12309_v51 = vpop.f32.mrb[211].mxu1 }
0x22a2   : > { %12367 = vmatpush3.bf16.xpose.msra.mxu1 %v8162_v48 }
0x22a3   : > { %12378 = vmatprep.subr.bf16.mxu1 %v13660_v9 }
0x22a6   : > { %v7724_v20 = vpop.f32.mrb[212].mxu0  ;;  %v7884_v52 = vpop.f32.mrb[212].mxu1 }
0x22a7   : > { %v7944_v54 = vpack.c.bf16 %v7884_v52, %v7884_v52  ;;  %v12300_v12 = vpop.f32.mrb[213].mxu0  ;;  %v12324_v61 = vpop.f32.mrb[213].mxu1  ;;  %v7733_v25 = vpack.c.bf16 %v7724_v20, %v7724_v20 }
0x22a8   : > { %v7727_v55 = vpop.f32.mrb[214].mxu0  ;;  %v7887_v53 = vpop.f32.mrb[214].mxu1 }
0x22a9   : > { %v8254_v56 = vsel %vm2166_vm2, %v7944_v54, 0  ;;  %v12301_v57 = vpop.f32.mrb[215].mxu0  ;;  %v12325_v58 = vpop.f32.mrb[215].mxu1  ;;  %12369 = vmatmul.mubr.msk.bf16.vlgmr.msra.gmra.mrb[224].mxu1 %vm2166_vm2, %v7730_v19 }
0x22aa   : > { %12379 = vmatpush3.bf16.xpose.msra.mxu1 %v8254_v56  ;;  %12380 = vmatprep.mubr.msk.bf16.mxu1 %vm13661_vm1, %v13660_v9 }
0x22ab   : > { %12390 = vmatprep.subr.bf16.mxu1 %v13660_v9 }
0x22ae   : > { %v7832_v59 = vpop.f32.mrb[216].mxu0  ;;  %v7992_v60 = vpop.f32.mrb[216].mxu1 }
0x22af   : > { %v7943_v63 = vpack.c.bf16 %v7832_v59, %v7832_v59  ;;  %v8154_v32 = vpack.c.bf16 %v7992_v60, %v7992_v60  ;;  %v12316_v0 = vpop.f32.mrb[217].mxu0  ;;  %v12340_v3 = vpop.f32.mrb[217].mxu1 }
0x22b0   : > { %v7835_v4 = vpop.f32.mrb[218].mxu0  ;;  %v7995_v2 = vpop.f32.mrb[218].mxu1 }
0x22b1   : > { %v8208_v1 = vsel %vm2166_vm2, %v7943_v63, 0  ;;  %v8394_v6 = vsel %vm2402_vm3, %v8154_v32, 0  ;;  %v12317_v7 = vpop.f32.mrb[219].mxu0  ;;  %v12341_v8 = vpop.f32.mrb[219].mxu1  ;;  %12381 = vmatmul.mubr.msk.bf16.vlgmr.msra.gmra.mrb[228].mxu1 %vm2166_vm2, %v7732_v62 }
0x22b2   : > { %12373 = vmatpush3.bf16.xpose.msra.mxu0 %v8208_v1  ;;  %12391 = vmatpush3.bf16.msra.mxu1 %v8394_v6 }
0x22b3   : > { %12384 = vmatprep.subr.bf16.mxu0 %v13660_v9  ;;  %12392 = vmatprep.mubr.msk.bf16.mxu1 %vm13661_vm1, %v13660_v9 }
0x22b4   : > { %12402 = vmatprep.subr.bf16.mxu1 %v13660_v9 }
0x22b6   : > { %v7936_v10 = vpop.f32.mrb[220].mxu0  ;;  %v15064_v11 = vpop.f32.mrb[220].mxu1 }
0x22b7   : > { %v7945_v13 = vpack.c.bf16 %v7936_v10, %v7936_v10  ;;  %v12332_v14 = vpop.f32.mrb[221].mxu0  ;;  %v12356_v15 = vpop.f32.mrb[221].mxu1 }
0x22b8   : > { %v7939_v16 = vpop.f32.mrb[222].mxu0  ;;  %v8099_v18 = vpop.f32.mrb[222].mxu1 }
0x22b9   : > { %v8300_v21 = vsel %vm2166_vm2, %v7945_v13, 0  ;;  %v12333_v38 = vpop.f32.mrb[223].mxu0  ;;  %v12357_v22 = vpop.f32.mrb[223].mxu1  ;;  %12375 = vmatmul.mubr.msk.bf16.vlgmr.msra.gmra.mrb[232].mxu0 %vm2166_vm2, %v7731_v23 }
0x22ba   : > { %12385 = vmatpush3.bf16.xpose.msra.mxu0 %v8300_v21  ;;  %12386 = vmatprep.mubr.msk.bf16.mxu0 %vm13661_vm1, %v13660_v9  ;;  %v8156_v38 = vpack.c.bf16 %v15064_v11, %v15064_v11 }
0x22bb   : > { %12396 = vmatprep.subr.bf16.mxu0 %v13660_v9 }
0x22be   : > { %v8044_v24 = vpop.f32.mrb[224].mxu0 }
0x22bf   : > { %v8155_v26 = vpack.c.bf16 %v8044_v24, %v8044_v24  ;;  %v12348_v27 = vpop.f32.mrb[225].mxu0 }
0x22c0   : > { %v8047_v28 = vpop.f32.mrb[226].mxu0 }
0x22c1   : > { %v8440_v29 = vsel %vm2402_vm3, %v8155_v26, 0  ;;  %v12349_v30 = vpop.f32.mrb[227].mxu0  ;;  %12387 = vmatmul.mubr.msk.bf16.vlgmr.msra.gmra.mrb[236].mxu0 %vm2166_vm2, %v7733_v25  ;;  %v8486_v25 = vsel %vm2402_vm3, %v8156_v38, 0 }
0x22c2   : > { %12397 = vmatpush3.bf16.msra.mxu0 %v8440_v29  ;;  %12398 = vmatprep.mubr.msk.bf16.mxu0 %vm13661_vm1, %v13660_v9 }
0x22c3   : > { %12408 = vmatprep.subr.bf16.mxu0 %v13660_v9 }
0x22c6   : > { %v15076_v31 = vpop.f32.mrb[228].mxu0 }
0x22c7   : > { %v12364_v17 = vpop.f32.mrb[229].mxu0 }
0x22c8   : > { %v8151_v33 = vpop.f32.mrb[230].mxu0  ;;  %v8157_v17 = vpack.c.bf16 %v15076_v31, %v15076_v31  ;;  %v7513_v31 = vld [vmem:[#allocation11 + $0x10] sm:$0xf] }
0x22c9   : > { %v12365_v35 = vpop.f32.mrb[231].mxu0 }
0x237c   : > { %v8198_v36 = vpop.f32.mrb[224].mxu1 }
0x237d   : > { %v8199_v39 = vadd.f32 %v8198_v36, %v14694_v50  ;;  %v12370_v37 = vpop.f32.mrb[225].mxu1  ;;  %v8532_v36 = vsel %vm2402_vm3, %v8157_v17, 0 }
0x237e   : > { %v8201_v40 = vpop.f32.mrb[226].mxu1 }
0x237f   : > { %v12371_v41 = vpop.f32.mrb[227].mxu1  ;;  %v8342_v42 = vsel %vm2166_vm2, %v8199_v39, -inf }
0x2380   : > { %8343 = vmax.xlane.f32.xlu0 %v8342_v42  ;;  %v8582_v41 = vsel %vm2402_vm3, %v7513_v31, 0  ;;  %v7514_v42 = vld [vmem:[#allocation11 + $0x14] sm:$0xf] }
0x2381   : > { %v12989_v31 = vld [vmem:[#allocation13 + $0x50] sm:$0xff]  }
0x2384   : > { %v8290_v43 = vpop.f32.mrb[228].mxu1 }
0x2385   : > { %v8291_v44 = vadd.f32 %v8290_v43, %v14694_v50  ;;  %v12382_v45 = vpop.f32.mrb[229].mxu1  ;;  %v8628_v43 = vsel %vm2402_vm3, %v7514_v42, 0  ;;  %v12991_v42 = vld [vmem:[#allocation13 + $0x58] sm:$0xff]  }
0x2386   : > { %v8293_v46 = vpop.f32.mrb[230].mxu1 }
0x2387   : > { %v12383_v47 = vpop.f32.mrb[231].mxu1  ;;  %v8348_v48 = vsel %vm2166_vm2, %v8291_v44, -inf }
0x2388   : > { %8349 = vmax.xlane.f32.xlu0 %v8348_v48 }
0x238c   : > { %v8244_v49 = vpop.f32.mrb[232].mxu0 }
0x238d   : > { %v8245_v51 = vadd.f32 %v8244_v49, %v14694_v50  ;;  %v12376_v20 = vpop.f32.mrb[233].mxu0 }
0x238e   : > { %v8247_v52 = vpop.f32.mrb[234].mxu0 }
0x238f   : > { %v12377_v19 = vpop.f32.mrb[235].mxu0  ;;  %v8345_v54 = vsel %vm2166_vm2, %v8245_v51, -inf }
0x2390   : > { %8346 = vmax.xlane.f32.xlu1 %v8345_v54 }
0x2394   : > { %v8336_v12 = vpop.f32.mrb[236].mxu0 }
0x2395   : > { %v8337_v61 = vadd.f32 %v8336_v12, %v14694_v50  ;;  %v12388_v55 = vpop.f32.mrb[237].mxu0 }
0x2396   : > { %v8339_v53 = vpop.f32.mrb[238].mxu0 }
0x2397   : > { %v12389_v56 = vpop.f32.mrb[239].mxu0  ;;  %v8351_v57 = vsel %vm2166_vm2, %v8337_v61, -inf }
0x2398   : > { %8352 = vmax.xlane.f32.xlu1 %v8351_v57 }
0x240d   : > { %v8344_v58 = vpop.xlane.xlu0 %8343 }
0x240e   : > { %v8354_v59 = vsub.f32 %v8199_v39, %v8344_v58 }
0x2410   : > { %v8358_v60 = vmul.f32 1.442695, %v8354_v59 }
0x2412   : > { %13108 = vpow2.f32 %v8358_v60 }
0x2415   : > { %v8350_v62 = vpop.xlane.xlu0 %8349 }
0x2416   : > { %v8356_v63 = vsub.f32 %v8291_v44, %v8350_v62  ;;  %v7515_v44 = vld [vmem:[#allocation11 + $0x18] sm:$0xf] }
0x2417   : > { %v8674_v48 = vsel %vm2402_vm3, %v7515_v44, 0 }
0x2418   : > { %v8362_v32 = vmul.f32 1.442695, %v8356_v63 }
0x241a   : > { %13110 = vpow2.f32 %v8362_v32 }
0x241c   : > { %v13109_v0 = vpop.eup %13108 }
0x241d   : > { %v8347_v3 = vpop.xlane.xlu1 %8346  ;;  %v8366_v4 = vsel %vm2166_vm2, %v13109_v0, 0.0 }
0x241e   : > { %v8355_v2 = vsub.f32 %v8245_v51, %v8347_v3  ;;  %8367 = vadd.xlane.f32.xlu0 %v8366_v4 }
0x2420   : > { %v8360_v50 = vmul.f32 1.442695, %v8355_v2 }
0x2422   : > { %13112 = vpow2.f32 %v8360_v50 }
0x2424   : > { %v13111_v1 = vpop.eup %13110 }
0x2425   : > { %v8353_v6 = vpop.xlane.xlu1 %8352  ;;  %v8372_v7 = vsel %vm2166_vm2, %v13111_v1, 0.0 }
0x2426   : > { %v8357_v8 = vsub.f32 %v8337_v61, %v8353_v6  ;;  %8373 = vadd.xlane.f32.xlu0 %v8372_v7  ;;  %v7516_v61 = vld [vmem:[#allocation11 + $0x1c] sm:$0xf] }
0x2427   : > { %v8720_v57 = vsel %vm2402_vm3, %v7516_v61, 0  ;;  %v12996_v61 = vld [vmem:[#allocation14 + $0x40] sm:$0xff]  }
0x2428   : > { %v8364_v10 = vmul.f32 1.442695, %v8357_v8 }
0x242a   : > { %13114 = vpow2.f32 %v8364_v10 }
0x242c   : > { %v13113_v23 = vpop.eup %13112 }
0x242d   : > { %v8369_v13 = vsel %vm2166_vm2, %v13113_v23, 0.0 }
0x242e   : > { %8370 = vadd.xlane.f32.xlu1 %v8369_v13 }
0x2434   : > { %v13115_v14 = vpop.eup %13114 }
0x2435   : > { %v8375_v15 = vsel %vm2166_vm2, %v13115_v14, 0.0 }
0x2436   : > { %8376 = vadd.xlane.f32.xlu1 %v8375_v15 }
0x24ab   : > { %v8368_v16 = vpop.xlane.xlu0 %8367 }
0x24ac   : > { %13116 = vrcp.f32 %v8368_v16 }
0x24b3   : > { %v8374_v18 = vpop.xlane.xlu0 %8373 }
0x24b4   : > { %13118 = vrcp.f32 %v8374_v18 }
0x24b6   : > { %v13117_v21 = vpop.eup %13116 }
0x24b7   : > { %v8382_v22 = vmul.f32 %v13117_v21, %v13109_v0 }
0x24b9   : > { %v8386_v24 = vpack.c.bf16 %v8382_v22, %v8382_v22 }
0x24bb   : > { %12393 = vmatmul.mubr.msk.bf16.vlgmr.msra.gmra.mrb[232].mxu1 %vm2166_vm2, %v8386_v24  ;;  %v8371_v26 = vpop.xlane.xlu1 %8370  ;;  %v11060_v24 = vld [vmem:[%s15497_s2 + $0x1] ss:$0 sm:$0xff] }
0x24bc   : > { %12403 = vmatpush3.bf16.msra.mxu1 %v8486_v25  ;;  %13120 = vrcp.f32 %v8371_v26  ;;  %12404 = vmatprep.mubr.msk.bf16.mxu1 %vm13661_vm1, %v13660_v9 }
0x24bd   : > { %12414 = vmatprep.subr.bf16.mxu1 %v13660_v9 }
0x24be   : > { %v13119_v27 = vpop.eup %13118 }
0x24bf   : > { %v8384_v28 = vmul.f32 %v13119_v27, %v13111_v1 }
0x24c1   : > { %v8388_v29 = vpack.c.bf16 %v8384_v28, %v8384_v28 }
0x24c3   : > { %12405 = vmatmul.mubr.msk.bf16.vlgmr.msra.gmra.mrb[236].mxu1 %vm2166_vm2, %v8388_v29  ;;  %v8377_v11 = vpop.xlane.xlu1 %8376 }
0x24c4   : > { %13122 = vrcp.f32 %v8377_v11  ;;  %12416 = vmatprep.mubr.msk.bf16.mxu1 %vm13661_vm1, %v13660_v9  ;;  %12415 = vmatpush3.bf16.msra.mxu1 %v8582_v41  ;;  %v12990_v41 = vld [vmem:[#allocation13 + $0x48] sm:$0xff]  }
0x24c5   : > { %12426 = vmatprep.subr.bf16.mxu1 %v13660_v9 }
0x24c6   : > { %v13121_v30 = vpop.eup %13120 }
0x24c7   : > { %v8383_v33 = vmul.f32 %v13121_v30, %v13113_v23 }
0x24c9   : > { %v8387_v35 = vpack.c.bf16 %v8383_v33, %v8383_v33 }
0x24cb   : > { %12399 = vmatmul.mubr.msk.bf16.vlgmr.msra.gmra.mrb[240].mxu0 %vm2166_vm2, %v8387_v35 }
0x24cc   : > { %12409 = vmatpush3.bf16.msra.mxu0 %v8532_v36  ;;  %12410 = vmatprep.mubr.msk.bf16.mxu0 %vm13661_vm1, %v13660_v9 }
0x24cd   : > { %12420 = vmatprep.subr.bf16.mxu0 %v13660_v9 }
0x24ce   : > { %v13123_v39 = vpop.eup %13122 }
0x24cf   : > { %v8385_v37 = vmul.f32 %v13123_v39, %v13115_v14 }
0x24d1   : > { %v8389_v40 = vpack.c.bf16 %v8385_v37, %v8385_v37 }
0x24d3   : > { %12411 = vmatmul.mubr.msk.bf16.vlgmr.msra.gmra.mrb[244].mxu0 %vm2166_vm2, %v8389_v40  ;;  %v12988_v40 = vld [vmem:[#allocation13 + $0x40] sm:$0xff]  }
0x24d4   : > { %12422 = vmatprep.mubr.msk.bf16.mxu0 %vm13661_vm1, %v13660_v9  ;;  %12421 = vmatpush3.bf16.msra.mxu0 %v8628_v43 }
0x24d5   : > { %12432 = vmatprep.subr.bf16.mxu0 %v13660_v9 }
0x258e   : > { %v8430_v45 = vpop.f32.mrb[232].mxu1 }
0x258f   : > { %v8574_v46 = vpack.c.bf16 %v8430_v45, %v8430_v45  ;;  %v12394_v47 = vpop.f32.mrb[233].mxu1 }
0x2590   : > { %v8433_v49 = vpop.f32.mrb[234].mxu1 }
0x2591   : > { %v12395_v51 = vpop.f32.mrb[235].mxu1  ;;  %12417 = vmatmul.mubr.msk.bf16.vlgmr.msra.gmra.mrb[240].mxu1 %vm2166_vm2, %v8574_v46  ;;  %v11063_v46 = vld [vmem:[%s15499_s1 + $0x1] ss:$0 sm:$0xff]  ;;  %s1431_s1 = scalar_lea.vmem [#allocation23], %s10701_s7  ;;  %s13516_s7 = sshll.u32 %s13663_s0, 4  ;;  %s13517_s7 = int_to_ptr.vmem [resolvable:$false] %s13516_s7 }
0x2592   : > { %12427 = vmatpush3.bf16.msra.mxu1 %v8674_v48  ;;  %12428 = vmatprep.mubr.msk.bf16.mxu1 %vm13661_vm1, %v13660_v9  ;;  %v11064_v48 = vld [vmem:[%s15501_s6 + $0x1] ss:$0 sm:$0xff]  ;;  %s10433_s2 = sshll.u32 %s1431_s1, 4  ;;  %s13518_s6 = scalar_lea.vmem %s13517_s7, 256  ;;  %s15321_s2 = int_to_ptr.vmem [resolvable:$true] %s10433_s2 }
0x2593   : > { %12438 = vmatprep.subr.bf16.mxu1 %v13660_v9  ;;  %p13519_p12 = scmp.lt.s32.totalorder %s15321_s2, %s13517_s7 }
0x2596   : > { %v8522_v20 = vpop.f32.mrb[236].mxu1 }
0x2597   : > { %v8576_v52 = vpack.c.bf16 %v8522_v20, %v8522_v20  ;;  %v12406_v19 = vpop.f32.mrb[237].mxu1  ;;  %v12992_v20 = vld [vmem:[#allocation13 + $0x60] sm:$0xff]  }
0x2598   : > { %v8525_v54 = vpop.f32.mrb[238].mxu1 }
0x2599   : > { %v12407_v12 = vpop.f32.mrb[239].mxu1  ;;  %12429 = vmatmul.mubr.msk.bf16.vlgmr.msra.gmra.mrb[244].mxu1 %vm2166_vm2, %v8576_v52  ;;  %v12993_v52 = vld [vmem:[#allocation13 + $0x70] sm:$0xff]   ;;  %v12994_v54 = vld [vmem:[#allocation13 + $0x68] sm:$0xff]  }
0x259a   : > { %12442 = vmatprep.mubr.msk.bf16.mxu1 %vm13661_vm1, %v13660_v9  ;;  %12439 = vmatpush3.bf16.msra.mxu1 %v12988_v40  ;;  %v12995_v12 = vld [vmem:[#allocation13 + $0x78] sm:$0xff]  }
0x259b   : > { %12440 = vmatprep.subr.bf16.mxu1 %v13660_v9 }
0x259e   : > { %v8476_v55 = vpop.f32.mrb[240].mxu0  ;;  %12441 = vmatpush3.bf16.msra.mxu1 %v12990_v41 }
0x259f   : > { %v8575_v53 = vpack.c.bf16 %v8476_v55, %v8476_v55  ;;  %v12400_v56 = vpop.f32.mrb[241].mxu0  ;;  %12454 = vmatprep.subr.bf16.mxu1 %v13660_v9  ;;  %v12997_v55 = vld [vmem:[#allocation14 + $0x50] sm:$0xff]  }
0x25a0   : > { %v8479_v58 = vpop.f32.mrb[242].mxu0  ;;  %v12999_v56 = vld [vmem:[#allocation14 + $0x58] sm:$0xff]  }
0x25a1   : > { %v12401_v59 = vpop.f32.mrb[243].mxu0  ;;  %12423 = vmatmul.mubr.msk.bf16.vlgmr.msra.gmra.mrb[248].mxu0 %vm2166_vm2, %v8575_v53  ;;  %v12998_v53 = vld [vmem:[#allocation14 + $0x48] sm:$0xff]   ;;  %v13001_v58 = vld [vmem:[#allocation14 + $0x70] sm:$0xff]  }
0x25a2   : > { %12433 = vmatpush3.bf16.msra.mxu0 %v8720_v57  ;;  %12434 = vmatprep.mubr.msk.bf16.mxu0 %vm13661_vm1, %v13660_v9  ;;  %v13000_v57 = vld [vmem:[#allocation14 + $0x60] sm:$0xff]   ;;  %v13002_v59 = vld [vmem:[#allocation14 + $0x68] sm:$0xff]  }
0x25a3   : > { %12446 = vmatprep.subr.bf16.mxu0 %v13660_v9 }
0x25a6   : > { %v8568_v60 = vpop.f32.mrb[244].mxu0 }
0x25a7   : > { %v8577_v62 = vpack.c.bf16 %v8568_v60, %v8568_v60  ;;  %v12412_v63 = vpop.f32.mrb[245].mxu0  ;;  %v13003_v60 = vld [vmem:[#allocation14 + $0x78] sm:$0xff]  }
0x25a8   : > { %v8571_v32 = vpop.f32.mrb[246].mxu0  ;;  %v13005_v63 = vld [vmem:[#allocation16 + $0x50] sm:$0xff]  }
0x25a9   : > { %v12413_v0 = vpop.f32.mrb[247].mxu0  ;;  %12435 = vmatmul.mubr.msk.bf16.vlgmr.msra.gmra.mrb[252].mxu0 %vm2166_vm2, %v8577_v62  ;;  %v13004_v62 = vld [vmem:[#allocation16 + $0x40] sm:$0xff]   ;;  %v13006_v32 = vld [vmem:[#allocation16 + $0x48] sm:$0xff]  }
0x25aa   : > { %12450 = vmatprep.mubr.msk.bf16.mxu0 %vm13661_vm1, %v13660_v9  ;;  %12447 = vmatpush3.bf16.msra.mxu0 %v12989_v31  ;;  %v13007_v0 = vld [vmem:[#allocation16 + $0x58] sm:$0xff]  }
0x25ab   : > { %12448 = vmatprep.subr.bf16.mxu0 %v13660_v9 }
0x25ae   : > { %12449 = vmatpush3.bf16.msra.mxu0 %v12991_v42 }
0x25af   : > { %12462 = vmatprep.subr.bf16.mxu0 %v13660_v9 }
0x2664   : > { %v8618_v3 = vpop.f32.mrb[240].mxu1 }
0x2665   : > { %v12418_v4 = vpop.f32.mrb[241].mxu1  ;;  %v8762_v23 = vsel %vm1444_vm0, %v8618_v3, 0.0  ;;  %v13008_v3 = vld [vmem:[#allocation16 + $0x60] sm:$0xff]  }
0x2666   : > { %v8621_v2 = vpop.f32.mrb[242].mxu1  ;;  %v13009_v4 = vld [vmem:[#allocation16 + $0x70] sm:$0xff]  }
0x2667   : > { %v12419_v50 = vpop.f32.mrb[243].mxu1  ;;  %v13010_v2 = vld [vmem:[#allocation16 + $0x68] sm:$0xff]  }
0x2668   : > { %v13011_v50 = vld [vmem:[#allocation16 + $0x78] sm:$0xff]  }
0x266c   : > { %v8710_v1 = vpop.f32.mrb[244].mxu1 }
0x266d   : > { %v12430_v6 = vpop.f32.mrb[245].mxu1  ;;  %v8765_v18 = vsel %vm1444_vm0, %v8710_v1, 0.0 }
0x266e   : > { %v8713_v7 = vpop.f32.mrb[246].mxu1 }
0x266f   : > { %v12431_v8 = vpop.f32.mrb[247].mxu1 }
0x2674   : > { %v8664_v10 = vpop.f32.mrb[248].mxu0 }
0x2675   : > { %v8763_v13 = vsel %vm1444_vm0, %v8664_v10, 0.0  ;;  %v12424_v14 = vpop.f32.mrb[249].mxu0 }
0x2676   : > { %v8764_v15 = vadd.f32 %v8763_v13, %v8762_v23  ;;  %v8667_v16 = vpop.f32.mrb[250].mxu0 }
0x2677   : > { %v12425_v21 = vpop.f32.mrb[251].mxu0 }
0x2678   : > { %v8766_v38 = vadd.f32 %v8765_v18, %v8764_v15 }
0x267c   : > { %v8756_v22 = vpop.f32.mrb[252].mxu0 }
0x267d   : > { %v8767_v25 = vsel %vm1444_vm0, %v8756_v22, 0.0  ;;  %v12436_v26 = vpop.f32.mrb[253].mxu0 }
0x267e   : > { %v8768_v27 = vadd.f32 %v8767_v25, %v8766_v38  ;;  %v8759_v28 = vpop.f32.mrb[254].mxu0 }
0x267f   : > { %v12437_v29 = vpop.f32.mrb[255].mxu0 }
0x2680   : > { %v8775_v11 = vadd.f32 %v11060_v24, %v8768_v27 }
0x2682   : > { %v8776_v30 = vadd.f32 %v8775_v11, %v14972_v5 }
0x2684   : > { %v8781_v17 = vsel %vm1444_vm0, %v8776_v30, 0.0 }
0x2685   : > { %8782 = vadd.xlane.f32.xlu0 %v8781_v17 }
0x2712   : > { %v8783_v33 = vpop.xlane.xlu0 %8782 }
0x2713   : > { %v8784_v35 = vmul.f32 0.03125, %v8783_v33 }
0x2715   : > { %v8785_v36 = vsub.f32 %v8776_v30, %v8784_v35 }
0x2717   : > { %v8786_v39 = vmul.f32 %v8785_v36, %v8785_v36 }
0x2719   : > { %v8787_v37 = vsel %vm1444_vm0, %v8786_v39, 0.0 }
0x271a   : > { %8788 = vadd.xlane.f32.xlu1 %v8787_v37 }
0x27a7   : > { %v8789_v5 = vpop.xlane.xlu1 %8788 }
0x27a8   : > { %v8790_v43 = vmul.f32 0.03125, %v8789_v5 }
0x27aa   : > { %v8791_v44 = vadd.f32 1e-12, %v8790_v43 }
0x27ac   : > { %13124 = vrsqrt.f32 %v8791_v44 }
0x27b6   : > { %v13125_v45 = vpop.eup %13124 }
0x27b7   : > { %v8793_v47 = vmul.f32 %v13125_v45, %v8785_v36 }
0x27b9   : > { %v8800_v49 = vmul.f32 %v11063_v46, %v8793_v47 }
0x27bb   : > { %v15144_v51 = vadd.f32 %v11064_v48, %v8800_v49 }
0x27bd   : > { %v8808_v19 = vpack.c.bf16 %v15144_v51, %v15144_v51 }
0x27bf   : > { %12443 = vmatmul.mubr.msk.bf16.vlgmr.msra.gmra.mrb[248].mxu1 %vm1444_vm0, %v8808_v19  ;;  %12451 = vmatmul.mubr.msk.bf16.vlgmr.msra.gmra.mrb[0].mxu0 %vm1444_vm0, %v8808_v19 }
0x27c0   : > { %12455 = vmatpush3.bf16.msra.mxu1 %v12992_v20  ;;  %12463 = vmatpush3.bf16.msra.mxu0 %v12993_v52 }
0x27c1   : > { %12456 = vmatprep.subr.bf16.mxu1 %v13660_v9  ;;  %12464 = vmatprep.subr.bf16.mxu0 %v13660_v9 }
0x27c2   : > { %12458 = vmatprep.mubr.msk.bf16.mxu1 %vm13661_vm1, %v13660_v9  ;;  %12466 = vmatprep.mubr.msk.bf16.mxu0 %vm13661_vm1, %v13660_v9 }
0x27c4   : > { %12457 = vmatpush3.bf16.msra.mxu1 %v12994_v54  ;;  %12465 = vmatpush3.bf16.msra.mxu0 %v12995_v12 }
0x27c5   : > { %12470 = vmatprep.subr.bf16.mxu1 %v13660_v9  ;;  %12478 = vmatprep.subr.bf16.mxu0 %v13660_v9 }
0x27c7   : > { %12459 = vmatmul.mubr.msk.bf16.vlgmr.msra.gmra.mrb[252].mxu1 %vm1444_vm0, %v8808_v19  ;;  %12467 = vmatmul.mubr.msk.bf16.vlgmr.msra.gmra.mrb[4].mxu0 %vm1444_vm0, %v8808_v19 }
0x27c8   : > { %12471 = vmatpush3.bf16.msra.mxu1 %v12996_v61  ;;  %12479 = vmatpush3.bf16.msra.mxu0 %v12997_v55 }
0x27c9   : > { %12472 = vmatprep.subr.bf16.mxu1 %v13660_v9  ;;  %12480 = vmatprep.subr.bf16.mxu0 %v13660_v9 }
0x27ca   : > { %12474 = vmatprep.mubr.msk.bf16.mxu1 %vm13661_vm1, %v13660_v9  ;;  %12482 = vmatprep.mubr.msk.bf16.mxu0 %vm13661_vm1, %v13660_v9 }
0x27cc   : > { %12473 = vmatpush3.bf16.msra.mxu1 %v12998_v53  ;;  %12481 = vmatpush3.bf16.msra.mxu0 %v12999_v56 }
0x27cd   : > { %12486 = vmatprep.subr.bf16.mxu1 %v13660_v9  ;;  %12494 = vmatprep.subr.bf16.mxu0 %v13660_v9 }
0x27cf   : > { %12475 = vmatmul.mubr.msk.bf16.vlgmr.msra.gmra.mrb[0].mxu1 %vm1444_vm0, %v14812_v34  ;;  %12483 = vmatmul.mubr.msk.bf16.vlgmr.msra.gmra.mrb[8].mxu0 %vm1444_vm0, %v14812_v34 }
0x27d0   : > { %12487 = vmatpush3.bf16.msra.mxu1 %v13000_v57  ;;  %12495 = vmatpush3.bf16.msra.mxu0 %v13001_v58 }
0x27d1   : > { %12488 = vmatprep.subr.bf16.mxu1 %v13660_v9  ;;  %12496 = vmatprep.subr.bf16.mxu0 %v13660_v9 }
0x27d2   : > { %12490 = vmatprep.mubr.msk.bf16.mxu1 %vm13661_vm1, %v13660_v9  ;;  %12498 = vmatprep.mubr.msk.bf16.mxu0 %vm13661_vm1, %v13660_v9 }
0x27d4   : > { %12489 = vmatpush3.bf16.msra.mxu1 %v13002_v59  ;;  %12497 = vmatpush3.bf16.msra.mxu0 %v13003_v60 }
0x27d5   : > { %12502 = vmatprep.subr.bf16.mxu1 %v13660_v9  ;;  %12510 = vmatprep.subr.bf16.mxu0 %v13660_v9 }
0x27d7   : > { %12491 = vmatmul.mubr.msk.bf16.vlgmr.msra.gmra.mrb[4].mxu1 %vm1444_vm0, %v14812_v34  ;;  %12499 = vmatmul.mubr.msk.bf16.vlgmr.msra.gmra.mrb[12].mxu0 %vm1444_vm0, %v14812_v34 }
0x27d8   : > { %12503 = vmatpush3.bf16.msra.mxu1 %v13004_v62  ;;  %12511 = vmatpush3.bf16.msra.mxu0 %v13005_v63 }
0x27d9   : > { %12504 = vmatprep.subr.bf16.mxu1 %v13660_v9  ;;  %12512 = vmatprep.subr.bf16.mxu0 %v13660_v9 }
0x27da   : > { %12506 = vmatprep.mubr.msk.bf16.mxu1 %vm13661_vm1, %v13660_v9  ;;  %12514 = vmatprep.mubr.msk.bf16.mxu0 %vm13661_vm1, %v13660_v9 }
0x27dc   : > { %12505 = vmatpush3.bf16.msra.mxu1 %v13006_v32  ;;  %12513 = vmatpush3.bf16.msra.mxu0 %v13007_v0 }
0x27dd   : > { %12518 = vmatprep.subr.bf16.mxu1 %v13660_v9  ;;  %12526 = vmatprep.subr.bf16.mxu0 %v13660_v9 }
0x27df   : > { %12507 = vmatmul.mubr.msk.bf16.vlgmr.msra.gmra.mrb[8].mxu1 %vm1444_vm0, %v14812_v34  ;;  %12515 = vmatmul.mubr.msk.bf16.vlgmr.msra.gmra.mrb[16].mxu0 %vm1444_vm0, %v14812_v34 }
0x27e0   : > { %12519 = vmatpush3.bf16.msra.mxu1 %v13008_v3  ;;  %12527 = vmatpush3.bf16.msra.mxu0 %v13009_v4 }
0x27e1   : > { %12520 = vmatprep.subr.bf16.mxu1 %v13660_v9  ;;  %12528 = vmatprep.subr.bf16.mxu0 %v13660_v9 }
0x27e2   : > { %12522 = vmatprep.mubr.msk.bf16.mxu1 %vm13661_vm1, %v13660_v9  ;;  %12530 = vmatprep.mubr.msk.bf16.mxu0 %vm13661_vm1, %v13660_v9 }
0x27e4   : > { %12521 = vmatpush3.bf16.msra.mxu1 %v13010_v2  ;;  %12529 = vmatpush3.bf16.msra.mxu0 %v13011_v50 }
0x27e5   : > { %12534 = vmatprep.subr.bf16.mxu1 %v13660_v9  ;;  %12540 = vmatprep.subr.bf16.mxu0 %v13660_v9 }
0x27e7   : > { %12523 = vmatmul.mubr.msk.bf16.vlgmr.msra.gmra.mrb[12].mxu1 %vm1444_vm0, %v14812_v34  ;;  %12531 = vmatmul.mubr.msk.bf16.vlgmr.msra.gmra.mrb[20].mxu0 %vm1444_vm0, %v14812_v34 }
0x27e8   : > { %12536 = vmatprep.mubr.msk.bf16.mxu1 %vm13661_vm1, %v13660_v9  ;;  %12542 = vmatprep.mubr.msk.bf16.mxu0 %vm13661_vm1, %v13660_v9 }
0x2892   : > { %v8916_v1 = vpop.f32.mrb[248].mxu1  ;;  %v8968_v6 = vpop.f32.mrb[0].mxu0 }
0x2893   : > { %v12444_v7 = vpop.f32.mrb[249].mxu1  ;;  %v12452_v8 = vpop.f32.mrb[1].mxu0  ;;  %v9078_v31 = vpack.c.bf16 %v8916_v1, %v8916_v1  ;;  %v9079_v41 = vpack.c.bf16 %v8968_v6, %v8968_v6 }
0x2894   : > { %v8919_v10 = vpop.f32.mrb[250].mxu1  ;;  %v8971_v23 = vpop.f32.mrb[2].mxu0 }
0x2895   : > { %v12445_v13 = vpop.f32.mrb[251].mxu1  ;;  %v12453_v14 = vpop.f32.mrb[3].mxu0 }
0x289a   : > { %v9020_v15 = vpop.f32.mrb[252].mxu1  ;;  %v9072_v16 = vpop.f32.mrb[4].mxu0 }
0x289b   : > { %v12460_v18 = vpop.f32.mrb[253].mxu1  ;;  %v12468_v21 = vpop.f32.mrb[5].mxu0  ;;  %v9080_v54 = vpack.c.bf16 %v9020_v15, %v9020_v15  ;;  %v9081_v12 = vpack.c.bf16 %v9072_v16, %v9072_v16 }
0x289c   : > { %v9023_v38 = vpop.f32.mrb[254].mxu1  ;;  %v9075_v34 = vpop.f32.mrb[6].mxu0 }
0x289d   : > { %v12461_v22 = vpop.f32.mrb[255].mxu1  ;;  %v12469_v24 = vpop.f32.mrb[7].mxu0 }
0x28a2   : > { %v9128_v25 = vpop.f32.mrb[0].mxu1  ;;  %v9180_v26 = vpop.f32.mrb[8].mxu0 }
0x28a3   : > { %v9290_v27 = vpack.c.bf16 %v9128_v25, %v9128_v25  ;;  %v9291_v28 = vpack.c.bf16 %v9180_v26, %v9180_v26  ;;  %v12476_v29 = vpop.f32.mrb[1].mxu1  ;;  %v12484_v11 = vpop.f32.mrb[9].mxu0 }
0x28a4   : > { %v9131_v30 = vpop.f32.mrb[2].mxu1  ;;  %v9183_v17 = vpop.f32.mrb[10].mxu0 }
0x28a5   : > { %v9510_v33 = vsel %vm2166_vm2, %v9290_v27, 0  ;;  %v9556_v35 = vsel %vm2166_vm2, %v9291_v28, 0  ;;  %v12477_v36 = vpop.f32.mrb[3].mxu1  ;;  %v12485_v39 = vpop.f32.mrb[11].mxu0 }
0x28a6   : > { %12535 = vmatpush3.bf16.xpose.msra.mxu1 %v9510_v33  ;;  %12541 = vmatpush3.bf16.xpose.msra.mxu0 %v9556_v35 }
0x28a7   : > { %12546 = vmatprep.subr.bf16.mxu1 %v13660_v9  ;;  %12552 = vmatprep.subr.bf16.mxu0 %v13660_v9 }
0x28aa   : > { %v9232_v37 = vpop.f32.mrb[4].mxu1  ;;  %v9284_v40 = vpop.f32.mrb[12].mxu0 }
0x28ab   : > { %v9292_v42 = vpack.c.bf16 %v9232_v37, %v9232_v37  ;;  %v9293_v5 = vpack.c.bf16 %v9284_v40, %v9284_v40  ;;  %v12492_v43 = vpop.f32.mrb[5].mxu1  ;;  %v12500_v44 = vpop.f32.mrb[13].mxu0 }
0x28ac   : > { %v9235_v45 = vpop.f32.mrb[6].mxu1  ;;  %v9287_v46 = vpop.f32.mrb[14].mxu0 }
0x28ad   : > { %v9602_v47 = vsel %vm2166_vm2, %v9292_v42, 0  ;;  %v9648_v48 = vsel %vm2166_vm2, %v9293_v5, 0  ;;  %v12493_v49 = vpop.f32.mrb[7].mxu1  ;;  %v12501_v20 = vpop.f32.mrb[15].mxu0  ;;  %12537 = vmatmul.mubr.msk.bf16.vlgmr.msra.gmra.mrb[16].mxu1 %vm2166_vm2, %v9078_v31  ;;  %12543 = vmatmul.mubr.msk.bf16.vlgmr.msra.gmra.mrb[24].mxu0 %vm2166_vm2, %v9079_v41 }
0x28ae   : > { %12547 = vmatpush3.bf16.xpose.msra.mxu1 %v9602_v47  ;;  %12553 = vmatpush3.bf16.xpose.msra.mxu0 %v9648_v48 }
0x28af   : > { %12548 = vmatprep.mubr.msk.bf16.mxu1 %vm13661_vm1, %v13660_v9  ;;  %12554 = vmatprep.mubr.msk.bf16.mxu0 %vm13661_vm1, %v13660_v9 }
0x28b0   : > { %12558 = vmatprep.subr.bf16.mxu1 %v13660_v9  ;;  %12564 = vmatprep.subr.bf16.mxu0 %v13660_v9 }
0x28b2   : > { %v9340_v52 = vpop.f32.mrb[8].mxu1  ;;  %v9392_v19 = vpop.f32.mrb[16].mxu0 }
0x28b3   : > { %v9502_v61 = vpack.c.bf16 %v9340_v52, %v9340_v52  ;;  %v9503_v55 = vpack.c.bf16 %v9392_v19, %v9392_v19  ;;  %v12508_v53 = vpop.f32.mrb[9].mxu1  ;;  %v12516_v56 = vpop.f32.mrb[17].mxu0 }
0x28b4   : > { %v9343_v57 = vpop.f32.mrb[10].mxu1  ;;  %v9395_v58 = vpop.f32.mrb[18].mxu0 }
0x28b5   : > { %v9742_v59 = vsel %vm2402_vm3, %v9502_v61, 0  ;;  %v9788_v60 = vsel %vm2402_vm3, %v9503_v55, 0  ;;  %v12509_v62 = vpop.f32.mrb[11].mxu1  ;;  %v12517_v63 = vpop.f32.mrb[19].mxu0  ;;  %12549 = vmatmul.mubr.msk.bf16.vlgmr.msra.gmra.mrb[20].mxu1 %vm2166_vm2, %v9080_v54  ;;  %12555 = vmatmul.mubr.msk.bf16.vlgmr.msra.gmra.mrb[28].mxu0 %vm2166_vm2, %v9081_v12 }
0x28b6   : > { %12559 = vmatpush3.bf16.msra.mxu1 %v9742_v59  ;;  %12565 = vmatpush3.bf16.msra.mxu0 %v9788_v60 }
0x28b7   : > { %12560 = vmatprep.mubr.msk.bf16.mxu1 %vm13661_vm1, %v13660_v9  ;;  %12566 = vmatprep.mubr.msk.bf16.mxu0 %vm13661_vm1, %v13660_v9 }
0x28b8   : > { %12570 = vmatprep.subr.bf16.mxu1 %v13660_v9  ;;  %12576 = vmatprep.subr.bf16.mxu0 %v13660_v9 }
0x28ba   : > { %v15236_v32 = vpop.f32.mrb[12].mxu1  ;;  %v15238_v0 = vpop.f32.mrb[20].mxu0 }
0x28bb   : > { %v12524_v3 = vpop.f32.mrb[13].mxu1  ;;  %v12532_v4 = vpop.f32.mrb[21].mxu0  ;;  %v9504_v53 = vpack.c.bf16 %v15236_v32, %v15236_v32  ;;  %v9505_v57 = vpack.c.bf16 %v15238_v0, %v15238_v0  ;;  %v8861_v0 = vld [vmem:[#allocation17 + $0x10] sm:$0xf] }
0x28bc   : > { %v9447_v2 = vpop.f32.mrb[14].mxu1  ;;  %v9499_v50 = vpop.f32.mrb[22].mxu0 }
0x28bd   : > { %v12525_v1 = vpop.f32.mrb[15].mxu1  ;;  %v12533_v6 = vpop.f32.mrb[23].mxu0  ;;  %v9834_v62 = vsel %vm2402_vm3, %v9504_v53, 0  ;;  %v9880_v63 = vsel %vm2402_vm3, %v9505_v57, 0  ;;  %v8862_v2 = vld [vmem:[#allocation17 + $0x14] sm:$0xf] }
0x28be   : > { %v9930_v6 = vsel %vm2402_vm3, %v8861_v0, 0 }
0x2980   : > { %v9546_v7 = vpop.f32.mrb[16].mxu1  ;;  %v9592_v8 = vpop.f32.mrb[24].mxu0 }
0x2981   : > { %v12538_v10 = vpop.f32.mrb[17].mxu1  ;;  %v12544_v23 = vpop.f32.mrb[25].mxu0  ;;  %v9690_v13 = vsel %vm2166_vm2, %v9546_v7, -inf  ;;  %v9693_v14 = vsel %vm2166_vm2, %v9592_v8, -inf }
0x2982   : > { %9691 = vmax.xlane.f32.xlu0 %v9690_v13  ;;  %v9549_v15 = vpop.f32.mrb[18].mxu1  ;;  %9694 = vmax.xlane.f32.xlu1 %v9693_v14  ;;  %v9595_v16 = vpop.f32.mrb[26].mxu0  ;;  %v8863_v10 = vld [vmem:[#allocation17 + $0x18] sm:$0xf]  ;;  %v8864_v23 = vld [vmem:[#allocation17 + $0x1c] sm:$0xf] }
0x2983   : > { %v12539_v18 = vpop.f32.mrb[19].mxu1  ;;  %v12545_v21 = vpop.f32.mrb[27].mxu0 }
0x2984   : > { %v10022_v18 = vsel %vm2402_vm3, %v8863_v10, 0 }
0x2988   : > { %v9638_v38 = vpop.f32.mrb[20].mxu1  ;;  %v9684_v34 = vpop.f32.mrb[28].mxu0 }
0x2989   : > { %v12550_v22 = vpop.f32.mrb[21].mxu1  ;;  %v12556_v24 = vpop.f32.mrb[29].mxu0  ;;  %v9696_v25 = vsel %vm2166_vm2, %v9638_v38, -inf  ;;  %v9699_v26 = vsel %vm2166_vm2, %v9684_v34, -inf }
0x298a   : > { %9697 = vmax.xlane.f32.xlu0 %v9696_v25  ;;  %v9641_v27 = vpop.f32.mrb[22].mxu1  ;;  %9700 = vmax.xlane.f32.xlu1 %v9699_v26  ;;  %v9687_v28 = vpop.f32.mrb[30].mxu0  ;;  %v10068_v22 = vsel %vm2402_vm3, %v8864_v23, 0  ;;  %v11118_v23 = vld [vmem:[%s15507_s9 + $0x1] ss:$0 sm:$0xff] }
0x298b   : > { %v12551_v29 = vpop.f32.mrb[23].mxu1  ;;  %v12557_v11 = vpop.f32.mrb[31].mxu0 }
0x2a0f   : > { %v9692_v30 = vpop.xlane.xlu0 %9691  ;;  %v9695_v17 = vpop.xlane.xlu1 %9694 }
0x2a10   : > { %v9702_v33 = vsub.f32 %v9546_v7, %v9692_v30  ;;  %v9703_v35 = vsub.f32 %v9592_v8, %v9695_v17  ;;  %v9976_v8 = vsel %vm2402_vm3, %v8862_v2, 0  ;;  %v13012_v2 = vld [vmem:[#allocation19 + $0x10] sm:$0xff]  }
0x2a12   : > { %v9706_v36 = vmul.f32 1.442695, %v9702_v33  ;;  %v9708_v39 = vmul.f32 1.442695, %v9703_v35 }
0x2a14   : > { %13126 = vpow2.f32 %v9706_v36 }
0x2a15   : > { %13128 = vpow2.f32 %v9708_v39 }
0x2a17   : > { %v9698_v37 = vpop.xlane.xlu0 %9697  ;;  %v9701_v40 = vpop.xlane.xlu1 %9700 }
0x2a18   : > { %v9704_v31 = vsub.f32 %v9638_v38, %v9698_v37  ;;  %v9705_v41 = vsub.f32 %v9684_v34, %v9701_v40 }
0x2a1a   : > { %v9710_v42 = vmul.f32 1.442695, %v9704_v31  ;;  %v9712_v5 = vmul.f32 1.442695, %v9705_v41 }
0x2a1c   : > { %13130 = vpow2.f32 %v9710_v42 }
0x2a1d   : > { %13132 = vpow2.f32 %v9712_v5 }
0x2a1e   : > { %v13127_v43 = vpop.eup %13126 }
0x2a1f   : > { %v13129_v44 = vpop.eup %13128  ;;  %v9714_v45 = vsel %vm2166_vm2, %v13127_v43, 0.0 }
0x2a20   : > { %9715 = vadd.xlane.f32.xlu0 %v9714_v45  ;;  %v9717_v46 = vsel %vm2166_vm2, %v13129_v44, 0.0 }
0x2a21   : > { %9718 = vadd.xlane.f32.xlu1 %v9717_v46 }
0x2a26   : > { %v13131_v47 = vpop.eup %13130 }
0x2a27   : > { %v13133_v48 = vpop.eup %13132  ;;  %v9720_v49 = vsel %vm2166_vm2, %v13131_v47, 0.0 }
0x2a28   : > { %9721 = vadd.xlane.f32.xlu0 %v9720_v49  ;;  %v9723_v20 = vsel %vm2166_vm2, %v13133_v48, 0.0 }
0x2a29   : > { %9724 = vadd.xlane.f32.xlu1 %v9723_v20 }
0x2aad   : > { %v9716_v52 = vpop.xlane.xlu0 %9715 }
0x2aae   : > { %13134 = vrcp.f32 %v9716_v52  ;;  %v9719_v19 = vpop.xlane.xlu1 %9718 }
0x2aaf   : > { %13136 = vrcp.f32 %v9719_v19 }
0x2ab5   : > { %v9722_v54 = vpop.xlane.xlu0 %9721 }
0x2ab6   : > { %13138 = vrcp.f32 %v9722_v54  ;;  %v9725_v12 = vpop.xlane.xlu1 %9724 }
0x2ab7   : > { %13140 = vrcp.f32 %v9725_v12 }
0x2ab8   : > { %v13135_v61 = vpop.eup %13134 }
0x2ab9   : > { %v13137_v55 = vpop.eup %13136  ;;  %v9730_v56 = vmul.f32 %v13135_v61, %v13127_v43  ;;  %v11114_v61 = vld [vmem:[%s15503_s4 + $0x1] ss:$0 sm:$0xff]  ;;  %s10420_s4 = scalar_lea.sflag [#allocation4], %s1429_s11 }
0x2aba   : > { %v9731_v58 = vmul.f32 %v13137_v55, %v13129_v44 }
0x2abb   : > { %v9734_v59 = vpack.c.bf16 %v9730_v56, %v9730_v56 }
0x2abc   : > { %v9735_v60 = vpack.c.bf16 %v9731_v58, %v9731_v58 }
0x2abd   : > { %12561 = vmatmul.mubr.msk.bf16.vlgmr.msra.gmra.mrb[24].mxu1 %vm2166_vm2, %v9734_v59 }
0x2abe   : > { %12567 = vmatmul.mubr.msk.bf16.vlgmr.msra.gmra.mrb[32].mxu0 %vm2166_vm2, %v9735_v60  ;;  %12571 = vmatpush3.bf16.msra.mxu1 %v9834_v62 }
0x2abf   : > { %12577 = vmatpush3.bf16.msra.mxu0 %v9880_v63  ;;  %12572 = vmatprep.mubr.msk.bf16.mxu1 %vm13661_vm1, %v13660_v9 }
0x2ac0   : > { %v13139_v32 = vpop.eup %13138  ;;  %12578 = vmatprep.mubr.msk.bf16.mxu0 %vm13661_vm1, %v13660_v9  ;;  %12582 = vmatprep.subr.bf16.mxu1 %v13660_v9 }
0x2ac1   : > { %v13141_v3 = vpop.eup %13140  ;;  %v9732_v4 = vmul.f32 %v13139_v32, %v13131_v47  ;;  %12588 = vmatprep.subr.bf16.mxu0 %v13660_v9 }
0x2ac2   : > { %v9733_v50 = vmul.f32 %v13141_v3, %v13133_v48 }
0x2ac3   : > { %v9736_v1 = vpack.c.bf16 %v9732_v4, %v9732_v4 }
0x2ac4   : > { %v9737_v7 = vpack.c.bf16 %v9733_v50, %v9733_v50  ;;  %v13013_v50 = vld [vmem:[#allocation19 + $0x18] sm:$0xff]  }
0x2ac5   : > { %12573 = vmatmul.mubr.msk.bf16.vlgmr.msra.gmra.mrb[28].mxu1 %vm2166_vm2, %v9736_v1 }
0x2ac6   : > { %12579 = vmatmul.mubr.msk.bf16.vlgmr.msra.gmra.mrb[36].mxu0 %vm2166_vm2, %v9737_v7  ;;  %12583 = vmatpush3.bf16.msra.mxu1 %v9930_v6 }
0x2ac7   : > { %12589 = vmatpush3.bf16.msra.mxu0 %v9976_v8  ;;  %12584 = vmatprep.mubr.msk.bf16.mxu1 %vm13661_vm1, %v13660_v9  ;;  %v11117_v8 = vld [vmem:[%s15505_s5 + $0x1] ss:$0 sm:$0xff]  ;;  %s13512_s5 = scalar_lea.vmem %s15321_s2, 128 }
0x2ac8   : > { %12590 = vmatprep.mubr.msk.bf16.mxu0 %vm13661_vm1, %v13660_v9  ;;  %12594 = vmatprep.subr.bf16.mxu1 %v13660_v9  ;;  %p13513_p0 = scmp.ne.s32.totalorder %s15321_s2, %s13512_s5  ;;  %p13520_p1 = scmp.lt.s32.totalorder %s13518_s6, %s13512_s5 }
0x2ac9   : > { %12600 = vmatprep.subr.bf16.mxu0 %v13660_v9 }
0x2aca   : > { %p13514_p9 = pnand %p13513_p0, %p15514_p5  ;;  %p13521_p2 = por %p13520_p1, %p13519_p12 }
0x2acc   : > { %p13515_p10 = pneg %p13514_p9 }
0x2ace   : > { %p13522_p3 = pnand %p13521_p2, %p13515_p10 }
0x2b90   : > { %v9778_v13 = vpop.f32.mrb[24].mxu1 }
0x2b91   : > { %v9922_v14 = vpack.c.bf16 %v9778_v13, %v9778_v13  ;;  %v9824_v15 = vpop.f32.mrb[32].mxu0  ;;  %v12562_v16 = vpop.f32.mrb[25].mxu1 }
0x2b92   : > { %v9923_v21 = vpack.c.bf16 %v9824_v15, %v9824_v15  ;;  %v12568_v38 = vpop.f32.mrb[33].mxu0  ;;  %v9781_v34 = vpop.f32.mrb[26].mxu1  ;;  %v13014_v16 = vld [vmem:[#allocation20 + $0x20] sm:$0xff]  }
0x2b93   : > { %v9827_v24 = vpop.f32.mrb[34].mxu0  ;;  %v12563_v25 = vpop.f32.mrb[27].mxu1  ;;  %12585 = vmatmul.mubr.msk.bf16.vlgmr.msra.gmra.mrb[32].mxu1 %vm2166_vm2, %v9922_v14  ;;  %v13017_v38 = vld [vmem:[#allocation20 + $0x38] sm:$0xff]   ;;  %v11120_v34 = vld [vmem:[%s15509_s12 + $0x1] ss:$0 sm:$0xff] }
0x2b94   : > { %v12569_v26 = vpop.f32.mrb[35].mxu0  ;;  %12591 = vmatmul.mubr.msk.bf16.vlgmr.msra.gmra.mrb[40].mxu0 %vm2166_vm2, %v9923_v21  ;;  %12595 = vmatpush3.bf16.msra.mxu1 %v10022_v18  ;;  %v13015_v18 = vld [vmem:[#allocation20 + $0x28] sm:$0xff]   ;;  %v13016_v21 = vld [vmem:[#allocation20 + $0x30] sm:$0xff]  }
0x2b95   : > { %12601 = vmatpush3.bf16.msra.mxu0 %v10068_v22  ;;  %12596 = vmatprep.mubr.msk.bf16.mxu1 %vm13661_vm1, %v13660_v9 }
0x2b96   : > { %12602 = vmatprep.mubr.msk.bf16.mxu0 %vm13661_vm1, %v13660_v9  ;;  %12606 = vmatprep.subr.bf16.mxu1 %v13660_v9 }
0x2b97   : > { %12614 = vmatprep.subr.bf16.mxu0 %v13660_v9 }
0x2b98   : > { %v9870_v27 = vpop.f32.mrb[28].mxu1 }
0x2b99   : > { %v9924_v28 = vpack.c.bf16 %v9870_v27, %v9870_v27  ;;  %v9916_v29 = vpop.f32.mrb[36].mxu0  ;;  %v12574_v11 = vpop.f32.mrb[29].mxu1 }
0x2b9a   : > { %v9925_v30 = vpack.c.bf16 %v9916_v29, %v9916_v29  ;;  %v12580_v17 = vpop.f32.mrb[37].mxu0  ;;  %v9873_v33 = vpop.f32.mrb[30].mxu1 }
0x2b9b   : > { %v9919_v35 = vpop.f32.mrb[38].mxu0  ;;  %v12575_v36 = vpop.f32.mrb[31].mxu1  ;;  %12597 = vmatmul.mubr.msk.bf16.vlgmr.msra.gmra.mrb[36].mxu1 %vm2166_vm2, %v9924_v28 }
0x2b9c   : > { %v12581_v39 = vpop.f32.mrb[39].mxu0  ;;  %12603 = vmatmul.mubr.msk.bf16.vlgmr.msra.gmra.mrb[44].mxu0 %vm2166_vm2, %v9925_v30  ;;  %12610 = vmatprep.mubr.msk.bf16.mxu1 %vm13661_vm1, %v13660_v9 }
0x2b9d   : > { %12622 = vmatprep.mubr.msk.bf16.mxu0 %vm13661_vm1, %v13660_v9  ;;  %12607 = vmatpush3.bf16.msra.mxu1 %v13012_v2 }
0x2b9e   : > { %12608 = vmatprep.subr.bf16.mxu1 %v13660_v9  ;;  %12615 = vmatpush3.bf16.msra.mxu0 %v13014_v16 }
0x2b9f   : > { %12616 = vmatprep.subr.bf16.mxu0 %v13660_v9 }
0x2ba1   : > { %12609 = vmatpush3.bf16.msra.mxu1 %v13013_v50 }
0x2ba2   : > { %12626 = vmatprep.subr.bf16.mxu1 %v13660_v9  ;;  %12617 = vmatpush3.bf16.msra.mxu0 %v13015_v18 }
0x2ba3   : > { %12618 = vmatprep.subr.bf16.mxu0 %v13660_v9 }
0x2ba6   : > { %12619 = vmatpush3.bf16.msra.mxu0 %v13016_v21 }
0x2ba7   : > { %12620 = vmatprep.subr.bf16.mxu0 %v13660_v9 }
0x2baa   : > { %12621 = vmatpush3.bf16.msra.mxu0 %v13017_v38 }
0x2c66   : > { %v9966_v37 = vpop.f32.mrb[32].mxu1 }
0x2c67   : > { %v10110_v40 = vsel %vm1444_vm0, %v9966_v37, 0.0  ;;  %v10012_v31 = vpop.f32.mrb[40].mxu0  ;;  %v12586_v41 = vpop.f32.mrb[33].mxu1 }
0x2c68   : > { %v10111_v42 = vsel %vm1444_vm0, %v10012_v31, 0.0  ;;  %v12592_v5 = vpop.f32.mrb[41].mxu0  ;;  %v9969_v43 = vpop.f32.mrb[34].mxu1 }
0x2c69   : > { %v10112_v44 = vadd.f32 %v10111_v42, %v10110_v40  ;;  %v10015_v45 = vpop.f32.mrb[42].mxu0  ;;  %v12587_v46 = vpop.f32.mrb[35].mxu1  ;;  %v11125_v40 = vld [vmem:[%s15511_s13 + $0x1] ss:$0 sm:$0xff] }
0x2c6a   : > { %v12593_v47 = vpop.f32.mrb[43].mxu0 }
0x2c6e   : > { %v10058_v48 = vpop.f32.mrb[36].mxu1 }
0x2c6f   : > { %v10113_v49 = vsel %vm1444_vm0, %v10058_v48, 0.0  ;;  %v10104_v20 = vpop.f32.mrb[44].mxu0  ;;  %v12598_v52 = vpop.f32.mrb[37].mxu1 }
0x2c70   : > { %v10114_v19 = vadd.f32 %v10113_v49, %v10112_v44  ;;  %v12604_v54 = vpop.f32.mrb[45].mxu0  ;;  %v10061_v12 = vpop.f32.mrb[38].mxu1  ;;  %v10115_v55 = vsel %vm1444_vm0, %v10104_v20, 0.0  ;;  %v13018_v52 = vld [vmem:[#allocation22] sm:$0xff]  }
0x2c71   : > { %v10107_v53 = vpop.f32.mrb[46].mxu0  ;;  %v12599_v56 = vpop.f32.mrb[39].mxu1 }
0x2c72   : > { %v10116_v57 = vadd.f32 %v10115_v55, %v10114_v19  ;;  %v12605_v58 = vpop.f32.mrb[47].mxu0  ;;  %v13019_v19 = vld [vmem:[#allocation22 + $0x8] sm:$0xff]   ;;  %v11133_v53 = vld [vmem:[%s15513_s14 + $0x1] ss:$0 sm:$0xff] }
0x2c74   : > { %v10123_v59 = vadd.f32 %v11114_v61, %v10116_v57  ;;  %v11134_v57 = vld [vmem:[%s13862_s19 + $0x1] ss:$0 sm:$0xff] }
0x2c76   : > { %v10124_v60 = vadd.f32 %v10123_v59, %v15144_v51 }
0x2c78   : > { %v10129_v62 = vsel %vm1444_vm0, %v10124_v60, 0.0 }
0x2c79   : > { %10130 = vadd.xlane.f32.xlu0 %v10129_v62 }
0x2d06   : > { %v10131_v63 = vpop.xlane.xlu0 %10130 }
0x2d07   : > { %v10132_v32 = vmul.f32 0.03125, %v10131_v63 }
0x2d09   : > { %v10133_v0 = vsub.f32 %v10124_v60, %v10132_v32 }
0x2d0b   : > { %v10134_v3 = vmul.f32 %v10133_v0, %v10133_v0 }
0x2d0d   : > { %v10135_v4 = vsel %vm1444_vm0, %v10134_v3, 0.0 }
0x2d0e   : > { %10136 = vadd.xlane.f32.xlu1 %v10135_v4 }
0x2d9b   : > { %v10137_v51 = vpop.xlane.xlu1 %10136 }
0x2d9c   : > { %v10138_v1 = vmul.f32 0.03125, %v10137_v51 }
0x2d9e   : > { %v10139_v6 = vadd.f32 1e-12, %v10138_v1 }
0x2da0   : > { %13142 = vrsqrt.f32 %v10139_v6 }
0x2daa   : > { %v13143_v7 = vpop.eup %13142 }
0x2dab   : > { %v10141_v10 = vmul.f32 %v13143_v7, %v10133_v0 }
0x2dad   : > { %v10148_v13 = vmul.f32 %v11117_v8, %v10141_v10 }
0x2daf   : > { %v10155_v14 = vadd.f32 %v11118_v23, %v10148_v13 }
0x2db1   : > { %v10163_v15 = vpack.c.bf16 %v10155_v14, %v10155_v14 }
0x2db3   : > { %12611 = vmatmul.mubr.msk.bf16.vlgmr.msra.gmra.mrb[40].mxu1 %vm1444_vm0, %v10163_v15 }
0x2db4   : > { %12630 = vmatprep.mubr.msk.bf16.mxu1 %vm13661_vm1, %v13660_v9  ;;  %12627 = vmatpush3.bf16.msra.mxu1 %v13018_v52 }
0x2db5   : > { %12628 = vmatprep.subr.bf16.mxu1 %v13660_v9  ;;  %v11135_v9 = vld [vmem:[%s13872_s8] ss:$0 sm:$0xff] }
0x2db8   : > { %12629 = vmatpush3.bf16.msra.mxu1 %v13019_v19 }
0x2e86   : > { %v10219_v22 = vpop.f32.mrb[40].mxu1 }
0x2e87   : > { %v10220_v24 = vadd.f32 %v11120_v34, %v10219_v22  ;;  %v12612_v25 = vpop.f32.mrb[41].mxu1 }
0x2e88   : > { %v10222_v26 = vpop.f32.mrb[42].mxu1 }
0x2e89   : > { %v10225_v27 = vmul.f32 %v10220_v24, %v10220_v24  ;;  %v12613_v28 = vpop.f32.mrb[43].mxu1 }
0x2e8b   : > { %v10226_v29 = vmul.f32 %v10225_v27, %v10220_v24 }
0x2e8d   : > { %v10227_v11 = vmul.f32 0.044715, %v10226_v29 }
0x2e8f   : > { %v10228_v30 = vadd.f32 %v10227_v11, %v10220_v24 }
0x2e91   : > { %v10229_v17 = vmul.f32 0.7978846, %v10228_v30 }
0x2e93   : > { %13144 = vtanh.f32 %v10229_v17 }
0x2e9d   : > { %v13145_v33 = vpop.eup %13144 }
0x2e9e   : > { %v10231_v35 = vadd.f32 1.0, %v13145_v33 }
0x2ea0   : > { %v10232_v36 = vmul.f32 0.5, %v10231_v35 }
0x2ea2   : > { %v10233_v39 = vmul.f32 %v10232_v36, %v10220_v24 }
0x2ea4   : > { %v10245_v37 = vpack.c.bf16 %v10233_v39, %v10233_v39 }
0x2ea6   : > { %12623 = vmatmul.mubr.msk.bf16.vlgmr.msra.gmra.mrb[48].mxu0 %vm2932_vm4, %v10245_v37 }
0x2f79   : > { %v10313_v31 = vpop.f32.mrb[48].mxu0 }
0x2f7a   : > { %v10314_v41 = vadd.f32 %v11125_v40, %v10313_v31  ;;  %v12624_v42 = vpop.f32.mrb[49].mxu0 }
0x2f7b   : > { %v10316_v5 = vpop.f32.mrb[50].mxu0 }
0x2f7c   : > { %v12625_v43 = vpop.f32.mrb[51].mxu0  ;;  %v10319_v44 = vadd.f32 %v10314_v41, %v10155_v14 }
0x2f7e   : > { %v10324_v45 = vsel %vm1444_vm0, %v10319_v44, 0.0 }
0x2f7f   : > { %10325 = vadd.xlane.f32.xlu0 %v10324_v45 }
0x300c   : > { %v10326_v46 = vpop.xlane.xlu0 %10325 }
0x300d   : > { %v10327_v47 = vmul.f32 0.03125, %v10326_v46 }
0x300f   : > { %v10328_v48 = vsub.f32 %v10319_v44, %v10327_v47 }
0x3011   : > { %v10329_v49 = vmul.f32 %v10328_v48, %v10328_v48 }
0x3013   : > { %v10330_v20 = vsel %vm1444_vm0, %v10329_v49, 0.0 }
0x3014   : > { %10331 = vadd.xlane.f32.xlu1 %v10330_v20 }
0x30a1   : > { %v10332_v54 = vpop.xlane.xlu1 %10331 }
0x30a2   : > { %v10333_v12 = vmul.f32 0.03125, %v10332_v54 }
0x30a4   : > { %v10334_v61 = vadd.f32 1e-12, %v10333_v12 }
0x30a6   : > { %13146 = vrsqrt.f32 %v10334_v61 }
0x30b0   : > { %v13147_v55 = vpop.eup %13146 }
0x30b1   : > { %v10336_v56 = vmul.f32 %v13147_v55, %v10328_v48 }
0x30b3   : > { %v10343_v58 = vmul.f32 %v11133_v53, %v10336_v56 }
0x30b5   : > { %v10350_v59 = vadd.f32 %v11134_v57, %v10343_v58 }
0x30b7   : > { %v10356_v60 = vpack.c.bf16 %v10350_v59, %v10350_v59 }
0x30b9   : > { %12631 = vmatmul.mubr.msk.bf16.vlgmr.msra.gmra.mrb[44].mxu1 %vm1444_vm0, %v10356_v60 }
0x318c   : > { %v10412_v62 = vpop.f32.mrb[44].mxu1 }
0x318d   : > { %v10413_v63 = vadd.f32 %v11135_v9, %v10412_v62  ;;  %v12632_v32 = vpop.f32.mrb[45].mxu1 }
0x318e   : > { %v10415_v0 = vpop.f32.mrb[46].mxu1 }
0x318f   : > { %10418 = vst [vmem:[%s1431_s1] sm:$0xff] %v10413_v63  ;;  %v12633_v3 = vpop.f32.mrb[47].mxu1 }
0x3190   : > { %13525 = shalt.err (!%p13522_p3)
}
0x3191   : > { %s13526_s1 = scalar_lea.hbm %s15319_s3, 128  ;;  %s13530_s11 = scalar_lea.hbm %s13877_s25, 256 }
0x3192   : > { %p13527_p4 = scmp.ne.s32.totalorder %s15319_s3, %s13526_s1  ;;  %p13531_p11 = scmp.lt.u32.totalorder %s15319_s3, %s13877_s25 }
0x3193   : > { %p13532_p13 = scmp.lt.u32.totalorder %s13530_s11, %s13526_s1  ;;  %p13534_p0 = scmp.lt.u32.totalorder %s13526_s1, %s15319_s3 }
0x3194   : > { %p13528_p7 = pnand %p13527_p4, %p15514_p5 }
0x3195   : > { %p13533_p6 = por %p13532_p13, %p13531_p11 }
0x3196   : > { %p13529_p8 = pneg %p13528_p7 }
0x3197   : > { %p13535_p9 = por %p13534_p0, %p13533_p6 }
0x3199   : > { %p13536_p10 = pnand %p13535_p9, %p13529_p8 }
0x319b   : > { %13539 = shalt.err (!%p13536_p10)
}
0x319c   : > { %12686 = dma.vmem_to_hbm [thread:$0]  (%p15514_p5), %s15321_s2, 128, %s15319_s3, %s10420_s4  }
0x319d PF: > { %s15515_s5 = sld [smem:[#allocation67_spill]]  ;;  %s15516_s6 = sld [smem:[#allocation65_spill]] }
0x319e   : > { %s15517_s15 = sld [smem:[#allocation70_spill]] }
0x31a3   : > { %p12758_p12 = scmp.ge.s32.totalorder %s15515_s5, 2  ;;  %s10445_s0 = sand.u32 1, %s15516_s6  }
0x31a4   : > { %p15518_p1 = scmp.ne.s32.totalorder %s15517_s15, 0  ;;  %s10446_s7 = scalar_lea.sflag [#allocation4], %s10445_s0 }
0x31a6   : > { %p12729_p2 = pnand %p12758_p12, %p15518_p1 }
0x31a8   : > { %13585 = dma.done.wait (!%p12729_p2), %s10446_s7, 128  }
0x31a9   : > { %13587 = vsyncadd (!%p12729_p2), %s10446_s7, 4294967168  ;;  %s15519_s15 = sld [smem:[#allocation68_spill]]  ;;  %s15520_s1 = sld [smem:[#allocation66_spill]] }
0x31aa   : > { %s15521_s11 = sld [smem:[#allocation69_spill]]  ;;  %s15522_s7 = smov %s13594_s10 }
0x31af   : > { %p100_p3 = scmp.ge.s32.totalorder %s15519_s15, 4   ;;  %s15523_s10 = smov %s15520_s1 }
0x31b1   :  { %102 = sbr.rel (!%p100_p3) target bundleno = 87 (0x57), region = 349 }
0x31b8   :  { %10451 = vsyncpa [#allocation3], 1 }
0x31b9   :  { %10453 = vsyncpa [#allocation3 + $0x1], 1 }
0x31ba   :  { %10454 = vsyncpa [#allocation6], 1 }
0x31bb   :  { %10455 = vsyncpa [#allocation9], 1 }
0x31bc   :  { %10456 = vsyncpa [#allocation12], 1 }
0x31bd   :  { %10457 = vsyncpa [#allocation15], 1 }
0x31be   :  { %10458 = vsyncpa [#allocation18], 1 }
0x31bf   :  { %10459 = vsyncpa [#allocation21], 1 }
0x31c0   :  { %10460 = vsyncpa [#allocation4], 1 }
0x31c1   :  { %10462 = vsyncpa [#allocation4 + $0x1], 1 }

</bundles_post_ra>
